<compile_context>
chip_gen: v7x
topology: tpu7x:2x2x1
jax: 0.10.0
libtpu: 0.0.40
codegen_flags: <defaults>
</compile_context>

<pallas_src>
import functools

import jax
import jax.numpy as jnp
import numpy as np
from jax.experimental import pallas as pl
from jax.experimental.pallas import tpu as pltpu


# ---------------------------------------------------------------------------
# Fused kernel
# ---------------------------------------------------------------------------
def _tiny_vgg_kernel(x_ref, w1_ref, b1_ref, w2_ref, b2_ref, w3_ref, b3_ref,
                     w4_ref, b4_ref, wfc_ref, bfc_ref, o_ref, *, H, W):
    """One batch element per grid step; everything stays in VMEM."""
    Np = H * W
    cin = x_ref.shape[1]
    cpad = w1_ref.shape[1] // 9          # layer-1 input channels after padding
    n_classes = bfc_ref.shape[-1]

    # x-coordinate of every flat position (masks column wrap-around of taps).
    col = jax.lax.broadcasted_iota(jnp.int32, (1, Np), 1) % W

    def conv3x3_relu(a, w_ref, b_ref, s):
        """3x3 conv (tap spacing s on the flat (C, H*W) grid) + bias + ReLU.

        a: (Cin, H*W) f32.  w_ref: (Cout, 9*Cin).  b_ref: (Cout, 1).
        Zero padding=1 is emulated by flat zero margins (handles row
        out-of-bounds) plus two column masks (handles column wrap).
        """
        C = a.shape[0]
        pad = s * (W + 1)
        zeros = jnp.zeros((C, pad), jnp.float32)
        ap = jnp.concatenate([zeros, a, zeros], axis=1)    # (C, Np + 2*pad)
        lo = col >= s                                      # valid for dx = -1
        hi = col < (W - s)                                 # valid for dx = +1
        pieces = []
        for dy in (-1, 0, 1):
            for dx in (-1, 0, 1):
                if dy == 0 and dx == 0:
                    p = a
                else:
                    off = pad + s * (dy * W + dx)
                    p = ap[:, off:off + Np]                # static lane slice
                if dx == -1:
                    p = jnp.where(lo, p, 0.0)
                elif dx == 1:
                    p = jnp.where(hi, p, 0.0)
                pieces.append(p)
        patches = jnp.concatenate(pieces, axis=0)          # (9*C, H*W) im2col
        acc = jnp.dot(w_ref[...], patches,
                      preferred_element_type=jnp.float32)  # (Cout, H*W)
        return jnp.maximum(acc + b_ref[...], 0.0)

    def shift_left(a, d):                                  # out[p] = a[p + d]
        C = a.shape[0]
        return jnp.concatenate(
            [a[:, d:], jnp.zeros((C, d), jnp.float32)], axis=1)

    def maxpool2x2(a, s):
        """2x2/stride-2 maxpool on the grid embedded with tap spacing s.

        Valid results land at positions whose coordinates are multiples of
        2*s; other positions hold (finite) don't-care values that are never
        read by later valid computations.
        """
        hm = jnp.maximum(a, shift_left(a, s))
        return jnp.maximum(hm, shift_left(hm, s * W))

    # ---- layer-1 input, channel-padded to a sublane-aligned count ----------
    x = x_ref[0].astype(jnp.float32)                       # (cin, H*W)
    if cpad > cin:
        x = jnp.concatenate(
            [x, jnp.zeros((cpad - cin, Np), jnp.float32)], axis=0)

    # ---- conv_block_1 -------------------------------------------------------
    a = conv3x3_relu(x, w1_ref, b1_ref, 1)
    a = conv3x3_relu(a, w2_ref, b2_ref, 1)
    a = maxpool2x2(a, 1)          # valid features now at stride-2 positions
    # ---- conv_block_2 -------------------------------------------------------
    a = conv3x3_relu(a, w3_ref, b3_ref, 2)
    a = conv3x3_relu(a, w4_ref, b4_ref, 2)
    a = maxpool2x2(a, 2)          # valid features now at stride-4 positions

    # ---- classifier (flatten + linear), folded into the kernel tail --------
    # wfc_ref: (n_classes, hidden, H*W) with nonzero columns only at the
    # stride-4 valid positions (NCHW-flatten order baked in at prepare time).
    cols = []
    for n in range(n_classes):
        cols.append(jnp.sum(a * wfc_ref[n], axis=1, keepdims=True))  # (hid, 1)
    s_cn = jnp.concatenate(cols, axis=1)                   # (hidden, n_classes)
    out = jnp.sum(s_cn, axis=0, keepdims=True)             # (1, n_classes)
    o_ref[0] = out + bfc_ref[...]


# ---------------------------------------------------------------------------
# Wrappers
# ---------------------------------------------------------------------------
def prepare_params(params, *, H, W):
    """One-time weight preprocessing (hoisted out of the per-call path)."""
    def conv_mat(w):                     # HWIO (3,3,Cin,Cout) -> (Cout, 9*Cin)
        cout = w.shape[-1]
        return jnp.transpose(w, (3, 0, 1, 2)).reshape(cout, -1)

    in_ch = params["w1"].shape[2]
    hidden = params["w1"].shape[3]
    n_classes = params["w_fc"].shape[0]
    cpad = -(-in_ch // 8) * 8            # pad layer-1 Cin to sublane multiple
    w1 = params["w1"]
    if cpad > in_ch:
        w1 = jnp.pad(w1, ((0, 0), (0, 0), (0, cpad - in_ch), (0, 0)))

    hf, wf = H // 4, W // 4
    assert H % 4 == 0 and W % 4 == 0
    assert params["w_fc"].shape[1] == hidden * hf * wf
    # Scatter FC columns onto the stride-4 flat positions where the fused
    # kernel leaves the pooled features (lazy pooling => no in-kernel gather).
    wt = params["w_fc"].reshape(n_classes, hidden, hf, wf).astype(jnp.float32)
    big = jnp.zeros((n_classes, hidden, H, W), jnp.float32)
    big = big.at[:, :, ::4, ::4].set(wt)
    wfc = big.reshape(n_classes, hidden, H * W)

    return {
        "w1": conv_mat(w1), "b1": params["b1"].reshape(-1, 1),
        "w2": conv_mat(params["w2"]), "b2": params["b2"].reshape(-1, 1),
        "w3": conv_mat(params["w3"]), "b3": params["b3"].reshape(-1, 1),
        "w4": conv_mat(params["w4"]), "b4": params["b4"].reshape(-1, 1),
        "wfc": wfc, "bfc": params["b_fc"].reshape(1, -1),
    }


@jax.jit
def tiny_vgg_forward(x_nchw, prep):
    """Matches TinyVGG.forward for NCHW input; returns (B, n_classes)."""
    B, cin, H, W = x_nchw.shape
    Np = H * W
    n_classes = prep["bfc"].shape[-1]
    x = x_nchw.reshape(B, cin, Np).astype(jnp.float32)   # free reshape, no transpose

    rep2 = lambda b: (0, 0)
    kernel = functools.partial(_tiny_vgg_kernel, H=H, W=W)
    out = pl.pallas_call(
        kernel,
        out_shape=jax.ShapeDtypeStruct((B, 1, n_classes), jnp.float32),
        grid=(B,),
        in_specs=[
            pl.BlockSpec((1, cin, Np), lambda b: (b, 0, 0)),
            pl.BlockSpec(prep["w1"].shape, rep2),
            pl.BlockSpec(prep["b1"].shape, rep2),
            pl.BlockSpec(prep["w2"].shape, rep2),
            pl.BlockSpec(prep["b2"].shape, rep2),
            pl.BlockSpec(prep["w3"].shape, rep2),
            pl.BlockSpec(prep["b3"].shape, rep2),
            pl.BlockSpec(prep["w4"].shape, rep2),
            pl.BlockSpec(prep["b4"].shape, rep2),
            pl.BlockSpec(prep["wfc"].shape, lambda b: (0, 0, 0)),
            pl.BlockSpec(prep["bfc"].shape, rep2),
        ],
        out_specs=pl.BlockSpec((1, 1, n_classes), lambda b: (b, 0, 0)),
        compiler_params=pltpu.CompilerParams(
            dimension_semantics=("parallel",)),   # megacore: 1 sample / core
    )(x, prep["w1"], prep["b1"], prep["w2"], prep["b2"], prep["w3"],
      prep["b3"], prep["w4"], prep["b4"], prep["wfc"], prep["bfc"])
    return out.reshape(B, n_classes)


# ---------------------------------------------------------------------------
# Pure-JAX reference (XLA ops only) for a correctness check
# ---------------------------------------------------------------------------
def reference_forward(x_nchw, params):
    def conv(x, w_hwio, b):
        y = jax.lax.conv_general_dilated(
            x, w_hwio, window_strides=(1, 1), padding="SAME",
            dimension_numbers=("NCHW", "HWIO", "NCHW"))
        return jax.nn.relu(y + b[None, :, None, None])

    def pool(x):
        return jax.lax.reduce_window(x, -jnp.inf, jax.lax.max,
                                     (1, 1, 2, 2), (1, 1, 2, 2), "VALID")

    x = x_nchw.astype(jnp.float32)
    x = conv(x, params["w1"], params["b1"])
    x = conv(x, params["w2"], params["b2"])
    x = pool(x)
    x = conv(x, params["w3"], params["b3"])
    x = conv(x, params["w4"], params["b4"])
    x = pool(x)
    flat = x.reshape(x.shape[0], -1)          # torch nn.Flatten on NCHW
    return flat @ params["w_fc"].T + params["b_fc"]


# ---------------------------------------------------------------------------
# Deterministic parameter construction + run
# ---------------------------------------------------------------------------
def init_params(key, in_ch, hidden, n_classes):
    ks = jax.random.split(key, 10)

    def u(k, shape, fan_in):
        bound = 1.0 / jnp.sqrt(jnp.float32(fan_in))
        return jax.random.uniform(k, shape, jnp.float32, -bound, bound)

    return {
        # conv_block_1 (HWIO)
        "w1": u(ks[0], (3, 3, in_ch, hidden), 9 * in_ch),
        "b1": u(ks[1], (hidden,), 9 * in_ch),
        "w2": u(ks[2], (3, 3, hidden, hidden), 9 * hidden),
        "b2": u(ks[3], (hidden,), 9 * hidden),
        # conv_block_2
        "w3": u(ks[4], (3, 3, hidden, hidden), 9 * hidden),
        "b3": u(ks[5], (hidden,), 9 * hidden),
        "w4": u(ks[6], (3, 3, hidden, hidden), 9 * hidden),
        "b4": u(ks[7], (hidden,), 9 * hidden),
        # classifier (torch layout: (out_features, in_features))
        "w_fc": u(ks[8], (n_classes, hidden * 16 * 16), hidden * 16 * 16),
        "b_fc": u(ks[9], (n_classes,), hidden * 16 * 16),
    }


if __name__ == "__main__":
    key = jax.random.PRNGKey(0)
    k_param, k_x = jax.random.split(key)

    # classifier expects hidden_units * 16 * 16 features -> 64x64 spatial input
    B, in_ch, spatial = 2, 3, 64
    hidden, n_classes = 8, 3

    params = init_params(k_param, in_ch, hidden, n_classes)
    prep = prepare_params(params, H=spatial, W=spatial)
    x = jax.random.normal(k_x, (B, in_ch, spatial, spatial), jnp.float32)  # NCHW

    out = jax.block_until_ready(tiny_vgg_forward(x, prep))
    assert out.shape == (B, n_classes), out.shape
    assert out.dtype == jnp.float32

    ref = jax.block_until_ready(reference_forward(x, params))
    np.testing.assert_allclose(np.asarray(out), np.asarray(ref),
                               rtol=2e-3, atol=2e-3)
    print("KERNEL_OK")
</pallas_src>

<mosaic_0001>
module attributes {stable_mosaic.version = 11 : i64} {
  func.func @_tiny_vgg_kernel(%arg0: i32, %arg1: memref<1x3x4096xf32, #tpu.memory_space<vmem>>, %arg2: memref<8x72xf32, #tpu.memory_space<vmem>>, %arg3: memref<8x1xf32, #tpu.memory_space<vmem>>, %arg4: memref<8x72xf32, #tpu.memory_space<vmem>>, %arg5: memref<8x1xf32, #tpu.memory_space<vmem>>, %arg6: memref<8x72xf32, #tpu.memory_space<vmem>>, %arg7: memref<8x1xf32, #tpu.memory_space<vmem>>, %arg8: memref<8x72xf32, #tpu.memory_space<vmem>>, %arg9: memref<8x1xf32, #tpu.memory_space<vmem>>, %arg10: memref<3x8x4096xf32, #tpu.memory_space<vmem>>, %arg11: memref<1x3xf32, #tpu.memory_space<vmem>>, %arg12: memref<1x1x3xf32, #tpu.memory_space<vmem>>) attributes {dimension_semantics = [#tpu.dimension_semantics<parallel>], iteration_bounds = array<i64: 2>, scalar_prefetch = 0 : i64, scratch_operands = 0 : i64, tpu.core_type = #tpu.core_type<tc>, window_params = [{transform_indices = @transform_0, window_bounds = array<i64: 1, 3, 4096>}, {pipeline_mode = #tpu.pipeline_mode<synchronous>, transform_indices = @transform_1, window_bounds = array<i64: 8, 72>}, {pipeline_mode = #tpu.pipeline_mode<synchronous>, transform_indices = @transform_2, window_bounds = array<i64: 8, 1>}, {pipeline_mode = #tpu.pipeline_mode<synchronous>, transform_indices = @transform_3, window_bounds = array<i64: 8, 72>}, {pipeline_mode = #tpu.pipeline_mode<synchronous>, transform_indices = @transform_4, window_bounds = array<i64: 8, 1>}, {pipeline_mode = #tpu.pipeline_mode<synchronous>, transform_indices = @transform_5, window_bounds = array<i64: 8, 72>}, {pipeline_mode = #tpu.pipeline_mode<synchronous>, transform_indices = @transform_6, window_bounds = array<i64: 8, 1>}, {pipeline_mode = #tpu.pipeline_mode<synchronous>, transform_indices = @transform_7, window_bounds = array<i64: 8, 72>}, {pipeline_mode = #tpu.pipeline_mode<synchronous>, transform_indices = @transform_8, window_bounds = array<i64: 8, 1>}, {pipeline_mode = #tpu.pipeline_mode<synchronous>, transform_indices = @transform_9, window_bounds = array<i64: 3, 8, 4096>}, {pipeline_mode = #tpu.pipeline_mode<synchronous>, transform_indices = @transform_10, window_bounds = array<i64: 1, 3>}, {transform_indices = @transform_11, window_bounds = array<i64: 1, 1, 3>}]} {
    %0 = tpu.iota {dimensions = array<i32: 1>} : vector<1x4096xi32>
    %c64_i32 = arith.constant 64 : i32
    %c0_i32 = arith.constant 0 : i32
    %1 = arith.cmpi eq, %c64_i32, %c0_i32 : i32
    %c1_i32 = arith.constant 1 : i32
    %2 = arith.select %1, %c1_i32, %c64_i32 : i32
    %3 = vector.broadcast %2 : i32 to vector<1x4096xi32>
    %4 = arith.remsi %0, %3 : vector<1x4096xi32>
    %c0_i32_0 = arith.constant 0 : i32
    %5 = vector.broadcast %c0_i32_0 : i32 to vector<1x4096xi32>
    %6 = arith.cmpi ne, %4, %5 : vector<1x4096xi32>
    %c0_i32_1 = arith.constant 0 : i32
    %7 = vector.broadcast %c0_i32_1 : i32 to vector<1x4096xi32>
    %8 = arith.cmpi slt, %4, %7 : vector<1x4096xi32>
    %c0_i32_2 = arith.constant 0 : i32
    %9 = arith.cmpi slt, %2, %c0_i32_2 : i32
    %10 = vector.broadcast %9 : i1 to vector<1x4096xi1>
    %11 = vector.broadcast %10 : vector<1x4096xi1> to vector<1x4096xi1>
    %12 = arith.xori %8, %11 : vector<1x4096xi1>
    %13 = arith.andi %12, %6 : vector<1x4096xi1>
    %14 = vector.broadcast %2 : i32 to vector<1x4096xi32>
    %15 = arith.addi %4, %14 : vector<1x4096xi32>
    %16 = arith.select %13, %15, %4 : vector<1x4096xi1>, vector<1x4096xi32>
    %c0 = arith.constant 0 : index
    %c0_3 = arith.constant 0 : index
    %c0_4 = arith.constant 0 : index
    %17 = vector.load %arg1[%c0, %c0_3, %c0_4] : memref<1x3x4096xf32, #tpu.memory_space<vmem>>, vector<1x3x4096xf32>
    %18 = vector.shape_cast %17 : vector<1x3x4096xf32> to vector<3x4096xf32>
    %cst = arith.constant 0.000000e+00 : f32
    %19 = vector.broadcast %cst : f32 to vector<5x4096xf32>
    %20 = tpu.concatenate %18, %19 in 0 : vector<3x4096xf32>, vector<5x4096xf32> -> vector<8x4096xf32>
    %cst_5 = arith.constant 0.000000e+00 : f32
    %21 = vector.broadcast %cst_5 : f32 to vector<8x65xf32>
    %22 = tpu.concatenate %21, %20, %21 in 1 : vector<8x65xf32>, vector<8x4096xf32>, vector<8x65xf32> -> vector<8x4226xf32>
    %c1_i32_6 = arith.constant 1 : i32
    %23 = vector.broadcast %c1_i32_6 : i32 to vector<1x4096xi32>
    %24 = arith.cmpi sge, %16, %23 : vector<1x4096xi32>
    %c63_i32 = arith.constant 63 : i32
    %25 = vector.broadcast %c63_i32 : i32 to vector<1x4096xi32>
    %26 = arith.cmpi slt, %16, %25 : vector<1x4096xi32>
    %27 = vector.extract_strided_slice %22 {offsets = [0, 0], sizes = [8, 4096], strides = [1, 1]} : vector<8x4226xf32> to vector<8x4096xf32>
    %cst_7 = arith.constant 0.000000e+00 : f32
    %28 = vector.shape_cast %24 : vector<1x4096xi1> to vector<1x4096xi1>
    %29 = vector.broadcast %28 : vector<1x4096xi1> to vector<8x4096xi1>
    %30 = vector.broadcast %cst_7 : f32 to vector<8x4096xf32>
    %31 = arith.select %29, %27, %30 : vector<8x4096xi1>, vector<8x4096xf32>
    %32 = vector.extract_strided_slice %22 {offsets = [0, 1], sizes = [8, 4096], strides = [1, 1]} : vector<8x4226xf32> to vector<8x4096xf32>
    %33 = vector.extract_strided_slice %22 {offsets = [0, 2], sizes = [8, 4096], strides = [1, 1]} : vector<8x4226xf32> to vector<8x4096xf32>
    %cst_8 = arith.constant 0.000000e+00 : f32
    %34 = vector.shape_cast %26 : vector<1x4096xi1> to vector<1x4096xi1>
    %35 = vector.broadcast %34 : vector<1x4096xi1> to vector<8x4096xi1>
    %36 = vector.broadcast %cst_8 : f32 to vector<8x4096xf32>
    %37 = arith.select %35, %33, %36 : vector<8x4096xi1>, vector<8x4096xf32>
    %38 = vector.extract_strided_slice %22 {offsets = [0, 64], sizes = [8, 4096], strides = [1, 1]} : vector<8x4226xf32> to vector<8x4096xf32>
    %cst_9 = arith.constant 0.000000e+00 : f32
    %39 = vector.shape_cast %24 : vector<1x4096xi1> to vector<1x4096xi1>
    %40 = vector.broadcast %39 : vector<1x4096xi1> to vector<8x4096xi1>
    %41 = vector.broadcast %cst_9 : f32 to vector<8x4096xf32>
    %42 = arith.select %40, %38, %41 : vector<8x4096xi1>, vector<8x4096xf32>
    %43 = vector.extract_strided_slice %22 {offsets = [0, 66], sizes = [8, 4096], strides = [1, 1]} : vector<8x4226xf32> to vector<8x4096xf32>
    %cst_10 = arith.constant 0.000000e+00 : f32
    %44 = vector.shape_cast %26 : vector<1x4096xi1> to vector<1x4096xi1>
    %45 = vector.broadcast %44 : vector<1x4096xi1> to vector<8x4096xi1>
    %46 = vector.broadcast %cst_10 : f32 to vector<8x4096xf32>
    %47 = arith.select %45, %43, %46 : vector<8x4096xi1>, vector<8x4096xf32>
    %48 = vector.extract_strided_slice %22 {offsets = [0, 128], sizes = [8, 4096], strides = [1, 1]} : vector<8x4226xf32> to vector<8x4096xf32>
    %cst_11 = arith.constant 0.000000e+00 : f32
    %49 = vector.shape_cast %24 : vector<1x4096xi1> to vector<1x4096xi1>
    %50 = vector.broadcast %49 : vector<1x4096xi1> to vector<8x4096xi1>
    %51 = vector.broadcast %cst_11 : f32 to vector<8x4096xf32>
    %52 = arith.select %50, %48, %51 : vector<8x4096xi1>, vector<8x4096xf32>
    %53 = vector.extract_strided_slice %22 {offsets = [0, 129], sizes = [8, 4096], strides = [1, 1]} : vector<8x4226xf32> to vector<8x4096xf32>
    %54 = vector.extract_strided_slice %22 {offsets = [0, 130], sizes = [8, 4096], strides = [1, 1]} : vector<8x4226xf32> to vector<8x4096xf32>
    %cst_12 = arith.constant 0.000000e+00 : f32
    %55 = vector.shape_cast %26 : vector<1x4096xi1> to vector<1x4096xi1>
    %56 = vector.broadcast %55 : vector<1x4096xi1> to vector<8x4096xi1>
    %57 = vector.broadcast %cst_12 : f32 to vector<8x4096xf32>
    %58 = arith.select %56, %54, %57 : vector<8x4096xi1>, vector<8x4096xf32>
    %59 = tpu.concatenate %31, %32, %37, %42, %20, %47, %52, %53, %58 in 0 : vector<8x4096xf32>, vector<8x4096xf32>, vector<8x4096xf32>, vector<8x4096xf32>, vector<8x4096xf32>, vector<8x4096xf32>, vector<8x4096xf32>, vector<8x4096xf32>, vector<8x4096xf32> -> vector<72x4096xf32>
    %c0_13 = arith.constant 0 : index
    %c0_14 = arith.constant 0 : index
    %60 = vector.load %arg2[%c0_13, %c0_14] : memref<8x72xf32, #tpu.memory_space<vmem>>, vector<8x72xf32>
    %cst_15 = arith.constant dense<0.000000e+00> : vector<8x4096xf32>
    %61 = tpu.matmul %60, %59, %cst_15 {dimension_numbers = #tpu.dot_dimension_numbers<[1], [0], [0], [1], [0, 0, 1, 1], [], []>} : vector<8x72xf32>, vector<72x4096xf32>, vector<8x4096xf32> -> vector<8x4096xf32>
    %c0_16 = arith.constant 0 : index
    %c0_17 = arith.constant 0 : index
    %62 = vector.load %arg3[%c0_16, %c0_17] : memref<8x1xf32, #tpu.memory_space<vmem>>, vector<8x1xf32>
    %63 = vector.broadcast %62 : vector<8x1xf32> to vector<8x4096xf32>
    %64 = arith.addf %61, %63 : vector<8x4096xf32>
    %cst_18 = arith.constant 0.000000e+00 : f32
    %65 = vector.broadcast %cst_18 : f32 to vector<8x4096xf32>
    %66 = arith.maximumf %64, %65 : vector<8x4096xf32>
    %cst_19 = arith.constant 0.000000e+00 : f32
    %67 = vector.broadcast %cst_19 : f32 to vector<8x65xf32>
    %68 = tpu.concatenate %67, %66, %67 in 1 : vector<8x65xf32>, vector<8x4096xf32>, vector<8x65xf32> -> vector<8x4226xf32>
    %c1_i32_20 = arith.constant 1 : i32
    %69 = vector.broadcast %c1_i32_20 : i32 to vector<1x4096xi32>
    %70 = arith.cmpi sge, %16, %69 : vector<1x4096xi32>
    %c63_i32_21 = arith.constant 63 : i32
    %71 = vector.broadcast %c63_i32_21 : i32 to vector<1x4096xi32>
    %72 = arith.cmpi slt, %16, %71 : vector<1x4096xi32>
    %73 = vector.extract_strided_slice %68 {offsets = [0, 0], sizes = [8, 4096], strides = [1, 1]} : vector<8x4226xf32> to vector<8x4096xf32>
    %cst_22 = arith.constant 0.000000e+00 : f32
    %74 = vector.shape_cast %70 : vector<1x4096xi1> to vector<1x4096xi1>
    %75 = vector.broadcast %74 : vector<1x4096xi1> to vector<8x4096xi1>
    %76 = vector.broadcast %cst_22 : f32 to vector<8x4096xf32>
    %77 = arith.select %75, %73, %76 : vector<8x4096xi1>, vector<8x4096xf32>
    %78 = vector.extract_strided_slice %68 {offsets = [0, 1], sizes = [8, 4096], strides = [1, 1]} : vector<8x4226xf32> to vector<8x4096xf32>
    %79 = vector.extract_strided_slice %68 {offsets = [0, 2], sizes = [8, 4096], strides = [1, 1]} : vector<8x4226xf32> to vector<8x4096xf32>
    %cst_23 = arith.constant 0.000000e+00 : f32
    %80 = vector.shape_cast %72 : vector<1x4096xi1> to vector<1x4096xi1>
    %81 = vector.broadcast %80 : vector<1x4096xi1> to vector<8x4096xi1>
    %82 = vector.broadcast %cst_23 : f32 to vector<8x4096xf32>
    %83 = arith.select %81, %79, %82 : vector<8x4096xi1>, vector<8x4096xf32>
    %84 = vector.extract_strided_slice %68 {offsets = [0, 64], sizes = [8, 4096], strides = [1, 1]} : vector<8x4226xf32> to vector<8x4096xf32>
    %cst_24 = arith.constant 0.000000e+00 : f32
    %85 = vector.shape_cast %70 : vector<1x4096xi1> to vector<1x4096xi1>
    %86 = vector.broadcast %85 : vector<1x4096xi1> to vector<8x4096xi1>
    %87 = vector.broadcast %cst_24 : f32 to vector<8x4096xf32>
    %88 = arith.select %86, %84, %87 : vector<8x4096xi1>, vector<8x4096xf32>
    %89 = vector.extract_strided_slice %68 {offsets = [0, 66], sizes = [8, 4096], strides = [1, 1]} : vector<8x4226xf32> to vector<8x4096xf32>
    %cst_25 = arith.constant 0.000000e+00 : f32
    %90 = vector.shape_cast %72 : vector<1x4096xi1> to vector<1x4096xi1>
    %91 = vector.broadcast %90 : vector<1x4096xi1> to vector<8x4096xi1>
    %92 = vector.broadcast %cst_25 : f32 to vector<8x4096xf32>
    %93 = arith.select %91, %89, %92 : vector<8x4096xi1>, vector<8x4096xf32>
    %94 = vector.extract_strided_slice %68 {offsets = [0, 128], sizes = [8, 4096], strides = [1, 1]} : vector<8x4226xf32> to vector<8x4096xf32>
    %cst_26 = arith.constant 0.000000e+00 : f32
    %95 = vector.shape_cast %70 : vector<1x4096xi1> to vector<1x4096xi1>
    %96 = vector.broadcast %95 : vector<1x4096xi1> to vector<8x4096xi1>
    %97 = vector.broadcast %cst_26 : f32 to vector<8x4096xf32>
    %98 = arith.select %96, %94, %97 : vector<8x4096xi1>, vector<8x4096xf32>
    %99 = vector.extract_strided_slice %68 {offsets = [0, 129], sizes = [8, 4096], strides = [1, 1]} : vector<8x4226xf32> to vector<8x4096xf32>
    %100 = vector.extract_strided_slice %68 {offsets = [0, 130], sizes = [8, 4096], strides = [1, 1]} : vector<8x4226xf32> to vector<8x4096xf32>
    %cst_27 = arith.constant 0.000000e+00 : f32
    %101 = vector.shape_cast %72 : vector<1x4096xi1> to vector<1x4096xi1>
    %102 = vector.broadcast %101 : vector<1x4096xi1> to vector<8x4096xi1>
    %103 = vector.broadcast %cst_27 : f32 to vector<8x4096xf32>
    %104 = arith.select %102, %100, %103 : vector<8x4096xi1>, vector<8x4096xf32>
    %105 = tpu.concatenate %77, %78, %83, %88, %66, %93, %98, %99, %104 in 0 : vector<8x4096xf32>, vector<8x4096xf32>, vector<8x4096xf32>, vector<8x4096xf32>, vector<8x4096xf32>, vector<8x4096xf32>, vector<8x4096xf32>, vector<8x4096xf32>, vector<8x4096xf32> -> vector<72x4096xf32>
    %c0_28 = arith.constant 0 : index
    %c0_29 = arith.constant 0 : index
    %106 = vector.load %arg4[%c0_28, %c0_29] : memref<8x72xf32, #tpu.memory_space<vmem>>, vector<8x72xf32>
    %cst_30 = arith.constant dense<0.000000e+00> : vector<8x4096xf32>
    %107 = tpu.matmul %106, %105, %cst_30 {dimension_numbers = #tpu.dot_dimension_numbers<[1], [0], [0], [1], [0, 0, 1, 1], [], []>} : vector<8x72xf32>, vector<72x4096xf32>, vector<8x4096xf32> -> vector<8x4096xf32>
    %c0_31 = arith.constant 0 : index
    %c0_32 = arith.constant 0 : index
    %108 = vector.load %arg5[%c0_31, %c0_32] : memref<8x1xf32, #tpu.memory_space<vmem>>, vector<8x1xf32>
    %109 = vector.broadcast %108 : vector<8x1xf32> to vector<8x4096xf32>
    %110 = arith.addf %107, %109 : vector<8x4096xf32>
    %cst_33 = arith.constant 0.000000e+00 : f32
    %111 = vector.broadcast %cst_33 : f32 to vector<8x4096xf32>
    %112 = arith.maximumf %110, %111 : vector<8x4096xf32>
    %113 = vector.extract_strided_slice %112 {offsets = [0, 1], sizes = [8, 4095], strides = [1, 1]} : vector<8x4096xf32> to vector<8x4095xf32>
    %cst_34 = arith.constant 0.000000e+00 : f32
    %114 = vector.broadcast %cst_34 : f32 to vector<8x1xf32>
    %115 = tpu.concatenate %113, %114 in 1 : vector<8x4095xf32>, vector<8x1xf32> -> vector<8x4096xf32>
    %116 = arith.maximumf %112, %115 : vector<8x4096xf32>
    %117 = vector.extract_strided_slice %116 {offsets = [0, 64], sizes = [8, 4032], strides = [1, 1]} : vector<8x4096xf32> to vector<8x4032xf32>
    %cst_35 = arith.constant 0.000000e+00 : f32
    %118 = vector.broadcast %cst_35 : f32 to vector<8x64xf32>
    %119 = tpu.concatenate %117, %118 in 1 : vector<8x4032xf32>, vector<8x64xf32> -> vector<8x4096xf32>
    %120 = arith.maximumf %116, %119 : vector<8x4096xf32>
    %cst_36 = arith.constant 0.000000e+00 : f32
    %121 = vector.broadcast %cst_36 : f32 to vector<8x130xf32>
    %122 = tpu.concatenate %121, %120, %121 in 1 : vector<8x130xf32>, vector<8x4096xf32>, vector<8x130xf32> -> vector<8x4356xf32>
    %c2_i32 = arith.constant 2 : i32
    %123 = vector.broadcast %c2_i32 : i32 to vector<1x4096xi32>
    %124 = arith.cmpi sge, %16, %123 : vector<1x4096xi32>
    %c62_i32 = arith.constant 62 : i32
    %125 = vector.broadcast %c62_i32 : i32 to vector<1x4096xi32>
    %126 = arith.cmpi slt, %16, %125 : vector<1x4096xi32>
    %127 = vector.extract_strided_slice %122 {offsets = [0, 0], sizes = [8, 4096], strides = [1, 1]} : vector<8x4356xf32> to vector<8x4096xf32>
    %cst_37 = arith.constant 0.000000e+00 : f32
    %128 = vector.shape_cast %124 : vector<1x4096xi1> to vector<1x4096xi1>
    %129 = vector.broadcast %128 : vector<1x4096xi1> to vector<8x4096xi1>
    %130 = vector.broadcast %cst_37 : f32 to vector<8x4096xf32>
    %131 = arith.select %129, %127, %130 : vector<8x4096xi1>, vector<8x4096xf32>
    %132 = vector.extract_strided_slice %122 {offsets = [0, 2], sizes = [8, 4096], strides = [1, 1]} : vector<8x4356xf32> to vector<8x4096xf32>
    %133 = vector.extract_strided_slice %122 {offsets = [0, 4], sizes = [8, 4096], strides = [1, 1]} : vector<8x4356xf32> to vector<8x4096xf32>
    %cst_38 = arith.constant 0.000000e+00 : f32
    %134 = vector.shape_cast %126 : vector<1x4096xi1> to vector<1x4096xi1>
    %135 = vector.broadcast %134 : vector<1x4096xi1> to vector<8x4096xi1>
    %136 = vector.broadcast %cst_38 : f32 to vector<8x4096xf32>
    %137 = arith.select %135, %133, %136 : vector<8x4096xi1>, vector<8x4096xf32>
    %138 = vector.extract_strided_slice %122 {offsets = [0, 128], sizes = [8, 4096], strides = [1, 1]} : vector<8x4356xf32> to vector<8x4096xf32>
    %cst_39 = arith.constant 0.000000e+00 : f32
    %139 = vector.shape_cast %124 : vector<1x4096xi1> to vector<1x4096xi1>
    %140 = vector.broadcast %139 : vector<1x4096xi1> to vector<8x4096xi1>
    %141 = vector.broadcast %cst_39 : f32 to vector<8x4096xf32>
    %142 = arith.select %140, %138, %141 : vector<8x4096xi1>, vector<8x4096xf32>
    %143 = vector.extract_strided_slice %122 {offsets = [0, 132], sizes = [8, 4096], strides = [1, 1]} : vector<8x4356xf32> to vector<8x4096xf32>
    %cst_40 = arith.constant 0.000000e+00 : f32
    %144 = vector.shape_cast %126 : vector<1x4096xi1> to vector<1x4096xi1>
    %145 = vector.broadcast %144 : vector<1x4096xi1> to vector<8x4096xi1>
    %146 = vector.broadcast %cst_40 : f32 to vector<8x4096xf32>
    %147 = arith.select %145, %143, %146 : vector<8x4096xi1>, vector<8x4096xf32>
    %148 = vector.extract_strided_slice %122 {offsets = [0, 256], sizes = [8, 4096], strides = [1, 1]} : vector<8x4356xf32> to vector<8x4096xf32>
    %cst_41 = arith.constant 0.000000e+00 : f32
    %149 = vector.shape_cast %124 : vector<1x4096xi1> to vector<1x4096xi1>
    %150 = vector.broadcast %149 : vector<1x4096xi1> to vector<8x4096xi1>
    %151 = vector.broadcast %cst_41 : f32 to vector<8x4096xf32>
    %152 = arith.select %150, %148, %151 : vector<8x4096xi1>, vector<8x4096xf32>
    %153 = vector.extract_strided_slice %122 {offsets = [0, 258], sizes = [8, 4096], strides = [1, 1]} : vector<8x4356xf32> to vector<8x4096xf32>
    %154 = vector.extract_strided_slice %122 {offsets = [0, 260], sizes = [8, 4096], strides = [1, 1]} : vector<8x4356xf32> to vector<8x4096xf32>
    %cst_42 = arith.constant 0.000000e+00 : f32
    %155 = vector.shape_cast %126 : vector<1x4096xi1> to vector<1x4096xi1>
    %156 = vector.broadcast %155 : vector<1x4096xi1> to vector<8x4096xi1>
    %157 = vector.broadcast %cst_42 : f32 to vector<8x4096xf32>
    %158 = arith.select %156, %154, %157 : vector<8x4096xi1>, vector<8x4096xf32>
    %159 = tpu.concatenate %131, %132, %137, %142, %120, %147, %152, %153, %158 in 0 : vector<8x4096xf32>, vector<8x4096xf32>, vector<8x4096xf32>, vector<8x4096xf32>, vector<8x4096xf32>, vector<8x4096xf32>, vector<8x4096xf32>, vector<8x4096xf32>, vector<8x4096xf32> -> vector<72x4096xf32>
    %c0_43 = arith.constant 0 : index
    %c0_44 = arith.constant 0 : index
    %160 = vector.load %arg6[%c0_43, %c0_44] : memref<8x72xf32, #tpu.memory_space<vmem>>, vector<8x72xf32>
    %cst_45 = arith.constant dense<0.000000e+00> : vector<8x4096xf32>
    %161 = tpu.matmul %160, %159, %cst_45 {dimension_numbers = #tpu.dot_dimension_numbers<[1], [0], [0], [1], [0, 0, 1, 1], [], []>} : vector<8x72xf32>, vector<72x4096xf32>, vector<8x4096xf32> -> vector<8x4096xf32>
    %c0_46 = arith.constant 0 : index
    %c0_47 = arith.constant 0 : index
    %162 = vector.load %arg7[%c0_46, %c0_47] : memref<8x1xf32, #tpu.memory_space<vmem>>, vector<8x1xf32>
    %163 = vector.broadcast %162 : vector<8x1xf32> to vector<8x4096xf32>
    %164 = arith.addf %161, %163 : vector<8x4096xf32>
    %cst_48 = arith.constant 0.000000e+00 : f32
    %165 = vector.broadcast %cst_48 : f32 to vector<8x4096xf32>
    %166 = arith.maximumf %164, %165 : vector<8x4096xf32>
    %cst_49 = arith.constant 0.000000e+00 : f32
    %167 = vector.broadcast %cst_49 : f32 to vector<8x130xf32>
    %168 = tpu.concatenate %167, %166, %167 in 1 : vector<8x130xf32>, vector<8x4096xf32>, vector<8x130xf32> -> vector<8x4356xf32>
    %c2_i32_50 = arith.constant 2 : i32
    %169 = vector.broadcast %c2_i32_50 : i32 to vector<1x4096xi32>
    %170 = arith.cmpi sge, %16, %169 : vector<1x4096xi32>
    %c62_i32_51 = arith.constant 62 : i32
    %171 = vector.broadcast %c62_i32_51 : i32 to vector<1x4096xi32>
    %172 = arith.cmpi slt, %16, %171 : vector<1x4096xi32>
    %173 = vector.extract_strided_slice %168 {offsets = [0, 0], sizes = [8, 4096], strides = [1, 1]} : vector<8x4356xf32> to vector<8x4096xf32>
    %cst_52 = arith.constant 0.000000e+00 : f32
    %174 = vector.shape_cast %170 : vector<1x4096xi1> to vector<1x4096xi1>
    %175 = vector.broadcast %174 : vector<1x4096xi1> to vector<8x4096xi1>
    %176 = vector.broadcast %cst_52 : f32 to vector<8x4096xf32>
    %177 = arith.select %175, %173, %176 : vector<8x4096xi1>, vector<8x4096xf32>
    %178 = vector.extract_strided_slice %168 {offsets = [0, 2], sizes = [8, 4096], strides = [1, 1]} : vector<8x4356xf32> to vector<8x4096xf32>
    %179 = vector.extract_strided_slice %168 {offsets = [0, 4], sizes = [8, 4096], strides = [1, 1]} : vector<8x4356xf32> to vector<8x4096xf32>
    %cst_53 = arith.constant 0.000000e+00 : f32
    %180 = vector.shape_cast %172 : vector<1x4096xi1> to vector<1x4096xi1>
    %181 = vector.broadcast %180 : vector<1x4096xi1> to vector<8x4096xi1>
    %182 = vector.broadcast %cst_53 : f32 to vector<8x4096xf32>
    %183 = arith.select %181, %179, %182 : vector<8x4096xi1>, vector<8x4096xf32>
    %184 = vector.extract_strided_slice %168 {offsets = [0, 128], sizes = [8, 4096], strides = [1, 1]} : vector<8x4356xf32> to vector<8x4096xf32>
    %cst_54 = arith.constant 0.000000e+00 : f32
    %185 = vector.shape_cast %170 : vector<1x4096xi1> to vector<1x4096xi1>
    %186 = vector.broadcast %185 : vector<1x4096xi1> to vector<8x4096xi1>
    %187 = vector.broadcast %cst_54 : f32 to vector<8x4096xf32>
    %188 = arith.select %186, %184, %187 : vector<8x4096xi1>, vector<8x4096xf32>
    %189 = vector.extract_strided_slice %168 {offsets = [0, 132], sizes = [8, 4096], strides = [1, 1]} : vector<8x4356xf32> to vector<8x4096xf32>
    %cst_55 = arith.constant 0.000000e+00 : f32
    %190 = vector.shape_cast %172 : vector<1x4096xi1> to vector<1x4096xi1>
    %191 = vector.broadcast %190 : vector<1x4096xi1> to vector<8x4096xi1>
    %192 = vector.broadcast %cst_55 : f32 to vector<8x4096xf32>
    %193 = arith.select %191, %189, %192 : vector<8x4096xi1>, vector<8x4096xf32>
    %194 = vector.extract_strided_slice %168 {offsets = [0, 256], sizes = [8, 4096], strides = [1, 1]} : vector<8x4356xf32> to vector<8x4096xf32>
    %cst_56 = arith.constant 0.000000e+00 : f32
    %195 = vector.shape_cast %170 : vector<1x4096xi1> to vector<1x4096xi1>
    %196 = vector.broadcast %195 : vector<1x4096xi1> to vector<8x4096xi1>
    %197 = vector.broadcast %cst_56 : f32 to vector<8x4096xf32>
    %198 = arith.select %196, %194, %197 : vector<8x4096xi1>, vector<8x4096xf32>
    %199 = vector.extract_strided_slice %168 {offsets = [0, 258], sizes = [8, 4096], strides = [1, 1]} : vector<8x4356xf32> to vector<8x4096xf32>
    %200 = vector.extract_strided_slice %168 {offsets = [0, 260], sizes = [8, 4096], strides = [1, 1]} : vector<8x4356xf32> to vector<8x4096xf32>
    %cst_57 = arith.constant 0.000000e+00 : f32
    %201 = vector.shape_cast %172 : vector<1x4096xi1> to vector<1x4096xi1>
    %202 = vector.broadcast %201 : vector<1x4096xi1> to vector<8x4096xi1>
    %203 = vector.broadcast %cst_57 : f32 to vector<8x4096xf32>
    %204 = arith.select %202, %200, %203 : vector<8x4096xi1>, vector<8x4096xf32>
    %205 = tpu.concatenate %177, %178, %183, %188, %166, %193, %198, %199, %204 in 0 : vector<8x4096xf32>, vector<8x4096xf32>, vector<8x4096xf32>, vector<8x4096xf32>, vector<8x4096xf32>, vector<8x4096xf32>, vector<8x4096xf32>, vector<8x4096xf32>, vector<8x4096xf32> -> vector<72x4096xf32>
    %c0_58 = arith.constant 0 : index
    %c0_59 = arith.constant 0 : index
    %206 = vector.load %arg8[%c0_58, %c0_59] : memref<8x72xf32, #tpu.memory_space<vmem>>, vector<8x72xf32>
    %cst_60 = arith.constant dense<0.000000e+00> : vector<8x4096xf32>
    %207 = tpu.matmul %206, %205, %cst_60 {dimension_numbers = #tpu.dot_dimension_numbers<[1], [0], [0], [1], [0, 0, 1, 1], [], []>} : vector<8x72xf32>, vector<72x4096xf32>, vector<8x4096xf32> -> vector<8x4096xf32>
    %c0_61 = arith.constant 0 : index
    %c0_62 = arith.constant 0 : index
    %208 = vector.load %arg9[%c0_61, %c0_62] : memref<8x1xf32, #tpu.memory_space<vmem>>, vector<8x1xf32>
    %209 = vector.broadcast %208 : vector<8x1xf32> to vector<8x4096xf32>
    %210 = arith.addf %207, %209 : vector<8x4096xf32>
    %cst_63 = arith.constant 0.000000e+00 : f32
    %211 = vector.broadcast %cst_63 : f32 to vector<8x4096xf32>
    %212 = arith.maximumf %210, %211 : vector<8x4096xf32>
    %213 = vector.extract_strided_slice %212 {offsets = [0, 2], sizes = [8, 4094], strides = [1, 1]} : vector<8x4096xf32> to vector<8x4094xf32>
    %cst_64 = arith.constant 0.000000e+00 : f32
    %214 = vector.broadcast %cst_64 : f32 to vector<8x2xf32>
    %215 = tpu.concatenate %213, %214 in 1 : vector<8x4094xf32>, vector<8x2xf32> -> vector<8x4096xf32>
    %216 = arith.maximumf %212, %215 : vector<8x4096xf32>
    %217 = vector.extract_strided_slice %216 {offsets = [0, 128], sizes = [8, 3968], strides = [1, 1]} : vector<8x4096xf32> to vector<8x3968xf32>
    %cst_65 = arith.constant 0.000000e+00 : f32
    %218 = vector.broadcast %cst_65 : f32 to vector<8x128xf32>
    %219 = tpu.concatenate %217, %218 in 1 : vector<8x3968xf32>, vector<8x128xf32> -> vector<8x4096xf32>
    %220 = arith.maximumf %216, %219 : vector<8x4096xf32>
    %c0_66 = arith.constant 0 : index
    %c0_67 = arith.constant 0 : index
    %c0_68 = arith.constant 0 : index
    %221 = vector.load %arg10[%c0_66, %c0_67, %c0_68] : memref<3x8x4096xf32, #tpu.memory_space<vmem>>, vector<1x8x4096xf32>
    %222 = vector.shape_cast %221 : vector<1x8x4096xf32> to vector<8x4096xf32>
    %223 = arith.mulf %220, %222 : vector<8x4096xf32>
    %cst_69 = arith.constant dense<0.000000e+00> : vector<8xf32>
    %224 = vector.multi_reduction <add>, %223, %cst_69 [1] : vector<8x4096xf32> to vector<8xf32>
    %225 = vector.shape_cast %224 : vector<8xf32> to vector<8x1xf32>
    %c1 = arith.constant 1 : index
    %c0_70 = arith.constant 0 : index
    %c0_71 = arith.constant 0 : index
    %226 = vector.load %arg10[%c1, %c0_70, %c0_71] : memref<3x8x4096xf32, #tpu.memory_space<vmem>>, vector<1x8x4096xf32>
    %227 = vector.shape_cast %226 : vector<1x8x4096xf32> to vector<8x4096xf32>
    %228 = arith.mulf %220, %227 : vector<8x4096xf32>
    %cst_72 = arith.constant dense<0.000000e+00> : vector<8xf32>
    %229 = vector.multi_reduction <add>, %228, %cst_72 [1] : vector<8x4096xf32> to vector<8xf32>
    %230 = vector.shape_cast %229 : vector<8xf32> to vector<8x1xf32>
    %c2 = arith.constant 2 : index
    %c0_73 = arith.constant 0 : index
    %c0_74 = arith.constant 0 : index
    %231 = vector.load %arg10[%c2, %c0_73, %c0_74] : memref<3x8x4096xf32, #tpu.memory_space<vmem>>, vector<1x8x4096xf32>
    %232 = vector.shape_cast %231 : vector<1x8x4096xf32> to vector<8x4096xf32>
    %233 = arith.mulf %220, %232 : vector<8x4096xf32>
    %cst_75 = arith.constant dense<0.000000e+00> : vector<8xf32>
    %234 = vector.multi_reduction <add>, %233, %cst_75 [1] : vector<8x4096xf32> to vector<8xf32>
    %235 = vector.shape_cast %234 : vector<8xf32> to vector<8x1xf32>
    %236 = tpu.concatenate %225, %230, %235 in 1 : vector<8x1xf32>, vector<8x1xf32>, vector<8x1xf32> -> vector<8x3xf32>
    %cst_76 = arith.constant dense<0.000000e+00> : vector<3xf32>
    %237 = vector.multi_reduction <add>, %236, %cst_76 [0] : vector<8x3xf32> to vector<3xf32>
    %238 = vector.shape_cast %237 : vector<3xf32> to vector<1x3xf32>
    %c0_77 = arith.constant 0 : index
    %c0_78 = arith.constant 0 : index
    %239 = vector.load %arg11[%c0_77, %c0_78] : memref<1x3xf32, #tpu.memory_space<vmem>>, vector<1x3xf32>
    %240 = arith.addf %238, %239 : vector<1x3xf32>
    %c0_79 = arith.constant 0 : index
    %c0_80 = arith.constant 0 : index
    %c0_81 = arith.constant 0 : index
    %241 = vector.load %arg12[%c0_79, %c0_80, %c0_81] : memref<1x1x3xf32, #tpu.memory_space<vmem>>, vector<1x1x3xf32>
    %242 = vector.shape_cast %241 : vector<1x1x3xf32> to vector<1x3xf32>
    %243 = vector.shape_cast %240 : vector<1x3xf32> to vector<1x1x3xf32>
    tpu.vector_store %arg12[%c0_79, %c0_80, %c0_81], %243 {strides = array<i32>} : memref<1x1x3xf32, #tpu.memory_space<vmem>>, vector<1x1x3xf32>,
    return
  }
  func.func @transform_0(%arg0: i32) -> (i32, i32, i32) {
    %c0_i32 = arith.constant 0 : i32
    %c0_i32_0 = arith.constant 0 : i32
    %c0_i32_1 = arith.constant 0 : i32
    return %arg0, %c0_i32, %c0_i32_0 : i32, i32, i32
  }
  func.func @transform_1(%arg0: i32) -> (i32, i32) {
    %c0_i32 = arith.constant 0 : i32
    %c0_i32_0 = arith.constant 0 : i32
    %c0_i32_1 = arith.constant 0 : i32
    return %c0_i32, %c0_i32_0 : i32, i32
  }
  func.func @transform_2(%arg0: i32) -> (i32, i32) {
    %c0_i32 = arith.constant 0 : i32
    %c0_i32_0 = arith.constant 0 : i32
    %c0_i32_1 = arith.constant 0 : i32
    return %c0_i32, %c0_i32_0 : i32, i32
  }
  func.func @transform_3(%arg0: i32) -> (i32, i32) {
    %c0_i32 = arith.constant 0 : i32
    %c0_i32_0 = arith.constant 0 : i32
    %c0_i32_1 = arith.constant 0 : i32
    return %c0_i32, %c0_i32_0 : i32, i32
  }
  func.func @transform_4(%arg0: i32) -> (i32, i32) {
    %c0_i32 = arith.constant 0 : i32
    %c0_i32_0 = arith.constant 0 : i32
    %c0_i32_1 = arith.constant 0 : i32
    return %c0_i32, %c0_i32_0 : i32, i32
  }
  func.func @transform_5(%arg0: i32) -> (i32, i32) {
    %c0_i32 = arith.constant 0 : i32
    %c0_i32_0 = arith.constant 0 : i32
    %c0_i32_1 = arith.constant 0 : i32
    return %c0_i32, %c0_i32_0 : i32, i32
  }
  func.func @transform_6(%arg0: i32) -> (i32, i32) {
    %c0_i32 = arith.constant 0 : i32
    %c0_i32_0 = arith.constant 0 : i32
    %c0_i32_1 = arith.constant 0 : i32
    return %c0_i32, %c0_i32_0 : i32, i32
  }
  func.func @transform_7(%arg0: i32) -> (i32, i32) {
    %c0_i32 = arith.constant 0 : i32
    %c0_i32_0 = arith.constant 0 : i32
    %c0_i32_1 = arith.constant 0 : i32
    return %c0_i32, %c0_i32_0 : i32, i32
  }
  func.func @transform_8(%arg0: i32) -> (i32, i32) {
    %c0_i32 = arith.constant 0 : i32
    %c0_i32_0 = arith.constant 0 : i32
    %c0_i32_1 = arith.constant 0 : i32
    return %c0_i32, %c0_i32_0 : i32, i32
  }
  func.func @transform_9(%arg0: i32) -> (i32, i32, i32) {
    %c0_i32 = arith.constant 0 : i32
    %c0_i32_0 = arith.constant 0 : i32
    %c0_i32_1 = arith.constant 0 : i32
    %c0_i32_2 = arith.constant 0 : i32
    return %c0_i32, %c0_i32_0, %c0_i32_1 : i32, i32, i32
  }
  func.func @transform_10(%arg0: i32) -> (i32, i32) {
    %c0_i32 = arith.constant 0 : i32
    %c0_i32_0 = arith.constant 0 : i32
    %c0_i32_1 = arith.constant 0 : i32
    return %c0_i32, %c0_i32_0 : i32, i32
  }
  func.func @transform_11(%arg0: i32) -> (i32, i32, i32) {
    %c0_i32 = arith.constant 0 : i32
    %c0_i32_0 = arith.constant 0 : i32
    %c0_i32_1 = arith.constant 0 : i32
    return %arg0, %c0_i32, %c0_i32_0 : i32, i32, i32
  }
}

</mosaic_0001>

<bundles_post_ra>
// kernel: tiny_vgg_forward.1
= control target key start
LH: loop header
LB: loop body
LE: loop exit
PB: predicated region body
PF: predicated region fallthrough
CT: control target
= control target key end

     0   :  { %16 = vsyncpa [#allocation3], 0  ;;  %s20662_s0 = inlined_call_operand.vmem [shape: f32[2,3,4096], index: 0, kind: input, shape index: {}]   ;;  %s20663_s1 = inlined_call_operand.vmem [shape: f32[8,72], index: 1, kind: input, shape index: {}]   ;;  %s20664_s2 = inlined_call_operand.vmem [shape: f32[8,1], index: 2, kind: input, shape index: {}]   ;;  %s20665_s3 = inlined_call_operand.vmem [shape: f32[8,72], index: 3, kind: input, shape index: {}]   ;;  %s20666_s4 = inlined_call_operand.vmem [shape: f32[8,1], index: 4, kind: input, shape index: {}]   ;;  %s20667_s5 = inlined_call_operand.vmem [shape: f32[8,72], index: 5, kind: input, shape index: {}]   ;;  %s20668_s6 = inlined_call_operand.vmem [shape: f32[8,1], index: 6, kind: input, shape index: {}]   ;;  %s20669_s7 = inlined_call_operand.vmem [shape: f32[8,72], index: 7, kind: input, shape index: {}]   ;;  %s20670_s8 = inlined_call_operand.vmem [shape: f32[8,1], index: 8, kind: input, shape index: {}]   ;;  %s20671_s9 = inlined_call_operand.hbm [shape: f32[3,8,4096], index: 9, kind: input, shape index: {}]   ;;  %s20672_s10 = inlined_call_operand.vmem [shape: f32[1,3], index: 10, kind: input, shape index: {}]   ;;  %s20673_s11 = inlined_call_operand.hbm [shape: f32[2,1,3], index: 11, kind: output, shape index: {}]  }
   0x1   :  { %17 = vsyncpa [#allocation4], 0 }
   0x2   :  { %19 = vsyncpa [#allocation4 + $0x1], 0  ;;  %s13344_s17 = smov 0   ;;  %s13346_s18 = smov 0  }
   0x3   :  { %s13348_s19 = smov 0   ;;  %s13350_s20 = smov 0  }
   0x4 LB: > { %s13365_s21 = sadd.s32 4294967295, %s13268_s20   ;;  %s10026_s22 = sadd.s32 4294967294, %s13268_s20   ;;  %s13268_s20 = sphi %s13350_s20, %s23630_s20   ;;  %s13264_s19 = sphi %s13348_s19, %s23629_s19   ;;  %s13260_s18 = sphi %s13346_s18, %s23628_s18   ;;  %s13256_s17 = sphi %s13344_s17, %s23627_s17  }
   0x5   : > { %s13369_s23 = sadd.s32 1, %s13268_s20   ;;  %s268_s24 = sadd.s32 1, %s13264_s19 }
   0x6   : > { %s265_s25 = ssub.s32 %s13268_s20, %s13369_s23  ;;  %p278_p0 = scmp.ne.s32.totalorder %s13264_s19, %s13260_s18 }
   0x7   : > { %p266_p1 = scmp.eq.s32.totalorder %s265_s25, 0  ;;  %p279_p2 = scmp.eq.s32.totalorder %s13365_s21, 1 }
   0x8   : > { %p284_p3 = scmp.ne.s32.totalorder %s13260_s18, %s13256_s17  ;;  %p285_p4 = scmp.eq.s32.totalorder %s10026_s22, 1 }
   0x9   : > { %s13380_s26 = scalar_select %p266_p1, %s13264_s19, %s268_s24  }
   0xa   : > { %p13382_p5 = por %p279_p2, %p278_p0  ;;  %p13386_p6 = por %p285_p4, %p284_p3 }
   0xb   : > { %21488 = sst [smem:[#allocation8_spill]] %s13380_s26  ;;  %p10027_p7 = scmp.ge.s32.totalorder %s13268_s20, 1 }
   0xc   : > { %s21489_s27 = scalar_select %p13382_p5, 1, 0 }
   0xd   : > { %s21490_s28 = scalar_select %p13386_p6, 1, 0 }
   0xe   : > { %p292_p8 = scmp.lt.s32.totalorder %s13268_s20, 3  ;;  %p20674_p9 = scmp.eq.s32.totalorder %s13365_s21, 0 }
   0xf   : > { %s13270_s30 = smov [#allocation2]   ;;  %s13174_s16 = scalar_lea.hbm %s20671_s9, 12288 }
  0x10   : > { %p13393_p10 = pnand %p10027_p7, %p292_p8  ;;  %s328_s12 = sshll.u32 %s13270_s30, 4  ;;  %s329_s12 = int_to_ptr.vmem [resolvable:$true] %s328_s12 }
  0x11   : > { %p13175_p13 = scmp.ne.s32.totalorder %s20671_s9, %s13174_s16  ;;  %p13181_p3 = scmp.lt.u32.totalorder %s13174_s16, %s20671_s9 }
  0x12   : > { %s21491_s29 = scalar_select %p13393_p10, 1, 0 }
  0x13   : > { %p12440_p11 = pneg %p13393_p10 }
  0x15   : > { %p13401_p12 = pnand %p20674_p9, %p12440_p11 }
  0x17   : > { %p13176_p0 = pneg %p13401_p12 }
  0x19   : > { %p13177_p1 = pnand %p13176_p0, %p13175_p13 }
  0x1b   : > { %p13178_p2 = pneg %p13177_p1 }
  0x1d   : > { %p13183_p4 = pnand %p13181_p3, %p13178_p2 }
  0x1f   : > { %13186 = shalt.err (!%p13183_p4)
}
  0x20   : > { %s13187_s26 = scalar_lea.vmem %s329_s12, 12288  ;;  %p13195_p9 = scmp.lt.s32.totalorder %s329_s12, %s329_s12 }
  0x21   : > { %p13188_p7 = scmp.ne.s32.totalorder %s329_s12, %s13187_s26  ;;  %p13196_p6 = scmp.lt.s32.totalorder %s13187_s26, %s13187_s26 }
  0x23   : > { %p13190_p8 = pnand %p13188_p7, %p13176_p0  ;;  %p13197_p5 = por %p13196_p6, %p13195_p9 }
  0x25   : > { %p13191_p11 = pneg %p13190_p8 }
  0x27   : > { %p13198_p10 = pnand %p13197_p5, %p13191_p11 }
  0x29   : > { %13201 = shalt.err (!%p13198_p10)
}
  0x2a   : > { %s13271_s14 = smov 4096   ;;  %s13272_s15 = smov 256  }
  0x2b   : > { %12443 = dma.hbm_to_vmem [thread:$0]  (!%p13401_p12), %s20671_s9, 12288, %s329_s12, [#allocation3], %s13271_s14, %s13271_s14, %s13272_s15  }
  0x2c   : > { %p21493_p13 = scmp.ne.s32.totalorder %s21491_s29, 0 }
  0x2e   : > { %355 = sbr.rel (%p21493_p13) target bundleno = 2876 (0xb3c), region = 64 }
  0x35   : > { %p21494_p1 = scmp.eq.s32.totalorder %s13365_s21, 0 }
  0x37   : > { %13247 = dma.done.wait (%p21494_p1), [#allocation3], 12288   ;;  %p21495_p0 = pmov %p21494_p1 }
  0x38   : > { %p394_p5 = scmp.lt.s32.totalorder %s13365_s21, 1  ;;  %vm20700_vm0 = vcmask 1042432   ;;  %s13273_s29 = smov 65   ;;  %vm20694_vm1 = vcmask 531456   ;;  %vm20698_vm3 = vcmask 1039360   ;;  %vm20696_vm5 = vmmov 1  }
  0x39   : > { %13249 = vsyncadd (%p21495_p0), [#allocation3], 4294955008  ;;  %s13274_s12 = smov 126   ;;  %s13275_s14 = smov 127   ;;  %vm20706_vm8 = vcmask 1031168   ;;  %vm20708_vm9 = vcmask 523264  }
  0x3a   : > { %s395_s26 = scalar_select %p394_p5, %s13365_s21, 1  ;;  %vm20714_vm14 = vcmask 506880  }
  0x3b   : > { %s13276_s15 = smov 62   ;;  %s13277_s22 = smov 64  }
  0x3c   : > { %s10899_s16 = sshll.u32 %s395_s26, 7  ;;  %p23624_p9 = scmp.ne.s32.totalorder %s21489_s27, 0 }
  0x3d   : > { %s13432_s30 = scalar_lea.vmem %s20662_s0, %s10899_s16 }
  0x3e   : > { %v13435_v0 = vld [vmem:[%s13432_s30 + $0x8] sm:$0x77]  ;;  %v13438_v1 = vld [vmem:[%s13432_s30] sm:$0x77]  ;;  %v13441_v2 = vld [vmem:[%s13432_s30 + $0x10] sm:$0x77] }
  0x3f   : > { %v883_v3 = vsel %vm20700_vm0, %v13435_v0, 0.0  ;;  %v881_v4 = vsel %vm20700_vm0, %v13438_v1, 0.0  ;;  %v13449_v5 = vcombine.high %v13435_v0, %v13435_v0  ;;  %v885_v7 = vsel %vm20700_vm0, %v13441_v2, 0.0  ;;  %v13466_v10 = vld [vmem:[%s13432_s30 + $0x18] sm:$0x77] }
  0x40   : > { %949 = vrot.lane.b32.xlu1 %v883_v3, %s13273_s29  ;;  %945 = vrot.lane.b32.xlu0 %v881_v4, %s13273_s29  ;;  %v13459_v8 = vcombine.high %v13441_v2, %v13441_v2  ;;  %v13463_v9 = vcombine.high %v13438_v1, %v13438_v1  ;;  %v13476_v13 = vcombine.high %v13466_v10, %v13466_v10  ;;  %v820_v14 = vld [vmem:[%s13432_s30 + $0x20] sm:$0x77]  ;;  %v887_v16 = vsel %vm20700_vm0, %v13466_v10, 0.0  ;;  %v821_v18 = vld [vmem:[%s13432_s30 + $0x28] sm:$0x77] }
  0x41   : > { %v884_v6 = vsel %vm20700_vm0, %v13449_v5, 0.0  ;;  %v13485_v17 = vcombine.high %v820_v14, %v820_v14  ;;  %v889_v20 = vsel %vm20700_vm0, %v820_v14, 0.0  ;;  %v13493_v21 = vcombine.high %v821_v18, %v821_v18  ;;  %v822_v22 = vld [vmem:[%s13432_s30 + $0x30] sm:$0x77]  ;;  %v823_v26 = vld [vmem:[%s13432_s30 + $0x38] sm:$0x77] }
  0x42   : > { %v886_v11 = vsel %vm20700_vm0, %v13459_v8, 0.0  ;;  %v882_v12 = vsel %vm20700_vm0, %v13463_v9, 0.0  ;;  %v888_v15 = vsel %vm20700_vm0, %v13476_v13, 0.0  ;;  %v891_v24 = vsel %vm20700_vm0, %v821_v18, 0.0  ;;  %v824_v30 = vld [vmem:[%s13432_s30 + $0x40] sm:$0x77] }
  0x43   : > { %v890_v19 = vsel %vm20700_vm0, %v13485_v17, 0.0  ;;  %v892_v23 = vsel %vm20700_vm0, %v13493_v21, 0.0  ;;  %v13501_v25 = vcombine.high %v822_v22, %v822_v22  ;;  %v893_v28 = vsel %vm20700_vm0, %v822_v22, 0.0  ;;  %v825_v36 = vld [vmem:[%s13432_s30 + $0x48] sm:$0x77] }
  0x44   : > { %951 = vrot.lane.b32.xlu1 %v884_v6, %s13273_s29  ;;  %953 = vrot.lane.b32.xlu0 %v885_v7, %s13273_s29  ;;  %v13509_v29 = vcombine.high %v823_v26, %v823_v26  ;;  %v895_v32 = vsel %vm20700_vm0, %v823_v26, 0.0  ;;  %v13517_v33 = vcombine.high %v824_v30, %v824_v30  ;;  %v897_v35 = vsel %vm20700_vm0, %v824_v30, 0.0  ;;  %v826_v37 = vld [vmem:[%s13432_s30 + $0x50] sm:$0x77]  ;;  %v827_v44 = vld [vmem:[%s13432_s30 + $0x58] sm:$0x77] }
  0x45   : > { %v894_v27 = vsel %vm20700_vm0, %v13501_v25, 0.0  ;;  %v899_v38 = vsel %vm20700_vm0, %v825_v36, 0.0  ;;  %v13529_v39 = vcombine.high %v825_v36, %v825_v36  ;;  %v901_v40 = vsel %vm20700_vm0, %v826_v37, 0.0  ;;  %v828_v45 = vld [vmem:[%s13432_s30 + $0x60] sm:$0x77] }
  0x46   : > { %v896_v31 = vsel %vm20700_vm0, %v13509_v29, 0.0  ;;  %21496 = vst [vmem:[#allocation9_spill] sm:$0xff] %v13517_v33  ;;  %v898_v34 = vsel %vm20700_vm0, %v13517_v33, 0.0  ;;  %v13532_v41 = vcombine.high %v826_v37, %v826_v37  ;;  %v903_v46 = vsel %vm20700_vm0, %v827_v44, 0.0  ;;  %v829_v52 = vld [vmem:[%s13432_s30 + $0x68] sm:$0x77] }
  0x47   : > { %21497 = vst [vmem:[#allocation10_spill] sm:$0xff] %v13529_v39  ;;  %v900_v42 = vsel %vm20700_vm0, %v13529_v39, 0.0  ;;  %v13545_v47 = vcombine.high %v827_v44, %v827_v44  ;;  %v905_v48 = vsel %vm20700_vm0, %v828_v45, 0.0  ;;  %v13548_v49 = vcombine.high %v828_v45, %v828_v45  ;;  %v13558_v53 = vld [vmem:[%s13432_s30 + $0x70] sm:$0x77] }
  0x48   : > { %955 = vrot.lane.b32.xlu1 %v886_v11, %s13273_s29  ;;  %947 = vrot.lane.b32.xlu0 %v882_v12, %s13273_s29  ;;  %21498 = vst [vmem:[#allocation11_spill] sm:$0xff] %v13532_v41  ;;  %v902_v43 = vsel %vm20700_vm0, %v13532_v41, 0.0  ;;  %v907_v54 = vsel %vm20700_vm0, %v829_v52, 0.0  ;;  %v13563_v55 = vcombine.high %v829_v52, %v829_v52  ;;  %v909_v56 = vsel %vm20700_vm0, %v13558_v53, 0.0 }
  0x49   : > { %21499 = vst [vmem:[#allocation12_spill] sm:$0xff] %v13545_v47  ;;  %21500 = vst [vmem:[#allocation13_spill] sm:$0xff] %v13548_v49  ;;  %v904_v50 = vsel %vm20700_vm0, %v13545_v47, 0.0  ;;  %v906_v51 = vsel %vm20700_vm0, %v13548_v49, 0.0  ;;  %v20677_v30 = vmov 0.0   ;;  %v21526_v33 = vmov 0 }
  0x4a   : > { %21501 = vst [vmem:[#allocation14_spill] sm:$0xff] %v13563_v55  ;;  %v908_v57 = vsel %vm20700_vm0, %v13563_v55, 0.0  ;;  %2070 = vmatprep.mubr.f32.mxu0 %v20677_v30  ;;  %2141 = vmatprep.mubr.f32.mxu1 %v20677_v30 }
  0x4c   : > { %959 = vrot.lane.b32.xlu1 %v888_v15, %s13273_s29  ;;  %957 = vrot.lane.b32.xlu0 %v887_v16, %s13273_s29 }
  0x50   : > { %963 = vrot.lane.b32.xlu1 %v890_v19, %s13273_s29  ;;  %961 = vrot.lane.b32.xlu0 %v889_v20, %s13273_s29 }
  0x54   : > { %967 = vrot.lane.b32.xlu1 %v892_v23, %s13273_s29  ;;  %965 = vrot.lane.b32.xlu0 %v891_v24, %s13273_s29 }
  0x58   : > { %971 = vrot.lane.b32.xlu1 %v894_v27, %s13273_s29  ;;  %969 = vrot.lane.b32.xlu0 %v893_v28, %s13273_s29 }
  0x5c   : > { %975 = vrot.lane.b32.xlu1 %v896_v31, %s13273_s29  ;;  %973 = vrot.lane.b32.xlu0 %v895_v32, %s13273_s29 }
  0x60   : > { %979 = vrot.lane.b32.xlu1 %v898_v34, %s13273_s29  ;;  %977 = vrot.lane.b32.xlu0 %v897_v35, %s13273_s29 }
  0x64   : > { %981 = vrot.lane.b32.xlu0 %v899_v38, %s13273_s29  ;;  %985 = vrot.lane.b32.xlu1 %v901_v40, %s13273_s29 }
  0x68   : > { %983 = vrot.lane.b32.xlu0 %v900_v42, %s13273_s29  ;;  %987 = vrot.lane.b32.xlu1 %v902_v43, %s13273_s29 }
  0x6c   : > { %989 = vrot.lane.b32.xlu0 %v903_v46, %s13273_s29  ;;  %993 = vrot.lane.b32.xlu1 %v905_v48, %s13273_s29 }
  0x70   : > { %991 = vrot.lane.b32.xlu0 %v904_v50, %s13273_s29  ;;  %995 = vrot.lane.b32.xlu1 %v906_v51, %s13273_s29 }
  0x74   : > { %997 = vrot.lane.b32.xlu0 %v907_v54, %s13273_s29  ;;  %1001 = vrot.lane.b32.xlu1 %v909_v56, %s13273_s29 }
  0x78   : > { %999 = vrot.lane.b32.xlu0 %v908_v57, %s13273_s29 }
  0xb2   : > { %v950_v58 = vpop.permute.xlu1 %949  ;;  %v946_v59 = vpop.permute.xlu0 %945 }
  0xb3   : > { %v13573_v60 = vsel %vm20694_vm1, 0.0, %v946_v59 }
  0xb4   : > { %1302 = vrot.lane.b32.xlu0 %v13573_v60, %s13274_s12 }
  0xb6   : > { %v952_v61 = vpop.permute.xlu1 %951  ;;  %v954_v62 = vpop.permute.xlu0 %953 }
  0xb7   : > { %v13578_v63 = vsel %vm20694_vm1, %v950_v58, %v952_v61  ;;  %v13601_v15 = vsel %vm20694_vm1, %v952_v61, %v954_v62 }
  0xb8   : > { %v12501_v3 = vpack.i.bf16 %v13578_v63, %v13573_v60 }
  0xba   : > { %12502 = vrot.lane.b32.xlu0 %v12501_v3, %s13275_s14  ;;  %v948_v4 = vpop.permute.xlu0 %947  ;;  %v956_v12 = vpop.permute.xlu1 %955 }
  0xbb   : > { %v13584_v6 = vsel %vm20694_vm1, %v946_v59, %v948_v4  ;;  %v13587_v7 = vsel %vm20694_vm1, %v948_v4, %v950_v58  ;;  %v13595_v14 = vsel %vm20694_vm1, %v954_v62, %v956_v12  ;;  %v831_v59 = vld [vmem:[%s13432_s30 + $0x78] sm:$0x77] }
  0xbc   : > { %v12496_v11 = vpack.i.bf16 %v13587_v7, %v13584_v6  ;;  %v12526_v16 = vpack.i.bf16 %v13595_v14, %v13601_v15  ;;  %v911_v61 = vsel %vm20700_vm0, %v831_v59, 0.0 }
  0xbe   : > { %1306 = vrot.lane.b32.xlu0 %v13587_v7, %s13274_s12  ;;  %12497 = vrot.lane.b32.xlu1 %v12496_v11, %s13275_s14  ;;  %v960_v18 = vpop.permute.xlu1 %959  ;;  %v958_v19 = vpop.permute.xlu0 %957 }
  0xbf   : > { %v13613_v20 = vsel %vm20694_vm1, %v956_v12, %v958_v19  ;;  %v13616_v22 = vsel %vm20694_vm1, %v958_v19, %v960_v18  ;;  %v13712_v12 = vcombine.high %v831_v59, %v831_v59 }
  0xc0   : > { %v12546_v26 = vpack.i.bf16 %v13616_v22, %v13613_v20 }
  0xc1   : > { %21505 = vst [vmem:[#allocation18_spill] sm:$0xff] %v13712_v12 }
  0xc2   : > { %12517 = vrot.lane.b32.xlu0 %v12496_v11, %s13276_s15  ;;  %1304 = vrot.lane.b32.xlu1 %v13584_v6, %s13274_s12  ;;  %v964_v23 = vpop.permute.xlu1 %963  ;;  %v962_v24 = vpop.permute.xlu0 %961 }
  0xc3   : > { %v13625_v27 = vsel %vm20694_vm1, %v960_v18, %v962_v24  ;;  %v13628_v28 = vsel %vm20694_vm1, %v962_v24, %v964_v23 }
  0xc4   : > { %v12556_v31 = vpack.i.bf16 %v13628_v28, %v13625_v27 }
  0xc6   : > { %12527 = vrot.lane.b32.xlu0 %v12526_v16, %s13275_s14  ;;  %12507 = vrot.lane.b32.xlu1 %v12496_v11, %s13277_s22  ;;  %v968_v32 = vpop.permute.xlu1 %967  ;;  %v966_v34 = vpop.permute.xlu0 %965 }
  0xc7   : > { %v13645_v35 = vsel %vm20694_vm1, %v964_v23, %v966_v34  ;;  %v13648_v36 = vsel %vm20694_vm1, %v966_v34, %v968_v32 }
  0xc8   : > { %v12576_v40 = vpack.i.bf16 %v13648_v36, %v13645_v35 }
  0xca   : > { %1310 = vrot.lane.b32.xlu0 %v13601_v15, %s13274_s12  ;;  %12512 = vrot.lane.b32.xlu1 %v12501_v3, %s13277_s22  ;;  %v972_v37 = vpop.permute.xlu1 %971  ;;  %v970_v38 = vpop.permute.xlu0 %969 }
  0xcb   : > { %v13657_v42 = vsel %vm20694_vm1, %v968_v32, %v970_v38  ;;  %v13660_v43 = vsel %vm20694_vm1, %v970_v38, %v972_v37 }
  0xcc   : > { %v12586_v44 = vpack.i.bf16 %v13660_v43, %v13657_v42 }
  0xce   : > { %12537 = vrot.lane.b32.xlu0 %v12526_v16, %s13276_s15  ;;  %12522 = vrot.lane.b32.xlu1 %v12501_v3, %s13276_s15  ;;  %v976_v45 = vpop.permute.xlu1 %975  ;;  %v974_v46 = vpop.permute.xlu0 %973  ;;  %v13705_v3 = vcombine.high %v13558_v53, %v13558_v53 }
  0xcf   : > { %v13675_v48 = vsel %vm20694_vm1, %v972_v37, %v974_v46  ;;  %v13678_v50 = vsel %vm20694_vm1, %v974_v46, %v976_v45 }
  0xd0   : > { %v12606_v54 = vpack.i.bf16 %v13678_v50, %v13675_v48  ;;  %21504 = vst [vmem:[#allocation17_spill] sm:$0xff] %v13705_v3  ;;  %v910_v11 = vsel %vm20700_vm0, %v13705_v3, 0.0 }
  0xd2   : > { %1312 = vrot.lane.b32.xlu0 %v13595_v14, %s13274_s12  ;;  %1308 = vrot.lane.b32.xlu1 %v13578_v63, %s13274_s12  ;;  %v980_v51 = vpop.permute.xlu1 %979  ;;  %v978_v52 = vpop.permute.xlu0 %977 }
  0xd3   : > { %v13687_v56 = vsel %vm20694_vm1, %v976_v45, %v978_v52  ;;  %v13690_v57 = vsel %vm20694_vm1, %v978_v52, %v980_v51 }
  0xd4   : > { %21502 = vst [vmem:[#allocation15_spill] sm:$0xff] %v13687_v56  ;;  %21503 = vst [vmem:[#allocation16_spill] sm:$0xff] %v13690_v57  ;;  %v12616_v58 = vpack.i.bf16 %v13690_v57, %v13687_v56 }
  0xd6   : > { %12532 = vrot.lane.b32.xlu1 %v12526_v16, %s13277_s22  ;;  %12547 = vrot.lane.b32.xlu0 %v12546_v26, %s13277_s22  ;;  %v982_v62 = vpop.permute.xlu0 %981  ;;  %v912_v16 = vsel %vm20700_vm0, %v13712_v12, 0.0  ;;  %v986_v18 = vpop.permute.xlu1 %985 }
  0xd7   : > { %v13722_v19 = vsel %vm20694_vm1, %v980_v51, %v982_v62 }
  0xd8   : > { %21506 = vst [vmem:[#allocation19_spill] sm:$0xff] %v13722_v19 }
  0xda   : > { %12542 = vrot.lane.b32.xlu1 %v12546_v26, %s13275_s14  ;;  %12557 = vrot.lane.b32.xlu0 %v12556_v31, %s13275_s14  ;;  %v984_v4 = vpop.permute.xlu0 %983 }
  0xdb   : > { %v13725_v23 = vsel %vm20694_vm1, %v982_v62, %v984_v4  ;;  %v13735_v34 = vsel %vm20694_vm1, %v984_v4, %v986_v18 }
  0xdc   : > { %21507 = vst [vmem:[#allocation20_spill] sm:$0xff] %v13725_v23  ;;  %21508 = vst [vmem:[#allocation21_spill] sm:$0xff] %v13735_v34 }
  0xde   : > { %1314 = vrot.lane.b32.xlu1 %v13613_v20, %s13274_s12  ;;  %1318 = vrot.lane.b32.xlu0 %v13625_v27, %s13274_s12  ;;  %v990_v53 = vpop.permute.xlu0 %989 }
  0xe2   : > { %12552 = vrot.lane.b32.xlu1 %v12546_v26, %s13276_s15  ;;  %12567 = vrot.lane.b32.xlu0 %v12556_v31, %s13276_s15  ;;  %v992_v24 = vpop.permute.xlu0 %991  ;;  %v12641_v26 = vpack.i.bf16 %v13725_v23, %v13722_v19 }
  0xe3   : > { %v13747_v45 = vsel %vm20694_vm1, %v990_v53, %v992_v24 }
  0xe4   : > { %21510 = vst [vmem:[#allocation23_spill] sm:$0xff] %v13747_v45 }
  0xe6   : > { %1316 = vrot.lane.b32.xlu1 %v13616_v22, %s13274_s12  ;;  %1320 = vrot.lane.b32.xlu0 %v13628_v28, %s13274_s12  ;;  %v998_v32 = vpop.permute.xlu0 %997 }
  0xea   : > { %12562 = vrot.lane.b32.xlu1 %v12556_v31, %s13277_s22  ;;  %12577 = vrot.lane.b32.xlu0 %v12576_v40, %s13277_s22  ;;  %v988_v31 = vpop.permute.xlu1 %987  ;;  %v13754_v51 = vpop.permute.xlu0 %999 }
  0xeb   : > { %v13738_v37 = vsel %vm20694_vm1, %v986_v18, %v988_v31  ;;  %v13750_v46 = vsel %vm20694_vm1, %v988_v31, %v990_v53 }
  0xec   : > { %21509 = vst [vmem:[#allocation22_spill] sm:$0xff] %v13738_v37  ;;  %21511 = vst [vmem:[#allocation24_spill] sm:$0xff] %v13750_v46  ;;  %v12661_v52 = vpack.i.bf16 %v13747_v45, %v13750_v46 }
  0xee   : > { %12572 = vrot.lane.b32.xlu1 %v12576_v40, %s13275_s14  ;;  %12587 = vrot.lane.b32.xlu0 %v12586_v44, %s13275_s14  ;;  %v994_v38 = vpop.permute.xlu1 %993 }
  0xf2   : > { %1322 = vrot.lane.b32.xlu1 %v13645_v35, %s13274_s12  ;;  %1326 = vrot.lane.b32.xlu0 %v13657_v42, %s13274_s12 }
  0xf6   : > { %12582 = vrot.lane.b32.xlu1 %v12576_v40, %s13276_s15  ;;  %12597 = vrot.lane.b32.xlu0 %v12586_v44, %s13276_s15  ;;  %v12651_v40 = vpack.i.bf16 %v13738_v37, %v13735_v34 }
  0xfa   : > { %1324 = vrot.lane.b32.xlu1 %v13648_v36, %s13274_s12  ;;  %1328 = vrot.lane.b32.xlu0 %v13660_v43, %s13274_s12 }
  0xfe   : > { %12592 = vrot.lane.b32.xlu1 %v12586_v44, %s13277_s22  ;;  %12607 = vrot.lane.b32.xlu0 %v12606_v54, %s13277_s22  ;;  %v399_v44 = vlaneseq }
 0x102   : > { %12602 = vrot.lane.b32.xlu1 %v12606_v54, %s13275_s14  ;;  %12617 = vrot.lane.b32.xlu0 %v12616_v58, %s13275_s14 }
 0x106   : > { %1330 = vrot.lane.b32.xlu1 %v13675_v48, %s13274_s12  ;;  %1005 = vrot.lane.b32.xlu0 %v911_v61, %s13273_s29 }
 0x10a   : > { %12612 = vrot.lane.b32.xlu1 %v12606_v54, %s13276_s15  ;;  %1334 = vrot.lane.b32.xlu0 %v13687_v56, %s13274_s12  ;;  %v13758_v54 = vand.u32 127, %v399_v44 }
 0x10c   : > { %v401_v61 = vadd.s32 128, %v13758_v54  ;;  %v402_v12 = vadd.s32 256, %v13758_v54 }
 0x10e   : > { %1003 = vrot.lane.b32.xlu1 %v910_v11, %s13273_s29  ;;  %12627 = vrot.lane.b32.xlu0 %v12616_v58, %s13276_s15  ;;  %v13771_v11 = vand.u32 63, %v401_v61  ;;  %v13784_v61 = vsel %vm20694_vm1, %v992_v24, %v994_v38  ;;  %v21514_v24 = vmov 0 }
 0x110   : > { %21512 = vst [vmem:[#allocation25_spill] sm:$0xff] %v13771_v11  ;;  %vm1077_vm2 = vcmp.ge.s32.totalorder %v13771_v11, 1  ;;  %vm20704_vm10 = vcmp.lt.s32.totalorder %v13771_v11, 63 }
 0x111   : > { %vm13798_vm6 = vmpackc.low %vm20696_vm5, %vm1077_vm2 }
 0x112   : > { %1332 = vrot.lane.b32.xlu1 %v13678_v50, %s13274_s12  ;;  %1007 = vrot.lane.b32.xlu0 %v912_v16, %s13273_s29  ;;  %v13774_v16 = vand.u32 63, %v13758_v54  ;;  %v21515_v24 = vsel %vm13798_vm6, 4294967295, %v21514_v24  ;;  %vm13864_vm13 = vmpackc.low %vm1077_vm2, %vm20704_vm10 }
 0x113   : > { %21516 = vst [vmem:[#allocation27_spill] sm:$0xff] %v21515_v24 }
 0x114   : > { %21513 = vst [vmem:[#allocation26_spill] sm:$0xff] %v13774_v16  ;;  %vm1076_vm4 = vcmp.ge.s32.totalorder %v13774_v16, 1  ;;  %vm20699_vm2 = vcmp.lt.s32.totalorder %v13774_v16, 63 }
 0x115   : > { %vm13812_vm7 = vmpackc.low %vm20696_vm5, %vm1076_vm4 }
 0x116   : > { %12622 = vrot.lane.b32.xlu1 %v12616_v58, %s13277_s22  ;;  %1338 = vrot.lane.b32.xlu0 %v13722_v19, %s13274_s12  ;;  %v996_v58 = vpop.permute.xlu1 %995 }
 0x11a   : > { %12642 = vrot.lane.b32.xlu0 %v12641_v26, %s13276_s15  ;;  %12632 = vrot.lane.b32.xlu1 %v12641_v26, %s13275_s14  ;;  %v13769_v62 = vpop.permute.xlu1 %1001 }
 0x11e   : > { %1340 = vrot.lane.b32.xlu0 %v13725_v23, %s13274_s12  ;;  %1336 = vrot.lane.b32.xlu1 %v13690_v57, %s13274_s12 }
 0x122   : > { %12652 = vrot.lane.b32.xlu0 %v12651_v40, %s13277_s22  ;;  %12637 = vrot.lane.b32.xlu1 %v12641_v26, %s13277_s22  ;;  %v403_v26 = vadd.s32 384, %v13758_v54 }
 0x124   : > { %v13816_v41 = vand.u32 63, %v403_v26 }
 0x126   : > { %12647 = vrot.lane.b32.xlu1 %v12651_v40, %s13275_s14  ;;  %12662 = vrot.lane.b32.xlu0 %v12661_v52, %s13275_s14  ;;  %v13762_v59 = vpop.permute.xlu0 %1302  ;;  %vm1079_vm11 = vcmp.ge.s32.totalorder %v13816_v41, 1 }
 0x127   : > { %vm13880_vm15 = vmpackc.low %vm20696_vm5, %vm1079_vm11 }
 0x128   : > { %v21527_v33 = vsel %vm13880_vm15, 4294967295, %v21526_v33 }
 0x12a   : > { %1342 = vrot.lane.b32.xlu1 %v13735_v34, %s13274_s12  ;;  %1346 = vrot.lane.b32.xlu0 %v13750_v46, %s13274_s12  ;;  %v21522_v34 = vmov 0 }
 0x12b   : > { %v21523_v34 = vsel %vm13864_vm13, 4294967295, %v21522_v34 }
 0x12c   : > { %v12503_v4 = vpop.permute.xlu0 %12502  ;;  %21524 = vst [vmem:[#allocation30_spill] sm:$0xff] %v21523_v34 }
 0x12d   : > { %v12504_v31 = vunpack.i.l.bf16 %v12503_v4 }
 0x12e   : > { %12657 = vrot.lane.b32.xlu1 %v12651_v40, %s13276_s15  ;;  %12672 = vrot.lane.b32.xlu0 %v12661_v52, %s13276_s15  ;;  %v13787_v40 = vsel %vm20694_vm1, %v994_v38, %v996_v58 }
 0x130   : > { %v12498_v53 = vpop.permute.xlu1 %12497  ;;  %v13778_v18 = vpop.permute.xlu0 %1306 }
 0x131   : > { %v12500_v44 = vunpack.i.h.bf16 %v12498_v53  ;;  %v12499_v30 = vunpack.i.l.bf16 %v12498_v53  ;;  %v13280_v53 = vmov 0  }
 0x132   : > { %1344 = vrot.lane.b32.xlu1 %v13738_v37, %s13274_s12  ;;  %1348 = vrot.lane.b32.xlu0 %v13747_v45, %s13274_s12  ;;  %v21517_v45 = vmov 0 }
 0x133   : > { %v1928_v3 = vsel %vm20698_vm3, %v12499_v30, %v12500_v44  ;;  %v1927_v38 = vsel %vm20698_vm3, %v12504_v31, %v12499_v30  ;;  %12736 = vset.pattern.permute.xlu0 %v13280_v53  ;;  %13062 = vset.pattern.permute.xlu1 %v13280_v53  ;;  %v21518_v45 = vsel %vm13812_vm7, 4294967295, %v21517_v45  ;;  %v12681_v30 = vpack.i.bf16 %v13787_v40, %v13784_v61 }
 0x134   : > { %v1305_v55 = vpop.permute.xlu1 %1304  ;;  %v13803_v49 = vpop.permute.xlu0 %12517  ;;  %v13806_v47 = vpack.c.bf16 %v1928_v3, %v13584_v6  ;;  %v10903_v46 = vpack.c.bf16 %v1927_v38, %v13573_v60  ;;  %21519 = vst [vmem:[#allocation28_spill] sm:$0xff] %v21518_v45  ;;  %v13822_v31 = vsel %vm20694_vm1, %v998_v32, %v13754_v51  ;;  %v13825_v6 = vsel %vm20694_vm1, %v996_v58, %v998_v32 }
 0x135   : > { %v13831_v60 = vand.u32 63, %v402_v12  ;;  %v12505_v3 = vunpack.i.h.bf16 %v12503_v4  ;;  %v12691_v38 = vpack.i.bf16 %v13822_v31, %v13825_v6 }
 0x136   : > { %10902 = vmatprep.subr.msk.bf16.mxu0 %vm13798_vm6, %v13806_v47  ;;  %12667 = vrot.lane.b32.xlu1 %v12661_v52, %s13277_s22  ;;  %v12519_v52 = vunpack.i.l.bf16 %v13803_v49 }
 0x137   : > { %21520 = vst [vmem:[#allocation29_spill] sm:$0xff] %v13831_v60  ;;  %12682 = vrot.lane.b32.xlu0 %v12681_v30, %s13277_s22  ;;  %10905 = vmatpush1.bf16.msk.msra.mxu0 %vm13812_vm7, %v10903_v46  ;;  %v13849_v46 = vsel %vm20706_vm8, %v1305_v55, %v13778_v18  ;;  %vm1078_vm12 = vcmp.ge.s32.totalorder %v13831_v60, 1  ;;  %v1929_v4 = vsel %vm20698_vm3, %v12500_v44, %v12505_v3 }
 0x138   : > { %v13836_v26 = vpop.permute.xlu1 %12507  ;;  %v13838_v32 = vpop.permute.xlu0 %12527  ;;  %vm13888_vm1 = vmpackc.low %vm20696_vm5, %vm1078_vm12 }
 0x139   : > { %v12509_v12 = vunpack.i.l.bf16 %v13836_v26  ;;  %v21521_v37 = vunpack.i.h.bf16 %v13836_v26  ;;  %v21525_v44 = vunpack.i.l.bf16 %v13838_v32  ;;  %vm13912_vm5 = vmpackc.low %vm1076_vm4, %vm20699_vm2  ;;  %v21544_v45 = vunpack.i.l.bf16 %v13838_v32 }
 0x13a   : > { %12677 = vrot.lane.b32.xlu1 %v12681_v30, %s13275_s14  ;;  %vm10916_vm4 = vmpackc.low %vm20699_vm2, %vm20700_vm0 }
 0x13b   : > { %v1533_v58 = vsel %vm20708_vm9, %v12509_v12, %v21521_v37  ;;  %12692 = vrot.lane.b32.xlu0 %v12691_v38, %s13275_s14  ;;  %v1930_v53 = vsel %vm20698_vm3, %v12505_v3, %v21525_v44  ;;  %v21528_v3 = vmov 0  ;;  %vm10913_vm3 = vmpackc.low %vm20704_vm10, %vm20700_vm0 }
 0x13c   : > { %v12513_v39 = vpop.permute.xlu1 %12512  ;;  %v13871_v19 = vpop.permute.xlu0 %1310  ;;  %v10906_v37 = vpack.c.bf16 %v1533_v58, %v13849_v46  ;;  %v13875_v23 = vpack.c.bf16 %v1930_v53, %v13578_v63  ;;  %v21529_v3 = vsel %vm13888_vm1, 4294967295, %v21528_v3  ;;  %v10918_v63 = vpack.c.bf16 %v1929_v4, %v13587_v7 }
 0x13d   : > { %v12514_v56 = vunpack.i.l.bf16 %v12513_v39  ;;  %v1369_v58 = vsel %vm20706_vm8, %v13762_v59, %v1305_v55  ;;  %v21530_v53 = vunpack.i.h.bf16 %v13803_v49  ;;  %v21531_v7 = vmov 0 }
 0x13e   : > { %1350 = vrot.lane.b32.xlu1 %v13784_v61, %s13274_s12  ;;  %10908 = vmatprep.subr.msk.bf16.mxu0 %vm13864_vm13, %v10906_v37  ;;  %v21532_v7 = vsel %vm13912_vm5, 4294967295, %v21531_v7  ;;  %v405_v37 = vadd.s32 640, %v13758_v54 }
 0x13f   : > { %v1696_v44 = vsel %vm20714_vm14, %v12519_v52, %v21530_v53  ;;  %v1532_v57 = vsel %vm20708_vm9, %v12514_v56, %v12509_v12  ;;  %1354 = vrot.lane.b32.xlu0 %v13825_v6, %s13274_s12  ;;  %10926 = vmatprep.subr.msk.bf16.mxu1 %vm13880_vm15, %v13875_v23  ;;  %21533 = vst [vmem:[#allocation31_spill] sm:$0xff] %v21532_v7  ;;  %v21540_v7 = vmov 0 }
 0x140   : > { %10929 = vmatpush1.bf16.msk.msra.mxu1 %vm13888_vm1, %v10918_v63  ;;  %v12523_v55 = vpop.permute.xlu1 %12522  ;;  %v13918_v56 = vpop.permute.xlu0 %12537  ;;  %v10909_v59 = vpack.c.bf16 %v1532_v57, %v1369_v58  ;;  %v10912_v4 = vpack.c.bf16 %v1696_v44, %v13463_v9  ;;  %v13939_v9 = vand.u32 63, %v405_v37 }
 0x141   : > { %v12524_v12 = vunpack.i.l.bf16 %v12523_v55  ;;  %v20701_v44 = vunpack.i.l.bf16 %v13918_v56 }
 0x142   : > { %12687 = vrot.lane.b32.xlu1 %v12681_v30, %s13276_s15  ;;  %10911 = vmatpush1.bf16.msk.msra.mxu0 %vm13912_vm5, %v10909_v59  ;;  %v404_v59 = vadd.s32 512, %v13758_v54  ;;  %21534 = vst [vmem:[#allocation32_spill] sm:$0xff] %v13939_v9 }
 0x143   : > { %v1695_v53 = vsel %vm20714_vm14, %v12524_v12, %v12519_v52  ;;  %12702 = vrot.lane.b32.xlu0 %v12691_v38, %s13276_s15  ;;  %10914 = vmatprep.subr.msk.bf16.mxu0 %vm10913_vm3, %v10912_v4  ;;  %v12525_v52 = vunpack.i.h.bf16 %v12523_v55  ;;  %v12515_v12 = vunpack.i.h.bf16 %v12513_v39  ;;  %vm20713_vm3 = vcmp.lt.s32.totalorder %v13816_v41, 63 }
 0x144   : > { %v1309_v57 = vpop.permute.xlu1 %1308  ;;  %v13933_v58 = vpop.permute.xlu0 %1312  ;;  %v10915_v30 = vpack.c.bf16 %v1695_v53, %v13438_v1  ;;  %v13949_v53 = vand.u32 63, %v404_v59  ;;  %v12530_v55 = vunpack.i.h.bf16 %v13838_v32  ;;  %vm13974_vm0 = vmpackc.low %vm1079_vm11, %vm20713_vm3  ;;  %v21550_v32 = vmov 0 }
 0x145   : > { %v1371_v39 = vsel %vm20706_vm8, %v13778_v18, %v1309_v57  ;;  %v13965_v37 = vsel %vm20706_vm8, %v1309_v57, %v13871_v19  ;;  %v21539_v18 = vunpack.i.h.bf16 %v13836_v26  ;;  %vm21547_vm8 = vcmp.lt.s32.totalorder %v13774_v16, 63 }
 0x146   : > { %1352 = vrot.lane.b32.xlu1 %v13787_v40, %s13274_s12  ;;  %10917 = vmatpush1.bf16.msk.msra.mxu0 %vm10916_vm4, %v10915_v30  ;;  %21535 = vst [vmem:[#allocation33_spill] sm:$0xff] %v13949_v53  ;;  %vm20716_vm4 = vcmp.lt.s32.totalorder %v13831_v60, 63 }
 0x147   : > { %1356 = vrot.lane.b32.xlu0 %v13822_v31, %s13274_s12  ;;  %10920 = vmatprep.subr.msk.bf16.mxu0 %vm13798_vm6, %v10918_v63  ;;  %v1698_v63 = vsel %vm20714_vm14, %v12525_v52, %v20701_v44 }
 0x148   : > { %v12533_v4 = vpop.permute.xlu1 %12532  ;;  %v13946_v1 = vpop.permute.xlu0 %12547 }
 0x149   : > { %v12534_v30 = vunpack.i.l.bf16 %v12533_v4  ;;  %v12535_v26 = vunpack.i.h.bf16 %v12533_v4  ;;  %v21546_v4 = vunpack.i.h.bf16 %v13803_v49  ;;  %v407_v49 = vadd.s32 896, %v13758_v54 }
 0x14a   : > { %12697 = vrot.lane.b32.xlu1 %v12691_v38, %s13277_s22  ;;  %10923 = vmatpush1.bf16.msk.msra.mxu0 %vm13812_vm7, %v13806_v47  ;;  %v21536_v47 = vmov 0  ;;  %v1534_v38 = vsel %vm20708_vm9, %v21539_v18, %v12515_v12 }
 0x14b   : > { %v1535_v59 = vsel %vm20708_vm9, %v12515_v12, %v12534_v30  ;;  %10046 = vmatprep.subr.msk.mxu0 %vm20704_vm10, %v1371_v39  ;;  %v21537_v47 = vsel %vm13974_vm0, 4294967295, %v21536_v47  ;;  %vm13990_vm10 = vmpackc.low %vm1078_vm12, %vm20716_vm4  ;;  %v10933_v18 = vpack.c.bf16 %v1534_v38, %v1371_v39  ;;  %vm21543_vm9 = vcmask 1042432  }
 0x14c   : > { %21538 = vst [vmem:[#allocation34_spill] sm:$0xff] %v21537_v47  ;;  %v13981_v57 = vpop.permute.xlu1 %12542  ;;  %v13983_v44 = vpop.permute.xlu0 %12557  ;;  %v10930_v11 = vpack.c.bf16 %v1535_v59, %v13965_v37  ;;  %v21541_v7 = vsel %vm13990_vm10, 4294967295, %v21540_v7  ;;  %vm10937_vm2 = vmpackc.low %vm20713_vm3, %vm21543_vm9  ;;  %v14004_v59 = vld [vmem:[%s20663_s1] sm:$0xff]  ;;  %vm21545_vm12 = vcmask 1039360   ;;  %v1697_v12 = vsel %vm20714_vm14, %v21546_v4, %v12525_v52 }
 0x14d   : > { %21542 = vst [vmem:[#allocation35_spill] sm:$0xff] %v21541_v7  ;;  %v12544_v34 = vunpack.i.l.bf16 %v13981_v57  ;;  %v1931_v24 = vsel %vm21545_vm12, %v21544_v45, %v12530_v55  ;;  %v10936_v39 = vpack.c.bf16 %v1698_v63, %v13449_v5  ;;  %vm21548_vm9 = vcmp.ge.s32.totalorder %v13939_v9, 1 }
 0x14e   : > { %10047 = vmatpush1.msk.msra.mxu0 %vm21547_vm8, %v13849_v46  ;;  %10932 = vmatprep.subr.msk.bf16.mxu1 %vm13974_vm0, %v10930_v11  ;;  %vm21549_vm3 = vmmov 1   ;;  %vm21552_vm8 = vcmask 1042432   ;;  %v406_v63 = vadd.s32 768, %v13758_v54  ;;  %v10942_v38 = vpack.c.bf16 %v1931_v24, %v13601_v15 }
 0x14f   : > { %vm14021_vm11 = vmpackc.low %vm21549_vm3, %vm21548_vm9  ;;  %v1932_v45 = vsel %vm21545_vm12, %v12530_v55, %v12544_v34  ;;  %10935 = vmatpush1.bf16.msk.msra.mxu1 %vm13990_vm10, %v10933_v18  ;;  %vm21555_vm9 = vcmask 588800   ;;  %vm21556_vm12 = vcmp.ge.s32.totalorder %v13949_v53, 1  ;;  %v21557_v55 = vmov 0 }
 0x150   : > { %v21551_v32 = vsel %vm14021_vm11, 4294967295, %v21550_v32  ;;  %vm14032_vm14 = vmpackc.low %vm20716_vm4, %vm21552_vm8  ;;  %v14036_v5 = vpop.permute.xlu1 %1314  ;;  %v14038_v46 = vpop.permute.xlu0 %1318  ;;  %10938 = vmatprep.subr.msk.bf16.mxu1 %vm10937_vm2, %v10936_v39  ;;  %v14041_v52 = vpack.c.bf16 %v1932_v45, %v13595_v14  ;;  %10048 = vmatmul.mubr.msk.f32.vlgmr.msra.gmra.mrb[0].mxu0 %vm21555_vm9, %v14004_v59  ;;  %vm21559_vm2 = vcmask 1031168   ;;  %v21560_v14 = vunpack.i.l.bf16 %v13946_v1 }
 0x151   : > { %vm14048_vm10 = vmpackc.low %vm21549_vm3, %vm21556_vm12  ;;  %v14057_v18 = vsel %vm21559_vm2, %v13933_v58, %v14036_v5  ;;  %vm21561_vm8 = vcmask 523264   ;;  %v10939_v39 = vpack.c.bf16 %v1697_v12, %v13435_v0  ;;  %vm21562_vm9 = vcmp.lt.s32.totalorder %v13939_v9, 63 }
 0x152   : > { %v21558_v55 = vsel %vm14048_vm10, 4294967295, %v21557_v55  ;;  %v1537_v4 = vsel %vm21561_vm8, %v12535_v26, %v21560_v14  ;;  %vm21563_vm12 = vcmp.ge.s32.totalorder %v13939_v9, 1  ;;  %v21564_v45 = vmov 0  ;;  %10950 = vmatprep.subr.msk.bf16.mxu0 %vm14021_vm11, %v14041_v52 }
 0x153   : > { %vm14067_vm4 = vmpackc.low %vm21563_vm12, %vm21562_vm9  ;;  %v21567_v15 = vmov 0.0   ;;  %v10954_v24 = vpack.c.bf16 %v1537_v4, %v14057_v18  ;;  %vm20723_vm2 = vcmp.lt.s32.totalorder %v13949_v53, 63  ;;  %v14077_v14 = vand.u32 63, %v407_v49  ;;  %10941 = vmatpush1.bf16.msk.msra.mxu1 %vm14032_vm14, %v10939_v39  ;;  %10953 = vmatpush1.bf16.msk.msra.mxu0 %vm14048_vm10, %v10942_v38 }
 0x154   : > { %v21565_v45 = vsel %vm14067_vm4, 4294967295, %v21564_v45  ;;  %2212 = vmatprep.mubr.f32.mxu0 %v21567_v15  ;;  %v12540_v0 = vunpack.i.h.bf16 %v13918_v56  ;;  %v1536_v12 = vsel %vm21561_vm8, %v12534_v30, %v12535_v26  ;;  %v12545_v7 = vunpack.i.h.bf16 %v13981_v57  ;;  %v14087_v4 = vpop.permute.xlu1 %12552  ;;  %v14089_v16 = vpop.permute.xlu0 %12567  ;;  %10944 = vmatprep.subr.msk.bf16.mxu1 %vm13880_vm15, %v10942_v38 }
 0x155   : > { %21566 = vst [vmem:[#allocation36_spill] sm:$0xff] %v21565_v45  ;;  %v20732_v47 = vunpack.i.l.bf16 %v13983_v44  ;;  %10956 = vmatprep.subr.msk.bf16.mxu0 %vm14067_vm4, %v10954_v24  ;;  %v14095_v30 = vand.u32 63, %v406_v63  ;;  %vm21569_vm9 = vcmask 1031168   ;;  %v20731_v26 = vunpack.i.l.bf16 %v14087_v4 }
 0x156   : > { %v1373_v57 = vsel %vm21569_vm9, %v13871_v19, %v13933_v58  ;;  %vm21570_vm14 = vcmp.ge.s32.totalorder %v13949_v53, 1  ;;  %v21571_v49 = vmov 0  ;;  %v21574_v63 = vunpack.i.l.bf16 %v13918_v56 }
 0x157   : > { %21568 = vst [vmem:[#allocation37_spill] sm:$0xff] %v14095_v30  ;;  %vm14105_vm12 = vmpackc.low %vm21570_vm14, %vm20723_vm2  ;;  %v10957_v11 = vpack.c.bf16 %v1536_v12, %v1373_v57  ;;  %vm21575_vm4 = vcmask 506880   ;;  %vm21576_vm9 = vcmask 1039360   ;;  %10947 = vmatpush1.bf16.msk.msra.mxu1 %vm13888_vm1, %v13875_v23  ;;  %vm21578_vm14 = vcmask 1042432  }
 0x158   : > { %v21572_v49 = vsel %vm14105_vm12, 4294967295, %v21571_v49  ;;  %v1699_v38 = vsel %vm21575_vm4, %v21574_v63, %v12540_v0  ;;  %v1934_v19 = vsel %vm21576_vm9, %v12545_v7, %v20732_v47  ;;  %vm21577_vm0 = vmmov %vm21575_vm4  ;;  %vm21579_vm2 = vcmp.lt.s32.totalorder %v13939_v9, 63  ;;  %v1317_v24 = vpop.permute.xlu1 %1316  ;;  %v14129_v12 = vpop.permute.xlu0 %1320 }
 0x159   : > { %21573 = vst [vmem:[#allocation38_spill] sm:$0xff] %v21572_v49  ;;  %v1700_v58 = vsel %vm21577_vm0, %v12540_v0, %v20731_v26  ;;  %vm10961_vm8 = vmpackc.low %vm21579_vm2, %vm21578_vm14  ;;  %v409_v56 = vadd.s32 1152, %v13758_v54  ;;  %10959 = vmatpush1.bf16.msk.msra.mxu0 %vm14105_vm12, %v10957_v11  ;;  %vm21581_vm0 = vcmp.lt.s32.totalorder %v13816_v41, 63  ;;  %vm20728_vm2 = vcmp.ge.s32.totalorder %v14095_v30, 1 }
 0x15a   : > { %vm21580_vm15 = vmmov %vm21576_vm9  ;;  %10061 = vmatprep.subr.msk.mxu1 %vm21581_vm0, %v1373_v57  ;;  %v10960_v0 = vpack.c.bf16 %v1700_v58, %v13459_v8  ;;  %vm21583_vm9 = vcmp.lt.s32.totalorder %v13949_v53, 63  ;;  %v408_v23 = vadd.s32 1024, %v13758_v54  ;;  %v14148_v8 = vpack.c.bf16 %v1934_v19, %v13616_v22 }
 0x15b   : > { %v1933_v39 = vsel %vm21580_vm15, %v12544_v34, %v12545_v7  ;;  %vm21582_vm4 = vmmov %vm21578_vm14  ;;  %vm21584_vm15 = vcmp.ge.s32.totalorder %v14077_v14, 1  ;;  %v21585_v34 = vmov 0  ;;  %v10963_v7 = vpack.c.bf16 %v1699_v38, %v13441_v2 }
 0x15c   : > { %vm10964_vm1 = vmpackc.low %vm21583_vm9, %vm21582_vm4  ;;  %10962 = vmatprep.subr.msk.bf16.mxu0 %vm10961_vm8, %v10960_v0  ;;  %v12555_v57 = vunpack.i.h.bf16 %v14087_v4  ;;  %v20730_v11 = vunpack.i.l.bf16 %v14089_v16  ;;  %vm21587_vm0 = vcmp.lt.s32.totalorder %v13831_v60, 63  ;;  %v10966_v63 = vpack.c.bf16 %v1933_v39, %v13613_v20  ;;  %v12563_v38 = vpop.permute.xlu1 %12562  ;;  %v14166_v19 = vpop.permute.xlu0 %12577 }
 0x15d   : > { %vm14142_vm14 = vmpackc.low %vm21549_vm3, %vm21584_vm15  ;;  %10062 = vmatpush1.msk.msra.mxu1 %vm21587_vm0, %v13965_v37  ;;  %v21588_v58 = vmov 0  ;;  %v14163_v2 = vand.u32 63, %v409_v56  ;;  %v12550_v22 = vunpack.i.h.bf16 %v13946_v1  ;;  %10965 = vmatpush1.bf16.msk.msra.mxu0 %vm10964_vm1, %v10963_v7  ;;  %vm20734_vm8 = vcmp.lt.s32.totalorder %v14077_v14, 63 }
 0x15e   : > { %v21586_v34 = vsel %vm14142_vm14, 4294967295, %v21585_v34  ;;  %vm14159_vm4 = vmpackc.low %vm21549_vm3, %vm20728_vm2  ;;  %10974 = vmatprep.subr.msk.bf16.mxu1 %vm14142_vm14, %v14148_v8  ;;  %v14172_v20 = vand.u32 63, %v408_v23  ;;  %v12564_v37 = vunpack.i.l.bf16 %v12563_v38  ;;  %10968 = vmatprep.subr.msk.bf16.mxu0 %vm14021_vm11, %v10966_v63  ;;  %vm21592_vm9 = vcmask 588800  }
 0x15f   : > { %v21589_v58 = vsel %vm14159_vm4, 4294967295, %v21588_v58  ;;  %21590 = vst [vmem:[#allocation39_spill] sm:$0xff] %v14163_v2  ;;  %10063 = vmatmul.mubr.msk.f32.vlgmr.msra.gmra.mrb[0].mxu1 %vm21592_vm9, %v14004_v59  ;;  %v12560_v56 = vunpack.i.h.bf16 %v13983_v44  ;;  %vm21593_vm15 = vcmask 1031168   ;;  %vm21594_vm0 = vcmask 506880  }
 0x160   : > { %21591 = vst [vmem:[#allocation40_spill] sm:$0xff] %v14172_v20  ;;  %10977 = vmatpush1.bf16.msk.msra.mxu1 %vm14159_vm4, %v10966_v63  ;;  %v1375_v39 = vsel %vm21593_vm15, %v14036_v5, %v1317_v24  ;;  %2283 = vmatprep.mubr.f32.mxu1 %v21567_v15  ;;  %v1702_v0 = vsel %vm21594_vm0, %v12555_v57, %v20730_v11  ;;  %vm21595_vm2 = vmmov %vm21593_vm15  ;;  %vm21596_vm9 = vcmask 523264   ;;  %vm21597_vm1 = vcmp.ge.s32.totalorder %v14077_v14, 1  ;;  %v14205_v5 = vpop.permute.xlu1 %12572 }
 0x161   : > { %v14190_v23 = vsel %vm21595_vm2, %v1317_v24, %v14038_v46  ;;  %v1539_v7 = vsel %vm21596_vm9, %v12550_v22, %v12564_v37  ;;  %vm14197_vm12 = vmpackc.low %vm21597_vm1, %vm20734_vm8  ;;  %v21598_v63 = vmov 0  ;;  %10971 = vmatpush1.bf16.msk.msra.mxu0 %vm14048_vm10, %v14041_v52  ;;  %v14207_v24 = vpop.permute.xlu0 %12587  ;;  %v21600_v11 = vunpack.i.l.bf16 %v13946_v1 }
 0x162   : > { %v21599_v63 = vsel %vm14197_vm12, 4294967295, %v21598_v63  ;;  %vm21601_vm2 = vmmov %vm21596_vm9  ;;  %v10978_v47 = vpack.c.bf16 %v1539_v7, %v14190_v23  ;;  %vm21602_vm1 = vcmp.lt.s32.totalorder %v14095_v30, 63  ;;  %vm21603_vm0 = vcmp.ge.s32.totalorder %v14095_v30, 1 }
 0x163   : > { %v1538_v26 = vsel %vm21601_vm2, %v21600_v11, %v12550_v22  ;;  %vm14217_vm9 = vmpackc.low %vm21603_vm0, %vm21602_vm1  ;;  %v21604_v49 = vmov 0  ;;  %v12565_v52 = vunpack.i.h.bf16 %v12563_v38  ;;  %v12574_v1 = vunpack.i.l.bf16 %v14205_v5 }
 0x164   : > { %v21605_v49 = vsel %vm14217_vm9, 4294967295, %v21604_v49  ;;  %vm21606_vm2 = vcmp.lt.s32.totalorder %v13939_v9, 63  ;;  %v10981_v11 = vpack.c.bf16 %v1538_v26, %v1375_v39  ;;  %vm21607_vm10 = vcmask 1042432   ;;  %10980 = vmatprep.subr.msk.bf16.mxu1 %vm14197_vm12, %v10978_v47 }
 0x165   : > { %10076 = vmatprep.subr.msk.mxu0 %vm21606_vm2, %v1375_v39  ;;  %vm21608_vm11 = vcmp.lt.s32.totalorder %v14077_v14, 63  ;;  %v21609_v22 = vunpack.i.l.bf16 %v13983_v44  ;;  %vm21610_vm0 = vcmask 1039360   ;;  %v21611_v60 = vunpack.i.l.bf16 %v14087_v4  ;;  %v14262_v47 = vpop.permute.xlu0 %1326 }
 0x166   : > { %vm10985_vm1 = vmpackc.low %vm21608_vm11, %vm21607_vm10  ;;  %vm21612_vm8 = vcmask 506880   ;;  %v10984_v45 = vpack.c.bf16 %v1702_v0, %v13476_v13  ;;  %vm21613_vm2 = vcmp.ge.s32.totalorder %v14163_v2, 1  ;;  %v21614_v26 = vmov 0  ;;  %10983 = vmatpush1.bf16.msk.msra.mxu1 %vm14217_vm9, %v10981_v11  ;;  %v14260_v13 = vpop.permute.xlu1 %1322 }
 0x167   : > { %v1935_v7 = vsel %vm21610_vm0, %v21609_v22, %v12560_v56  ;;  %v1701_v38 = vsel %vm21612_vm8, %v21611_v60, %v12555_v57  ;;  %vm14242_vm15 = vmpackc.low %vm21549_vm3, %vm21613_vm2  ;;  %v411_v44 = vadd.s32 1408, %v13758_v54  ;;  %vm21618_vm11 = vcmask 1042432  }
 0x168   : > { %v21615_v26 = vsel %vm14242_vm15, 4294967295, %v21614_v26  ;;  %vm21617_vm10 = vmmov %vm21610_vm0  ;;  %vm21619_vm8 = vcmp.lt.s32.totalorder %v14095_v30, 63  ;;  %vm21622_vm2 = vcmp.lt.s32.totalorder %v13949_v53, 63  ;;  %10986 = vmatprep.subr.msk.bf16.mxu1 %vm10985_vm1, %v10984_v45  ;;  %v21624_v57 = vmov 0 }
 0x169   : > { %21616 = vst [vmem:[#allocation41_spill] sm:$0xff] %v21615_v26  ;;  %v1936_v39 = vsel %vm21617_vm10, %v12560_v56, %v12574_v1  ;;  %vm14253_vm0 = vmpackc.low %vm21619_vm8, %vm21618_vm11  ;;  %10077 = vmatpush1.msk.msra.mxu0 %vm21622_vm2, %v14057_v18  ;;  %vm21623_vm10 = vcmp.ge.s32.totalorder %v14172_v20, 1  ;;  %v410_v56 = vadd.s32 1280, %v13758_v54  ;;  %v10990_v0 = vpack.c.bf16 %v1935_v7, %v13625_v27 }
 0x16a   : > { %v14265_v4 = vpack.c.bf16 %v1936_v39, %v13628_v28  ;;  %vm14270_vm9 = vmpackc.low %vm21549_vm3, %vm21623_vm10  ;;  %v10987_v18 = vpack.c.bf16 %v1701_v38, %v13466_v10  ;;  %vm21627_vm11 = vcmask 1031168   ;;  %v21628_v28 = vunpack.i.l.bf16 %v14166_v19 }
 0x16b   : > { %v21625_v57 = vsel %vm14270_vm9, 4294967295, %v21624_v57  ;;  %v14280_v45 = vsel %vm21627_vm11, %v14129_v12, %v14260_v13  ;;  %vm21629_vm1 = vcmask 523264   ;;  %vm21630_vm8 = vcmask 588800  }
 0x16c   : > { %21626 = vst [vmem:[#allocation42_spill] sm:$0xff] %v21625_v57  ;;  %v1541_v11 = vsel %vm21629_vm1, %v12565_v52, %v21628_v28  ;;  %10078 = vmatmul.mubr.msk.f32.vlgmr.msra.gmra.mrb[2].mxu0 %vm21630_vm8, %v14004_v59  ;;  %vm21631_vm2 = vcmp.lt.s32.totalorder %v14163_v2, 63  ;;  %vm21632_vm10 = vcmp.ge.s32.totalorder %v14163_v2, 1  ;;  %v21633_v27 = vmov 0  ;;  %10998 = vmatprep.subr.msk.bf16.mxu0 %vm14242_vm15, %v14265_v4 }
 0x16d   : > { %vm14291_vm12 = vmpackc.low %vm21632_vm10, %vm21631_vm2  ;;  %v11002_v10 = vpack.c.bf16 %v1541_v11, %v14280_v45  ;;  %vm20745_vm11 = vcmp.lt.s32.totalorder %v14172_v20, 63  ;;  %v14300_v22 = vand.u32 63, %v411_v44  ;;  %2354 = vmatprep.mubr.f32.mxu0 %v21567_v15  ;;  %v12570_v7 = vunpack.i.h.bf16 %v14089_v16  ;;  %10989 = vmatpush1.bf16.msk.msra.mxu1 %vm14253_vm0, %v10987_v18  ;;  %v14311_v11 = vpop.permute.xlu1 %12582  ;;  %v14313_v44 = vpop.permute.xlu0 %12597 }
 0x16e   : > { %v21634_v27 = vsel %vm14291_vm12, 4294967295, %v21633_v27  ;;  %v1540_v38 = vsel %vm21629_vm1, %v12564_v37, %v12565_v52  ;;  %v12575_v39 = vunpack.i.h.bf16 %v14205_v5  ;;  %v20751_v28 = vunpack.i.l.bf16 %v14207_v24  ;;  %11001 = vmatpush1.bf16.msk.msra.mxu0 %vm14270_vm9, %v10990_v0  ;;  %10992 = vmatprep.subr.msk.bf16.mxu1 %vm14142_vm14, %v10990_v0 }
 0x16f   : > { %21635 = vst [vmem:[#allocation43_spill] sm:$0xff] %v21634_v27  ;;  %21636 = vst [vmem:[#allocation44_spill] sm:$0xff] %v14300_v22  ;;  %11004 = vmatprep.subr.msk.bf16.mxu0 %vm14291_vm12, %v11002_v10  ;;  %v14319_v37 = vand.u32 63, %v410_v56  ;;  %vm21638_vm8 = vcmask 1031168   ;;  %v20750_v52 = vunpack.i.l.bf16 %v14311_v11  ;;  %vm21639_vm0 = vcmp.ge.s32.totalorder %v14172_v20, 1 }
 0x170   : > { %v1377_v5 = vsel %vm21638_vm8, %v14038_v46, %v14129_v12  ;;  %vm14329_vm2 = vmpackc.low %vm21639_vm0, %vm20745_vm11  ;;  %v21640_v60 = vmov 0  ;;  %v21643_v56 = vunpack.i.l.bf16 %v14089_v16  ;;  %vm21644_vm1 = vcmask 506880  }
 0x171   : > { %21637 = vst [vmem:[#allocation45_spill] sm:$0xff] %v14319_v37  ;;  %v21641_v60 = vsel %vm14329_vm2, 4294967295, %v21640_v60  ;;  %v11005_v0 = vpack.c.bf16 %v1540_v38, %v1377_v5  ;;  %vm21645_vm8 = vcmask 1039360   ;;  %vm21646_vm12 = vmmov %vm21644_vm1  ;;  %10995 = vmatpush1.bf16.msk.msra.mxu1 %vm14159_vm4, %v14148_v8  ;;  %vm21647_vm0 = vcmask 1042432   ;;  %v1325_v38 = vpop.permute.xlu1 %1324 }
 0x172   : > { %21642 = vst [vmem:[#allocation46_spill] sm:$0xff] %v21641_v60  ;;  %v1703_v18 = vsel %vm21644_vm1, %v21643_v56, %v12570_v7  ;;  %v1938_v46 = vsel %vm21645_vm8, %v12575_v39, %v20751_v28  ;;  %v1704_v12 = vsel %vm21646_vm12, %v12570_v7, %v20750_v52  ;;  %vm21648_vm10 = vcmp.lt.s32.totalorder %v14163_v2, 63  ;;  %vm21649_vm1 = vmmov %vm21645_vm8  ;;  %v14353_v56 = vpop.permute.xlu0 %1328 }
 0x173   : > { %vm11009_vm11 = vmpackc.low %vm21648_vm10, %vm21647_vm0  ;;  %v413_v16 = vadd.s32 1664, %v13758_v54  ;;  %v1937_v10 = vsel %vm21649_vm1, %v12574_v1, %v12575_v39  ;;  %11007 = vmatpush1.bf16.msk.msra.mxu0 %vm14329_vm2, %v11005_v0  ;;  %vm21650_vm12 = vcmp.lt.s32.totalorder %v14077_v14, 63  ;;  %v11008_v7 = vpack.c.bf16 %v1704_v12, %v13485_v17  ;;  %v13159_v39 = vld [vmem:[%s13432_s30 + $0x20] sm:$0x77] }
 0x174   : > { %10091 = vmatprep.subr.msk.mxu1 %vm21650_vm12, %v1377_v5  ;;  %vm21651_vm8 = vmmov %vm21647_vm0  ;;  %vm21652_vm4 = vcmp.lt.s32.totalorder %v14172_v20, 63  ;;  %vm20752_vm10 = vcmp.ge.s32.totalorder %v14319_v37, 1  ;;  %v412_v8 = vadd.s32 1536, %v13758_v54  ;;  %vm21653_vm0 = vcmp.ge.s32.totalorder %v14300_v22, 1 }
 0x175   : > { %vm11012_vm14 = vmpackc.low %vm21652_vm4, %vm21651_vm8  ;;  %v21654_v1 = vmov 0  ;;  %v11011_v0 = vpack.c.bf16 %v1703_v18, %v13159_v39  ;;  %11010 = vmatprep.subr.msk.bf16.mxu0 %vm11009_vm11, %v11008_v7  ;;  %v14372_v17 = vpack.c.bf16 %v1938_v46, %v13648_v36  ;;  %v12585_v5 = vunpack.i.h.bf16 %v14311_v11  ;;  %v12593_v46 = vpop.permute.xlu1 %12592 }
 0x176   : > { %vm14366_vm1 = vmpackc.low %vm21549_vm3, %vm21653_vm0  ;;  %v20754_v12 = vunpack.i.l.bf16 %v14313_v44  ;;  %vm21657_vm4 = vcmp.lt.s32.totalorder %v14095_v30, 63  ;;  %v11014_v52 = vpack.c.bf16 %v1937_v10, %v13645_v35  ;;  %v21658_v28 = vmov 0  ;;  %v14390_v7 = vpop.permute.xlu0 %12607 }
 0x177   : > { %v21655_v1 = vsel %vm14366_vm1, 4294967295, %v21654_v1  ;;  %10092 = vmatpush1.msk.msra.mxu1 %vm21657_vm4, %v14190_v23  ;;  %vm14383_vm12 = vmpackc.low %vm21549_vm3, %vm20752_vm10  ;;  %v14387_v18 = vand.u32 63, %v413_v16  ;;  %v12580_v36 = vunpack.i.h.bf16 %v14166_v19  ;;  %11013 = vmatpush1.bf16.msk.msra.mxu0 %vm11012_vm14, %v11011_v0  ;;  %vm20763_vm11 = vcmp.lt.s32.totalorder %v14300_v22, 63 }
 0x178   : > { %21656 = vst [vmem:[#allocation47_spill] sm:$0xff] %v21655_v1  ;;  %v21659_v28 = vsel %vm14383_vm12, 4294967295, %v21658_v28  ;;  %11022 = vmatprep.subr.msk.bf16.mxu1 %vm14366_vm1, %v14372_v17  ;;  %v14396_v35 = vand.u32 63, %v412_v8  ;;  %v12594_v23 = vunpack.i.l.bf16 %v12593_v46  ;;  %11016 = vmatprep.subr.msk.bf16.mxu0 %vm14242_vm15, %v11014_v52  ;;  %vm21663_vm8 = vcmask 588800  }
 0x179   : > { %21660 = vst [vmem:[#allocation48_spill] sm:$0xff] %v21659_v28  ;;  %21661 = vst [vmem:[#allocation49_spill] sm:$0xff] %v14387_v18  ;;  %10093 = vmatmul.mubr.msk.f32.vlgmr.msra.gmra.mrb[2].mxu1 %vm21663_vm8, %v14004_v59  ;;  %v12590_v16 = vunpack.i.h.bf16 %v14207_v24  ;;  %vm21664_vm0 = vcmask 1031168   ;;  %vm21665_vm4 = vcmask 506880   ;;  %vm21667_vm8 = vcmask 523264  }
 0x17a   : > { %21662 = vst [vmem:[#allocation50_spill] sm:$0xff] %v14396_v35  ;;  %11025 = vmatpush1.bf16.msk.msra.mxu1 %vm14383_vm12, %v11014_v52  ;;  %v1379_v10 = vsel %vm21664_vm0, %v14260_v13, %v1325_v38  ;;  %2425 = vmatprep.mubr.f32.mxu1 %v21567_v15  ;;  %v1706_v8 = vsel %vm21665_vm4, %v12585_v5, %v20754_v12  ;;  %vm21666_vm10 = vmmov %vm21664_vm0  ;;  %vm21668_vm14 = vcmp.ge.s32.totalorder %v14300_v22, 1  ;;  %v21669_v52 = vmov 0  ;;  %v14429_v13 = vpop.permute.xlu1 %12602 }
 0x17b   : > { %v14414_v39 = vsel %vm21666_vm10, %v1325_v38, %v14262_v47  ;;  %v1543_v0 = vsel %vm21667_vm8, %v12580_v36, %v12594_v23  ;;  %vm14421_vm2 = vmpackc.low %vm21668_vm14, %vm20763_vm11  ;;  %11019 = vmatpush1.bf16.msk.msra.mxu0 %vm14270_vm9, %v14265_v4  ;;  %v14431_v38 = vpop.permute.xlu0 %12617  ;;  %v21672_v12 = vunpack.i.l.bf16 %v14166_v19  ;;  %vm21674_vm14 = vcmp.lt.s32.totalorder %v14319_v37, 63 }
 0x17c   : > { %v21670_v52 = vsel %vm14421_vm2, 4294967295, %v21669_v52  ;;  %vm21673_vm10 = vmmov %vm21667_vm8  ;;  %v11026_v27 = vpack.c.bf16 %v1543_v0, %v14414_v39  ;;  %vm21675_vm4 = vcmp.ge.s32.totalorder %v14319_v37, 1  ;;  %v21676_v26 = vmov 0 }
 0x17d   : > { %21671 = vst [vmem:[#allocation51_spill] sm:$0xff] %v21670_v52  ;;  %v1542_v60 = vsel %vm21673_vm10, %v21672_v12, %v12580_v36  ;;  %vm14441_vm8 = vmpackc.low %vm21675_vm4, %vm21674_vm14  ;;  %v12595_v4 = vunpack.i.h.bf16 %v12593_v46  ;;  %v12604_v30 = vunpack.i.l.bf16 %v14429_v13  ;;  %vm21679_vm11 = vcmp.lt.s32.totalorder %v14163_v2, 63 }
 0x17e   : > { %v21677_v26 = vsel %vm14441_vm8, 4294967295, %v21676_v26  ;;  %10106 = vmatprep.subr.msk.mxu0 %vm21679_vm11, %v1379_v10  ;;  %v11029_v19 = vpack.c.bf16 %v1542_v60, %v1379_v10  ;;  %vm21680_vm10 = vcmask 1042432   ;;  %vm21681_vm9 = vcmp.lt.s32.totalorder %v14300_v22, 63  ;;  %11028 = vmatprep.subr.msk.bf16.mxu1 %vm14421_vm2, %v11026_v27 }
 0x17f   : > { %21678 = vst [vmem:[#allocation52_spill] sm:$0xff] %v21677_v26  ;;  %vm11033_vm15 = vmpackc.low %vm21681_vm9, %vm21680_vm10  ;;  %v21682_v12 = vunpack.i.l.bf16 %v14207_v24  ;;  %vm21683_vm14 = vcmask 1039360   ;;  %v21684_v0 = vunpack.i.l.bf16 %v14311_v11  ;;  %vm21685_vm4 = vcmask 506880   ;;  %v14484_v11 = vpop.permute.xlu1 %1330 }
 0x180   : > { %v11032_v57 = vpack.c.bf16 %v1706_v8, %v13493_v21  ;;  %vm21686_vm11 = vcmp.ge.s32.totalorder %v14387_v18, 1  ;;  %v21687_v60 = vmov 0  ;;  %vm20776_vm9 = vcmp.lt.s32.totalorder %v14387_v18, 63  ;;  %vm21690_vm10 = vmmov %vm21683_vm14  ;;  %11031 = vmatpush1.bf16.msk.msra.mxu1 %vm14441_vm8, %v11029_v19  ;;  %v13160_v19 = vld [vmem:[%s13432_s30 + $0x28] sm:$0x77] }
 0x181   : > { %v1939_v36 = vsel %vm21683_vm14, %v21682_v12, %v12590_v16  ;;  %v1705_v46 = vsel %vm21685_vm4, %v21684_v0, %v12585_v5  ;;  %vm14465_vm0 = vmpackc.low %vm21549_vm3, %vm21686_vm11  ;;  %v1940_v24 = vsel %vm21690_vm10, %v12590_v16, %v12604_v30  ;;  %vm21691_vm14 = vcmask 1042432   ;;  %v14486_v5 = vpop.permute.xlu0 %1005 }
 0x182   : > { %v21688_v60 = vsel %vm14465_vm0, 4294967295, %v21687_v60  ;;  %vm21692_vm4 = vcmp.lt.s32.totalorder %v14319_v37, 63  ;;  %v415_v27 = vadd.s32 1920, %v13758_v54  ;;  %vm21695_vm11 = vcmp.lt.s32.totalorder %v14172_v20, 63  ;;  %11034 = vmatprep.subr.msk.bf16.mxu1 %vm11033_vm15, %v11032_v57 }
 0x183   : > { %21689 = vst [vmem:[#allocation53_spill] sm:$0xff] %v21688_v60  ;;  %vm14476_vm2 = vmpackc.low %vm21692_vm4, %vm21691_vm14  ;;  %10107 = vmatpush1.msk.msra.mxu0 %vm21695_vm11, %v14280_v45  ;;  %v14489_v16 = vpack.c.bf16 %v1940_v24, %v13660_v43  ;;  %vm21696_vm10 = vcmp.ge.s32.totalorder %v14396_v35, 1  ;;  %v21697_v10 = vmov 0  ;;  %v414_v8 = vadd.s32 1792, %v13758_v54 }
 0x184   : > { %vm14494_vm14 = vmpackc.low %vm21549_vm3, %vm21696_vm10  ;;  %v11038_v45 = vpack.c.bf16 %v1939_v36, %v13657_v42  ;;  %v11035_v12 = vpack.c.bf16 %v1705_v46, %v13160_v19  ;;  %vm21700_vm15 = vcmask 1031168   ;;  %v21701_v57 = vunpack.i.l.bf16 %v14390_v7 }
 0x185   : > { %v21698_v10 = vsel %vm14494_vm14, 4294967295, %v21697_v10  ;;  %v14505_v43 = vsel %vm21700_vm15, %v14353_v56, %v14484_v11  ;;  %vm21702_vm11 = vcmask 523264   ;;  %vm21703_vm10 = vcmask 588800   ;;  %11046 = vmatprep.subr.msk.bf16.mxu0 %vm14465_vm0, %v14489_v16  ;;  %v14540_v26 = vpop.permute.xlu0 %1334 }
 0x186   : > { %21699 = vst [vmem:[#allocation54_spill] sm:$0xff] %v21698_v10  ;;  %v1545_v0 = vsel %vm21702_vm11, %v12595_v4, %v21701_v57  ;;  %10108 = vmatmul.mubr.msk.f32.vlgmr.msra.gmra.mrb[4].mxu0 %vm21703_vm10, %v14004_v59  ;;  %vm21704_vm4 = vcmp.ge.s32.totalorder %v14387_v18, 1  ;;  %v21705_v42 = vmov 0  ;;  %v12600_v36 = vunpack.i.h.bf16 %v14313_v44  ;;  %vm21708_vm5 = vmmov %vm21702_vm11  ;;  %11037 = vmatpush1.bf16.msk.msra.mxu1 %vm14476_vm2, %v11035_v12 }
 0x187   : > { %vm14516_vm8 = vmpackc.low %vm21704_vm4, %vm20776_vm9  ;;  %v1544_v46 = vsel %vm21708_vm5, %v12594_v23, %v12595_v4  ;;  %v11050_v24 = vpack.c.bf16 %v1545_v0, %v14505_v43  ;;  %2496 = vmatprep.mubr.f32.mxu0 %v21567_v15  ;;  %11049 = vmatpush1.bf16.msk.msra.mxu0 %vm14494_vm14, %v11038_v45  ;;  %v14531_v19 = vand.u32 63, %v415_v27  ;;  %v12605_v4 = vunpack.i.h.bf16 %v14429_v13  ;;  %v14538_v0 = vpop.permute.xlu1 %12612 }
 0x188   : > { %v21706_v42 = vsel %vm14516_vm8, 4294967295, %v21705_v42  ;;  %vm21710_vm4 = vmmov %vm21700_vm15  ;;  %v20778_v57 = vunpack.i.l.bf16 %v14431_v38  ;;  %11040 = vmatprep.subr.msk.bf16.mxu1 %vm14366_vm1, %v11038_v45  ;;  %vm21711_vm5 = vcmp.lt.s32.totalorder %v14396_v35, 63  ;;  %vm21712_vm2 = vcmp.ge.s32.totalorder %v14396_v35, 1 }
 0x189   : > { %21707 = vst [vmem:[#allocation55_spill] sm:$0xff] %v21706_v42  ;;  %21709 = vst [vmem:[#allocation56_spill] sm:$0xff] %v14531_v19  ;;  %v1381_v23 = vsel %vm21710_vm4, %v14262_v47, %v14353_v56  ;;  %11052 = vmatprep.subr.msk.bf16.mxu0 %vm14516_vm8, %v11050_v24  ;;  %v21713_v47 = vmov 0  ;;  %v20777_v13 = vunpack.i.l.bf16 %v14538_v0  ;;  %v14555_v21 = vand.u32 63, %v414_v8  ;;  %v13161_v24 = vld [vmem:[%s13432_s30 + $0x30] sm:$0x77] }
 0x18a   : > { %vm14550_vm15 = vmpackc.low %vm21712_vm2, %vm21711_vm5  ;;  %v11053_v56 = vpack.c.bf16 %v1544_v46, %v1381_v23  ;;  %v21717_v27 = vunpack.i.l.bf16 %v14313_v44  ;;  %vm21718_vm11 = vcmask 506880   ;;  %11043 = vmatpush1.bf16.msk.msra.mxu1 %vm14383_vm12, %v14372_v17  ;;  %vm21720_vm4 = vcmask 1042432   ;;  %v14576_v46 = vpop.permute.xlu0 %12627 }
 0x18b   : > { %v21714_v47 = vsel %vm14550_vm15, 4294967295, %v21713_v47  ;;  %21716 = vst [vmem:[#allocation58_spill] sm:$0xff] %v14555_v21  ;;  %vm21719_vm10 = vmmov %vm21718_vm11  ;;  %vm1091_vm2 = vcmp.ge.s32.totalorder %v14531_v19, 1  ;;  %vm21721_vm8 = vcmask 1039360   ;;  %vm21725_vm12 = vcmp.lt.s32.totalorder %v14396_v35, 63 }
 0x18c   : > { %21715 = vst [vmem:[#allocation57_spill] sm:$0xff] %v21714_v47  ;;  %v1707_v45 = vsel %vm21718_vm11, %v21717_v27, %v12600_v36  ;;  %v1708_v12 = vsel %vm21719_vm10, %v12600_v36, %v20777_v13  ;;  %11055 = vmatpush1.bf16.msk.msra.mxu0 %vm14550_vm15, %v11053_v56  ;;  %vm11057_vm5 = vmpackc.low %vm20776_vm9, %vm21720_vm4  ;;  %v1941_v44 = vsel %vm21721_vm8, %v12604_v30, %v12605_v4  ;;  %v1004_v36 = vpop.permute.xlu1 %1003  ;;  %vm21723_vm10 = vcmp.lt.s32.totalorder %v14300_v22, 63  ;;  %v1996_v22 = vld [vmem:[%s20664_s2] sm:$0xff] }
 0x18d   : > { %vm21722_vm11 = vmmov %vm21721_vm8  ;;  %10121 = vmatprep.subr.msk.mxu1 %vm21723_vm10, %v1381_v23  ;;  %v11056_v17 = vpack.c.bf16 %v1708_v12, %v13501_v25  ;;  %vm21726_vm9 = vcmask 531456   ;;  %v11059_v56 = vpack.c.bf16 %v1707_v45, %v13161_v24  ;;  %v21728_v23 = vmov 0 }
 0x18e   : > { %v1942_v8 = vsel %vm21722_vm11, %v12605_v4, %v20778_v57  ;;  %vm21724_vm15 = vmmov %vm21720_vm4  ;;  %v14587_v30 = vsel %vm21726_vm9, %v13754_v51, %v13769_v62  ;;  %vm20779_vm11 = vcmp.ge.s32.totalorder %v14555_v21, 1  ;;  %v11062_v51 = vpack.c.bf16 %v1941_v44, %v13675_v48  ;;  %v14613_v45 = vpop.permute.xlu0 %1007 }
 0x18f   : > { %vm11060_vm4 = vmpackc.low %vm21725_vm12, %vm21724_vm15  ;;  %11058 = vmatprep.subr.msk.bf16.mxu0 %vm11057_vm5, %v11056_v17  ;;  %v21732_v12 = vmov 0  ;;  %v416_v48 = vadd.s32 2048, %v13758_v54  ;;  %vm21735_vm5 = vcmask 588800   ;;  %v12610_v44 = vunpack.i.h.bf16 %v14390_v7 }
 0x190   : > { %vm21727_vm8 = vmmov %vm21726_vm9  ;;  %vm21731_vm9 = vcmp.lt.s32.totalorder %v14319_v37, 63  ;;  %11061 = vmatpush1.bf16.msk.msra.mxu0 %vm11060_vm4, %v11059_v56  ;;  %v1333_v27 = vpop.permute.xlu1 %1332  ;;  %vm20790_vm4 = vcmp.lt.s32.totalorder %v14531_v19, 63  ;;  %v12620_v13 = vunpack.i.h.bf16 %v14431_v38  ;;  %v12615_v57 = vunpack.i.h.bf16 %v14538_v0 }
 0x191   : > { %v14592_v4 = vsel %vm21727_vm8, %v13769_v62, %v1004_v36  ;;  %vm14600_vm12 = vmpackc.low %vm21549_vm3, %vm1091_vm2  ;;  %10122 = vmatpush1.msk.msra.mxu1 %vm21731_vm9, %v14414_v39  ;;  %v14609_v62 = vpack.c.bf16 %v1942_v8, %v13678_v50  ;;  %v417_v39 = vadd.s32 2176, %v13758_v54  ;;  %11064 = vmatprep.subr.msk.bf16.mxu0 %vm14465_vm0, %v11062_v51  ;;  %v20785_v8 = vunpack.i.l.bf16 %v14576_v46 }
 0x192   : > { %v12706_v25 = vpack.i.bf16 %v14592_v4, %v14587_v30  ;;  %v21729_v23 = vsel %vm14600_vm12, 4294967295, %v21728_v23  ;;  %vm14618_vm15 = vmpackc.low %vm21549_vm3, %vm20779_vm11  ;;  %10123 = vmatmul.mubr.msk.f32.vlgmr.msra.gmra.mrb[4].mxu1 %vm21735_vm5, %v14004_v59  ;;  %vm21739_vm9 = vcmp.lt.s32.totalorder %v14387_v18, 63  ;;  %v21748_v47 = vunpack.i.l.bf16 %v14390_v7  ;;  %v13162_v18 = vld [vmem:[%s13432_s30 + $0x38] sm:$0x77] }
 0x193   : > { %21730 = vst [vmem:[#allocation59_spill] sm:$0xff] %v21729_v23  ;;  %v21733_v12 = vsel %vm14618_vm15, 4294967295, %v21732_v12  ;;  %11070 = vmatprep.subr.msk.bf16.mxu1 %vm14600_vm12, %v14609_v62  ;;  %vm21736_vm10 = vmmov %vm21727_vm8  ;;  %vm21737_vm8 = vcmask 1031168   ;;  %2567 = vmatprep.mubr.f32.mxu1 %v21567_v15  ;;  %vm21758_vm0 = vcmask 588800   ;;  %v21792_v60 = vmov 0 }
 0x194   : > { %12707 = vrot.lane.b32.xlu1 %v12706_v25, %s13275_s14  ;;  %12712 = vrot.lane.b32.xlu0 %v12706_v25, %s13277_s22  ;;  %21734 = vst [vmem:[#allocation60_spill] sm:$0xff] %v21733_v12  ;;  %v14633_v50 = vsel %vm21736_vm10, %v1004_v36, %v14486_v5  ;;  %v14643_v17 = vpop.permute.xlu1 %12622  ;;  %v14649_v36 = vpop.permute.xlu0 %1338  ;;  %v1383_v24 = vsel %vm21737_vm8, %v14484_v11, %v1333_v27  ;;  %vm21741_vm10 = vmmov %vm21737_vm8  ;;  %vm21742_vm8 = vcmask 523264  }
 0x195   : > { %11073 = vmatpush1.bf16.msk.msra.mxu1 %vm14618_vm15, %v11062_v51  ;;  %11067 = vmatpush1.bf16.msk.msra.mxu0 %vm14494_vm14, %v14489_v16  ;;  %v14653_v16 = vand.u32 63, %v417_v39  ;;  %v20781_v56 = vunpack.i.l.bf16 %v14643_v17  ;;  %v14659_v51 = vand.u32 63, %v416_v48  ;;  %v14666_v11 = vsel %vm21741_vm10, %v1333_v27, %v14540_v26  ;;  %vm14678_vm11 = vmpackc.low %vm1091_vm2, %vm20790_vm4 }
 0x196   : > { %10136 = vmatprep.subr.msk.mxu0 %vm21739_vm9, %v1383_v24  ;;  %vm21743_vm9 = vcmp.lt.s32.totalorder %v14396_v35, 63  ;;  %v21744_v48 = vmov 0  ;;  %vm21747_vm10 = vcmask 506880   ;;  %vm21749_vm5 = vmmov %vm21742_vm8  ;;  %vm21750_vm2 = vcmp.lt.s32.totalorder %v14555_v21, 63 }
 0x197   : > { %21738 = vst [vmem:[#allocation61_spill] sm:$0xff] %v14653_v16  ;;  %21740 = vst [vmem:[#allocation62_spill] sm:$0xff] %v14659_v51  ;;  %v1547_v39 = vsel %vm21742_vm8, %v12610_v44, %v20781_v56  ;;  %v21745_v48 = vsel %vm14678_vm11, 4294967295, %v21744_v48  ;;  %v1710_v27 = vsel %vm21747_vm10, %v12615_v57, %v20785_v8  ;;  %v1546_v56 = vsel %vm21749_vm5, %v21748_v47, %v12610_v44 }
 0x198   : > { %1358 = vrot.lane.b32.xlu1 %v14587_v30, %s13274_s12  ;;  %1920 = vrot.lane.b32.xlu0 %v14633_v50, %s13275_s14  ;;  %21746 = vst [vmem:[#allocation63_spill] sm:$0xff] %v21745_v48  ;;  %v14688_v42 = vpop.permute.xlu1 %12632  ;;  %v11074_v35 = vpack.c.bf16 %v1547_v39, %v14666_v11  ;;  %vm21751_vm8 = vcmp.ge.s32.totalorder %v14555_v21, 1  ;;  %v21752_v8 = vmov 0  ;;  %v11077_v7 = vpack.c.bf16 %v1546_v56, %v1383_v24 }
 0x199   : > { %10137 = vmatpush1.msk.msra.mxu0 %vm21743_vm9, %v14505_v43  ;;  %v14693_v43 = vpop.permute.xlu0 %12642  ;;  %vm14700_vm9 = vmpackc.low %vm21751_vm8, %vm21750_vm2  ;;  %vm21755_vm10 = vcmask 1042432   ;;  %vm20799_vm2 = vcmp.ge.s32.totalorder %v14659_v51, 1  ;;  %v21759_v44 = vunpack.i.l.bf16 %v14431_v38  ;;  %vm21760_vm8 = vcmask 1039360  }
 0x19a   : > { %v21753_v8 = vsel %vm14700_vm9, 4294967295, %v21752_v8  ;;  %vm14709_vm14 = vmpackc.low %vm20790_vm4, %vm21755_vm10  ;;  %10138 = vmatmul.mubr.msk.f32.vlgmr.msra.gmra.mrb[6].mxu0 %vm21758_vm0, %v14004_v59  ;;  %v21761_v24 = vunpack.i.l.bf16 %v14538_v0  ;;  %vm21762_vm5 = vcmask 506880   ;;  %11076 = vmatprep.subr.msk.bf16.mxu1 %vm14678_vm11, %v11074_v35  ;;  %vm21763_vm4 = vcmp.lt.s32.totalorder %v14555_v21, 63 }
 0x19b   : > { %21754 = vst [vmem:[#allocation64_spill] sm:$0xff] %v21753_v8  ;;  %v1943_v39 = vsel %vm21760_vm8, %v21759_v44, %v12620_v13  ;;  %vm14727_vm1 = vmpackc.low %vm21763_vm4, %vm21755_vm10  ;;  %2638 = vmatprep.mubr.f32.mxu0 %v21567_v15  ;;  %v21766_v38 = vunpack.i.l.bf16 %v14688_v42  ;;  %11079 = vmatpush1.bf16.msk.msra.mxu1 %vm14700_vm9, %v11077_v7  ;;  %v21769_v35 = vmov 0  ;;  %v21776_v8 = vld [vmem:[#allocation15_spill] sm:$0xff]  ;;  %vm21777_vm10 = vcmask 531456  }
 0x19c   : > { %12717 = vrot.lane.b32.xlu1 %v12706_v25, %s13276_s15  ;;  %1362 = vrot.lane.b32.xlu0 %v14633_v50, %s13274_s12  ;;  %v1709_v56 = vsel %vm21762_vm5, %v21761_v24, %v12615_v57  ;;  %vm21767_vm0 = vmmov %vm21760_vm8  ;;  %v11080_v57 = vpack.c.bf16 %v1710_v27, %v13509_v29  ;;  %vm21768_vm5 = vcmp.ge.s32.totalorder %v14653_v16, 1  ;;  %v1337_v0 = vpop.permute.xlu1 %1336  ;;  %v21772_v24 = vld [vmem:[#allocation16_spill] sm:$0xff]  ;;  %v21773_v29 = vmov 0 }
 0x19d   : > { %v1944_v44 = vsel %vm21767_vm0, %v12620_v13, %v21766_v38  ;;  %vm14741_vm8 = vmpackc.low %vm21549_vm3, %vm21768_vm5  ;;  %v14749_v13 = vpop.permute.xlu0 %1340  ;;  %v419_v27 = vadd.s32 2432, %v13758_v54  ;;  %v418_v38 = vadd.s32 2304, %v13758_v54  ;;  %v11086_v48 = vpack.c.bf16 %v1943_v39, %v21776_v8 }
 0x19e   : > { %v21770_v35 = vsel %vm14741_vm8, 4294967295, %v21769_v35  ;;  %v14752_v7 = vpack.c.bf16 %v1944_v44, %v21772_v24  ;;  %vm14757_vm4 = vmpackc.low %vm21549_vm3, %vm20799_vm2  ;;  %v11083_v10 = vpack.c.bf16 %v1709_v56, %v13162_v18  ;;  %11082 = vmatprep.subr.msk.bf16.mxu1 %vm14709_vm14, %v11080_v57  ;;  %v14773_v44 = vsel %vm21777_vm10, %v14486_v5, %v14613_v45 }
 0x19f   : > { %21771 = vst [vmem:[#allocation65_spill] sm:$0xff] %v21770_v35  ;;  %v21774_v29 = vsel %vm14757_vm4, 4294967295, %v21773_v29  ;;  %vm21778_vm0 = vmmov %vm21777_vm10  ;;  %v12625_v18 = vunpack.i.h.bf16 %v14643_v17  ;;  %vm20806_vm14 = vcmp.lt.s32.totalorder %v14653_v16, 63  ;;  %v12635_v39 = vunpack.i.h.bf16 %v14688_v42 }
 0x1a0   : > { %1360 = vrot.lane.b32.xlu1 %v14592_v4, %s13274_s12  ;;  %1688 = vrot.lane.b32.xlu0 %v14633_v50, %s13276_s15  ;;  %21775 = vst [vmem:[#allocation16_spill] sm:$0xff] %v21774_v29  ;;  %v14777_v24 = vsel %vm21778_vm0, %v14613_v45, 0.0  ;;  %v14784_v8 = vpop.permute.xlu1 %12637  ;;  %v14793_v45 = vand.u32 63, %v419_v27  ;;  %v12630_v57 = vunpack.i.h.bf16 %v14576_v46  ;;  %vm21781_vm5 = vcmask 1031168  }
 0x1a1   : > { %11094 = vmatprep.subr.msk.bf16.mxu0 %vm14741_vm8, %v14752_v7  ;;  %11085 = vmatpush1.bf16.msk.msra.mxu1 %vm14727_vm1, %v11083_v10  ;;  %v14790_v5 = vpop.permute.xlu0 %12652  ;;  %v14795_v10 = vand.u32 63, %v418_v38  ;;  %v12639_v25 = vunpack.i.l.bf16 %v14784_v8  ;;  %v14805_v56 = vpack.i.bf16 %v14777_v24, %v14773_v44  ;;  %v14810_v27 = vsel %vm21781_vm5, %v1337_v0, %v14649_v36  ;;  %vm21783_vm0 = vmmov %vm21781_vm5 }
 0x1a2   : > { %11097 = vmatpush1.bf16.msk.msra.mxu0 %vm14757_vm4, %v11086_v48  ;;  %21779 = vst [vmem:[#allocation15_spill] sm:$0xff] %v14793_v45  ;;  %11088 = vmatprep.subr.msk.bf16.mxu1 %vm14600_vm12, %v11086_v48  ;;  %vm21782_vm10 = vcmask 523264   ;;  %v1385_v48 = vsel %vm21783_vm0, %v14540_v26, %v1337_v0  ;;  %vm21784_vm2 = vcmp.ge.s32.totalorder %v14653_v16, 1  ;;  %v21785_v47 = vmov 0 }
 0x1a3   : > { %21780 = vst [vmem:[#allocation66_spill] sm:$0xff] %v14795_v10  ;;  %v1549_v38 = vsel %vm21782_vm10, %v12625_v18, %v12639_v25  ;;  %vm14822_vm1 = vmpackc.low %vm21784_vm2, %vm20806_vm14  ;;  %v21788_v26 = vunpack.i.l.bf16 %v14643_v17  ;;  %vm21790_vm2 = vcmp.lt.s32.totalorder %v14659_v51, 63  ;;  %v21795_v37 = vunpack.i.l.bf16 %v14693_v43 }
 0x1a4   : > { %1525 = vrot.lane.b32.xlu1 %v14633_v50, %s13277_s22  ;;  %1364 = vrot.lane.b32.xlu0 %v14773_v44, %s13274_s12  ;;  %v21786_v47 = vsel %vm14822_vm1, 4294967295, %v21785_v47  ;;  %v14826_v23 = vpop.permute.xlu1 %12647  ;;  %vm21789_vm5 = vmmov %vm21782_vm10  ;;  %v11098_v12 = vpack.c.bf16 %v1549_v38, %v14810_v27  ;;  %vm21791_vm10 = vcmp.ge.s32.totalorder %v14659_v51, 1  ;;  %vm21796_vm11 = vcmask 506880  }
 0x1a5   : > { %11091 = vmatpush1.bf16.msk.msra.mxu1 %vm14618_vm15, %v14609_v62  ;;  %21787 = vst [vmem:[#allocation67_spill] sm:$0xff] %v21786_v47  ;;  %v14832_v62 = vpop.permute.xlu0 %12662  ;;  %v1548_v0 = vsel %vm21789_vm5, %v21788_v26, %v12625_v18  ;;  %vm14842_vm0 = vmpackc.low %vm21791_vm10, %vm21790_vm2  ;;  %v1712_v17 = vsel %vm21796_vm11, %v12630_v57, %v21795_v37  ;;  %v12640_v18 = vunpack.i.h.bf16 %v14784_v8  ;;  %v12649_v26 = vunpack.i.l.bf16 %v14826_v23 }
 0x1a6   : > { %v21793_v60 = vsel %vm14842_vm0, 4294967295, %v21792_v60  ;;  %vm21797_vm5 = vcmp.lt.s32.totalorder %v14531_v19, 63  ;;  %vm21798_vm2 = vcmask 1042432   ;;  %vm21799_vm10 = vcmp.lt.s32.totalorder %v14653_v16, 63  ;;  %11100 = vmatprep.subr.msk.bf16.mxu0 %vm14822_vm1, %v11098_v12 }
 0x1a7   : > { %21794 = vst [vmem:[#allocation68_spill] sm:$0xff] %v21793_v60  ;;  %10151 = vmatprep.subr.msk.mxu1 %vm21797_vm5, %v1385_v48  ;;  %vm14859_vm15 = vmpackc.low %vm21799_vm10, %vm21798_vm2  ;;  %v21802_v52 = vunpack.i.l.bf16 %v14688_v42  ;;  %vm21803_vm9 = vcmask 1039360   ;;  %v11101_v28 = vpack.c.bf16 %v1548_v0, %v1385_v48  ;;  %vm21805_vm14 = vcmp.lt.s32.totalorder %v14659_v51, 63  ;;  %v21817_v0 = vld [vmem:[#allocation20_spill] sm:$0xff] }
 0x1a8   : > { %12727 = vrot.lane.b32.xlu0 %v14805_v56, %s13277_s22  ;;  %12722 = vrot.lane.b32.xlu1 %v14805_v56, %s13275_s14  ;;  %vm21804_vm11 = vmmov %vm21798_vm2  ;;  %vm20837_vm5 = vcmp.lt.s32.totalorder %v14793_v45, 63  ;;  %v21808_v38 = vunpack.i.l.bf16 %v14576_v46  ;;  %vm21809_vm2 = vcmask 506880   ;;  %vm21812_vm1 = vcmp.ge.s32.totalorder %v14793_v45, 1 }
 0x1a9   : > { %v1945_v37 = vsel %vm21803_vm9, %v21802_v52, %v12635_v39  ;;  %vm14871_vm12 = vmpackc.low %vm21805_vm14, %vm21804_vm11  ;;  %v21813_v52 = vmov 0  ;;  %v421_v12 = vadd.s32 2688, %v13758_v54  ;;  %v420_v46 = vadd.s32 2560, %v13758_v54  ;;  %11103 = vmatpush1.bf16.msk.msra.mxu0 %vm14842_vm0, %v11101_v28  ;;  %v21822_v28 = vld [vmem:[#allocation19_spill] sm:$0xff] }
 0x1aa   : > { %v1711_v19 = vsel %vm21809_vm2, %v21808_v38, %v12630_v57  ;;  %vm21810_vm10 = vmmov %vm21803_vm9  ;;  %vm21811_vm9 = vcmp.lt.s32.totalorder %v14555_v21, 63  ;;  %v21816_v57 = vld [vmem:[#allocation9_spill] sm:$0xff]  ;;  %vm21818_vm14 = vcmp.ge.s32.totalorder %v14795_v10, 1  ;;  %v21819_v47 = vmov 0 }
 0x1ab   : > { %v1946_v42 = vsel %vm21810_vm10, %v12635_v39, %v12649_v26  ;;  %10152 = vmatpush1.msk.msra.mxu1 %vm21811_vm9, %v14666_v11  ;;  %vm14886_vm13 = vmpackc.low %vm21549_vm3, %vm21812_vm1  ;;  %v14894_v39 = vpop.permute.xlu1 %1342  ;;  %v14898_v11 = vpop.permute.xlu0 %1346  ;;  %v11104_v48 = vpack.c.bf16 %v1712_v17, %v21816_v57  ;;  %v11110_v60 = vpack.c.bf16 %v1945_v37, %v21822_v28  ;;  %vm21823_vm11 = vcmask 1031168  }
 0x1ac   : > { %v21814_v52 = vsel %vm14886_vm13, 4294967295, %v21813_v52  ;;  %1991 = vrot.lane.b32.xlu0 %v21567_v15, %s13275_s14  ;;  %v14902_v38 = vpack.c.bf16 %v1946_v42, %v21817_v0  ;;  %vm14907_vm1 = vmpackc.low %vm21549_vm3, %vm21818_vm14  ;;  %v14915_v21 = vsel %vm21823_vm11, %v14749_v13, %v14894_v39  ;;  %v21824_v1 = vunpack.i.l.bf16 %v14790_v5  ;;  %1366 = vrot.lane.b32.xlu1 %v14777_v24, %s13274_s12  ;;  %v13163_v42 = vld [vmem:[%s13432_s30 + $0x40] sm:$0x77] }
 0x1ad   : > { %21815 = vst [vmem:[#allocation69_spill] sm:$0xff] %v21814_v52  ;;  %v21820_v47 = vsel %vm14907_vm1, 4294967295, %v21819_v47  ;;  %vm21825_vm2 = vcmask 523264   ;;  %vm21826_vm10 = vcmask 588800   ;;  %vm21827_vm9 = vcmp.ge.s32.totalorder %v14793_v45, 1  ;;  %11106 = vmatprep.subr.msk.bf16.mxu0 %vm14859_vm15, %v11104_v48 }
 0x1ae   : > { %21821 = vst [vmem:[#allocation9_spill] sm:$0xff] %v21820_v47  ;;  %v1551_v17 = vsel %vm21825_vm2, %v12640_v18, %v21824_v1  ;;  %10153 = vmatmul.mubr.msk.f32.vlgmr.msra.gmra.mrb[6].mxu1 %vm21826_vm10, %v14004_v59  ;;  %vm14928_vm14 = vmpackc.low %vm21827_vm9, %vm20837_vm5  ;;  %v21828_v37 = vmov 0  ;;  %vm20834_vm11 = vcmp.lt.s32.totalorder %v14795_v10, 63  ;;  %v11107_v57 = vpack.c.bf16 %v1711_v19, %v13163_v42  ;;  %11118 = vmatprep.subr.msk.bf16.mxu1 %vm14886_vm13, %v14902_v38 }
 0x1af   : > { %v21829_v37 = vsel %vm14928_vm14, 4294967295, %v21828_v37  ;;  %v12645_v1 = vunpack.i.h.bf16 %v14693_v43  ;;  %v1550_v0 = vsel %vm21825_vm2, %v12639_v25, %v12640_v18  ;;  %v11122_v28 = vpack.c.bf16 %v1551_v17, %v14915_v21  ;;  %11121 = vmatpush1.bf16.msk.msra.mxu1 %vm14907_vm1, %v11110_v60  ;;  %2709 = vmatprep.mubr.f32.mxu1 %v21567_v15 }
 0x1b0   : > { %21830 = vst [vmem:[#allocation20_spill] sm:$0xff] %v21829_v37  ;;  %v12650_v20 = vunpack.i.h.bf16 %v14826_v23  ;;  %v14945_v2 = vand.u32 63, %v421_v12  ;;  %v14947_v19 = vand.u32 63, %v420_v46  ;;  %vm21833_vm15 = vcmask 1031168   ;;  %11109 = vmatpush1.bf16.msk.msra.mxu0 %vm14871_vm12, %v11107_v57  ;;  %v14959_v23 = vpop.permute.xlu1 %12657  ;;  %v14961_v12 = vpop.permute.xlu0 %12672  ;;  %12732 = vrot.lane.b32.xlu1 %v14805_v56, %s13276_s15 }
 0x1b1   : > { %v1387_v25 = vsel %vm21833_vm15, %v14649_v36, %v14749_v13  ;;  %v20842_v18 = vunpack.i.l.bf16 %v14832_v62  ;;  %11124 = vmatprep.subr.msk.bf16.mxu1 %vm14928_vm14, %v11122_v28  ;;  %vm21834_vm10 = vcmp.ge.s32.totalorder %v14795_v10, 1  ;;  %v21835_v46 = vmov 0  ;;  %11112 = vmatprep.subr.msk.bf16.mxu0 %vm14741_vm8, %v11110_v60  ;;  %v13164_v28 = vld [vmem:[%s13432_s30 + $0x48] sm:$0x77] }
 0x1b2   : > { %21831 = vst [vmem:[#allocation19_spill] sm:$0xff] %v14945_v2  ;;  %21832 = vst [vmem:[#allocation70_spill] sm:$0xff] %v14947_v19  ;;  %v11125_v36 = vpack.c.bf16 %v1550_v0, %v1387_v25  ;;  %v20840_v13 = vunpack.i.l.bf16 %v14959_v23  ;;  %v21838_v8 = vunpack.i.l.bf16 %v14693_v43  ;;  %vm21839_vm12 = vcmask 506880   ;;  %1999 = vperm.xlu0 %12736, %v1996_v22  }
 0x1b3   : > { %vm14969_vm9 = vmpackc.low %vm21834_vm10, %vm20834_vm11  ;;  %vm21840_vm2 = vcmask 1039360   ;;  %vm21842_vm10 = vcmask 1042432   ;;  %vm20839_vm14 = vcmp.ge.s32.totalorder %v14945_v2, 1  ;;  %vm20838_vm0 = vcmp.ge.s32.totalorder %v14947_v19, 1 }
 0x1b4   : > { %v21836_v46 = vsel %vm14969_vm9, 4294967295, %v21835_v46  ;;  %v1713_v48 = vsel %vm21839_vm12, %v21838_v8, %v12645_v1  ;;  %v1947_v17 = vsel %vm21840_vm2, %v12649_v26, %v12650_v20  ;;  %vm21841_vm15 = vmmov %vm21839_vm12  ;;  %11127 = vmatpush1.bf16.msk.msra.mxu1 %vm14969_vm9, %v11125_v36  ;;  %11115 = vmatpush1.bf16.msk.msra.mxu0 %vm14757_vm4, %v14752_v7  ;;  %v1345_v43 = vpop.permute.xlu1 %1344  ;;  %v14998_v56 = vpop.permute.xlu0 %1348  ;;  %v21844_v26 = vld [vmem:[#allocation10_spill] sm:$0xff]  ;;  %v422_v0 = vadd.s32 2816, %v13758_v54 }
 0x1b5   : > { %21837 = vst [vmem:[#allocation71_spill] sm:$0xff] %v21836_v46  ;;  %v1714_v42 = vsel %vm21841_vm15, %v12645_v1, %v20840_v13  ;;  %vm11129_vm11 = vmpackc.low %vm20837_vm5, %vm21842_vm10  ;;  %vm21846_vm15 = vcmp.lt.s32.totalorder %v14795_v10, 63  ;;  %v423_v1 = vadd.s32 2944, %v13758_v54  ;;  %v11131_v22 = vpack.c.bf16 %v1713_v48, %v13164_v28  ;;  %1824 = vrot.lane.b32.xlu1 %v21567_v15, %s13274_s12 }
 0x1b6   : > { %vm21843_vm12 = vmmov %vm21840_vm2  ;;  %v11128_v57 = vpack.c.bf16 %v1714_v42, %v21844_v26  ;;  %v21849_v36 = vmov 0  ;;  %v12660_v8 = vunpack.i.h.bf16 %v14959_v23  ;;  %v20841_v48 = vunpack.i.l.bf16 %v14961_v12  ;;  %v21852_v42 = vld [vmem:[#allocation22_spill] sm:$0xff] }
 0x1b7   : > { %v1948_v60 = vsel %vm21843_vm12, %v12650_v20, %v20842_v18  ;;  %vm21845_vm2 = vmmov %vm21842_vm10  ;;  %vm21847_vm12 = vcmp.lt.s32.totalorder %v14653_v16, 63  ;;  %v21848_v20 = vld [vmem:[#allocation21_spill] sm:$0xff]  ;;  %v15040_v28 = vand.u32 63, %v422_v0  ;;  %vm21872_vm9 = vcmp.ge.s32.totalorder %v14947_v19, 1 }
 0x1b8   : > { %vm11132_vm10 = vmpackc.low %vm21846_vm15, %vm21845_vm2  ;;  %10166 = vmatprep.subr.msk.mxu0 %vm21847_vm12, %v1387_v25  ;;  %11130 = vmatprep.subr.msk.bf16.mxu1 %vm11129_vm11, %v11128_v57  ;;  %v11134_v7 = vpack.c.bf16 %v1947_v17, %v21848_v20  ;;  %v15022_v26 = vpack.c.bf16 %v1948_v60, %v21852_v42  ;;  %v21853_v25 = vmov 0  ;;  %v12655_v17 = vunpack.i.h.bf16 %v14790_v5  ;;  %v12668_v57 = vpop.permute.xlu1 %12667  ;;  %v15042_v20 = vpop.permute.xlu0 %12682  ;;  %v16162_v16 = vld [vmem:[%s20665_s3] sm:$0xff] }
 0x1b9   : > { %vm15015_vm5 = vmpackc.low %vm21549_vm3, %vm20839_vm14  ;;  %11133 = vmatpush1.bf16.msk.msra.mxu1 %vm11132_vm10, %v11131_v22  ;;  %vm21856_vm2 = vcmp.lt.s32.totalorder %v14659_v51, 63  ;;  %vm20846_vm15 = vcmp.lt.s32.totalorder %v14945_v2, 63  ;;  %v15038_v60 = vand.u32 63, %v423_v1  ;;  %21858 = vst [vmem:[#allocation72_spill] sm:$0xff] %v15040_v28  ;;  %v12669_v22 = vunpack.i.l.bf16 %v12668_v57 }
 0x1ba   : > { %v21850_v36 = vsel %vm15015_vm5, 4294967295, %v21849_v36  ;;  %vm15027_vm11 = vmpackc.low %vm21549_vm3, %vm20838_vm0  ;;  %10167 = vmatpush1.msk.msra.mxu0 %vm21856_vm2, %v14810_v27  ;;  %11136 = vmatprep.subr.msk.bf16.mxu1 %vm14886_vm13, %v11134_v7  ;;  %vm21859_vm10 = vcmask 588800   ;;  %v12665_v27 = vunpack.i.h.bf16 %v14832_v62  ;;  %vm21860_vm2 = vcmask 1031168  }
 0x1bb   : > { %21851 = vst [vmem:[#allocation10_spill] sm:$0xff] %v21850_v36  ;;  %v21854_v25 = vsel %vm15027_vm11, 4294967295, %v21853_v25  ;;  %21857 = vst [vmem:[#allocation22_spill] sm:$0xff] %v15038_v60  ;;  %10168 = vmatmul.mubr.msk.f32.vlgmr.msra.gmra.mrb[8].mxu0 %vm21859_vm10, %v14004_v59  ;;  %11142 = vmatprep.subr.msk.bf16.mxu0 %vm15015_vm5, %v15022_v26  ;;  %v1389_v1 = vsel %vm21860_vm2, %v14894_v39, %v1345_v43  ;;  %vm21861_vm0 = vcmask 506880   ;;  %vm21863_vm14 = vcmask 523264  }
 0x1bc   : > { %21855 = vst [vmem:[#allocation21_spill] sm:$0xff] %v21854_v25  ;;  %11145 = vmatpush1.bf16.msk.msra.mxu0 %vm15027_vm11, %v11134_v7  ;;  %2780 = vmatprep.mubr.f32.mxu0 %v21567_v15  ;;  %v1716_v0 = vsel %vm21861_vm0, %v12660_v8, %v20841_v48  ;;  %vm21862_vm10 = vmmov %vm21860_vm2  ;;  %v1553_v13 = vsel %vm21863_vm14, %v12655_v17, %v12669_v22  ;;  %vm21864_vm2 = vcmp.ge.s32.totalorder %v14945_v2, 1  ;;  %v21865_v39 = vmov 0  ;;  %v15075_v7 = vpop.permute.xlu1 %12677  ;;  %v15095_v46 = vpop.permute.xlu0 %12692 }
 0x1bd   : > { %v15061_v42 = vsel %vm21862_vm10, %v1345_v43, %v14898_v11  ;;  %11139 = vmatpush1.bf16.msk.msra.mxu1 %vm14907_vm1, %v14902_v38  ;;  %vm15071_vm12 = vmpackc.low %vm21864_vm2, %vm20846_vm15  ;;  %v21868_v48 = vunpack.i.l.bf16 %v14790_v5  ;;  %vm21871_vm10 = vcmp.lt.s32.totalorder %v14947_v19, 63  ;;  %v21873_v38 = vmov 0 }
 0x1be   : > { %v21866_v39 = vsel %vm15071_vm12, 4294967295, %v21865_v39  ;;  %vm21869_vm0 = vmmov %vm21863_vm14  ;;  %vm21870_vm14 = vcmp.lt.s32.totalorder %v14793_v45, 63  ;;  %v11146_v18 = vpack.c.bf16 %v1553_v13, %v15061_v42  ;;  %v12670_v5 = vunpack.i.h.bf16 %v12668_v57  ;;  %v21882_v57 = vld [vmem:[#allocation11_spill] sm:$0xff] }
 0x1bf   : > { %21867 = vst [vmem:[#allocation73_spill] sm:$0xff] %v21866_v39  ;;  %v1552_v43 = vsel %vm21869_vm0, %v21868_v48, %v12655_v17  ;;  %10181 = vmatprep.subr.msk.mxu1 %vm21870_vm14, %v1389_v1  ;;  %vm15087_vm1 = vmpackc.low %vm21872_vm9, %vm21871_vm10  ;;  %v12679_v17 = vunpack.i.l.bf16 %v15075_v7  ;;  %vm21876_vm0 = vcmask 1042432   ;;  %vm21877_vm14 = vcmp.lt.s32.totalorder %v14945_v2, 63 }
 0x1c0   : > { %v21874_v38 = vsel %vm15087_vm1, 4294967295, %v21873_v38  ;;  %v11149_v13 = vpack.c.bf16 %v1552_v43, %v1389_v1  ;;  %vm11153_vm13 = vmpackc.low %vm21877_vm14, %vm21876_vm0  ;;  %v21878_v45 = vunpack.i.l.bf16 %v14832_v62  ;;  %vm21879_vm9 = vcmask 1039360   ;;  %11148 = vmatprep.subr.msk.bf16.mxu0 %vm15071_vm12, %v11146_v18  ;;  %v15131_v18 = vpop.permute.xlu1 %1350 }
 0x1c1   : > { %21875 = vst [vmem:[#allocation74_spill] sm:$0xff] %v21874_v38  ;;  %v21880_v47 = vunpack.i.l.bf16 %v14959_v23  ;;  %vm21881_vm10 = vcmask 506880   ;;  %v11152_v48 = vpack.c.bf16 %v1716_v0, %v21882_v57  ;;  %vm21883_vm15 = vmmov %vm21876_vm0  ;;  %vm21884_vm2 = vcmp.lt.s32.totalorder %v14947_v19, 63  ;;  %v21894_v23 = vld [vmem:[#allocation23_spill] sm:$0xff]  ;;  %v21899_v0 = vld [vmem:[#allocation24_spill] sm:$0xff] }
 0x1c2   : > { %v1949_v37 = vsel %vm21879_vm9, %v21878_v45, %v12665_v27  ;;  %vm15112_vm4 = vmpackc.low %vm21884_vm2, %vm21883_vm15  ;;  %vm20861_vm0 = vcmp.lt.s32.totalorder %v15038_v60, 63  ;;  %11151 = vmatpush1.bf16.msk.msra.mxu0 %vm15087_vm1, %v11149_v13  ;;  %v425_v62 = vadd.s32 3200, %v13758_v54  ;;  %vm21893_vm15 = vcmask 588800   ;;  %v13165_v13 = vld [vmem:[%s13432_s30 + $0x50] sm:$0x77] }
 0x1c3   : > { %v1715_v52 = vsel %vm21881_vm10, %v21880_v47, %v12660_v8  ;;  %vm21887_vm14 = vmmov %vm21879_vm9  ;;  %vm21888_vm9 = vcmp.lt.s32.totalorder %v14795_v10, 63  ;;  %vm21889_vm10 = vcmp.ge.s32.totalorder %v15038_v60, 1  ;;  %v21890_v47 = vmov 0  ;;  %11154 = vmatprep.subr.msk.bf16.mxu0 %vm11153_vm13, %v11152_v48 }
 0x1c4   : > { %v1950_v45 = vsel %vm21887_vm14, %v12665_v27, %v12679_v17  ;;  %10182 = vmatpush1.msk.msra.mxu1 %vm21888_vm9, %v14915_v21  ;;  %vm15126_vm12 = vmpackc.low %vm21549_vm3, %vm21889_vm10  ;;  %vm21895_vm2 = vcmp.ge.s32.totalorder %v15040_v28, 1  ;;  %v21896_v8 = vmov 0  ;;  %v424_v27 = vadd.s32 3072, %v13758_v54 }
 0x1c5   : > { %v21891_v47 = vsel %vm15126_vm12, 4294967295, %v21890_v47  ;;  %10183 = vmatmul.mubr.msk.f32.vlgmr.msra.gmra.mrb[8].mxu1 %vm21893_vm15, %v14004_v59  ;;  %v15136_v21 = vpack.c.bf16 %v1950_v45, %v21894_v23  ;;  %vm15141_vm14 = vmpackc.low %vm21549_vm3, %vm21895_vm2  ;;  %v11158_v43 = vpack.c.bf16 %v1949_v37, %v21899_v0  ;;  %v11155_v57 = vpack.c.bf16 %v1715_v52, %v13165_v13  ;;  %v15169_v13 = vpop.permute.xlu0 %1354 }
 0x1c6   : > { %21892 = vst [vmem:[#allocation11_spill] sm:$0xff] %v21891_v47  ;;  %v21897_v8 = vsel %vm15141_vm14, 4294967295, %v21896_v8  ;;  %vm21900_vm13 = vcmask 1031168   ;;  %v21901_v48 = vunpack.i.l.bf16 %v15042_v20  ;;  %vm21902_vm10 = vcmask 523264   ;;  %2851 = vmatprep.mubr.f32.mxu1 %v21567_v15 }
 0x1c7   : > { %21898 = vst [vmem:[#allocation23_spill] sm:$0xff] %v21897_v8  ;;  %v15152_v59 = vsel %vm21900_vm13, %v14998_v56, %v15131_v18  ;;  %vm21903_vm15 = vcmp.ge.s32.totalorder %v15038_v60, 1  ;;  %v21904_v23 = vmov 0  ;;  %v12675_v52 = vunpack.i.h.bf16 %v14961_v12  ;;  %vm21907_vm9 = vmmov %vm21902_vm10  ;;  %11166 = vmatprep.subr.msk.bf16.mxu1 %vm15126_vm12, %v15136_v21  ;;  %11157 = vmatpush1.bf16.msk.msra.mxu0 %vm15112_vm4, %v11155_v57 }
 0x1c8   : > { %v1555_v45 = vsel %vm21902_vm10, %v12670_v5, %v21901_v48  ;;  %vm15161_vm2 = vmpackc.low %vm21903_vm15, %vm20861_vm0  ;;  %v1554_v37 = vsel %vm21907_vm9, %v12669_v22, %v12670_v5  ;;  %v12680_v48 = vunpack.i.h.bf16 %v15075_v7  ;;  %11169 = vmatpush1.bf16.msk.msra.mxu1 %vm15141_vm14, %v11158_v43  ;;  %v15179_v38 = vand.u32 63, %v425_v62  ;;  %11160 = vmatprep.subr.msk.bf16.mxu0 %vm15015_vm5, %v11158_v43 }
 0x1c9   : > { %v21905_v23 = vsel %vm15161_vm2, 4294967295, %v21904_v23  ;;  %v11170_v0 = vpack.c.bf16 %v1555_v45, %v15152_v59  ;;  %vm21909_vm9 = vmmov %vm21900_vm13  ;;  %v12694_v5 = vunpack.i.l.bf16 %v15095_v46  ;;  %v12688_v45 = vpop.permute.xlu1 %12687  ;;  %vm21910_vm4 = vcmp.lt.s32.totalorder %v15040_v28, 63 }
 0x1ca   : > { %21906 = vst [vmem:[#allocation24_spill] sm:$0xff] %v21905_v23  ;;  %21908 = vst [vmem:[#allocation75_spill] sm:$0xff] %v15179_v38  ;;  %v1391_v22 = vsel %vm21909_vm9, %v14898_v11, %v14998_v56  ;;  %vm21911_vm13 = vcmp.ge.s32.totalorder %v15040_v28, 1  ;;  %v21912_v7 = vmov 0  ;;  %v15197_v1 = vand.u32 63, %v424_v27  ;;  %v15214_v27 = vpop.permute.xlu0 %12702 }
 0x1cb   : > { %11172 = vmatprep.subr.msk.bf16.mxu1 %vm15161_vm2, %v11170_v0  ;;  %vm15193_vm10 = vmpackc.low %vm21911_vm13, %vm21910_vm4  ;;  %v11173_v11 = vpack.c.bf16 %v1554_v37, %v1391_v22  ;;  %v12689_v56 = vunpack.i.l.bf16 %v12688_v45  ;;  %v21916_v62 = vunpack.i.l.bf16 %v14961_v12  ;;  %vm21917_vm15 = vcmask 506880   ;;  %11163 = vmatpush1.bf16.msk.msra.mxu0 %vm15027_vm11, %v15022_v26  ;;  %v13166_v26 = vld [vmem:[%s13432_s30 + $0x58] sm:$0x77] }
 0x1cc   : > { %v21913_v7 = vsel %vm15193_vm10, 4294967295, %v21912_v7  ;;  %21915 = vst [vmem:[#allocation77_spill] sm:$0xff] %v15197_v1  ;;  %vm21918_vm9 = vcmask 1039360   ;;  %vm21919_vm0 = vmmov %vm21917_vm15  ;;  %vm21920_vm4 = vcmask 1042432   ;;  %vm21921_vm13 = vcmp.lt.s32.totalorder %v15038_v60, 63 }
 0x1cd   : > { %21914 = vst [vmem:[#allocation76_spill] sm:$0xff] %v21913_v7  ;;  %v1717_v43 = vsel %vm21917_vm15, %v21916_v62, %v12675_v52  ;;  %v1951_v57 = vsel %vm21918_vm9, %v12679_v17, %v12680_v48  ;;  %v1718_v0 = vsel %vm21919_vm0, %v12675_v52, %v12689_v56  ;;  %11175 = vmatpush1.bf16.msk.msra.mxu1 %vm15193_vm10, %v11173_v11  ;;  %vm11177_vm2 = vmpackc.low %vm21921_vm13, %vm21920_vm4  ;;  %vm1101_vm1 = vcmp.ge.s32.totalorder %v15179_v38, 1  ;;  %v1353_v17 = vpop.permute.xlu1 %1352  ;;  %v21924_v52 = vld [vmem:[#allocation12_spill] sm:$0xff] }
 0x1ce   : > { %vm21922_vm5 = vmmov %vm21918_vm9  ;;  %vm21923_vm0 = vcmp.lt.s32.totalorder %v14945_v2, 63  ;;  %v11176_v37 = vpack.c.bf16 %v1718_v0, %v21924_v52  ;;  %vm21926_vm9 = vcmp.lt.s32.totalorder %v15040_v28, 63  ;;  %vm1100_vm11 = vcmp.ge.s32.totalorder %v15197_v1, 1 }
 0x1cf   : > { %v1952_v12 = vsel %vm21922_vm5, %v12680_v48, %v12694_v5  ;;  %10196 = vmatprep.subr.msk.mxu0 %vm21923_vm0, %v1391_v22  ;;  %vm21925_vm15 = vmmov %vm21920_vm4  ;;  %v11179_v11 = vpack.c.bf16 %v1717_v43, %v13166_v26  ;;  %v11182_v62 = vpack.c.bf16 %v1951_v57, %v13784_v61  ;;  %v21927_v48 = vmov 0 }
 0x1d0   : > { %vm11180_vm10 = vmpackc.low %vm21926_vm9, %vm21925_vm15  ;;  %11178 = vmatprep.subr.msk.bf16.mxu1 %vm11177_vm2, %v11176_v37  ;;  %v12690_v22 = vunpack.i.h.bf16 %v12688_v45  ;;  %v20869_v0 = vunpack.i.l.bf16 %v15214_v27  ;;  %vm21930_vm4 = vcmp.lt.s32.totalorder %v14947_v19, 63  ;;  %v11188_v43 = vpack.c.bf16 %v1952_v12, %v13787_v40  ;;  %v15250_v45 = vld [vmem:[%s20663_s1] sm:$0xff] }
 0x1d1   : > { %vm15228_vm5 = vmpackc.low %vm21549_vm3, %vm1101_vm1  ;;  %10197 = vmatpush1.msk.msra.mxu0 %vm21930_vm4, %v15061_v42  ;;  %11181 = vmatpush1.bf16.msk.msra.mxu1 %vm11180_vm10, %v11179_v11  ;;  %v21931_v61 = vmov 0  ;;  %v12685_v57 = vunpack.i.h.bf16 %v15042_v20  ;;  %v15245_v52 = vpop.permute.xlu1 %12697  ;;  %vm21934_vm10 = vcmask 588800   ;;  %vm20875_vm13 = vcmp.lt.s32.totalorder %v15179_v38, 63 }
 0x1d2   : > { %v21928_v48 = vsel %vm15228_vm5, 4294967295, %v21927_v48  ;;  %vm15240_vm2 = vmpackc.low %vm21549_vm3, %vm1100_vm11  ;;  %10198 = vmatmul.mubr.msk.f32.vlgmr.msra.gmra.mrb[10].mxu0 %vm21934_vm10, %v15250_v45  ;;  %11184 = vmatprep.subr.msk.bf16.mxu1 %vm15126_vm12, %v11182_v62  ;;  %v20876_v40 = vunpack.i.l.bf16 %v15245_v52  ;;  %vm20874_vm0 = vcmp.lt.s32.totalorder %v15197_v1, 63  ;;  %vm21935_vm15 = vcmask 1031168  }
 0x1d3   : > { %21929 = vst [vmem:[#allocation12_spill] sm:$0xff] %v21928_v48  ;;  %v21932_v61 = vsel %vm15240_vm2, 4294967295, %v21931_v61  ;;  %11190 = vmatprep.subr.msk.bf16.mxu0 %vm15228_vm5, %v11188_v43  ;;  %2922 = vmatprep.mubr.f32.mxu0 %v21567_v15  ;;  %v1393_v42 = vsel %vm21935_vm15, %v15131_v18, %v1353_v17  ;;  %v12695_v12 = vunpack.i.h.bf16 %v15095_v46  ;;  %vm21936_vm9 = vcmask 506880   ;;  %vm21937_vm4 = vmmov %vm21935_vm15 }
 0x1d4   : > { %21933 = vst [vmem:[#allocation78_spill] sm:$0xff] %v21932_v61  ;;  %11193 = vmatpush1.bf16.msk.msra.mxu0 %vm15240_vm2, %v11182_v62  ;;  %v1720_v37 = vsel %vm21936_vm9, %v12690_v22, %v20869_v0  ;;  %v1394_v26 = vsel %vm21937_vm4, %v1353_v17, %v15169_v13  ;;  %vm21938_vm10 = vcmask 523264   ;;  %vm15282_vm15 = vmpackc.low %vm1101_vm1, %vm20875_vm13  ;;  %v21939_v46 = vmov 0 }
 0x1d5   : > { %v1557_v11 = vsel %vm21938_vm10, %v12685_v57, %v20876_v40  ;;  %11187 = vmatpush1.bf16.msk.msra.mxu1 %vm15141_vm14, %v15136_v21  ;;  %v21940_v46 = vsel %vm15282_vm15, 4294967295, %v21939_v46  ;;  %v21942_v18 = vunpack.i.l.bf16 %v15042_v20  ;;  %vm21943_vm9 = vmmov %vm21938_vm10  ;;  %vm21944_vm4 = vcmp.lt.s32.totalorder %v15038_v60, 63 }
 0x1d6   : > { %21941 = vst [vmem:[#allocation79_spill] sm:$0xff] %v21940_v46  ;;  %10211 = vmatprep.subr.msk.mxu1 %vm21944_vm4, %v1393_v42  ;;  %v11194_v62 = vpack.c.bf16 %v1557_v11, %v1394_v26  ;;  %vm15295_vm10 = vmpackc.low %vm1100_vm11, %vm20874_vm0  ;;  %v21945_v21 = vmov 0  ;;  %vm21948_vm1 = vcmask 1042432   ;;  %vm21949_vm12 = vcmask 506880  }
 0x1d7   : > { %v1556_v17 = vsel %vm21943_vm9, %v21942_v18, %v12685_v57  ;;  %v21946_v21 = vsel %vm15295_vm10, 4294967295, %v21945_v21  ;;  %vm11201_vm14 = vmpackc.low %vm20875_vm13, %vm21948_vm1  ;;  %v1719_v20 = vsel %vm21949_vm12, %v12689_v56, %v12690_v22  ;;  %v21950_v57 = vld [vmem:[#allocation13_spill] sm:$0xff]  ;;  %vm21951_vm9 = vcmask 1039360  }
 0x1d8   : > { %21947 = vst [vmem:[#allocation80_spill] sm:$0xff] %v21946_v21  ;;  %v11197_v0 = vpack.c.bf16 %v1556_v17, %v1393_v42  ;;  %11196 = vmatprep.subr.msk.bf16.mxu0 %vm15282_vm15, %v11194_v62  ;;  %v11200_v11 = vpack.c.bf16 %v1720_v37, %v21950_v57  ;;  %v1953_v18 = vsel %vm21951_vm9, %v12694_v5, %v12695_v12  ;;  %vm21952_vm11 = vcmp.lt.s32.totalorder %v15040_v28, 63  ;;  %vm11204_vm12 = vmpackc.low %vm20874_vm0, %vm21948_vm1  ;;  %v13168_v56 = vld [vmem:[%s13432_s30 + $0x60] sm:$0x77]  ;;  %v1357_v42 = vpop.permute.xlu0 %1356 }
 0x1d9   : > { %10212 = vmatpush1.msk.msra.mxu1 %vm21952_vm11, %v15152_v59  ;;  %vm21953_vm4 = vcmask 588800   ;;  %v11203_v22 = vpack.c.bf16 %v1719_v20, %v13168_v56  ;;  %v11206_v5 = vpack.c.bf16 %v1953_v18, %v13825_v6  ;;  %v427_v6 = vadd.s32 3456, %v13758_v54 }
 0x1da   : > { %11199 = vmatpush1.bf16.msk.msra.mxu0 %vm15295_vm10, %v11197_v0  ;;  %10213 = vmatmul.mubr.msk.f32.vlgmr.msra.gmra.mrb[10].mxu1 %vm21953_vm4, %v15250_v45  ;;  %vm21955_vm9 = vmmov %vm21953_vm4  ;;  %v426_v0 = vadd.s32 3328, %v13758_v54 }
 0x1db   : > { %11202 = vmatprep.subr.msk.bf16.mxu0 %vm11201_vm14, %v11200_v11  ;;  %2993 = vmatprep.mubr.f32.mxu1 %v21567_v15  ;;  %vm21954_vm14 = vcmask 1031168   ;;  %v15336_v37 = vand.u32 63, %v427_v6  ;;  %v21960_v6 = vmov 0 }
 0x1dc   : > { %v1395_v59 = vsel %vm21954_vm14, %v15169_v13, %v1357_v42  ;;  %v428_v13 = vadd.s32 3584, %v13758_v54  ;;  %v15339_v17 = vand.u32 63, %v426_v0 }
 0x1dd   : > { %21956 = vst [vmem:[#allocation13_spill] sm:$0xff] %v15336_v37  ;;  %vm1103_vm11 = vcmp.ge.s32.totalorder %v15336_v37, 1  ;;  %vm21968_vm14 = vcmp.lt.s32.totalorder %v15336_v37, 63 }
 0x1de   : > { %11205 = vmatpush1.bf16.msk.msra.mxu0 %vm11204_vm12, %v11203_v22  ;;  %21957 = vst [vmem:[#allocation81_spill] sm:$0xff] %v15339_v17  ;;  %vm20877_vm4 = vcmp.ge.s32.totalorder %v15339_v17, 1  ;;  %v12700_v22 = vunpack.i.h.bf16 %v15245_v52  ;;  %vm15355_vm12 = vmpackc.low %vm21549_vm3, %vm1103_vm11 }
 0x1df   : > { %11208 = vmatprep.subr.msk.bf16.mxu0 %vm15228_vm5, %v11206_v5  ;;  %v21961_v6 = vsel %vm15355_vm12, 4294967295, %v21960_v6  ;;  %vm21996_vm5 = vcmp.lt.s32.totalorder %v15339_v17, 63 }
 0x1e0   : > { %21962 = vst [vmem:[#allocation84_spill] sm:$0xff] %v21961_v6 }
 0x1e2   : > { %11211 = vmatpush1.bf16.msk.msra.mxu0 %vm15240_vm2, %v11188_v43  ;;  %v429_v43 = vadd.s32 3712, %v13758_v54 }
 0x1e3   : > { %10226 = vmatprep.subr.msk.mxu0 %vm20875_vm13, %v1395_v59  ;;  %vm21974_vm13 = vcmask 523264  }
 0x1e4   : > { %v15341_v62 = vand.u32 63, %v429_v43  ;;  %v21964_v43 = vmov 0 }
 0x1e6   : > { %10227 = vmatpush1.msk.msra.mxu0 %vm20874_vm0, %v1394_v26  ;;  %21958 = vst [vmem:[#allocation82_spill] sm:$0xff] %v15341_v62  ;;  %v15344_v26 = vand.u32 63, %v428_v13  ;;  %vm15364_vm0 = vmpackc.low %vm21549_vm3, %vm20877_vm4  ;;  %vm21972_vm4 = vcmask 1031168   ;;  %vm21975_vm10 = vcmp.ge.s32.totalorder %v15341_v62, 1 }
 0x1e7   : > { %10228 = vmatmul.mubr.msk.f32.vlgmr.msra.gmra.mrb[12].mxu0 %vm21955_vm9, %v15250_v45  ;;  %vm21963_vm9 = vcmask 1039360   ;;  %v21965_v43 = vsel %vm15364_vm0, 4294967295, %v21964_v43  ;;  %vm15392_vm15 = vmpackc.low %vm21549_vm3, %vm21975_vm10 }
 0x1e8   : > { %3064 = vmatprep.mubr.f32.mxu0 %v21567_v15  ;;  %21959 = vst [vmem:[#allocation83_spill] sm:$0xff] %v15344_v26  ;;  %21966 = vst [vmem:[#allocation85_spill] sm:$0xff] %v21965_v43 }
 0x1e9   : > { %vm21967_vm1 = vmmov %vm21963_vm9 }
 0x206   : > { %v12708_v20 = vpop.permute.xlu1 %12707  ;;  %v15346_v57 = vpop.permute.xlu0 %12712 }
 0x207   : > { %v12710_v11 = vunpack.i.h.bf16 %v12708_v20  ;;  %v12709_v18 = vunpack.i.l.bf16 %v12708_v20  ;;  %v21973_v38 = vunpack.i.l.bf16 %v15346_v57 }
 0x209   : > { %v1954_v0 = vsel %vm21963_vm9, %v12695_v12, %v12709_v18  ;;  %v1955_v13 = vsel %vm21967_vm1, %v12709_v18, %v12710_v11  ;;  %vm15377_vm9 = vmpackc.low %vm1103_vm11, %vm21968_vm14  ;;  %v21969_v12 = vmov 0  ;;  %v1559_v18 = vsel %vm21974_vm13, %v12700_v22, %v21973_v38 }
 0x20a   : > { %v1359_v20 = vpop.permute.xlu1 %1358  ;;  %v15370_v40 = vpop.permute.xlu0 %1920  ;;  %v11212_v56 = vpack.c.bf16 %v1954_v0, %v13822_v31  ;;  %v21970_v12 = vsel %vm15377_vm9, 4294967295, %v21969_v12  ;;  %v21976_v31 = vmov 0  ;;  %vm20891_vm11 = vcmp.lt.s32.totalorder %v15339_v17, 63 }
 0x20b   : > { %21971 = vst [vmem:[#allocation86_spill] sm:$0xff] %v21970_v12  ;;  %v15382_v1 = vsel %vm21972_vm4, %v1357_v42, %v1359_v20  ;;  %v1956_v21 = vsel %vm21967_vm1, %v12710_v11, %v15370_v40  ;;  %v21977_v31 = vsel %vm15392_vm15, 4294967295, %v21976_v31  ;;  %v12705_v0 = vunpack.i.h.bf16 %v15214_v27  ;;  %vm21980_vm4 = vmmov %vm21974_vm13 }
 0x20c   : > { %21978 = vst [vmem:[#allocation87_spill] sm:$0xff] %v21977_v31  ;;  %v21979_v42 = vunpack.i.l.bf16 %v15245_v52  ;;  %v11218_v38 = vpack.c.bf16 %v1559_v18, %v15382_v1  ;;  %v15403_v61 = vpack.c.bf16 %v1956_v21, %v14592_v4  ;;  %11214 = vmatprep.subr.msk.bf16.mxu1 %vm15355_vm12, %v11212_v56  ;;  %vm21981_vm13 = vcmp.ge.s32.totalorder %v15344_v26, 1 }
 0x20d   : > { %vm15410_vm10 = vmpackc.low %vm21549_vm3, %vm21981_vm13  ;;  %v21982_v11 = vmov 0  ;;  %v11230_v48 = vpack.c.bf16 %v1955_v13, %v14587_v30  ;;  %11217 = vmatpush1.bf16.msk.msra.mxu1 %vm15364_vm0, %v11206_v5  ;;  %vm21985_vm14 = vcmp.ge.s32.totalorder %v15339_v17, 1  ;;  %v21986_v30 = vmov 0 }
 0x20e   : > { %v1558_v46 = vsel %vm21980_vm4, %v21979_v42, %v12700_v22  ;;  %v21983_v11 = vsel %vm15410_vm10, 4294967295, %v21982_v11  ;;  %v12718_v52 = vpop.permute.xlu1 %12717  ;;  %v15417_v22 = vpop.permute.xlu0 %1362  ;;  %11220 = vmatprep.subr.msk.bf16.mxu1 %vm15377_vm9, %v11218_v38  ;;  %11238 = vmatprep.subr.msk.bf16.mxu0 %vm15392_vm15, %v15403_v61  ;;  %vm15428_vm1 = vmpackc.low %vm21985_vm14, %vm20891_vm11  ;;  %v21989_v5 = vunpack.i.l.bf16 %v15214_v27  ;;  %vm21990_vm4 = vcmask 506880  }
 0x20f   : > { %21984 = vst [vmem:[#allocation88_spill] sm:$0xff] %v21983_v11  ;;  %v21987_v30 = vsel %vm15428_vm1, 4294967295, %v21986_v30  ;;  %v11221_v4 = vpack.c.bf16 %v1558_v46, %v1395_v59  ;;  %v12719_v21 = vunpack.i.l.bf16 %v12718_v52  ;;  %11241 = vmatpush1.bf16.msk.msra.mxu0 %vm15410_vm10, %v11230_v48  ;;  %vm21991_vm13 = vmmov %vm21990_vm4  ;;  %vm21992_vm9 = vcmask 1042432   ;;  %v21994_v46 = vld [vmem:[#allocation14_spill] sm:$0xff] }
 0x210   : > { %21988 = vst [vmem:[#allocation89_spill] sm:$0xff] %v21987_v30  ;;  %v1721_v13 = vsel %vm21990_vm4, %v21989_v5, %v12705_v0  ;;  %vm21993_vm14 = vcmp.lt.s32.totalorder %v15336_v37, 63  ;;  %vm21995_vm2 = vmmov %vm21992_vm9  ;;  %v431_v27 = vadd.s32 3968, %v13758_v54  ;;  %v13169_v5 = vld [vmem:[%s13432_s30 + $0x68] sm:$0x77]  ;;  %v430_v30 = vadd.s32 3840, %v13758_v54 }
 0x211   : > { %v1722_v18 = vsel %vm21991_vm13, %v12705_v0, %v12719_v21  ;;  %11223 = vmatpush1.bf16.msk.msra.mxu1 %vm15428_vm1, %v11221_v4  ;;  %vm11225_vm11 = vmpackc.low %vm21993_vm14, %vm21992_vm9  ;;  %v11227_v0 = vpack.c.bf16 %v1721_v13, %v13169_v5  ;;  %v12715_v4 = vunpack.i.h.bf16 %v15346_v57  ;;  %vm20904_vm9 = vcmp.lt.s32.totalorder %v15341_v62, 63 }
 0x212   : > { %v1361_v42 = vpop.permute.xlu1 %1360  ;;  %v15443_v38 = vpop.permute.xlu0 %1688  ;;  %v11224_v59 = vpack.c.bf16 %v1722_v18, %v21994_v46  ;;  %vm11228_vm8 = vmpackc.low %vm21996_vm5, %vm21995_vm2  ;;  %v12720_v12 = vunpack.i.h.bf16 %v12718_v52  ;;  %vm20907_vm4 = vcmp.lt.s32.totalorder %v15344_v26, 63  ;;  %vm21997_vm5 = vcmask 1031168  }
 0x213   : > { %v1397_v28 = vsel %vm21997_vm5, %v1359_v20, %v1361_v42  ;;  %v15458_v7 = vand.u32 63, %v431_v27  ;;  %vm21999_vm2 = vmmov %vm21997_vm5  ;;  %v22010_v5 = vmov 0  ;;  %vm22014_vm1 = vcmask 506880  }
 0x214   : > { %11226 = vmatprep.subr.msk.bf16.mxu1 %vm11225_vm11, %v11224_v59  ;;  %v15462_v54 = vsel %vm21999_vm2, %v1361_v42, %v15417_v22  ;;  %vm22000_vm11 = vmmov %vm21991_vm13  ;;  %vm22001_vm13 = vcmask 523264   ;;  %v22003_v59 = vmov 0  ;;  %v22007_v42 = vunpack.i.l.bf16 %v15346_v57 }
 0x215   : > { %11229 = vmatpush1.bf16.msk.msra.mxu1 %vm11228_vm8, %v11227_v0  ;;  %21998 = vst [vmem:[#allocation14_spill] sm:$0xff] %v15458_v7  ;;  %v1724_v13 = vsel %vm22000_vm11, %v12720_v12, %v15443_v38  ;;  %vm22002_vm8 = vcmp.ge.s32.totalorder %v15341_v62, 1  ;;  %vm22008_vm5 = vmmov %vm22001_vm13  ;;  %vm22009_vm2 = vcmp.ge.s32.totalorder %v15344_v26, 1  ;;  %v1723_v57 = vsel %vm22014_vm1, %v12719_v21, %v12720_v12 }
 0x216   : > { %v1526_v18 = vpop.permute.xlu1 %1525  ;;  %v1365_v46 = vpop.permute.xlu0 %1364  ;;  %11232 = vmatprep.subr.msk.bf16.mxu1 %vm15355_vm12, %v11230_v48  ;;  %vm15471_vm14 = vmpackc.low %vm22002_vm8, %vm20904_vm9  ;;  %v15475_v48 = vand.u32 63, %v430_v30  ;;  %v1560_v27 = vsel %vm22008_vm5, %v22007_v42, %v12715_v4  ;;  %v22015_v30 = vld [vmem:[#allocation17_spill] sm:$0xff]  ;;  %vm22016_vm5 = vcmp.lt.s32.totalorder %v15336_v37, 63 }
 0x217   : > { %v1561_v52 = vsel %vm22001_vm13, %v12715_v4, %v1526_v18  ;;  %v22004_v59 = vsel %vm15471_vm14, 4294967295, %v22003_v59  ;;  %vm15485_vm11 = vmpackc.low %vm22009_vm2, %vm20907_vm4  ;;  %v11245_v0 = vpack.c.bf16 %v1560_v27, %v1397_v28  ;;  %vm22013_vm13 = vcmask 1042432  }
 0x218   : > { %22005 = vst [vmem:[#allocation90_spill] sm:$0xff] %v22004_v59  ;;  %22006 = vst [vmem:[#allocation91_spill] sm:$0xff] %v15475_v48  ;;  %v11242_v20 = vpack.c.bf16 %v1561_v52, %v15462_v54  ;;  %v22011_v5 = vsel %vm15485_vm11, 4294967295, %v22010_v5  ;;  %v11248_v4 = vpack.c.bf16 %v1724_v13, %v22015_v30 }
 0x219   : > { %22012 = vst [vmem:[#allocation92_spill] sm:$0xff] %v22011_v5  ;;  %11235 = vmatpush1.bf16.msk.msra.mxu1 %vm15364_vm0, %v11212_v56  ;;  %vm11249_vm8 = vmpackc.low %vm20904_vm9, %vm22013_vm13 }
 0x21a   : > { %v12723_v52 = vpop.permute.xlu1 %12722  ;;  %v12728_v42 = vpop.permute.xlu0 %12727  ;;  %10241 = vmatprep.subr.msk.mxu1 %vm22016_vm5, %v1397_v28  ;;  %11244 = vmatprep.subr.msk.bf16.mxu0 %vm15471_vm14, %v11242_v20  ;;  %vm22017_vm1 = vmmov %vm22013_vm13  ;;  %v13170_v28 = vld [vmem:[%s13432_s30 + $0x70] sm:$0x77]  ;;  %vm22018_vm5 = vcmask 1039360   ;;  %vm22020_vm14 = vcmp.lt.s32.totalorder %v15339_v17, 63  ;;  %vm22021_vm13 = vcmp.ge.s32.totalorder %v15458_v7, 1 }
 0x21b   : > { %v12725_v56 = vunpack.i.h.bf16 %v12723_v52  ;;  %v12724_v27 = vunpack.i.l.bf16 %v12723_v52  ;;  %11247 = vmatpush1.bf16.msk.msra.mxu0 %vm15485_vm11, %v11245_v0  ;;  %v12730_v12 = vunpack.i.h.bf16 %v12728_v42  ;;  %v12729_v21 = vunpack.i.l.bf16 %v12728_v42  ;;  %vm11252_vm9 = vmpackc.low %vm20907_vm4, %vm22017_vm1 }
 0x21c   : > { %11250 = vmatprep.subr.msk.bf16.mxu0 %vm11249_vm8, %v11248_v4  ;;  %v11251_v13 = vpack.c.bf16 %v1723_v57, %v13170_v28  ;;  %vm22019_vm2 = vmmov %vm22018_vm5  ;;  %v22022_v0 = vmov 0  ;;  %vm21048_vm8 = vcmp.lt.s32.totalorder %v15458_v7, 63  ;;  %vm22025_vm1 = vcmask 588800  }
 0x21d   : > { %v1957_v20 = vsel %vm22018_vm5, %v15370_v40, %v12724_v27  ;;  %v1958_v30 = vsel %vm22019_vm2, %v12724_v27, %v12725_v56  ;;  %10242 = vmatpush1.msk.msra.mxu1 %vm22020_vm14, %v15382_v1  ;;  %vm15517_vm11 = vmpackc.low %vm21549_vm3, %vm22021_vm13  ;;  %vm22026_vm2 = vcmp.ge.s32.totalorder %v15475_v48, 1  ;;  %v22027_v1 = vmov 0 }
 0x21e   : > { %v22023_v0 = vsel %vm15517_vm11, 4294967295, %v22022_v0  ;;  %10243 = vmatmul.mubr.msk.f32.vlgmr.msra.gmra.mrb[12].mxu1 %vm22025_vm1, %v15250_v45  ;;  %v11254_v40 = vpack.c.bf16 %v1957_v20, %v14633_v50  ;;  %v11260_v57 = vpack.c.bf16 %v1958_v30, %v14773_v44  ;;  %vm15529_vm14 = vmpackc.low %vm21549_vm3, %vm22026_vm2  ;;  %v1367_v4 = vpop.permute.xlu1 %1366  ;;  %vm20910_vm13 = vcmp.lt.s32.totalorder %v15475_v48, 63 }
 0x21f   : > { %22024 = vst [vmem:[#allocation17_spill] sm:$0xff] %v22023_v0  ;;  %v22028_v1 = vsel %vm15529_vm14, 4294967295, %v22027_v1  ;;  %11253 = vmatpush1.bf16.msk.msra.mxu0 %vm11252_vm9, %v11251_v13  ;;  %3135 = vmatprep.mubr.f32.mxu1 %v21567_v15  ;;  %vm22030_vm5 = vcmask 1031168   ;;  %vm22031_vm1 = vcmask 523264   ;;  %vm22032_vm2 = vcmp.ge.s32.totalorder %v15458_v7, 1  ;;  %v15562_v13 = vpop.permute.xlu0 %1991 }
 0x220   : > { %22029 = vst [vmem:[#allocation93_spill] sm:$0xff] %v22028_v1  ;;  %v1400_v52 = vsel %vm22030_vm5, %v1365_v46, %v1367_v4  ;;  %v1563_v42 = vsel %vm22031_vm1, %v12729_v21, %v12730_v12  ;;  %11256 = vmatprep.subr.msk.bf16.mxu0 %vm15392_vm15, %v11254_v40  ;;  %11262 = vmatprep.subr.msk.bf16.mxu1 %vm15517_vm11, %v11260_v57  ;;  %vm15545_vm4 = vmpackc.low %vm22032_vm2, %vm21048_vm8  ;;  %v22033_v50 = vmov 0  ;;  %v22038_v28 = vmov 0 }
 0x221   : > { %v22034_v50 = vsel %vm15545_vm4, 4294967295, %v22033_v50  ;;  %vm22036_vm9 = vmmov %vm22031_vm1  ;;  %v11266_v27 = vpack.c.bf16 %v1563_v42, %v1400_v52  ;;  %11265 = vmatpush1.bf16.msk.msra.mxu1 %vm15529_vm14, %v11254_v40  ;;  %v1399_v12 = vsel %vm22030_vm5, %v15417_v22, %v1365_v46  ;;  %vm22037_vm1 = vcmp.ge.s32.totalorder %v15475_v48, 1  ;;  %22041 = vst [vmem:[#allocation96_spill] sm:$0xff] %v15562_v13 }
 0x222   : > { %22035 = vst [vmem:[#allocation94_spill] sm:$0xff] %v22034_v50  ;;  %v1562_v44 = vsel %vm22036_vm9, %v1526_v18, %v12729_v21  ;;  %vm15558_vm15 = vmpackc.low %vm22037_vm1, %vm20910_vm13  ;;  %v12733_v20 = vpop.permute.xlu1 %12732  ;;  %vm22042_vm2 = vcmp.lt.s32.totalorder %v15341_v62, 63  ;;  %vm22043_vm9 = vcmask 1039360   ;;  %vm22044_vm5 = vcmask 506880  }
 0x223   : > { %v22039_v28 = vsel %vm15558_vm15, 4294967295, %v22038_v28  ;;  %11268 = vmatprep.subr.msk.bf16.mxu1 %vm15545_vm4, %v11266_v27  ;;  %11259 = vmatpush1.bf16.msk.msra.mxu0 %vm15410_vm10, %v15403_v61  ;;  %v11269_v18 = vpack.c.bf16 %v1562_v44, %v1399_v12  ;;  %v12735_v22 = vunpack.i.h.bf16 %v12733_v20  ;;  %v12734_v46 = vunpack.i.l.bf16 %v12733_v20  ;;  %vm22045_vm1 = vmmov %vm22044_vm5  ;;  %v13171_v61 = vld [vmem:[%s13432_s30 + $0x78] sm:$0x77]  ;;  %v22048_v44 = vld [vmem:[#allocation18_spill] sm:$0xff]  ;;  %s10896_s30 = sshll.u32 %s13365_s21, 4  ;;  %s13283_s21 = smov [#allocation5]  }
 0x224   : > { %22040 = vst [vmem:[#allocation95_spill] sm:$0xff] %v22039_v28  ;;  %10256 = vmatprep.subr.msk.mxu0 %vm22042_vm2, %v1399_v12  ;;  %v1993_v21 = vsel %vm22043_vm9, %v12725_v56, %v15562_v13  ;;  %vm22046_vm13 = vcmask 1042432   ;;  %vm22047_vm2 = vcmp.lt.s32.totalorder %v15344_v26, 63  ;;  %vm22050_vm9 = vcmp.lt.s32.totalorder %v15475_v48, 63  ;;  %s20620_s25 = scalar_lea.hbm %s20673_s11, %s10896_s30 }
 0x225   : > { %11271 = vmatpush1.bf16.msk.msra.mxu1 %vm15558_vm15, %v11269_v18  ;;  %v1725_v30 = vsel %vm22044_vm5, %v15443_v38, %v12734_v46  ;;  %v1726_v40 = vsel %vm22045_vm1, %v12734_v46, %v12735_v22  ;;  %vm11273_vm4 = vmpackc.low %vm21048_vm8, %vm22046_vm13  ;;  %vm22051_vm5 = vcmask 588800   ;;  %v11278_v38 = vpack.c.bf16 %v1993_v21, %v14777_v24  ;;  %v2072_v24 = vpop.f32.mrb[0].mxu0 }
 0x226   : > { %v11275_v42 = vpack.c.bf16 %v1725_v30, %v13171_v61  ;;  %v11272_v27 = vpack.c.bf16 %v1726_v40, %v22048_v44  ;;  %vm22049_vm15 = vmmov %vm22046_vm13  ;;  %vm22053_vm13 = vcmask 1031168   ;;  %v2074_v18 = vpop.f32.mrb[1].mxu0 }
 0x227   : > { %10257 = vmatpush1.msk.msra.mxu0 %vm22047_vm2, %v15462_v54  ;;  %vm11276_vm10 = vmpackc.low %vm22050_vm9, %vm22049_vm15  ;;  %v15593_v56 = vpop.permute.xlu1 %1824 }
 0x228   : > { %10258 = vmatmul.mubr.msk.f32.vlgmr.msra.gmra.mrb[14].mxu0 %vm22051_vm5, %v15250_v45  ;;  %11274 = vmatprep.subr.msk.bf16.mxu1 %vm11273_vm4, %v11272_v27  ;;  %22052 = vst [vmem:[#allocation18_spill] sm:$0xff] %v15593_v56  ;;  %v1826_v54 = vsel %vm22053_vm13, %v1367_v4, %v15593_v56  ;;  %vm22054_vm15 = vmmov %vm22050_vm9  ;;  %vm22073_vm4 = vcmask 531456  }
 0x229   : > { %4128 = vmatprep.mubr.f32.mxu0 %v21567_v15  ;;  %11277 = vmatpush1.bf16.msk.msra.mxu1 %vm11276_vm10, %v11275_v42  ;;  %vm22055_vm10 = vmmov %vm22051_vm5 }
 0x22a   : > { %11280 = vmatprep.subr.msk.bf16.mxu1 %vm15517_vm11, %v11278_v38  ;;  %vm22074_vm1 = vmmov %vm22073_vm4 }
 0x22b   : > { %vm22075_vm2 = vmmov %vm22074_vm1 }
 0x22c   : > { %vm22076_vm9 = vmmov %vm22074_vm1 }
 0x22d   : > { %11283 = vmatpush1.bf16.msk.msra.mxu1 %vm15529_vm14, %v11260_v57  ;;  %vm22081_vm5 = vmmov %vm22074_vm1 }
 0x22e   : > { %10271 = vmatprep.subr.msk.mxu1 %vm21048_vm8, %v1826_v54  ;;  %vm22082_vm13 = vmmov %vm22074_vm1  ;;  %vm22181_vm8 = vcmask 506880  }
 0x231   : > { %v15603_v12 = vpop.permute.xlu0 %1999  ;;  %10272 = vmatpush1.msk.msra.mxu1 %vm22054_vm15, %v1400_v52  ;;  %vm22083_vm15 = vmmov %vm22074_vm1 }
 0x232   : > { %10273 = vmatmul.mubr.msk.f32.vlgmr.msra.gmra.mrb[14].mxu1 %vm22055_vm10, %v15250_v45  ;;  %v15610_v20 = vadd.f32 %v2072_v24, %v15603_v12  ;;  %v15614_v57 = vadd.f32 %v2074_v18, %v15603_v12  ;;  %v2143_v45 = vpop.f32.mrb[0].mxu1  ;;  %vm22084_vm10 = vmmov %vm22074_vm1 }
 0x233   : > { %4199 = vmatprep.mubr.f32.mxu1 %v21567_v15  ;;  %v15625_v52 = vadd.f32 %v2143_v45, %v15603_v12  ;;  %v2145_v46 = vpop.f32.mrb[1].mxu1 }
 0x234   : > { %v20922_v4 = vmax.f32 %v15610_v20, 0.0  ;;  %v20921_v22 = vmax.f32 %v15614_v57, 0.0  ;;  %v15628_v21 = vadd.f32 %v2145_v46, %v15603_v12 }
 0x235   : > { %v20917_v30 = vmax.f32 %v15625_v52, 0.0 }
 0x236   : > { %3206 = vrot.lane.b32.xlu1 %v20922_v4, %s13273_s29  ;;  %v20918_v40 = vmax.f32 %v15628_v21, 0.0 }
 0x237   : > { %3210 = vrot.lane.b32.xlu0 %v20917_v30, %s13273_s29 }
 0x23a   : > { %3208 = vrot.lane.b32.xlu1 %v20921_v22, %s13273_s29 }
 0x23e   : > { %3212 = vrot.lane.b32.xlu1 %v20918_v40, %s13273_s29 }
 0x23f   : > { %v2214_v61 = vpop.f32.mrb[2].mxu0 }
 0x240   : > { %v15639_v42 = vadd.f32 %v2214_v61, %v15603_v12  ;;  %v2216_v44 = vpop.f32.mrb[3].mxu0 }
 0x241   : > { %v15642_v27 = vadd.f32 %v2216_v44, %v15603_v12 }
 0x242   : > { %v20915_v38 = vmax.f32 %v15639_v42, 0.0 }
 0x243   : > { %v20916_v54 = vmax.f32 %v15642_v27, 0.0 }
 0x244   : > { %3214 = vrot.lane.b32.xlu0 %v20915_v38, %s13273_s29 }
 0x245   : > { %3216 = vrot.lane.b32.xlu1 %v20916_v54, %s13273_s29 }
 0x24c   : > { %v2285_v24 = vpop.f32.mrb[2].mxu1 }
 0x24d   : > { %v15653_v18 = vadd.f32 %v2285_v24, %v15603_v12  ;;  %v2287_v45 = vpop.f32.mrb[3].mxu1 }
 0x24e   : > { %v15656_v46 = vadd.f32 %v2287_v45, %v15603_v12 }
 0x24f   : > { %v20919_v61 = vmax.f32 %v15653_v18, 0.0 }
 0x250   : > { %v20920_v44 = vmax.f32 %v15656_v46, 0.0 }
 0x251   : > { %3218 = vrot.lane.b32.xlu0 %v20919_v61, %s13273_s29 }
 0x252   : > { %3220 = vrot.lane.b32.xlu1 %v20920_v44, %s13273_s29 }
 0x259   : > { %v2356_v38 = vpop.f32.mrb[4].mxu0 }
 0x25a   : > { %v15667_v24 = vadd.f32 %v2356_v38, %v15603_v12  ;;  %v2358_v54 = vpop.f32.mrb[5].mxu0 }
 0x25b   : > { %v15670_v45 = vadd.f32 %v2358_v54, %v15603_v12 }
 0x25c   : > { %22056 = vst [vmem:[#allocation97_spill] sm:$0xff] %v15667_v24  ;;  %v20923_v30 = vmax.f32 %v15667_v24, 0.0 }
 0x25d   : > { %v20924_v40 = vmax.f32 %v15670_v45, 0.0 }
 0x25e   : > { %3222 = vrot.lane.b32.xlu0 %v20923_v30, %s13273_s29 }
 0x25f   : > { %3224 = vrot.lane.b32.xlu1 %v20924_v40, %s13273_s29 }
 0x265   : > { %v2427_v61 = vpop.f32.mrb[4].mxu1 }
 0x266   : > { %v15681_v38 = vadd.f32 %v2427_v61, %v15603_v12  ;;  %v2429_v44 = vpop.f32.mrb[5].mxu1 }
 0x267   : > { %v15684_v54 = vadd.f32 %v2429_v44, %v15603_v12 }
 0x268   : > { %22057 = vst [vmem:[#allocation98_spill] sm:$0xff] %v15681_v38  ;;  %v20929_v22 = vmax.f32 %v15681_v38, 0.0 }
 0x269   : > { %22058 = vst [vmem:[#allocation99_spill] sm:$0xff] %v15684_v54  ;;  %v20930_v4 = vmax.f32 %v15684_v54, 0.0 }
 0x26a   : > { %3226 = vrot.lane.b32.xlu0 %v20929_v22, %s13273_s29 }
 0x26b   : > { %3228 = vrot.lane.b32.xlu1 %v20930_v4, %s13273_s29 }
 0x26d   : > { %v2498_v30 = vpop.f32.mrb[6].mxu0 }
 0x26e   : > { %v15695_v61 = vadd.f32 %v2498_v30, %v15603_v12  ;;  %v2500_v40 = vpop.f32.mrb[7].mxu0 }
 0x26f   : > { %v15698_v44 = vadd.f32 %v2500_v40, %v15603_v12 }
 0x270   : > { %22059 = vst [vmem:[#allocation100_spill] sm:$0xff] %v15695_v61  ;;  %v20933_v56 = vmax.f32 %v15695_v61, 0.0 }
 0x271   : > { %22060 = vst [vmem:[#allocation101_spill] sm:$0xff] %v15698_v44  ;;  %v20934_v48 = vmax.f32 %v15698_v44, 0.0 }
 0x272   : > { %3230 = vrot.lane.b32.xlu0 %v20933_v56, %s13273_s29 }
 0x273   : > { %3232 = vrot.lane.b32.xlu1 %v20934_v48, %s13273_s29 }
 0x281   : > { %v2569_v22 = vpop.f32.mrb[6].mxu1 }
 0x282   : > { %v15709_v30 = vadd.f32 %v2569_v22, %v15603_v12  ;;  %v2571_v4 = vpop.f32.mrb[7].mxu1 }
 0x283   : > { %v15712_v40 = vadd.f32 %v2571_v4, %v15603_v12 }
 0x284   : > { %22061 = vst [vmem:[#allocation102_spill] sm:$0xff] %v15709_v30  ;;  %v20938_v28 = vmax.f32 %v15709_v30, 0.0 }
 0x285   : > { %22062 = vst [vmem:[#allocation103_spill] sm:$0xff] %v15712_v40  ;;  %v20939_v13 = vmax.f32 %v15712_v40, 0.0 }
 0x286   : > { %3234 = vrot.lane.b32.xlu0 %v20938_v28, %s13273_s29 }
 0x287   : > { %3236 = vrot.lane.b32.xlu1 %v20939_v13, %s13273_s29 }
 0x28e   : > { %v2640_v56 = vpop.f32.mrb[8].mxu0 }
 0x28f   : > { %v15723_v22 = vadd.f32 %v2640_v56, %v15603_v12  ;;  %v2642_v48 = vpop.f32.mrb[9].mxu0 }
 0x290   : > { %v15726_v4 = vadd.f32 %v2642_v48, %v15603_v12 }
 0x291   : > { %22063 = vst [vmem:[#allocation104_spill] sm:$0xff] %v15723_v22  ;;  %v20942_v50 = vmax.f32 %v15723_v22, 0.0 }
 0x292   : > { %22064 = vst [vmem:[#allocation105_spill] sm:$0xff] %v15726_v4  ;;  %v20943_v7 = vmax.f32 %v15726_v4, 0.0 }
 0x293   : > { %3238 = vrot.lane.b32.xlu0 %v20942_v50, %s13273_s29 }
 0x294   : > { %3240 = vrot.lane.b32.xlu1 %v20943_v7, %s13273_s29 }
 0x298   : > { %v2711_v28 = vpop.f32.mrb[8].mxu1 }
 0x299   : > { %v15737_v56 = vadd.f32 %v2711_v28, %v15603_v12  ;;  %v2713_v13 = vpop.f32.mrb[9].mxu1 }
 0x29a   : > { %v15741_v1 = vadd.f32 %v2713_v13, %v15603_v12 }
 0x29b   : > { %22065 = vst [vmem:[#allocation106_spill] sm:$0xff] %v15737_v56  ;;  %v20948_v48 = vmax.f32 %v15737_v56, 0.0 }
 0x29c   : > { %22066 = vst [vmem:[#allocation107_spill] sm:$0xff] %v15741_v1  ;;  %v20952_v50 = vmax.f32 %v15741_v1, 0.0 }
 0x29d   : > { %3242 = vrot.lane.b32.xlu0 %v20948_v48, %s13273_s29 }
 0x2a1   : > { %3244 = vrot.lane.b32.xlu0 %v20952_v50, %s13273_s29 }
 0x2a5   : > { %v2782_v7 = vpop.f32.mrb[10].mxu0 }
 0x2a6   : > { %v15751_v28 = vadd.f32 %v2782_v7, %v15603_v12  ;;  %v2784_v0 = vpop.f32.mrb[11].mxu0 }
 0x2a7   : > { %v15755_v13 = vadd.f32 %v2784_v0, %v15603_v12 }
 0x2a8   : > { %22067 = vst [vmem:[#allocation108_spill] sm:$0xff] %v15751_v28  ;;  %v20953_v26 = vmax.f32 %v15751_v28, 0.0 }
 0x2a9   : > { %22068 = vst [vmem:[#allocation109_spill] sm:$0xff] %v15755_v13  ;;  %v20957_v48 = vmax.f32 %v15755_v13, 0.0  ;;  %v3211_v37 = vpop.permute.xlu0 %3210 }
 0x2aa   : > { %3246 = vrot.lane.b32.xlu1 %v20953_v26, %s13273_s29 }
 0x2ad   : > { %v2853_v5 = vpop.f32.mrb[10].mxu1 }
 0x2ae   : > { %v15762_v62 = vadd.f32 %v2853_v5, %v15603_v12  ;;  %v2855_v50 = vpop.f32.mrb[11].mxu1  ;;  %3248 = vrot.lane.b32.xlu1 %v20957_v48, %s13273_s29  ;;  %v3207_v5 = vpop.permute.xlu1 %3206 }
 0x2af   : > { %v15769_v0 = vadd.f32 %v2855_v50, %v15603_v12 }
 0x2b0   : > { %22069 = vst [vmem:[#allocation110_spill] sm:$0xff] %v15762_v62  ;;  %v20964_v7 = vmax.f32 %v15762_v62, 0.0 }
 0x2b1   : > { %22070 = vst [vmem:[#allocation111_spill] sm:$0xff] %v15769_v0  ;;  %v20965_v26 = vmax.f32 %v15769_v0, 0.0 }
 0x2b2   : > { %3250 = vrot.lane.b32.xlu0 %v20964_v7, %s13273_s29  ;;  %v3209_v17 = vpop.permute.xlu1 %3208 }
 0x2b3   : > { %v15789_v7 = vsel %vm22073_vm4, %v3207_v5, %v3209_v17  ;;  %vm22087_vm4 = vmmov %vm22074_vm1 }
 0x2b6   : > { %3252 = vrot.lane.b32.xlu0 %v20965_v26, %s13273_s29  ;;  %v15792_v26 = vsel %vm22074_vm1, %v3209_v17, %v3211_v37  ;;  %v3213_v43 = vpop.permute.xlu1 %3212 }
 0x2b7   : > { %v15807_v17 = vsel %vm22076_vm9, %v3211_v37, %v3213_v43  ;;  %vm22090_vm9 = vmmov %vm22074_vm1 }
 0x2ba   : > { %v2924_v59 = vpop.f32.mrb[12].mxu0  ;;  %v3217_v0 = vpop.permute.xlu1 %3216 }
 0x2bb   : > { %v15779_v11 = vadd.f32 %v2924_v59, %v15603_v12  ;;  %v2926_v48 = vpop.f32.mrb[13].mxu0 }
 0x2bc   : > { %v15783_v50 = vadd.f32 %v2926_v48, %v15603_v12  ;;  %v12737_v48 = vpack.i.bf16 %v15792_v26, %v15789_v7 }
 0x2bd   : > { %22071 = vst [vmem:[#allocation112_spill] sm:$0xff] %v15779_v11  ;;  %v20968_v31 = vmax.f32 %v15779_v11, 0.0 }
 0x2be   : > { %22072 = vst [vmem:[#allocation113_spill] sm:$0xff] %v15783_v50  ;;  %v20969_v59 = vmax.f32 %v15783_v50, 0.0 }
 0x2bf   : > { %3254 = vrot.lane.b32.xlu1 %v20968_v31, %s13273_s29  ;;  %v15804_v31 = vsel %vm22075_vm2, 0.0, %v3207_v5  ;;  %vm22088_vm2 = vmmov %vm22074_vm1 }
 0x2c3   : > { %3256 = vrot.lane.b32.xlu1 %v20969_v59, %s13273_s29  ;;  %v12752_v59 = vpack.i.bf16 %v15807_v17, %v15804_v31 }
 0x2c7   : > { %12738 = vrot.lane.b32.xlu1 %v12737_v48, %s13275_s14 }
 0x2cb   : > { %3372 = vrot.lane.b32.xlu1 %v15789_v7, %s13274_s12 }
 0x2cf   : > { %12748 = vrot.lane.b32.xlu1 %v12737_v48, %s13277_s22 }
 0x2d3   : > { %12753 = vrot.lane.b32.xlu1 %v12752_v59, %s13277_s22 }
 0x2d7   : > { %12763 = vrot.lane.b32.xlu1 %v12752_v59, %s13276_s15 }
 0x2db   : > { %3376 = vrot.lane.b32.xlu1 %v15807_v17, %s13274_s12 }
 0x2f1   : > { %v2995_v6 = vpop.f32.mrb[12].mxu1 }
 0x2f2   : > { %v15817_v11 = vadd.f32 %v2995_v6, %v15603_v12  ;;  %v2997_v5 = vpop.f32.mrb[13].mxu1 }
 0x2f3   : > { %v15821_v50 = vadd.f32 %v2997_v5, %v15603_v12 }
 0x2f4   : > { %22077 = vst [vmem:[#allocation114_spill] sm:$0xff] %v15817_v11  ;;  %v20981_v37 = vmax.f32 %v15817_v11, 0.0  ;;  %v3221_v11 = vpop.permute.xlu1 %3220 }
 0x2f5   : > { %22078 = vst [vmem:[#allocation115_spill] sm:$0xff] %v15821_v50  ;;  %v20983_v62 = vmax.f32 %v15821_v50, 0.0 }
 0x2f6   : > { %3258 = vrot.lane.b32.xlu0 %v20981_v37, %s13273_s29  ;;  %v3215_v37 = vpop.permute.xlu0 %3214 }
 0x2f7   : > { %v15848_v50 = vsel %vm22082_vm13, %v3215_v37, %v3217_v0  ;;  %vm22094_vm13 = vmmov %vm22074_vm1 }
 0x2f8   : > { %v3225_v47 = vpop.permute.xlu1 %3224 }
 0x2fa   : > { %3260 = vrot.lane.b32.xlu0 %v20983_v62, %s13273_s29 }
 0x2fb   : > { %v3066_v23 = vpop.f32.mrb[14].mxu0 }
 0x2fc   : > { %v15831_v6 = vadd.f32 %v3066_v23, %v15603_v12  ;;  %v3068_v60 = vpop.f32.mrb[15].mxu0  ;;  %v15845_v23 = vsel %vm22081_vm5, %v3213_v43, %v3215_v37  ;;  %vm22092_vm5 = vmmov %vm22074_vm1 }
 0x2fd   : > { %v15835_v5 = vadd.f32 %v3068_v60, %v15603_v12  ;;  %v3219_v60 = vpop.permute.xlu0 %3218 }
 0x2fe   : > { %22079 = vst [vmem:[#allocation116_spill] sm:$0xff] %v15831_v6  ;;  %v20988_v8 = vmax.f32 %v15831_v6, 0.0  ;;  %3370 = vrot.lane.b32.xlu0 %v15804_v31, %s13274_s12  ;;  %v15861_v43 = vsel %vm22084_vm10, %v3219_v60, %v3221_v11  ;;  %vm22098_vm10 = vmmov %vm22074_vm1 }
 0x2ff   : > { %22080 = vst [vmem:[#allocation117_spill] sm:$0xff] %v15835_v5  ;;  %v20990_v62 = vmax.f32 %v15835_v5, 0.0  ;;  %v3229_v5 = vpop.permute.xlu1 %3228 }
 0x300   : > { %3262 = vrot.lane.b32.xlu1 %v20988_v8, %s13273_s29  ;;  %v12772_v8 = vpack.i.bf16 %v15848_v50, %v15845_v23 }
 0x302   : > { %12743 = vrot.lane.b32.xlu0 %v12752_v59, %s13275_s14  ;;  %v15858_v59 = vsel %vm22083_vm15, %v3217_v0, %v3219_v60  ;;  %v3223_v60 = vpop.permute.xlu0 %3222  ;;  %vm22096_vm15 = vmmov %vm22074_vm1 }
 0x304   : > { %3264 = vrot.lane.b32.xlu1 %v20990_v62, %s13273_s29  ;;  %v12782_v62 = vpack.i.bf16 %v15861_v43, %v15858_v59 }
 0x305   : > { %v3137_v28 = vpop.f32.mrb[14].mxu1 }
 0x306   : > { %3374 = vrot.lane.b32.xlu0 %v15792_v26, %s13274_s12  ;;  %v3139_v37 = vpop.f32.mrb[15].mxu1  ;;  %v15864_v6 = vadd.f32 %v3137_v28, %v15603_v12 }
 0x307   : > { %v15872_v0 = vadd.f32 %v3139_v37, %v15603_v12  ;;  %v15888_v12 = vsel %vm22087_vm4, %v3221_v11, %v3223_v60  ;;  %v15891_v37 = vsel %vm22074_vm1, %v3223_v60, %v3225_v47  ;;  %vm22100_vm4 = vcmask 1039360  }
 0x308   : > { %22085 = vst [vmem:[#allocation118_spill] sm:$0xff] %v15864_v6  ;;  %12773 = vrot.lane.b32.xlu1 %v12772_v8, %s13277_s22  ;;  %v20994_v19 = vmax.f32 %v15864_v6, 0.0  ;;  %v3227_v6 = vpop.permute.xlu0 %3226 }
 0x309   : > { %22086 = vst [vmem:[#allocation119_spill] sm:$0xff] %v15872_v0  ;;  %v20996_v28 = vmax.f32 %v15872_v0, 0.0  ;;  %v15899_v0 = vsel %vm22088_vm2, %v3225_v47, %v3227_v6  ;;  %v15902_v13 = vsel %vm22090_vm9, %v3227_v6, %v3229_v5  ;;  %vm22103_vm2 = vmmov %vm22074_vm1 }
 0x30a   : > { %12758 = vrot.lane.b32.xlu0 %v12737_v48, %s13276_s15  ;;  %v3233_v48 = vpop.permute.xlu1 %3232  ;;  %22089 = vst [vmem:[#allocation120_spill] sm:$0xff] %v15899_v0  ;;  %22091 = vst [vmem:[#allocation121_spill] sm:$0xff] %v15902_v13  ;;  %v12812_v60 = vpack.i.bf16 %v15902_v13, %v15899_v0 }
 0x30b   : > { %vm22105_vm9 = vmmov %vm22074_vm1 }
 0x30c   : > { %12783 = vrot.lane.b32.xlu1 %v12782_v62, %s13275_s14  ;;  %v3231_v47 = vpop.permute.xlu0 %3230 }
 0x30d   : > { %v15922_v39 = vsel %vm22092_vm5, %v3229_v5, %v3231_v47  ;;  %v15925_v25 = vsel %vm22094_vm13, %v3231_v47, %v3233_v48  ;;  %vm22107_vm5 = vmmov %vm22074_vm1 }
 0x30e   : > { %3266 = vrot.lane.b32.xlu0 %v20994_v19, %s13273_s29  ;;  %v3237_v19 = vpop.permute.xlu1 %3236  ;;  %22093 = vst [vmem:[#allocation122_spill] sm:$0xff] %v15922_v39  ;;  %22095 = vst [vmem:[#allocation123_spill] sm:$0xff] %v15925_v25  ;;  %v12832_v56 = vpack.i.bf16 %v15925_v25, %v15922_v39 }
 0x30f   : > { %vm22109_vm13 = vmmov %vm22074_vm1 }
 0x310   : > { %3382 = vrot.lane.b32.xlu1 %v15858_v59, %s13274_s12  ;;  %v3235_v36 = vpop.permute.xlu0 %3234 }
 0x311   : > { %v15935_v10 = vsel %vm22096_vm15, %v3233_v48, %v3235_v36  ;;  %v15938_v5 = vsel %vm22098_vm10, %v3235_v36, %v3237_v19  ;;  %vm22111_vm15 = vmmov %vm22074_vm1 }
 0x312   : > { %3268 = vrot.lane.b32.xlu0 %v20996_v28, %s13273_s29  ;;  %v12802_v28 = vpack.i.bf16 %v15891_v37, %v15888_v12  ;;  %v3241_v11 = vpop.permute.xlu1 %3240  ;;  %22097 = vst [vmem:[#allocation124_spill] sm:$0xff] %v15935_v10  ;;  %22099 = vst [vmem:[#allocation125_spill] sm:$0xff] %v15938_v5  ;;  %v12842_v1 = vpack.i.bf16 %v15938_v5, %v15935_v10 }
 0x313   : > { %vm22113_vm10 = vmmov %vm22074_vm1 }
 0x314   : > { %12793 = vrot.lane.b32.xlu1 %v12782_v62, %s13276_s15  ;;  %v3239_v48 = vpop.permute.xlu0 %3238 }
 0x316   : > { %3378 = vrot.lane.b32.xlu0 %v15845_v23, %s13274_s12 }
 0x318   : > { %3384 = vrot.lane.b32.xlu1 %v15861_v43, %s13274_s12  ;;  %v3243_v4 = vpop.permute.xlu0 %3242 }
 0x31a   : > { %12768 = vrot.lane.b32.xlu0 %v12772_v8, %s13275_s14 }
 0x31c   : > { %12803 = vrot.lane.b32.xlu1 %v12802_v28, %s13277_s22  ;;  %v3247_v2 = vpop.permute.xlu1 %3246 }
 0x31e   : > { %12778 = vrot.lane.b32.xlu0 %v12772_v8, %s13276_s15 }
 0x320   : > { %12813 = vrot.lane.b32.xlu1 %v12812_v60, %s13275_s14  ;;  %v15913_v6 = vpop.permute.xlu1 %3248 }
 0x322   : > { %3380 = vrot.lane.b32.xlu0 %v15848_v50, %s13274_s12 }
 0x324   : > { %3390 = vrot.lane.b32.xlu1 %v15899_v0, %s13274_s12 }
 0x326   : > { %12788 = vrot.lane.b32.xlu0 %v12782_v62, %s13277_s22 }
 0x328   : > { %12823 = vrot.lane.b32.xlu1 %v12812_v60, %s13276_s15 }
 0x32a   : > { %3386 = vrot.lane.b32.xlu0 %v15888_v12, %s13274_s12 }
 0x32c   : > { %3392 = vrot.lane.b32.xlu1 %v15902_v13, %s13274_s12 }
 0x32e   : > { %12798 = vrot.lane.b32.xlu0 %v12802_v28, %s13275_s14 }
 0x330   : > { %12833 = vrot.lane.b32.xlu1 %v12832_v56, %s13277_s22 }
 0x331   : > { %v15919_v8 = vpop.permute.xlu1 %3254 }
 0x332   : > { %12808 = vrot.lane.b32.xlu0 %v12802_v28, %s13276_s15 }
 0x334   : > { %12843 = vrot.lane.b32.xlu1 %v12842_v1, %s13275_s14 }
 0x335   : > { %v15930_v62 = vpop.permute.xlu1 %3256 }
 0x336   : > { %3388 = vrot.lane.b32.xlu0 %v15891_v37, %s13274_s12 }
 0x338   : > { %3398 = vrot.lane.b32.xlu1 %v15935_v10, %s13274_s12 }
 0x339   : > { %v15942_v47 = vpop.permute.xlu1 %12738 }
 0x33a   : > { %v21016_v22 = vunpack.i.h.bf16 %v15942_v47  ;;  %v21017_v51 = vunpack.i.l.bf16 %v15942_v47  ;;  %12818 = vrot.lane.b32.xlu0 %v12812_v60, %s13277_s22 }
 0x33c   : > { %v3989_v36 = vsel %vm22100_vm4, %v21017_v51, %v21016_v22  ;;  %12853 = vrot.lane.b32.xlu1 %v12842_v1, %s13276_s15  ;;  %v15969_v22 = vsel %vm22074_vm1, %v3237_v19, %v3239_v48  ;;  %v15984_v19 = vsel %vm22107_vm5, %v3241_v11, %v3243_v4  ;;  %vm22115_vm4 = vmmov %vm22074_vm1 }
 0x33d   : > { %v15957_v28 = vpack.c.bf16 %v3989_v36, %v15789_v7  ;;  %22102 = vst [vmem:[#allocation27_spill] sm:$0xff] %v15969_v22  ;;  %v15972_v7 = vsel %vm22103_vm2, %v3239_v48, %v3241_v11  ;;  %v3245_v36 = vpop.permute.xlu0 %3244  ;;  %22108 = vst [vmem:[#allocation128_spill] sm:$0xff] %v15984_v19  ;;  %v3373_v29 = vpop.permute.xlu1 %3372 }
 0x33e   : > { %3394 = vrot.lane.b32.xlu0 %v15922_v39, %s13274_s12  ;;  %22104 = vst [vmem:[#allocation126_spill] sm:$0xff] %v15972_v7  ;;  %v12862_v60 = vpack.i.bf16 %v15972_v7, %v15969_v22  ;;  %v15980_v51 = vsel %vm22105_vm9, %v3243_v4, %v3245_v36  ;;  %v15999_v4 = vsel %vm22109_vm13, %v3245_v36, %v3247_v2  ;;  %vm22118_vm2 = vmmov %vm22074_vm1  ;;  %vm22123_vm13 = vcmask 1039360  }
 0x33f   : > { %11286 = vmatprep.subr.msk.bf16.mxu0 %vm13798_vm6, %v15957_v28  ;;  %22106 = vst [vmem:[#allocation127_spill] sm:$0xff] %v15980_v51  ;;  %v12872_v48 = vpack.i.bf16 %v15980_v51, %v15984_v19  ;;  %22110 = vst [vmem:[#allocation129_spill] sm:$0xff] %v15999_v4 }
 0x340   : > { %3400 = vrot.lane.b32.xlu1 %v15938_v5, %s13274_s12  ;;  %vm22120_vm9 = vmmov %vm22074_vm1 }
 0x341   : > { %v3251_v11 = vpop.permute.xlu0 %3250  ;;  %v16013_v35 = vpop.permute.xlu1 %12748  ;;  %vm22121_vm5 = vmmov %vm22074_vm1 }
 0x342   : > { %12828 = vrot.lane.b32.xlu0 %v12832_v56, %s13275_s14  ;;  %v12750_v40 = vunpack.i.l.bf16 %v16013_v35  ;;  %v22128_v54 = vunpack.i.h.bf16 %v16013_v35 }
 0x344   : > { %12863 = vrot.lane.b32.xlu1 %v12862_v60, %s13277_s22 }
 0x345   : > { %v3253_v36 = vpop.permute.xlu0 %3252 }
 0x346   : > { %12838 = vrot.lane.b32.xlu0 %v12832_v56, %s13276_s15  ;;  %v16003_v56 = vsel %vm22111_vm15, %v3247_v2, %v15913_v6  ;;  %v16018_v2 = vsel %vm22113_vm10, %v3251_v11, %v3253_v36  ;;  %vm22124_vm15 = vmmov %vm22074_vm1  ;;  %vm22125_vm10 = vcmask 1031168  }
 0x347   : > { %22112 = vst [vmem:[#allocation130_spill] sm:$0xff] %v16003_v56  ;;  %22114 = vst [vmem:[#allocation131_spill] sm:$0xff] %v16018_v2 }
 0x348   : > { %12873 = vrot.lane.b32.xlu1 %v12872_v48, %s13275_s14 }
 0x34a   : > { %3396 = vrot.lane.b32.xlu0 %v15925_v25, %s13274_s12 }
 0x34c   : > { %3404 = vrot.lane.b32.xlu1 %v15972_v7, %s13274_s12 }
 0x34e   : > { %12848 = vrot.lane.b32.xlu0 %v12842_v1, %s13277_s22  ;;  %v12887_v1 = vpack.i.bf16 %v16003_v56, %v15999_v4 }
 0x350   : > { %12878 = vrot.lane.b32.xlu1 %v12872_v48, %s13277_s22 }
 0x352   : > { %3402 = vrot.lane.b32.xlu0 %v15969_v22, %s13274_s12 }
 0x354   : > { %3410 = vrot.lane.b32.xlu1 %v15999_v4, %s13274_s12  ;;  %v16024_v4 = vsel %vm22115_vm4, %v15913_v6, %v3251_v11  ;;  %v16041_v6 = vsel %vm22118_vm2, %v15919_v8, %v15930_v62  ;;  %vm22126_vm4 = vmmov %vm22074_vm1  ;;  %vm22129_vm2 = vcmask 523264  }
 0x355   : > { %22116 = vst [vmem:[#allocation132_spill] sm:$0xff] %v16024_v4  ;;  %v12907_v22 = vpack.i.bf16 %v16018_v2, %v16024_v4  ;;  %22119 = vst [vmem:[#allocation134_spill] sm:$0xff] %v16041_v6  ;;  %v3599_v13 = vsel %vm22129_vm2, %v12750_v40, %v22128_v54  ;;  %v22132_v54 = vld [vmem:[#allocation30_spill] sm:$0xff] }
 0x356   : > { %12858 = vrot.lane.b32.xlu0 %v12862_v60, %s13275_s14 }
 0x358   : > { %12888 = vrot.lane.b32.xlu1 %v12887_v1, %s13275_s14 }
 0x35a   : > { %12868 = vrot.lane.b32.xlu0 %v12862_v60, %s13276_s15  ;;  %v16027_v60 = vpop.permute.xlu1 %12753 }
 0x35b   : > { %v12755_v44 = vunpack.i.l.bf16 %v16027_v60 }
 0x35c   : > { %12898 = vrot.lane.b32.xlu1 %v12887_v1, %s13276_s15 }
 0x35e   : > { %3406 = vrot.lane.b32.xlu0 %v15984_v19, %s13274_s12  ;;  %v16036_v19 = vsel %vm22074_vm1, %v3253_v36, %v15919_v8  ;;  %vm22127_vm1 = vmmov %vm22125_vm10 }
 0x35f   : > { %22117 = vst [vmem:[#allocation133_spill] sm:$0xff] %v16036_v19 }
 0x360   : > { %3412 = vrot.lane.b32.xlu1 %v16003_v56, %s13274_s12  ;;  %v12917_v56 = vpack.i.bf16 %v16041_v6, %v16036_v19 }
 0x362   : > { %12883 = vrot.lane.b32.xlu0 %v12872_v48, %s13276_s15  ;;  %v16043_v48 = vpop.permute.xlu1 %12763 }
 0x364   : > { %12908 = vrot.lane.b32.xlu1 %v12907_v22, %s13277_s22 }
 0x366   : > { %3408 = vrot.lane.b32.xlu0 %v15980_v51, %s13274_s12  ;;  %v16051_v36 = vpop.permute.xlu1 %3376 }
 0x368   : > { %v3259_v11 = vpop.permute.xlu0 %3258  ;;  %3418 = vrot.lane.b32.xlu1 %v16036_v19, %s13274_s12 }
 0x369   : > { %v16068_v5 = vsel %vm22121_vm5, %v15930_v62, %v3259_v11  ;;  %vm22133_vm5 = vnez %v22132_v54  ;;  %v22140_v54 = vld [vmem:[#allocation25_spill] sm:$0xff] }
 0x36a   : > { %12893 = vrot.lane.b32.xlu0 %v12887_v1, %s13277_s22 }
 0x36c   : > { %v3261_v51 = vpop.permute.xlu0 %3260  ;;  %12918 = vrot.lane.b32.xlu1 %v12917_v56, %s13275_s14 }
 0x36d   : > { %v16058_v7 = vsel %vm22120_vm9, %v3259_v11, %v3261_v51  ;;  %vm22131_vm9 = vmmov %vm22129_vm2 }
 0x36e   : > { %12903 = vrot.lane.b32.xlu0 %v12907_v22, %s13275_s14  ;;  %v12937_v61 = vpack.i.bf16 %v16058_v7, %v16068_v5 }
 0x370   : > { %v3371_v8 = vpop.permute.xlu0 %3370  ;;  %12928 = vrot.lane.b32.xlu1 %v12917_v56, %s13276_s15 }
 0x372   : > { %3414 = vrot.lane.b32.xlu0 %v16024_v4, %s13274_s12  ;;  %v3263_v30 = vpop.permute.xlu1 %3262 }
 0x373   : > { %v16085_v39 = vsel %vm22126_vm4, %v3261_v51, %v3263_v30  ;;  %v3598_v51 = vsel %vm22131_vm9, %v12755_v44, %v12750_v40  ;;  %v22134_v40 = vld [vmem:[#allocation31_spill] sm:$0xff] }
 0x374   : > { %v16060_v1 = vpop.permute.xlu0 %12743  ;;  %3420 = vrot.lane.b32.xlu1 %v16041_v6, %s13274_s12  ;;  %v22122_v6 = vunpack.i.l.bf16 %v15942_v47 }
 0x375   : > { %v12745_v10 = vunpack.i.l.bf16 %v16060_v1 }
 0x376   : > { %12913 = vrot.lane.b32.xlu0 %v12907_v22, %s13276_s15  ;;  %v3265_v4 = vpop.permute.xlu1 %3264  ;;  %v3436_v22 = vsel %vm22125_vm10, %v3371_v8, %v3373_v29  ;;  %vm22138_vm10 = vcmask 506880  }
 0x377   : > { %v3988_v19 = vsel %vm22123_vm13, %v12745_v10, %v22122_v6  ;;  %v16079_v38 = vsel %vm22124_vm15, %v3263_v30, %v3265_v4  ;;  %v11293_v30 = vpack.c.bf16 %v3598_v51, %v3436_v22  ;;  %vm22135_vm13 = vnez %v22134_v40  ;;  %vm22139_vm4 = vmmov %vm22138_vm10 }
 0x378   : > { %v11287_v62 = vpack.c.bf16 %v3988_v19, %v15804_v31  ;;  %v3375_v11 = vpop.permute.xlu0 %3374  ;;  %12938 = vrot.lane.b32.xlu1 %v12937_v61, %s13277_s22  ;;  %v16099_v19 = vpack.i.bf16 %v16079_v38, %v16085_v39  ;;  %vm22137_vm15 = vcmask 1039360  }
 0x379   : > { %v3437_v25 = vsel %vm22127_vm1, %v3373_v29, %v3375_v11  ;;  %v12746_v29 = vunpack.i.h.bf16 %v16060_v1  ;;  %v22136_v1 = vunpack.i.h.bf16 %v15942_v47  ;;  %vm22141_vm1 = vcmp.lt.s32.totalorder %v22140_v54, 63 }
 0x37a   : > { %v11290_v10 = vpack.c.bf16 %v3599_v13, %v3437_v25  ;;  %3416 = vrot.lane.b32.xlu0 %v16018_v2, %s13274_s12  ;;  %v16093_v6 = vpop.permute.xlu1 %12773  ;;  %11289 = vmatpush1.bf16.msk.msra.mxu0 %vm13812_vm7, %v11287_v62  ;;  %v12765_v13 = vunpack.i.l.bf16 %v16043_v48  ;;  %vm11297_vm2 = vmpackc.low %vm22141_vm1, %vm21549_vm3  ;;  %v22143_v47 = vmax.f32 %v15614_v57, 0.0 }
 0x37b   : > { %v3990_v22 = vsel %vm22137_vm15, %v22136_v1, %v12746_v29  ;;  %vm22147_vm15 = vmmov %vm22141_vm1  ;;  %vm22152_vm1 = vcmask 588800  }
 0x37c   : > { %v16103_v8 = vpop.permute.xlu0 %12758  ;;  %12948 = vrot.lane.b32.xlu1 %v16099_v19, %s13275_s14  ;;  %11292 = vmatprep.subr.msk.bf16.mxu0 %vm22133_vm5, %v11290_v10  ;;  %v11302_v40 = vpack.c.bf16 %v3990_v22, %v15792_v26 }
 0x37d   : > { %v21045_v62 = vunpack.i.h.bf16 %v16103_v8  ;;  %v12760_v2 = vunpack.i.l.bf16 %v16103_v8 }
 0x37e   : > { %12923 = vrot.lane.b32.xlu0 %v12917_v56, %s13277_s22  ;;  %v16113_v44 = vpop.permute.xlu1 %12783  ;;  %11295 = vmatpush1.bf16.msk.msra.mxu0 %vm22135_vm13, %v11293_v30  ;;  %v22142_v56 = vmax.f32 %v15610_v20, 0.0  ;;  %vm22146_vm13 = vcmask 1031168  }
 0x37f   : > { %v3760_v51 = vsel %vm22138_vm10, %v12765_v13, %v12760_v2  ;;  %v3761_v10 = vsel %vm22139_vm4, %v12760_v2, %v21045_v62  ;;  %v22144_v13 = vld [vmem:[#allocation26_spill] sm:$0xff]  ;;  %v3438_v26 = vsel %vm22146_vm13, %v3375_v11, %v16051_v36 }
 0x380   : > { %v11299_v0 = vpack.c.bf16 %v3760_v51, %v22142_v56  ;;  %v3267_v24 = vpop.permute.xlu0 %3266  ;;  %3426 = vrot.lane.b32.xlu1 %v16085_v39, %s13274_s12  ;;  %v11296_v30 = vpack.c.bf16 %v3761_v10, %v22143_v47  ;;  %vm22145_vm9 = vcmp.lt.s32.totalorder %v22144_v13, 63  ;;  %v12775_v10 = vunpack.i.l.bf16 %v16093_v6 }
 0x381   : > { %vm11300_vm5 = vmpackc.low %vm22145_vm9, %vm21549_vm3 }
 0x382   : > { %12933 = vrot.lane.b32.xlu0 %v12937_v61, %s13275_s14  ;;  %v16137_v2 = vpop.permute.xlu1 %3382  ;;  %11298 = vmatprep.subr.msk.bf16.mxu0 %vm11297_vm2, %v11296_v30  ;;  %vm22151_vm4 = vmmov %vm22145_vm9  ;;  %vm22153_vm2 = vcmask 1039360  }
 0x383   : > { %11301 = vmatpush1.bf16.msk.msra.mxu0 %vm11300_vm5, %v11299_v0  ;;  %vm22154_vm9 = vmmov %vm22153_vm2 }
 0x384   : > { %v3269_v20 = vpop.permute.xlu0 %3268  ;;  %12958 = vrot.lane.b32.xlu1 %v16099_v19, %s13276_s15  ;;  %11304 = vmatprep.subr.msk.bf16.mxu0 %vm13798_vm6, %v11302_v40  ;;  %vm22148_vm6 = vcmask 531456   ;;  %vm22155_vm5 = vmmov %vm22153_vm2 }
 0x385   : > { %vm22150_vm10 = vmmov %vm22148_vm6 }
 0x386   : > { %3422 = vrot.lane.b32.xlu0 %v16068_v5, %s13274_s12  ;;  %v16146_v57 = vpop.permute.xlu1 %12793  ;;  %v16174_v1 = vsel %vm22150_vm10, %v3269_v20, 0.0  ;;  %vm22159_vm10 = vnez %v21551_v32 }
 0x387   : > { %11307 = vmatpush1.bf16.msk.msra.mxu0 %vm13812_vm7, %v15957_v28  ;;  %v16168_v28 = vsel %vm22148_vm6, %v3265_v4, %v3267_v24  ;;  %vm22149_vm7 = vmmov %vm22148_vm6  ;;  %vm22157_vm6 = vnez %v21527_v33  ;;  %v22184_v33 = vmax.f32 %v15642_v27, 0.0  ;;  %v22190_v27 = vmax.f32 %v15639_v42, 0.0 }
 0x388   : > { %v16153_v0 = vpop.permute.xlu0 %3378  ;;  %3428 = vrot.lane.b32.xlu1 %v16079_v38, %s13274_s12  ;;  %10284 = vmatprep.subr.msk.mxu0 %vm22147_vm15, %v3438_v26  ;;  %v16171_v11 = vsel %vm22149_vm7, %v3267_v24, %v3269_v20  ;;  %v12756_v24 = vunpack.i.h.bf16 %v16027_v60  ;;  %vm22156_vm15 = vcmask 523264   ;;  %vm22158_vm7 = vcmask 506880  }
 0x389   : > { %v16192_v56 = vpack.i.bf16 %v16174_v1, %v16171_v11  ;;  %v16202_v60 = vsel %vm22146_vm13, %v16051_v36, %v16153_v0 }
 0x38a   : > { %12943 = vrot.lane.b32.xlu0 %v12937_v61, %s13276_s15  ;;  %v16165_v31 = vpop.permute.xlu1 %3384  ;;  %v12785_v61 = vunpack.i.l.bf16 %v16113_v44 }
 0x38b   : > { %10285 = vmatpush1.msk.msra.mxu0 %vm22151_vm4, %v3437_v25  ;;  %vm22160_vm4 = vnez %v21529_v3 }
 0x38c   : > { %v12769_v22 = vpop.permute.xlu0 %12768  ;;  %3592 = vrot.lane.b32.xlu1 %v16168_v28, %s13277_s22  ;;  %10286 = vmatmul.mubr.msk.f32.vlgmr.msra.gmra.mrb[16].mxu0 %vm22152_vm1, %v16162_v16  ;;  %vm22162_vm1 = vmmov %vm22156_vm15 }
 0x38d   : > { %v12771_v4 = vunpack.i.h.bf16 %v12769_v22  ;;  %v12770_v51 = vunpack.i.l.bf16 %v12769_v22  ;;  %4270 = vmatprep.mubr.f32.mxu0 %v21567_v15 }
 0x38e   : > { %3424 = vrot.lane.b32.xlu0 %v16058_v7, %s13274_s12  ;;  %v16188_v25 = vpop.permute.xlu1 %12803 }
 0x38f   : > { %v3991_v47 = vsel %vm22153_vm2, %v12746_v29, %v12770_v51  ;;  %v3992_v30 = vsel %vm22154_vm9, %v12770_v51, %v12771_v4  ;;  %v3993_v20 = vsel %vm22155_vm5, %v12771_v4, %v12785_v61  ;;  %v12766_v51 = vunpack.i.h.bf16 %v16043_v48 }
 0x390   : > { %v11326_v22 = vpack.c.bf16 %v3992_v30, %v15845_v23  ;;  %v12779_v62 = vpop.permute.xlu0 %12778  ;;  %12963 = vrot.lane.b32.xlu1 %v16192_v56, %s13275_s14  ;;  %v11308_v13 = vpack.c.bf16 %v3991_v47, %v15807_v17  ;;  %v16209_v29 = vpack.c.bf16 %v3993_v20, %v15848_v50  ;;  %v3601_v4 = vsel %vm22156_vm15, %v12756_v24, %v12775_v10  ;;  %v22164_v30 = vld [vmem:[#allocation34_spill] sm:$0xff]  ;;  %vm22168_vm15 = vmmov %vm22158_vm7 }
 0x391   : > { %v12780_v54 = vunpack.i.l.bf16 %v12779_v62  ;;  %v11314_v36 = vpack.c.bf16 %v3601_v4, %v16202_v60  ;;  %v22161_v50 = vunpack.i.h.bf16 %v16013_v35  ;;  %vm22163_vm2 = vnez %v21558_v55 }
 0x392   : > { %11310 = vmatprep.subr.msk.bf16.mxu1 %vm22157_vm6, %v11308_v13  ;;  %12953 = vrot.lane.b32.xlu0 %v16099_v19, %s13277_s22  ;;  %v16217_v23 = vpop.permute.xlu1 %12813  ;;  %vm22165_vm9 = vnez %v22164_v30  ;;  %vm22166_vm5 = vcmp.lt.s32.totalorder %v13816_v41, 63  ;;  %v22169_v20 = vmax.f32 %v15628_v21, 0.0  ;;  %v12795_v21 = vunpack.i.l.bf16 %v16146_v57 }
 0x393   : > { %v3763_v17 = vsel %vm22158_vm7, %v12766_v51, %v12780_v54  ;;  %11334 = vmatprep.subr.msk.bf16.mxu0 %vm22159_vm10, %v16209_v29  ;;  %11313 = vmatpush1.bf16.msk.msra.mxu1 %vm22160_vm4, %v11302_v40  ;;  %v3600_v48 = vsel %vm22162_vm1, %v22161_v50, %v12756_v24  ;;  %vm11321_vm13 = vmpackc.low %vm22166_vm5, %vm21549_vm3  ;;  %v22167_v40 = vunpack.i.h.bf16 %v16103_v8  ;;  %v22170_v50 = vld [vmem:[#allocation35_spill] sm:$0xff]  ;;  %v22172_v8 = vld [vmem:[#allocation29_spill] sm:$0xff]  ;;  %vm22175_vm5 = vcmask 1031168  }
 0x394   : > { %11337 = vmatpush1.bf16.msk.msra.mxu0 %vm22163_vm2, %v11326_v22  ;;  %v3381_v19 = vpop.permute.xlu0 %3380  ;;  %3434 = vrot.lane.b32.xlu1 %v16174_v1, %s13274_s12  ;;  %v11317_v47 = vpack.c.bf16 %v3600_v48, %v3438_v26  ;;  %v11320_v4 = vpack.c.bf16 %v3763_v17, %v22169_v20  ;;  %v12781_v26 = vunpack.i.h.bf16 %v12779_v62  ;;  %vm22171_vm7 = vnez %v22170_v50 }
 0x395   : > { %11316 = vmatprep.subr.msk.bf16.mxu1 %vm22165_vm9, %v11314_v36  ;;  %v3762_v35 = vsel %vm22168_vm15, %v22167_v40, %v12766_v51  ;;  %v12776_v36 = vunpack.i.h.bf16 %v16093_v6  ;;  %vm22173_vm1 = vcmp.lt.s32.totalorder %v22172_v8, 63  ;;  %v22174_v51 = vmax.f32 %v15625_v52, 0.0 }
 0x396   : > { %3982 = vrot.lane.b32.xlu0 %v16168_v28, %s13275_s14  ;;  %v16243_v24 = vpop.permute.xlu1 %3390  ;;  %vm11324_vm9 = vmpackc.low %vm22173_vm1, %vm21549_vm3  ;;  %v3440_v17 = vsel %vm22175_vm5, %v16153_v0, %v3381_v19 }
 0x397   : > { %11319 = vmatpush1.bf16.msk.msra.mxu1 %vm22171_vm7, %v11317_v47  ;;  %v11323_v30 = vpack.c.bf16 %v3762_v35, %v22174_v51  ;;  %v12786_v47 = vunpack.i.h.bf16 %v16113_v44  ;;  %vm22178_vm7 = vcmask 523264  }
 0x398   : > { %v12789_v48 = vpop.permute.xlu0 %12788  ;;  %12973 = vrot.lane.b32.xlu1 %v16192_v56, %s13276_s15  ;;  %11322 = vmatprep.subr.msk.bf16.mxu1 %vm11321_vm13, %v11320_v4  ;;  %vm22176_vm13 = vmmov %vm22168_vm15 }
 0x399   : > { %v12790_v62 = vunpack.i.l.bf16 %v12789_v48  ;;  %v3765_v40 = vsel %vm22176_vm13, %v12781_v26, %v12795_v21  ;;  %vm22177_vm15 = vmmov %vm22175_vm5  ;;  %vm22180_vm5 = vcmp.lt.s32.totalorder %v13939_v9, 63 }
 0x39a   : > { %3430 = vrot.lane.b32.xlu0 %v16168_v28, %s13274_s12  ;;  %v16262_v6 = vpop.permute.xlu1 %12823  ;;  %v16270_v52 = vsel %vm22177_vm15, %v3381_v19, %v16137_v2  ;;  %vm22179_vm1 = vmmov %vm22178_vm7  ;;  %v3764_v19 = vsel %vm22181_vm8, %v12780_v54, %v12781_v26  ;;  %vm22188_vm15 = vcmp.lt.s32.totalorder %v13816_v41, 63  ;;  %v12791_v26 = vunpack.i.h.bf16 %v12789_v48 }
 0x39b   : > { %v3603_v35 = vsel %vm22178_vm7, %v12776_v36, %v12790_v62  ;;  %11325 = vmatpush1.bf16.msk.msra.mxu1 %vm11324_vm9, %v11323_v30  ;;  %v3602_v0 = vsel %vm22179_vm1, %v12775_v10, %v12776_v36  ;;  %vm11345_vm13 = vmpackc.low %vm22180_vm5, %vm21549_vm3  ;;  %v22182_v10 = vld [vmem:[#allocation36_spill] sm:$0xff]  ;;  %v22186_v30 = vld [vmem:[#allocation38_spill] sm:$0xff]  ;;  %vm22189_vm7 = vcmp.lt.s32.totalorder %v13949_v53, 63  ;;  %v11347_v44 = vpack.c.bf16 %v3764_v19, %v22190_v27 }
 0x39c   : > { %v16274_v20 = vpop.permute.xlu0 %3386  ;;  %11328 = vmatprep.subr.msk.bf16.mxu1 %vm22157_vm6, %v11326_v22  ;;  %v11338_v4 = vpack.c.bf16 %v3603_v35, %v16270_v52  ;;  %v11341_v50 = vpack.c.bf16 %v3602_v0, %v3440_v17  ;;  %vm22183_vm9 = vnez %v22182_v10  ;;  %v11344_v22 = vpack.c.bf16 %v3765_v40, %v22184_v33  ;;  %vm11348_vm1 = vmpackc.low %vm22189_vm7, %vm21549_vm3  ;;  %v4055_v10 = vld [vmem:[%s20666_s4] sm:$0xff] }
 0x39d   : > { %vm22185_vm6 = vcmask 1039360   ;;  %vm22187_vm8 = vnez %v22186_v30  ;;  %v12805_v40 = vunpack.i.l.bf16 %v16188_v25  ;;  %v12796_v0 = vunpack.i.h.bf16 %v16146_v57 }
 0x39e   : > { %3754 = vrot.lane.b32.xlu0 %v16168_v28, %s13276_s15  ;;  %v16285_v51 = vpop.permute.xlu1 %3392  ;;  %11340 = vmatprep.subr.msk.bf16.mxu0 %vm22183_vm9, %v11338_v4  ;;  %v3994_v36 = vsel %vm22185_vm6, %v12785_v61, %v12786_v47  ;;  %vm22192_vm5 = vmmov %vm22185_vm6  ;;  %vm22194_vm9 = vcmask 588800   ;;  %vm22195_vm6 = vcmask 523264   ;;  %vm22199_vm7 = vnez %v21589_v58  ;;  %v22235_v58 = vld [vmem:[#allocation120_spill] sm:$0xff] }
 0x39f   : > { %11331 = vmatpush1.bf16.msk.msra.mxu1 %vm22160_vm4, %v11308_v13  ;;  %11343 = vmatpush1.bf16.msk.msra.mxu0 %vm22187_vm8, %v11341_v50  ;;  %v11350_v13 = vpack.c.bf16 %v3994_v36, %v15858_v59  ;;  %vm22191_vm4 = vcmask 1031168   ;;  %v3605_v4 = vsel %vm22195_vm6, %v12791_v26, %v12805_v40  ;;  %vm22197_vm8 = vmmov %vm22195_vm6  ;;  %v12806_v57 = vunpack.i.h.bf16 %v16188_v25  ;;  %v22217_v25 = vld [vmem:[#allocation42_spill] sm:$0xff] }
 0x3a0   : > { %v12799_v54 = vpop.permute.xlu0 %12798  ;;  %10297 = vmatprep.subr.msk.mxu1 %vm22188_vm15, %v3440_v17  ;;  %11346 = vmatprep.subr.msk.bf16.mxu0 %vm11345_vm13, %v11344_v22  ;;  %v16314_v17 = vsel %vm22191_vm4, %v16165_v31, %v16274_v20  ;;  %vm22193_vm13 = vcmp.lt.s32.totalorder %v22172_v8, 63  ;;  %v3604_v32 = vsel %vm22197_vm8, %v12790_v62, %v12791_v26  ;;  %vm22198_vm15 = vcmask 506880  }
 0x3a1   : > { %v12800_v61 = vunpack.i.l.bf16 %v12799_v54  ;;  %v12801_v42 = vunpack.i.h.bf16 %v12799_v54  ;;  %v11362_v50 = vpack.c.bf16 %v3605_v4, %v16314_v17  ;;  %vm22206_vm8 = vmmov %vm22198_vm15  ;;  %v22207_v22 = vmax.f32 %v15656_v46, 0.0  ;;  %v22211_v46 = vld [vmem:[#allocation37_spill] sm:$0xff] }
 0x3a2   : > { %3432 = vrot.lane.b32.xlu0 %v16171_v11, %s13274_s12  ;;  %v16307_v3 = vpop.permute.xlu1 %12833  ;;  %v12825_v27 = vunpack.i.l.bf16 %v16262_v6 }
 0x3a3   : > { %v3995_v35 = vsel %vm22192_vm5, %v12786_v47, %v12800_v61  ;;  %10298 = vmatpush1.msk.msra.mxu1 %vm22193_vm13, %v16202_v60  ;;  %11349 = vmatpush1.bf16.msk.msra.mxu0 %vm11348_vm1, %v11347_v44  ;;  %v12815_v60 = vunpack.i.l.bf16 %v16217_v23  ;;  %vm22200_vm1 = vmmov %vm22191_vm4  ;;  %vm22203_vm13 = vnez %v21599_v63  ;;  %v22214_v44 = vld [vmem:[#allocation41_spill] sm:$0xff] }
 0x3a4   : > { %v12809_v48 = vpop.permute.xlu0 %12808  ;;  %10299 = vmatmul.mubr.msk.f32.vlgmr.msra.gmra.mrb[16].mxu1 %vm22194_vm9, %v16162_v16  ;;  %11352 = vmatprep.subr.msk.bf16.mxu0 %vm22159_vm10, %v11350_v13  ;;  %v11356_v59 = vpack.c.bf16 %v3995_v35, %v15861_v43  ;;  %vm22196_vm10 = vnez %v21586_v34  ;;  %vm22201_vm4 = vmmov %vm22192_vm5  ;;  %vm22202_vm5 = vcmp.lt.s32.totalorder %v13939_v9, 63  ;;  %vm22205_vm9 = vcmp.lt.s32.totalorder %v14077_v14, 63  ;;  %v22228_v34 = vld [vmem:[#allocation46_spill] sm:$0xff] }
 0x3a5   : > { %v12810_v47 = vunpack.i.l.bf16 %v12809_v48  ;;  %4341 = vmatprep.mubr.f32.mxu1 %v21567_v15  ;;  %v3997_v33 = vsel %vm22201_vm4, %v12801_v42, %v12815_v60  ;;  %vm11369_vm6 = vmpackc.low %vm22205_vm9, %vm21549_vm3  ;;  %v12811_v30 = vunpack.i.h.bf16 %v12809_v48  ;;  %vm22216_vm9 = vcmask 1031168  }
 0x3a6   : > { %12968 = vrot.lane.b32.xlu0 %v16192_v56, %s13277_s22  ;;  %v16332_v19 = vpop.permute.xlu1 %12843  ;;  %11358 = vmatprep.subr.msk.bf16.mxu1 %vm22196_vm10, %v11356_v59  ;;  %v3442_v56 = vsel %vm22200_vm1, %v16137_v2, %v16165_v31  ;;  %v3766_v2 = vsel %vm22206_vm8, %v12795_v21, %v12796_v0  ;;  %vm22209_vm1 = vnez %v21605_v49  ;;  %v16371_v63 = vpack.c.bf16 %v3997_v33, %v15891_v37  ;;  %v22233_v33 = vld [vmem:[#allocation97_spill] sm:$0xff] }
 0x3a7   : > { %v3767_v43 = vsel %vm22198_vm15, %v12796_v0, %v12810_v47  ;;  %11355 = vmatpush1.bf16.msk.msra.mxu0 %vm22163_vm2, %v16209_v29  ;;  %11361 = vmatpush1.bf16.msk.msra.mxu1 %vm22199_vm7, %v11350_v13  ;;  %vm22204_vm2 = vmmov %vm22201_vm4  ;;  %v11365_v29 = vpack.c.bf16 %v3604_v32, %v3442_v56  ;;  %vm22208_vm15 = vcmp.lt.s32.totalorder %v13949_v53, 63  ;;  %vm22210_vm4 = vcmask 588800   ;;  %v22224_v32 = vld [vmem:[#allocation43_spill] sm:$0xff] }
 0x3a8   : > { %v3389_v62 = vpop.permute.xlu0 %3388  ;;  %10310 = vmatprep.subr.msk.mxu0 %vm22202_vm5, %v3442_v56  ;;  %11364 = vmatprep.subr.msk.bf16.mxu1 %vm22203_vm13, %v11362_v50  ;;  %v3996_v55 = vsel %vm22204_vm2, %v12800_v61, %v12801_v42  ;;  %v11368_v36 = vpack.c.bf16 %v3767_v43, %v22207_v22  ;;  %vm22212_vm5 = vcmp.lt.s32.totalorder %v22211_v46, 63  ;;  %vm22215_vm2 = vnez %v22214_v44 }
 0x3a9   : > { %v11374_v21 = vpack.c.bf16 %v3996_v55, %v15888_v12  ;;  %vm11372_vm13 = vmpackc.low %vm22212_vm5, %vm21549_vm3  ;;  %v3444_v12 = vsel %vm22216_vm9, %v16274_v20, %v3389_v62  ;;  %v3769_v61 = vsel %vm22206_vm8, %v12811_v30, %v12825_v27  ;;  %v3768_v4 = vsel %vm22206_vm8, %v12810_v47, %v12811_v30  ;;  %v22231_v47 = vld [vmem:[#allocation40_spill] sm:$0xff] }
 0x3aa   : > { %4058 = vperm.xlu0 %12736, %v4055_v10   ;;  %v16361_v31 = vpop.permute.xlu1 %3398  ;;  %vm22238_vm8 = vcmp.lt.s32.totalorder %v22211_v46, 63 }
 0x3ab   : > { %10311 = vmatpush1.msk.msra.mxu0 %vm22208_vm15, %v16270_v52  ;;  %11367 = vmatpush1.bf16.msk.msra.mxu1 %vm22209_vm1, %v11365_v29  ;;  %v22213_v52 = vmax.f32 %v15653_v18, 0.0  ;;  %v12816_v18 = vunpack.i.h.bf16 %v16217_v23  ;;  %vm22219_vm15 = vmmov %vm22216_vm9  ;;  %vm22220_vm1 = vcmask 523264   ;;  %v22222_v23 = vld [vmem:[#allocation39_spill] sm:$0xff] }
 0x3ac   : > { %v12819_v54 = vpop.permute.xlu0 %12818  ;;  %10312 = vmatmul.mubr.msk.f32.vlgmr.msra.gmra.mrb[18].mxu0 %vm22210_vm4, %v16162_v16  ;;  %11370 = vmatprep.subr.msk.bf16.mxu1 %vm11369_vm6, %v11368_v36  ;;  %vm22218_vm6 = vnez %v22217_v25  ;;  %v3445_v13 = vsel %vm22219_vm15, %v3389_v62, %v16243_v24  ;;  %vm22221_vm4 = vmmov %vm22220_vm1  ;;  %vm22223_vm5 = vcmp.lt.s32.totalorder %v22222_v23, 63  ;;  %vm22225_vm15 = vnez %v22224_v32 }
 0x3ad   : > { %v11371_v49 = vpack.c.bf16 %v3766_v2, %v22213_v52  ;;  %v12820_v37 = vunpack.i.l.bf16 %v12819_v54  ;;  %11382 = vmatprep.subr.msk.bf16.mxu0 %vm22215_vm2, %v16371_v63  ;;  %4412 = vmatprep.mubr.f32.mxu0 %v21567_v15  ;;  %v3606_v42 = vsel %vm22221_vm4, %v12805_v40, %v12806_v57  ;;  %vm11393_vm9 = vmpackc.low %vm22223_vm5, %vm21549_vm3  ;;  %v22226_v40 = vmax.f32 %v15670_v45, 0.0 }
 0x3ae   : > { %11385 = vmatpush1.bf16.msk.msra.mxu0 %vm22218_vm6, %v11374_v21  ;;  %v16391_v26 = vpop.permute.xlu1 %12853  ;;  %v11389_v0 = vpack.c.bf16 %v3606_v42, %v3444_v12  ;;  %vm22232_vm4 = vcmp.lt.s32.totalorder %v22231_v47, 63  ;;  %v22234_v45 = vmax.f32 %v22233_v33, 0.0  ;;  %v12821_v55 = vunpack.i.h.bf16 %v12819_v54  ;;  %v22260_v33 = vld [vmem:[#allocation52_spill] sm:$0xff] }
 0x3af   : > { %v3607_v35 = vsel %vm22220_vm1, %v12806_v57, %v12820_v37  ;;  %11373 = vmatpush1.bf16.msk.msra.mxu1 %vm11372_vm13, %v11371_v49  ;;  %v11392_v43 = vpack.c.bf16 %v3769_v61, %v22226_v40  ;;  %vm22227_vm13 = vcmask 1039360   ;;  %vm22230_vm1 = vcmp.lt.s32.totalorder %v14077_v14, 63  ;;  %vm11396_vm5 = vmpackc.low %vm22232_vm4, %vm21549_vm3 }
 0x3b0   : > { %v16401_v20 = vpop.permute.xlu0 %3394  ;;  %11376 = vmatprep.subr.msk.bf16.mxu1 %vm22196_vm10, %v11374_v21  ;;  %v11386_v48 = vpack.c.bf16 %v3607_v35, %v3445_v13  ;;  %v3998_v56 = vsel %vm22227_vm13, %v12815_v60, %v12816_v18  ;;  %vm22229_vm10 = vnez %v22228_v34  ;;  %v11395_v62 = vpack.c.bf16 %v3768_v4, %v22234_v45  ;;  %v22240_v21 = vld [vmem:[#allocation121_spill] sm:$0xff]  ;;  %v22242_v35 = vld [vmem:[#allocation47_spill] sm:$0xff] }
 0x3b1   : > { %v12835_v2 = vunpack.i.l.bf16 %v16307_v3  ;;  %v12826_v52 = vunpack.i.h.bf16 %v16262_v6  ;;  %v22262_v45 = vld [vmem:[#allocation123_spill] sm:$0xff]  ;;  %v22263_v6 = vld [vmem:[#allocation122_spill] sm:$0xff] }
 0x3b2   : > { %v16409_v50 = vpop.permute.xlu1 %3400  ;;  %11388 = vmatprep.subr.msk.bf16.mxu0 %vm22225_vm15, %v11386_v48  ;;  %vm22239_vm15 = vcmask 588800   ;;  %v22246_v48 = vld [vmem:[#allocation48_spill] sm:$0xff] }
 0x3b3   : > { %11379 = vmatpush1.bf16.msk.msra.mxu1 %vm22199_vm7, %v11356_v59  ;;  %11391 = vmatpush1.bf16.msk.msra.mxu0 %vm22229_vm10, %v11389_v0  ;;  %v11398_v59 = vpack.c.bf16 %v3998_v56, %v22235_v58  ;;  %vm22236_vm7 = vcmask 1031168   ;;  %vm22243_vm10 = vnez %v22242_v35  ;;  %vm22247_vm4 = vnez %v22246_v48  ;;  %v22265_v58 = vld [vmem:[#allocation45_spill] sm:$0xff] }
 0x3b4   : > { %v12829_v10 = vpop.permute.xlu0 %12828  ;;  %10323 = vmatprep.subr.msk.mxu1 %vm22230_vm1, %v3444_v12  ;;  %11394 = vmatprep.subr.msk.bf16.mxu0 %vm11393_vm9, %v11392_v43  ;;  %v16434_v22 = vsel %vm22236_vm7, %v16285_v51, %v16401_v20  ;;  %vm22237_vm9 = vmmov %vm22227_vm13  ;;  %vm22241_vm13 = vcmask 523264   ;;  %v22257_v43 = vld [vmem:[#allocation99_spill] sm:$0xff]  ;;  %v22284_v35 = vld [vmem:[#allocation57_spill] sm:$0xff] }
 0x3b5   : > { %v12830_v60 = vunpack.i.l.bf16 %v12829_v10  ;;  %v12831_v30 = vunpack.i.h.bf16 %v12829_v10  ;;  %v3609_v49 = vsel %vm22241_vm13, %v12821_v55, %v12835_v2  ;;  %vm22244_vm1 = vmmov %vm22241_vm13  ;;  %v22258_v56 = vmax.f32 %v22257_v43, 0.0  ;;  %v22281_v43 = vld [vmem:[#allocation101_spill] sm:$0xff] }
 0x3b6   : > { %v16427_v29 = vpop.permute.xlu1 %12863  ;;  %v3608_v44 = vsel %vm22244_vm1, %v12820_v37, %v12821_v55  ;;  %v22251_v37 = vld [vmem:[#allocation51_spill] sm:$0xff]  ;;  %v12836_v55 = vunpack.i.h.bf16 %v16307_v3 }
 0x3b7   : > { %v3999_v36 = vsel %vm22237_vm9, %v12816_v18, %v12830_v60  ;;  %10324 = vmatpush1.msk.msra.mxu1 %vm22238_vm8, %v16314_v17  ;;  %11397 = vmatpush1.bf16.msk.msra.mxu0 %vm11396_vm5, %v11395_v62  ;;  %v12845_v17 = vunpack.i.l.bf16 %v16332_v19  ;;  %v11410_v18 = vpack.c.bf16 %v3609_v49, %v16434_v22  ;;  %vm22248_vm5 = vmmov %vm22236_vm7  ;;  %vm22252_vm8 = vnez %v22251_v37 }
 0x3b8   : > { %v12839_v57 = vpop.permute.xlu0 %12838  ;;  %10325 = vmatmul.mubr.msk.f32.vlgmr.msra.gmra.mrb[18].mxu1 %vm22239_vm15, %v16162_v16  ;;  %11400 = vmatprep.subr.msk.bf16.mxu0 %vm22215_vm2, %v11398_v59  ;;  %v11404_v54 = vpack.c.bf16 %v3999_v36, %v22240_v21  ;;  %vm22245_vm2 = vcmask 506880   ;;  %v3446_v0 = vsel %vm22248_vm5, %v16243_v24, %v16285_v51  ;;  %vm22249_vm7 = vmmov %vm22237_vm9  ;;  %vm22250_vm9 = vcmp.lt.s32.totalorder %v22222_v23, 63  ;;  %v22269_v21 = vld [vmem:[#allocation53_spill] sm:$0xff] }
 0x3b9   : > { %v12840_v12 = vunpack.i.l.bf16 %v12839_v57  ;;  %4483 = vmatprep.mubr.f32.mxu1 %v21567_v15  ;;  %v4001_v4 = vsel %vm22249_vm7, %v12831_v30, %v12845_v17  ;;  %vm22253_vm15 = vmmov %vm22249_vm7  ;;  %v11413_v25 = vpack.c.bf16 %v3608_v44, %v3446_v0  ;;  %v12841_v10 = vunpack.i.h.bf16 %v12839_v57 }
 0x3ba   : > { %v16450_v61 = vpop.permute.xlu1 %12873  ;;  %11406 = vmatprep.subr.msk.bf16.mxu1 %vm22243_vm10, %v11404_v54  ;;  %v4000_v40 = vsel %vm22253_vm15, %v12830_v60, %v12831_v30  ;;  %vm22256_vm1 = vmmov %vm22245_vm2  ;;  %vm22261_vm5 = vnez %v22260_v33  ;;  %v16485_v62 = vpack.c.bf16 %v4001_v4, %v22262_v45  ;;  %vm22264_vm7 = vcmask 588800  }
 0x3bb   : > { %v3771_v42 = vsel %vm22245_vm2, %v12826_v52, %v12840_v12  ;;  %11403 = vmatpush1.bf16.msk.msra.mxu0 %vm22218_vm6, %v16371_v63  ;;  %11409 = vmatpush1.bf16.msk.msra.mxu1 %vm22247_vm4, %v11398_v59  ;;  %v22254_v63 = vld [vmem:[#allocation44_spill] sm:$0xff]  ;;  %v3770_v24 = vsel %vm22256_vm1, %v12825_v27, %v12826_v52  ;;  %vm22259_vm2 = vcmp.lt.s32.totalorder %v22231_v47, 63  ;;  %v11422_v60 = vpack.c.bf16 %v4000_v40, %v22263_v6  ;;  %v22272_v52 = vld [vmem:[#allocation54_spill] sm:$0xff] }
 0x3bc   : > { %v3397_v32 = vpop.permute.xlu0 %3396  ;;  %10336 = vmatprep.subr.msk.mxu0 %vm22250_vm9, %v3446_v0  ;;  %11412 = vmatprep.subr.msk.bf16.mxu1 %vm22252_vm8, %v11410_v18  ;;  %vm22255_vm6 = vcmp.lt.s32.totalorder %v22254_v63, 63  ;;  %v11416_v34 = vpack.c.bf16 %v3771_v42, %v22258_v56  ;;  %vm22266_vm9 = vcmp.lt.s32.totalorder %v22265_v58, 63  ;;  %v12855_v30 = vunpack.i.l.bf16 %v16391_v26 }
 0x3bd   : > { %vm11417_vm13 = vmpackc.low %vm22255_vm6, %vm21549_vm3  ;;  %vm22270_vm15 = vnez %v22269_v21  ;;  %vm22271_vm6 = vcmask 1031168   ;;  %v12846_v18 = vunpack.i.h.bf16 %v16332_v19  ;;  %v22277_v19 = vld [vmem:[#allocation49_spill] sm:$0xff] }
 0x3be   : > { %v16476_v51 = vpop.permute.xlu1 %3404  ;;  %vm11420_vm8 = vmpackc.low %vm22266_vm9, %vm21549_vm3  ;;  %v3448_v3 = vsel %vm22271_vm6, %v16401_v20, %v3397_v32  ;;  %v3773_v44 = vsel %vm22256_vm1, %v12841_v10, %v12855_v30  ;;  %vm22278_vm9 = vcmp.lt.s32.totalorder %v22277_v19, 63 }
 0x3bf   : > { %10337 = vmatpush1.msk.msra.mxu0 %vm22259_vm2, %v3445_v13  ;;  %11415 = vmatpush1.bf16.msk.msra.mxu1 %vm22261_vm5, %v11413_v25  ;;  %v22267_v13 = vld [vmem:[#allocation98_spill] sm:$0xff]  ;;  %vm22274_vm2 = vmmov %vm22271_vm6  ;;  %vm22275_vm5 = vcmask 523264   ;;  %v3772_v25 = vsel %vm22256_vm1, %v12840_v12, %v12841_v10  ;;  %v22289_v10 = vld [vmem:[#allocation100_spill] sm:$0xff]  ;;  %vm22294_vm1 = vcmp.lt.s32.totalorder %v22265_v58, 63 }
 0x3c0   : > { %v12849_v27 = vpop.permute.xlu0 %12848  ;;  %10338 = vmatmul.mubr.msk.f32.vlgmr.msra.gmra.mrb[20].mxu0 %vm22264_vm7, %v16162_v16  ;;  %11418 = vmatprep.subr.msk.bf16.mxu1 %vm11417_vm13, %v11416_v34  ;;  %v22268_v59 = vmax.f32 %v22267_v13, 0.0  ;;  %vm22273_vm13 = vnez %v22272_v52  ;;  %v3449_v42 = vsel %vm22274_vm2, %v3397_v32, %v16361_v31  ;;  %vm22276_vm7 = vmmov %vm22275_vm5  ;;  %v22279_v32 = vld [vmem:[#allocation55_spill] sm:$0xff]  ;;  %v22287_v12 = vld [vmem:[#allocation50_spill] sm:$0xff]  ;;  %v22290_v45 = vmax.f32 %v22289_v10, 0.0 }
 0x3c1   : > { %v12850_v57 = vunpack.i.l.bf16 %v12849_v27  ;;  %11430 = vmatprep.subr.msk.bf16.mxu0 %vm22270_vm15, %v16485_v62  ;;  %4554 = vmatprep.mubr.f32.mxu0 %v21567_v15  ;;  %v3610_v4 = vsel %vm22276_vm7, %v12835_v2, %v12836_v55  ;;  %vm11441_vm6 = vmpackc.low %vm22278_vm9, %vm21549_vm3  ;;  %vm22280_vm2 = vnez %v22279_v32  ;;  %v22282_v2 = vmax.f32 %v22281_v43, 0.0  ;;  %v22298_v32 = vld [vmem:[#allocation59_spill] sm:$0xff] }
 0x3c2   : > { %v11419_v36 = vpack.c.bf16 %v3770_v24, %v22268_v59  ;;  %11433 = vmatpush1.bf16.msk.msra.mxu0 %vm22273_vm13, %v11422_v60  ;;  %v16505_v49 = vpop.permute.xlu1 %12878  ;;  %v11437_v40 = vpack.c.bf16 %v3610_v4, %v3448_v3  ;;  %vm22288_vm7 = vcmp.lt.s32.totalorder %v22287_v12, 63  ;;  %v12851_v6 = vunpack.i.h.bf16 %v12849_v27 }
 0x3c3   : > { %v3611_v0 = vsel %vm22275_vm5, %v12836_v55, %v12850_v57  ;;  %v11440_v56 = vpack.c.bf16 %v3773_v44, %v22282_v2  ;;  %vm22286_vm5 = vcmp.lt.s32.totalorder %v22254_v63, 63  ;;  %vm11444_vm9 = vmpackc.low %vm22288_vm7, %vm21549_vm3  ;;  %v11443_v55 = vpack.c.bf16 %v3772_v25, %v22290_v45  ;;  %v22296_v44 = vld [vmem:[#allocation125_spill] sm:$0xff]  ;;  %v22302_v2 = vld [vmem:[#allocation60_spill] sm:$0xff] }
 0x3c4   : > { %11421 = vmatpush1.bf16.msk.msra.mxu1 %vm11420_vm8, %v11419_v36  ;;  %v16515_v20 = vpop.permute.xlu0 %3402  ;;  %v11434_v37 = vpack.c.bf16 %v3611_v0, %v3449_v42  ;;  %vm22283_vm8 = vcmask 1039360   ;;  %v12865_v13 = vunpack.i.l.bf16 %v16427_v29  ;;  %v12856_v4 = vunpack.i.h.bf16 %v16391_v26 }
 0x3c5   : > { %11424 = vmatprep.subr.msk.bf16.mxu1 %vm22243_vm10, %v11422_v60  ;;  %v4002_v34 = vsel %vm22283_vm8, %v12845_v17, %v12846_v18  ;;  %vm22285_vm10 = vnez %v22284_v35  ;;  %vm22303_vm7 = vnez %v22302_v2  ;;  %v22351_v2 = vld [vmem:[#allocation127_spill] sm:$0xff] }
 0x3c6   : > { %v16523_v24 = vpop.permute.xlu1 %3410  ;;  %11436 = vmatprep.subr.msk.bf16.mxu0 %vm22280_vm2, %v11434_v37  ;;  %vm22295_vm2 = vcmask 588800  }
 0x3c7   : > { %11439 = vmatpush1.bf16.msk.msra.mxu0 %vm22285_vm10, %v11437_v40  ;;  %vm22299_vm10 = vnez %v22298_v32  ;;  %v22345_v32 = vld [vmem:[#allocation62_spill] sm:$0xff] }
 0x3c8   : > { %11427 = vmatpush1.bf16.msk.msra.mxu1 %vm22247_vm4, %v11404_v54  ;;  %v12859_v33 = vpop.permute.xlu0 %12858  ;;  %11442 = vmatprep.subr.msk.bf16.mxu0 %vm11441_vm6, %v11440_v56  ;;  %v22291_v54 = vld [vmem:[#allocation124_spill] sm:$0xff]  ;;  %vm22292_vm4 = vcmask 1031168   ;;  %vm22293_vm6 = vmmov %vm22283_vm8  ;;  %vm22297_vm8 = vcmask 523264  }
 0x3c9   : > { %10349 = vmatprep.subr.msk.mxu1 %vm22286_vm5, %v3448_v3  ;;  %v12860_v17 = vunpack.i.l.bf16 %v12859_v33  ;;  %v11446_v48 = vpack.c.bf16 %v4002_v34, %v22291_v54  ;;  %v16548_v59 = vsel %vm22292_vm4, %v16409_v50, %v16515_v20  ;;  %v12861_v27 = vunpack.i.h.bf16 %v12859_v33  ;;  %vm22300_vm5 = vmmov %vm22297_vm8 }
 0x3ca   : > { %v16541_v60 = vpop.permute.xlu1 %12888  ;;  %v3613_v37 = vsel %vm22297_vm8, %v12851_v6, %v12865_v13  ;;  %v3612_v21 = vsel %vm22300_vm5, %v12850_v57, %v12851_v6  ;;  %v12880_v34 = vunpack.i.l.bf16 %v16505_v49  ;;  %v22307_v57 = vld [vmem:[#allocation63_spill] sm:$0xff] }
 0x3cb   : > { %v4003_v36 = vsel %vm22293_vm6, %v12846_v18, %v12860_v17  ;;  %11445 = vmatpush1.bf16.msk.msra.mxu0 %vm11444_vm9, %v11443_v55  ;;  %v11458_v40 = vpack.c.bf16 %v3613_v37, %v16548_v59  ;;  %vm22304_vm9 = vmmov %vm22292_vm4  ;;  %v22314_v6 = vld [vmem:[#allocation103_spill] sm:$0xff] }
 0x3cc   : > { %10350 = vmatpush1.msk.msra.mxu1 %vm22294_vm1, %v16434_v22  ;;  %v12869_v3 = vpop.permute.xlu0 %12868  ;;  %11448 = vmatprep.subr.msk.bf16.mxu0 %vm22270_vm15, %v11446_v48  ;;  %v11452_v0 = vpack.c.bf16 %v4003_v36, %v22296_v44  ;;  %v12875_v22 = vunpack.i.l.bf16 %v16450_v61  ;;  %vm22301_vm15 = vcmask 506880   ;;  %v3450_v56 = vsel %vm22304_vm9, %v16361_v31, %v16409_v50  ;;  %vm22305_vm4 = vmmov %vm22293_vm6  ;;  %v22311_v31 = vld [vmem:[#allocation56_spill] sm:$0xff]  ;;  %v22320_v36 = vld [vmem:[#allocation102_spill] sm:$0xff] }
 0x3cd   : > { %10351 = vmatmul.mubr.msk.f32.vlgmr.msra.gmra.mrb[20].mxu1 %vm22295_vm2, %v16162_v16  ;;  %v12870_v18 = vunpack.i.l.bf16 %v12869_v3  ;;  %vm22306_vm6 = vcmp.lt.s32.totalorder %v22277_v19, 63  ;;  %vm22308_vm1 = vnez %v22307_v57  ;;  %vm22310_vm2 = vmmov %vm22305_vm4  ;;  %v11461_v10 = vpack.c.bf16 %v3612_v21, %v3450_v56  ;;  %v22322_v44 = vld [vmem:[#allocation27_spill] sm:$0xff]  ;;  %v22328_v57 = vld [vmem:[#allocation65_spill] sm:$0xff] }
 0x3ce   : > { %4625 = vmatprep.mubr.f32.mxu1 %v21567_v15  ;;  %v16564_v25 = vpop.permute.xlu1 %12898  ;;  %11454 = vmatprep.subr.msk.bf16.mxu1 %vm22299_vm10, %v11452_v0  ;;  %v4005_v35 = vsel %vm22305_vm4, %v12861_v27, %v12875_v22  ;;  %v4004_v52 = vsel %vm22310_vm2, %v12860_v17, %v12861_v27  ;;  %vm22312_vm8 = vcmp.lt.s32.totalorder %v22311_v31, 63  ;;  %v12866_v50 = vunpack.i.h.bf16 %v16427_v29  ;;  %v22319_v17 = vld [vmem:[#allocation126_spill] sm:$0xff] }
 0x3cf   : > { %v3775_v43 = vsel %vm22301_vm15, %v12856_v4, %v12870_v18  ;;  %11451 = vmatpush1.bf16.msk.msra.mxu0 %vm22273_vm13, %v16485_v62  ;;  %11457 = vmatpush1.bf16.msk.msra.mxu1 %vm22303_vm7, %v11446_v48  ;;  %vm22309_vm13 = vmmov %vm22301_vm15  ;;  %v22315_v26 = vmax.f32 %v22314_v6, 0.0  ;;  %v11476_v48 = vpack.c.bf16 %v4005_v35, %v22319_v17  ;;  %v22321_v29 = vmax.f32 %v22320_v36, 0.0  ;;  %v22338_v36 = vld [vmem:[#allocation61_spill] sm:$0xff] }
 0x3d0   : > { %v16580_v33 = vpop.permute.xlu0 %3406  ;;  %10362 = vmatprep.subr.msk.mxu0 %vm22306_vm6, %v3450_v56  ;;  %11460 = vmatprep.subr.msk.bf16.mxu1 %vm22308_vm1, %v11458_v40  ;;  %v3774_v62 = vsel %vm22309_vm13, %v12855_v30, %v12856_v4  ;;  %vm11465_vm5 = vmpackc.low %vm22312_vm8, %vm21549_vm3  ;;  %v22317_v30 = vld [vmem:[#allocation64_spill] sm:$0xff]  ;;  %v11470_v4 = vpack.c.bf16 %v4004_v52, %v22322_v44  ;;  %vm22323_vm6 = vcmask 523264   ;;  %vm22324_vm1 = vcmask 588800  }
 0x3d1   : > { %vm22313_vm15 = vmmov %vm22304_vm9  ;;  %v11464_v54 = vpack.c.bf16 %v3775_v43, %v22315_v26  ;;  %vm22316_vm9 = vcmp.lt.s32.totalorder %v22287_v12, 63  ;;  %vm22318_vm4 = vnez %v22317_v30  ;;  %v11467_v27 = vpack.c.bf16 %v3774_v62, %v22321_v29  ;;  %v22330_v52 = vld [vmem:[#allocation16_spill] sm:$0xff] }
 0x3d2   : > { %v16597_v45 = vsel %vm22313_vm15, %v16476_v51, %v16580_v33  ;;  %v16599_v55 = vpop.permute.xlu1 %3412  ;;  %v3615_v37 = vsel %vm22323_vm6, %v12866_v50, %v12880_v34  ;;  %vm22327_vm8 = vmmov %vm22313_vm15  ;;  %v12871_v43 = vunpack.i.h.bf16 %v12869_v3  ;;  %vm22329_vm15 = vnez %v22328_v57  ;;  %v22334_v3 = vld [vmem:[#allocation67_spill] sm:$0xff]  ;;  %v22342_v29 = vld [vmem:[#allocation68_spill] sm:$0xff] }
 0x3d3   : > { %10363 = vmatpush1.msk.msra.mxu0 %vm22316_vm9, %v3449_v42  ;;  %11463 = vmatpush1.bf16.msk.msra.mxu1 %vm22318_vm4, %v11461_v10  ;;  %v22325_v42 = vld [vmem:[#allocation58_spill] sm:$0xff]  ;;  %v3452_v21 = vsel %vm22327_vm8, %v16515_v20, %v16476_v51  ;;  %v11482_v56 = vpack.c.bf16 %v3615_v37, %v16597_v45  ;;  %v12876_v62 = vunpack.i.h.bf16 %v16450_v61  ;;  %vm22332_vm9 = vmmov %vm22323_vm6  ;;  %v12890_v51 = vunpack.i.l.bf16 %v16541_v60  ;;  %v22336_v61 = vld [vmem:[#allocation105_spill] sm:$0xff] }
 0x3d4   : > { %v16614_v40 = vpop.permute.xlu0 %12883  ;;  %10364 = vmatmul.mubr.msk.f32.vlgmr.msra.gmra.mrb[22].mxu0 %vm22324_vm1, %v16162_v16  ;;  %11466 = vmatprep.subr.msk.bf16.mxu1 %vm11465_vm5, %v11464_v54  ;;  %vm22326_vm13 = vcmp.lt.s32.totalorder %v22325_v42, 63  ;;  %vm22331_vm5 = vnez %v22330_v52  ;;  %v3614_v6 = vsel %vm22332_vm9, %v12865_v13, %v12866_v50  ;;  %vm22333_vm4 = vcmask 506880  }
 0x3d5   : > { %vm11468_vm2 = vmpackc.low %vm22326_vm13, %vm21549_vm3  ;;  %v12885_v35 = vunpack.i.l.bf16 %v16614_v40  ;;  %11478 = vmatprep.subr.msk.bf16.mxu0 %vm22329_vm15, %v11476_v48  ;;  %4696 = vmatprep.mubr.f32.mxu0 %v21567_v15  ;;  %vm22335_vm6 = vnez %v22334_v3  ;;  %v11485_v26 = vpack.c.bf16 %v3614_v6, %v3452_v21  ;;  %v22337_v30 = vmax.f32 %v22336_v61, 0.0  ;;  %v22350_v6 = vld [vmem:[#allocation128_spill] sm:$0xff] }
 0x3d6   : > { %11481 = vmatpush1.bf16.msk.msra.mxu0 %vm22331_vm5, %v11470_v4  ;;  %v16632_v10 = vpop.permute.xlu1 %12908  ;;  %vm22339_vm1 = vcmp.lt.s32.totalorder %v22338_v36, 63  ;;  %vm22340_vm8 = vmmov %vm22333_vm4  ;;  %vm22341_vm9 = vcmask 1039360   ;;  %v12900_v61 = vunpack.i.l.bf16 %v16564_v25 }
 0x3d7   : > { %v3777_v20 = vsel %vm22333_vm4, %v12871_v43, %v12885_v35  ;;  %11484 = vmatprep.subr.msk.bf16.mxu0 %vm22335_vm6, %v11482_v56  ;;  %11469 = vmatpush1.bf16.msk.msra.mxu1 %vm11468_vm2, %v11467_v27  ;;  %vm11489_vm13 = vmpackc.low %vm22339_vm1, %vm21549_vm3  ;;  %v3776_v13 = vsel %vm22340_vm8, %v12870_v18, %v12871_v43  ;;  %v4006_v50 = vsel %vm22341_vm9, %v12875_v22, %v12876_v62  ;;  %vm22349_vm1 = vcmp.lt.s32.totalorder %v22311_v31, 63 }
 0x3d8   : > { %v3409_v54 = vpop.permute.xlu0 %3408  ;;  %11472 = vmatprep.subr.msk.bf16.mxu1 %vm22299_vm10, %v11470_v4  ;;  %v11488_v17 = vpack.c.bf16 %v3777_v20, %v22337_v30  ;;  %vm22343_vm4 = vnez %v22342_v29  ;;  %vm22344_vm2 = vmmov %vm22341_vm9  ;;  %vm22346_vm10 = vcmp.lt.s32.totalorder %v22345_v32, 63  ;;  %v22347_v4 = vld [vmem:[#allocation104_spill] sm:$0xff]  ;;  %v12881_v22 = vunpack.i.h.bf16 %v16505_v49 }
 0x3d9   : > { %v4007_v44 = vsel %vm22344_vm2, %v12876_v62, %v12890_v51  ;;  %vm11492_vm6 = vmpackc.low %vm22346_vm10, %vm21549_vm3  ;;  %v22348_v37 = vmax.f32 %v22347_v4, 0.0  ;;  %v12886_v56 = vunpack.i.h.bf16 %v16614_v40  ;;  %v11494_v20 = vpack.c.bf16 %v4006_v50, %v22350_v6 }
 0x3da   : > { %11487 = vmatpush1.bf16.msk.msra.mxu0 %vm22343_vm4, %v11485_v26  ;;  %v16650_v27 = vpop.permute.xlu1 %3418  ;;  %v16668_v3 = vpack.c.bf16 %v4007_v44, %v22351_v2  ;;  %v12891_v26 = vunpack.i.h.bf16 %v16541_v60  ;;  %vm22354_vm8 = vcmp.lt.s32.totalorder %v22325_v42, 63  ;;  %vm22355_vm9 = vcmask 588800   ;;  %v22356_v60 = vld [vmem:[#allocation69_spill] sm:$0xff] }
 0x3db   : > { %11490 = vmatprep.subr.msk.bf16.mxu0 %vm11489_vm13, %v11488_v17  ;;  %11475 = vmatpush1.bf16.msk.msra.mxu1 %vm22303_vm7, %v11452_v0  ;;  %v11491_v18 = vpack.c.bf16 %v3776_v13, %v22348_v37  ;;  %vm22352_vm7 = vcmask 1031168   ;;  %vm22353_vm13 = vcmask 523264   ;;  %vm22357_vm4 = vnez %v22356_v60  ;;  %v22360_v44 = vld [vmem:[#allocation9_spill] sm:$0xff] }
 0x3dc   : > { %v12894_v43 = vpop.permute.xlu0 %12893  ;;  %10375 = vmatprep.subr.msk.mxu1 %vm22349_vm1, %v3452_v21  ;;  %v16674_v21 = vsel %vm22352_vm7, %v3409_v54, %v16523_v24  ;;  %vm22358_vm2 = vmmov %vm22352_vm7  ;;  %vm22359_vm10 = vcmask 506880   ;;  %vm22365_vm7 = vcmask 1039360   ;;  %v12910_v37 = vunpack.i.l.bf16 %v16632_v10 }
 0x3dd   : > { %v12895_v62 = vunpack.i.l.bf16 %v12894_v43  ;;  %v3454_v17 = vsel %vm22358_vm2, %v16580_v33, %v3409_v54  ;;  %v3779_v57 = vsel %vm22359_vm10, %v12886_v56, %v12900_v61  ;;  %v12896_v50 = vunpack.i.h.bf16 %v12894_v43  ;;  %v22363_v54 = vld [vmem:[#allocation20_spill] sm:$0xff]  ;;  %vm22370_vm2 = vmmov %vm22359_vm10  ;;  %v22371_v43 = vld [vmem:[#allocation107_spill] sm:$0xff] }
 0x3de   : > { %11493 = vmatpush1.bf16.msk.msra.mxu0 %vm11492_vm6, %v11491_v18  ;;  %v16665_v0 = vpop.permute.xlu1 %12918  ;;  %vm22362_vm6 = vmmov %vm22353_vm13  ;;  %vm22364_vm1 = vnez %v22363_v54  ;;  %v4008_v4 = vsel %vm22365_vm7, %v12890_v51, %v12891_v26  ;;  %v3778_v49 = vsel %vm22370_vm2, %v12885_v35, %v12886_v56  ;;  %vm22374_vm10 = vcmask 1031168   ;;  %v22381_v54 = vld [vmem:[#allocation106_spill] sm:$0xff] }
 0x3df   : > { %v3617_v30 = vsel %vm22353_vm13, %v12881_v22, %v12895_v62  ;;  %11496 = vmatprep.subr.msk.bf16.mxu0 %vm22329_vm15, %v11494_v20  ;;  %10376 = vmatpush1.msk.msra.mxu1 %vm22354_vm8, %v16548_v59  ;;  %vm22361_vm15 = vnez %v22360_v44  ;;  %v3616_v33 = vsel %vm22362_vm6, %v12880_v34, %v12881_v22  ;;  %vm22366_vm13 = vmmov %vm22365_vm7  ;;  %vm22367_vm8 = vcmp.lt.s32.totalorder %v22338_v36, 63  ;;  %v22408_v44 = vld [vmem:[#allocation131_spill] sm:$0xff] }
 0x3e0   : > { %v12904_v40 = vpop.permute.xlu0 %12903  ;;  %10377 = vmatmul.mubr.msk.f32.vlgmr.msra.gmra.mrb[22].mxu1 %vm22355_vm9, %v16162_v16  ;;  %11502 = vmatprep.subr.msk.bf16.mxu1 %vm22357_vm4, %v16668_v3  ;;  %v11506_v13 = vpack.c.bf16 %v3617_v30, %v16674_v21  ;;  %v11509_v52 = vpack.c.bf16 %v3616_v33, %v3454_v17  ;;  %v22372_v22 = vmax.f32 %v22371_v43, 0.0  ;;  %v22375_v30 = vld [vmem:[#allocation71_spill] sm:$0xff]  ;;  %vm22378_vm7 = vcmp.lt.s32.totalorder %v22345_v32, 63  ;;  %v22385_v43 = vld [vmem:[#allocation10_spill] sm:$0xff] }
 0x3e1   : > { %v12905_v29 = vunpack.i.l.bf16 %v12904_v40  ;;  %11505 = vmatpush1.bf16.msk.msra.mxu1 %vm22361_vm15, %v11494_v20  ;;  %4767 = vmatprep.mubr.f32.mxu1 %v21567_v15  ;;  %v22373_v20 = vld [vmem:[#allocation130_spill] sm:$0xff]  ;;  %v12901_v33 = vunpack.i.h.bf16 %v16564_v25  ;;  %vm22384_vm2 = vcmask 588800  }
 0x3e2   : > { %11499 = vmatpush1.bf16.msk.msra.mxu0 %vm22331_vm5, %v11476_v48  ;;  %v16696_v59 = vpop.permute.xlu1 %12928  ;;  %11508 = vmatprep.subr.msk.bf16.mxu1 %vm22364_vm1, %v11506_v13  ;;  %v22368_v48 = vld [vmem:[#allocation15_spill] sm:$0xff]  ;;  %v11512_v6 = vpack.c.bf16 %v3779_v57, %v22372_v22  ;;  %vm22376_vm1 = vnez %v22375_v30  ;;  %v22379_v57 = vld [vmem:[#allocation66_spill] sm:$0xff]  ;;  %v22387_v22 = vld [vmem:[#allocation21_spill] sm:$0xff] }
 0x3e3   : > { %v4009_v18 = vsel %vm22366_vm13, %v12891_v26, %v12905_v29  ;;  %10388 = vmatprep.subr.msk.mxu0 %vm22367_vm8, %v3454_v17  ;;  %vm22369_vm5 = vcmp.lt.s32.totalorder %v22368_v48, 63  ;;  %v3619_v26 = vsel %vm22362_vm6, %v12896_v50, %v12910_v37  ;;  %v22377_v17 = vld [vmem:[#allocation129_spill] sm:$0xff]  ;;  %vm22380_vm13 = vcmp.lt.s32.totalorder %v22379_v57, 63 }
 0x3e4   : > { %vm11513_vm9 = vmpackc.low %vm22369_vm5, %vm21549_vm3  ;;  %v3415_v34 = vpop.permute.xlu0 %3414  ;;  %v11524_v51 = vpack.c.bf16 %v4009_v18, %v22373_v20  ;;  %v11518_v13 = vpack.c.bf16 %v4008_v4, %v22377_v17  ;;  %v22382_v18 = vmax.f32 %v22381_v54, 0.0  ;;  %v22390_v20 = vld [vmem:[#allocation73_spill] sm:$0xff]  ;;  %v22394_v17 = vld [vmem:[#allocation19_spill] sm:$0xff] }
 0x3e5   : > { %v16717_v2 = vsel %vm22374_vm10, %v16599_v55, %v3415_v34  ;;  %11511 = vmatpush1.bf16.msk.msra.mxu1 %vm22376_vm1, %v11509_v52  ;;  %vm11516_vm8 = vmpackc.low %vm22380_vm13, %vm21549_vm3  ;;  %vm22386_vm10 = vnez %v22385_v43  ;;  %vm22391_vm1 = vnez %v22390_v20  ;;  %v22399_v54 = vld [vmem:[#allocation109_spill] sm:$0xff] }
 0x3e6   : > { %v11530_v35 = vpack.c.bf16 %v3619_v26, %v16717_v2  ;;  %10389 = vmatpush1.msk.msra.mxu0 %vm22378_vm7, %v16597_v45  ;;  %v16729_v56 = vpop.permute.xlu1 %3420  ;;  %11514 = vmatprep.subr.msk.bf16.mxu1 %vm11513_vm9, %v11512_v6  ;;  %v11515_v52 = vpack.c.bf16 %v3778_v49, %v22382_v18  ;;  %vm22383_vm5 = vmmov %vm22362_vm6  ;;  %v12906_v45 = vunpack.i.h.bf16 %v12904_v40  ;;  %vm22388_vm9 = vnez %v22387_v22 }
 0x3e7   : > { %v3618_v4 = vsel %vm22383_vm5, %v12895_v62, %v12896_v50  ;;  %10390 = vmatmul.mubr.msk.f32.vlgmr.msra.gmra.mrb[24].mxu0 %vm22384_vm2, %v16162_v16  ;;  %11526 = vmatprep.subr.msk.bf16.mxu0 %vm22386_vm10, %v11524_v51  ;;  %vm22389_vm6 = vcmask 1031168   ;;  %vm22392_vm7 = vcmask 506880   ;;  %v12920_v26 = vunpack.i.l.bf16 %v16665_v0 }
 0x3e8   : > { %11529 = vmatpush1.bf16.msk.msra.mxu0 %vm22388_vm9, %v11518_v13  ;;  %v12914_v6 = vpop.permute.xlu0 %12913  ;;  %4838 = vmatprep.mubr.f32.mxu0 %v21567_v15  ;;  %v3456_v25 = vsel %vm22389_vm6, %v16523_v24, %v16599_v55  ;;  %v3780_v40 = vsel %vm22392_vm7, %v12900_v61, %v12901_v33  ;;  %vm22393_vm13 = vmmov %vm22392_vm7  ;;  %vm22395_vm5 = vcmp.lt.s32.totalorder %v22394_v17, 63  ;;  %vm22396_vm6 = vcmask 1039360   ;;  %v22397_v55 = vld [vmem:[#allocation74_spill] sm:$0xff] }
 0x3e9   : > { %v12915_v49 = vunpack.i.l.bf16 %v12914_v6  ;;  %11532 = vmatprep.subr.msk.bf16.mxu0 %vm22391_vm1, %v11530_v35  ;;  %11517 = vmatpush1.bf16.msk.msra.mxu1 %vm11516_vm8, %v11515_v52  ;;  %v11533_v62 = vpack.c.bf16 %v3618_v4, %v3456_v25  ;;  %vm11537_vm2 = vmpackc.low %vm22395_vm5, %vm21549_vm3  ;;  %v4010_v24 = vsel %vm22396_vm6, %v12905_v29, %v12906_v45  ;;  %vm22398_vm8 = vnez %v22397_v55  ;;  %v22402_v61 = vld [vmem:[#allocation70_spill] sm:$0xff] }
 0x3ea   : > { %v16750_v50 = vpop.permute.xlu1 %12938  ;;  %11520 = vmatprep.subr.msk.bf16.mxu1 %vm22357_vm4, %v11518_v13  ;;  %v22400_v18 = vmax.f32 %v22399_v54, 0.0  ;;  %vm22401_vm4 = vmmov %vm22396_vm6  ;;  %vm22403_vm1 = vcmp.lt.s32.totalorder %v22402_v61, 63  ;;  %v12916_v20 = vunpack.i.h.bf16 %v12914_v6  ;;  %v12930_v54 = vunpack.i.l.bf16 %v16696_v59 }
 0x3eb   : > { %v3781_v30 = vsel %vm22393_vm13, %v12901_v33, %v12915_v49  ;;  %v4011_v13 = vsel %vm22401_vm4, %v12906_v45, %v12920_v26  ;;  %vm11540_vm7 = vmpackc.low %vm22403_vm1, %vm21549_vm3  ;;  %v22404_v33 = vld [vmem:[#allocation108_spill] sm:$0xff]  ;;  %vm22406_vm13 = vcmp.lt.s32.totalorder %v22368_v48, 63  ;;  %v12921_v6 = vunpack.i.h.bf16 %v16665_v0 }
 0x3ec   : > { %11535 = vmatpush1.bf16.msk.msra.mxu0 %vm22398_vm8, %v11533_v62  ;;  %v3417_v35 = vpop.permute.xlu0 %3416  ;;  %v11536_v60 = vpack.c.bf16 %v3781_v30, %v22400_v18  ;;  %v22405_v52 = vmax.f32 %v22404_v33, 0.0  ;;  %v22407_v62 = vld [vmem:[#allocation132_spill] sm:$0xff]  ;;  %v12911_v30 = vunpack.i.h.bf16 %v16632_v10  ;;  %v11548_v55 = vpack.c.bf16 %v4011_v13, %v22408_v44  ;;  %v22417_v13 = vld [vmem:[#allocation23_spill] sm:$0xff] }
 0x3ed   : > { %11523 = vmatpush1.bf16.msk.msra.mxu1 %vm22361_vm15, %v16668_v3  ;;  %v11542_v45 = vpack.c.bf16 %v4010_v24, %v22407_v62  ;;  %vm22409_vm15 = vcmp.lt.s32.totalorder %v22379_v57, 63  ;;  %vm22410_vm5 = vcmask 588800   ;;  %vm22413_vm6 = vcmask 1031168   ;;  %v22421_v62 = vld [vmem:[#allocation22_spill] sm:$0xff]  ;;  %v22425_v10 = vld [vmem:[#allocation24_spill] sm:$0xff] }
 0x3ee   : > { %v11539_v29 = vpack.c.bf16 %v3780_v40, %v22405_v52  ;;  %v16774_v4 = vpop.permute.xlu1 %12948  ;;  %10401 = vmatprep.subr.msk.mxu1 %vm22406_vm13, %v3456_v25  ;;  %11538 = vmatprep.subr.msk.bf16.mxu0 %vm11537_vm2, %v11536_v60  ;;  %v22411_v40 = vld [vmem:[#allocation11_spill] sm:$0xff]  ;;  %v3458_v24 = vsel %vm22413_vm6, %v3415_v34, %v3417_v35  ;;  %vm22414_vm8 = vcmask 506880   ;;  %vm22416_vm4 = vcmask 523264  }
 0x3ef   : > { %vm22412_vm2 = vnez %v22411_v40  ;;  %v3783_v60 = vsel %vm22414_vm8, %v12916_v20, %v12930_v54  ;;  %vm22418_vm1 = vnez %v22417_v13  ;;  %vm22420_vm13 = vcmp.lt.s32.totalorder %v22394_v17, 63 }
 0x3f0   : > { %11541 = vmatpush1.bf16.msk.msra.mxu0 %vm11540_vm7, %v11539_v29  ;;  %v12924_v3 = vpop.permute.xlu0 %12923  ;;  %vm22419_vm7 = vmmov %vm22416_vm4  ;;  %v12940_v44 = vunpack.i.l.bf16 %v16750_v50 }
 0x3f1   : > { %v12925_v18 = vunpack.i.l.bf16 %v12924_v3  ;;  %11544 = vmatprep.subr.msk.bf16.mxu0 %vm22386_vm10, %v11542_v45  ;;  %10402 = vmatpush1.msk.msra.mxu1 %vm22409_vm15, %v16674_v21  ;;  %vm22415_vm10 = vmmov %vm22413_vm6  ;;  %v3620_v34 = vsel %vm22419_vm7, %v12910_v37, %v12911_v30  ;;  %v12926_v52 = vunpack.i.h.bf16 %v12924_v3  ;;  %vm22422_vm15 = vcmp.lt.s32.totalorder %v22421_v62, 63  ;;  %v22427_v37 = vld [vmem:[#allocation111_spill] sm:$0xff] }
 0x3f2   : > { %v16788_v25 = vpop.permute.xlu1 %3426  ;;  %10403 = vmatmul.mubr.msk.f32.vlgmr.msra.gmra.mrb[24].mxu1 %vm22410_vm5, %v16162_v16  ;;  %11550 = vmatprep.subr.msk.bf16.mxu1 %vm22412_vm2, %v11548_v55  ;;  %v16798_v43 = vsel %vm22415_vm10, %v3417_v35, %v16650_v27  ;;  %v11557_v29 = vpack.c.bf16 %v3620_v34, %v3458_v24  ;;  %vm11561_vm5 = vmpackc.low %vm22422_vm15, %vm21549_vm3  ;;  %vm22423_vm6 = vcmask 1039360   ;;  %vm22432_vm7 = vcmp.lt.s32.totalorder %v22402_v61, 63  ;;  %v22434_v34 = vld [vmem:[#allocation72_spill] sm:$0xff] }
 0x3f3   : > { %v3621_v21 = vsel %vm22416_vm4, %v12911_v30, %v12925_v18  ;;  %11553 = vmatpush1.bf16.msk.msra.mxu1 %vm22418_vm1, %v11542_v45  ;;  %4909 = vmatprep.mubr.f32.mxu1 %v21567_v15  ;;  %v4012_v22 = vsel %vm22423_vm6, %v12920_v26, %v12921_v6  ;;  %v22428_v30 = vmax.f32 %v22427_v37, 0.0  ;;  %vm22429_vm10 = vmmov %vm22423_vm6  ;;  %v22433_v26 = vld [vmem:[#allocation134_spill] sm:$0xff]  ;;  %vm22439_vm6 = vcmask 1031168  }
 0x3f4   : > { %11547 = vmatpush1.bf16.msk.msra.mxu0 %vm22388_vm9, %v11524_v51  ;;  %v12934_v0 = vpop.permute.xlu0 %12933  ;;  %v11554_v33 = vpack.c.bf16 %v3621_v21, %v16798_v43  ;;  %vm22424_vm9 = vmmov %vm22414_vm8  ;;  %vm22426_vm8 = vnez %v22425_v10  ;;  %v22430_v21 = vld [vmem:[#allocation76_spill] sm:$0xff]  ;;  %v22437_v10 = vld [vmem:[#allocation110_spill] sm:$0xff] }
 0x3f5   : > { %v12935_v35 = vunpack.i.l.bf16 %v12934_v0  ;;  %10414 = vmatprep.subr.msk.mxu0 %vm22420_vm13, %v3458_v24  ;;  %v3782_v51 = vsel %vm22424_vm9, %v12915_v49, %v12916_v20  ;;  %v11560_v3 = vpack.c.bf16 %v3783_v60, %v22428_v30  ;;  %vm22431_vm4 = vnez %v22430_v21  ;;  %v22436_v60 = vld [vmem:[#allocation133_spill] sm:$0xff]  ;;  %v22445_v21 = vld [vmem:[#allocation78_spill] sm:$0xff] }
 0x3f6   : > { %v16817_v45 = vpop.permute.xlu1 %12958  ;;  %11556 = vmatprep.subr.msk.bf16.mxu1 %vm22426_vm8, %v11554_v33  ;;  %vm22435_vm13 = vcmp.lt.s32.totalorder %v22434_v34, 63  ;;  %v11566_v33 = vpack.c.bf16 %v4012_v22, %v22436_v60  ;;  %v22438_v37 = vmax.f32 %v22437_v10, 0.0  ;;  %vm22440_vm9 = vcmask 523264  }
 0x3f7   : > { %v4013_v24 = vsel %vm22429_vm10, %v12921_v6, %v12935_v35  ;;  %11559 = vmatpush1.bf16.msk.msra.mxu1 %vm22431_vm4, %v11557_v29  ;;  %vm11564_vm15 = vmpackc.low %vm22435_vm13, %vm21549_vm3  ;;  %v12931_v30 = vunpack.i.h.bf16 %v16696_v59  ;;  %vm22446_vm4 = vnez %v22445_v21 }
 0x3f8   : > { %10415 = vmatpush1.msk.msra.mxu0 %vm22432_vm7, %v16717_v2  ;;  %v3423_v49 = vpop.permute.xlu0 %3422  ;;  %11562 = vmatprep.subr.msk.bf16.mxu1 %vm11561_vm5, %v11560_v3  ;;  %v11572_v20 = vpack.c.bf16 %v4013_v24, %v22433_v26  ;;  %v11563_v6 = vpack.c.bf16 %v3782_v51, %v22438_v37  ;;  %v3623_v2 = vsel %vm22440_vm9, %v12926_v52, %v12940_v44  ;;  %vm22441_vm5 = vcmask 588800   ;;  %vm22442_vm8 = vmmov %vm22440_vm9  ;;  %v22443_v24 = vld [vmem:[#allocation12_spill] sm:$0xff] }
 0x3f9   : > { %v16839_v29 = vsel %vm22439_vm6, %v16729_v56, %v3423_v49  ;;  %10416 = vmatmul.mubr.msk.f32.vlgmr.msra.gmra.mrb[26].mxu0 %vm22441_vm5, %v16162_v16  ;;  %v3622_v3 = vsel %vm22442_vm8, %v12925_v18, %v12926_v52  ;;  %vm22444_vm10 = vnez %v22443_v24  ;;  %v12936_v51 = vunpack.i.h.bf16 %v12934_v0  ;;  %vm22447_vm7 = vmmov %vm22439_vm6  ;;  %v22448_v18 = vld [vmem:[#allocation79_spill] sm:$0xff] }
 0x3fa   : > { %v11578_v22 = vpack.c.bf16 %v3623_v2, %v16839_v29  ;;  %11574 = vmatprep.subr.msk.bf16.mxu0 %vm22444_vm10, %v11572_v20  ;;  %4980 = vmatprep.mubr.f32.mxu0 %v21567_v15  ;;  %v3460_v26 = vsel %vm22447_vm7, %v16650_v27, %v16729_v56  ;;  %v16857_v60 = vpop.permute.xlu1 %3428  ;;  %vm22449_vm13 = vnez %v22448_v18  ;;  %vm22450_vm6 = vcmask 506880   ;;  %v22453_v27 = vld [vmem:[#allocation80_spill] sm:$0xff]  ;;  %v22455_v56 = vld [vmem:[#allocation75_spill] sm:$0xff] }
 0x3fb   : > { %11565 = vmatpush1.bf16.msk.msra.mxu1 %vm11564_vm15, %v11563_v6  ;;  %11577 = vmatpush1.bf16.msk.msra.mxu0 %vm22446_vm4, %v11566_v33  ;;  %v11581_v52 = vpack.c.bf16 %v3622_v3, %v3460_v26  ;;  %v3784_v0 = vsel %vm22450_vm6, %v12930_v54, %v12931_v30  ;;  %v12950_v37 = vunpack.i.l.bf16 %v16774_v4  ;;  %vm22451_vm15 = vcmask 1039360   ;;  %vm22452_vm9 = vmmov %vm22450_vm6  ;;  %v22459_v54 = vld [vmem:[#allocation113_spill] sm:$0xff] }
 0x3fc   : > { %v12944_v59 = vpop.permute.xlu0 %12943  ;;  %11568 = vmatprep.subr.msk.bf16.mxu1 %vm22412_vm2, %v11566_v33  ;;  %11580 = vmatprep.subr.msk.bf16.mxu0 %vm22449_vm13, %v11578_v22  ;;  %v4014_v6 = vsel %vm22451_vm15, %v12935_v35, %v12936_v51  ;;  %vm22454_vm5 = vnez %v22453_v27  ;;  %vm22456_vm2 = vcmp.lt.s32.totalorder %v22455_v56, 63  ;;  %vm22457_vm7 = vmmov %vm22451_vm15  ;;  %vm22458_vm13 = vcmp.lt.s32.totalorder %v22421_v62, 63 }
 0x3fd   : > { %v12945_v10 = vunpack.i.l.bf16 %v12944_v59  ;;  %vm11585_vm8 = vmpackc.low %vm22456_vm2, %vm21549_vm3  ;;  %v4015_v40 = vsel %vm22457_vm7, %v12936_v51, %v12950_v37  ;;  %v22460_v35 = vmax.f32 %v22459_v54, 0.0  ;;  %v12946_v51 = vunpack.i.h.bf16 %v12944_v59 }
 0x3fe   : > { %v16884_v18 = vpop.permute.xlu1 %3592  ;;  %vm22465_vm15 = vcmp.lt.s32.totalorder %v22434_v34, 63  ;;  %v12951_v27 = vunpack.i.h.bf16 %v16774_v4  ;;  %vm22470_vm2 = vcmask 506880  }
 0x3ff   : > { %v3785_v2 = vsel %vm22452_vm9, %v12931_v30, %v12945_v10  ;;  %11571 = vmatpush1.bf16.msk.msra.mxu1 %vm22418_vm1, %v11548_v55  ;;  %11583 = vmatpush1.bf16.msk.msra.mxu0 %vm22454_vm5, %v11581_v52  ;;  %v22461_v30 = vld [vmem:[#allocation77_spill] sm:$0xff]  ;;  %v22463_v55 = vld [vmem:[#allocation112_spill] sm:$0xff]  ;;  %v11590_v52 = vpack.c.bf16 %v4014_v6, %v16068_v5  ;;  %vm22466_vm9 = vcmask 588800   ;;  %v12960_v5 = vunpack.i.l.bf16 %v16817_v45 }
 0x400   : > { %v3425_v33 = vpop.permute.xlu0 %3424  ;;  %10427 = vmatprep.subr.msk.mxu1 %vm22458_vm13, %v3460_v26  ;;  %v11584_v3 = vpack.c.bf16 %v3785_v2, %v22460_v35  ;;  %vm22462_vm6 = vcmp.lt.s32.totalorder %v22461_v30, 63  ;;  %v22464_v13 = vmax.f32 %v22463_v55, 0.0  ;;  %v16891_v26 = vpack.c.bf16 %v4015_v40, %v16058_v7 }
 0x401   : > { %vm11588_vm1 = vmpackc.low %vm22462_vm6, %vm21549_vm3  ;;  %v12941_v2 = vunpack.i.h.bf16 %v16750_v50  ;;  %vm22469_vm5 = vcmask 1031168   ;;  %v4016_v6 = vsel %vm22457_vm7, %v12950_v37, %v12951_v27  ;;  %vm22474_vm6 = vcmp.lt.s32.totalorder %v22455_v56, 63  ;;  %v22477_v37 = vld [vmem:[#allocation13_spill] sm:$0xff]  ;;  %v22479_v50 = vld [vmem:[#allocation86_spill] sm:$0xff] }
 0x402   : > { %v11587_v22 = vpack.c.bf16 %v3784_v0, %v22464_v13  ;;  %11586 = vmatprep.subr.msk.bf16.mxu0 %vm11585_vm8, %v11584_v3  ;;  %v3462_v4 = vsel %vm22469_vm5, %v3423_v49, %v3425_v33  ;;  %v3787_v0 = vsel %vm22470_vm2, %v12946_v51, %v12960_v5  ;;  %vm22471_vm8 = vmmov %vm22469_vm5  ;;  %v16916_v40 = vpop.permute.xlu1 %12963  ;;  %vm22480_vm5 = vnez %v22479_v50 }
 0x403   : > { %10428 = vmatpush1.msk.msra.mxu1 %vm22465_vm15, %v16798_v43  ;;  %vm22476_vm15 = vmmov %vm22457_vm7 }
 0x404   : > { %11589 = vmatpush1.bf16.msk.msra.mxu0 %vm11588_vm1, %v11587_v22  ;;  %v12954_v54 = vpop.permute.xlu0 %12953  ;;  %10429 = vmatmul.mubr.msk.f32.vlgmr.msra.gmra.mrb[26].mxu1 %vm22466_vm9, %v16162_v16  ;;  %v16910_v16 = vsel %vm22471_vm8, %v3425_v33, %v16788_v25  ;;  %vm22475_vm1 = vmmov %vm22470_vm2  ;;  %vm22483_vm2 = vcmp.lt.s32.totalorder %v22461_v30, 63 }
 0x405   : > { %11592 = vmatprep.subr.msk.bf16.mxu0 %vm22444_vm10, %v11590_v52  ;;  %v12955_v59 = vunpack.i.l.bf16 %v12954_v54  ;;  %11598 = vmatprep.subr.msk.bf16.mxu1 %vm15355_vm12, %v16891_v26  ;;  %vm22472_vm10 = vcmask 523264   ;;  %v3786_v3 = vsel %vm22475_vm1, %v12945_v10, %v12946_v51  ;;  %v12956_v55 = vunpack.i.h.bf16 %v12954_v54  ;;  %v22484_v10 = vld [vmem:[#allocation89_spill] sm:$0xff] }
 0x406   : > { %5051 = vmatprep.mubr.f32.mxu1 %v21567_v15  ;;  %11601 = vmatpush1.bf16.msk.msra.mxu1 %vm15364_vm0, %v11590_v52  ;;  %vm22473_vm13 = vmmov %vm22472_vm10  ;;  %vm22485_vm8 = vnez %v22484_v10  ;;  %v11614_v51 = vpack.c.bf16 %v4016_v6, %v16085_v39  ;;  %vm22492_vm1 = vcmask 1031168   ;;  %v22503_v10 = vld [vmem:[#allocation82_spill] sm:$0xff] }
 0x407   : > { %v3625_v24 = vsel %vm22472_vm10, %v12941_v2, %v12955_v59  ;;  %v3624_v49 = vsel %vm22473_vm13, %v12940_v44, %v12941_v2  ;;  %v22481_v44 = vld [vmem:[#allocation115_spill] sm:$0xff]  ;;  %v22486_v2 = vld [vmem:[#allocation114_spill] sm:$0xff]  ;;  %vm22488_vm10 = vcmask 588800  }
 0x408   : > { %11595 = vmatpush1.bf16.msk.msra.mxu0 %vm22446_vm4, %v11572_v20  ;;  %v3983_v35 = vpop.permute.xlu0 %3982  ;;  %v11602_v33 = vpack.c.bf16 %v3625_v24, %v16910_v16  ;;  %v11605_v20 = vpack.c.bf16 %v3624_v49, %v3462_v4  ;;  %vm22478_vm4 = vcmp.lt.s32.totalorder %v22477_v37, 63  ;;  %v22482_v22 = vmax.f32 %v22481_v44, 0.0  ;;  %v22494_v49 = vld [vmem:[#allocation87_spill] sm:$0xff]  ;;  %v22499_v44 = vld [vmem:[#allocation90_spill] sm:$0xff] }
 0x409   : > { %10440 = vmatprep.subr.msk.mxu0 %vm22474_vm6, %v3462_v4  ;;  %v4017_v21 = vsel %vm22476_vm15, %v12951_v27, %v3983_v35  ;;  %vm11609_vm9 = vmpackc.low %vm22478_vm4, %vm21549_vm3  ;;  %v22487_v27 = vmax.f32 %v22486_v2, 0.0  ;;  %vm22491_vm6 = vcmask 523264   ;;  %vm22495_vm4 = vnez %v22494_v49 }
 0x40a   : > { %v11620_v13 = vpack.c.bf16 %v4017_v21, %v16079_v38  ;;  %11604 = vmatprep.subr.msk.bf16.mxu1 %vm22480_vm5, %v11602_v33  ;;  %v11608_v52 = vpack.c.bf16 %v3787_v0, %v22482_v22  ;;  %v16945_v38 = vld [vmem:[%s20665_s3] sm:$0xff]  ;;  %v12961_v0 = vunpack.i.h.bf16 %v16817_v45  ;;  %v3626_v39 = vsel %vm22491_vm6, %v12955_v59, %v12956_v55  ;;  %vm22493_vm15 = vmmov %vm22491_vm6  ;;  %v16961_v33 = vpop.permute.xlu1 %3434 }
 0x40b   : > { %11607 = vmatpush1.bf16.msk.msra.mxu1 %vm22485_vm8, %v11605_v20  ;;  %v11611_v54 = vpack.c.bf16 %v3786_v3, %v22487_v27  ;;  %v3627_v6 = vsel %vm22493_vm15, %v12956_v55, %v16884_v18  ;;  %v22496_v21 = vld [vmem:[#allocation88_spill] sm:$0xff]  ;;  %vm22498_vm5 = vmmov %vm22492_vm1  ;;  %v12966_v59 = vunpack.i.h.bf16 %v16916_v40  ;;  %v12965_v20 = vunpack.i.l.bf16 %v16916_v40 }
 0x40c   : > { %10441 = vmatpush1.msk.msra.mxu0 %vm22483_vm2, %v16839_v29  ;;  %v3431_v4 = vpop.permute.xlu0 %3430  ;;  %11610 = vmatprep.subr.msk.bf16.mxu1 %vm11609_vm9, %v11608_v52  ;;  %v22489_v29 = vld [vmem:[#allocation81_spill] sm:$0xff]  ;;  %vm22497_vm9 = vnez %v22496_v21  ;;  %v3464_v45 = vsel %vm22498_vm5, %v16788_v25, %v16857_v60  ;;  %vm22500_vm2 = vnez %v22499_v44  ;;  %vm22501_vm8 = vcmask 506880   ;;  %v22508_v27 = vld [vmem:[#allocation92_spill] sm:$0xff]  ;;  %v22525_v21 = vld [vmem:[#allocation14_spill] sm:$0xff] }
 0x40d   : > { %10442 = vmatmul.mubr.msk.f32.vlgmr.msra.gmra.mrb[28].mxu0 %vm22488_vm10, %v16945_v38  ;;  %vm22490_vm7 = vcmp.lt.s32.totalorder %v22489_v29, 63  ;;  %v3465_v24 = vsel %vm22492_vm1, %v16857_v60, %v3431_v4  ;;  %11622 = vmatprep.subr.msk.bf16.mxu0 %vm22495_vm4, %v11620_v13  ;;  %v11629_v55 = vpack.c.bf16 %v3626_v39, %v3464_v45  ;;  %v3788_v22 = vsel %vm22501_vm8, %v12960_v5, %v12961_v0  ;;  %vm22502_vm10 = vmmov %vm22501_vm8  ;;  %v22506_v60 = vld [vmem:[#allocation117_spill] sm:$0xff]  ;;  %v22511_v5 = vld [vmem:[#allocation83_spill] sm:$0xff] }
 0x40e   : > { %vm11612_vm13 = vmpackc.low %vm22490_vm7, %vm21549_vm3  ;;  %5122 = vmatprep.mubr.f32.mxu0 %v21567_v15  ;;  %v11626_v3 = vpack.c.bf16 %v3627_v6, %v3465_v24  ;;  %11625 = vmatpush1.bf16.msk.msra.mxu0 %vm22497_vm9, %v11614_v51  ;;  %vm22504_vm7 = vcmp.lt.s32.totalorder %v22503_v10, 63  ;;  %vm22505_vm1 = vcmask 1039360   ;;  %v22507_v40 = vmax.f32 %v22506_v60, 0.0 }
 0x40f   : > { %11613 = vmatpush1.bf16.msk.msra.mxu1 %vm11612_vm13, %v11611_v54  ;;  %vm11633_vm6 = vmpackc.low %vm22504_vm7, %vm21549_vm3  ;;  %v4018_v25 = vsel %vm22505_vm1, %v3983_v35, %v12965_v20  ;;  %vm22509_vm13 = vnez %v22508_v27  ;;  %vm22512_vm15 = vcmp.lt.s32.totalorder %v22511_v5, 63  ;;  %v12974_v35 = vpop.permute.xlu1 %12973  ;;  %vm22517_vm8 = vcmask 588800   ;;  %v22533_v27 = vld [vmem:[#allocation96_spill] sm:$0xff] }
 0x410   : > { %v3755_v50 = vpop.permute.xlu0 %3754  ;;  %11616 = vmatprep.subr.msk.bf16.mxu1 %vm15355_vm12, %v11614_v51  ;;  %11628 = vmatprep.subr.msk.bf16.mxu0 %vm22500_vm2, %v11626_v3  ;;  %vm22510_vm12 = vmmov %vm22505_vm1  ;;  %v22513_v51 = vld [vmem:[#allocation116_spill] sm:$0xff]  ;;  %vm22515_vm2 = vcmp.lt.s32.totalorder %v22477_v37, 63  ;;  %v11638_v6 = vpack.c.bf16 %v4018_v25, %v16168_v28  ;;  %v12976_v7 = vunpack.i.h.bf16 %v12974_v35 }
 0x411   : > { %v3789_v52 = vsel %vm22502_vm10, %v12961_v0, %v3755_v50  ;;  %v4019_v43 = vsel %vm22510_vm12, %v12965_v20, %v12966_v59  ;;  %vm11636_vm5 = vmpackc.low %vm22512_vm15, %vm21549_vm3  ;;  %v22514_v54 = vmax.f32 %v22513_v51, 0.0  ;;  %v22535_v51 = vld [vmem:[#allocation95_spill] sm:$0xff] }
 0x412   : > { %v11632_v2 = vpack.c.bf16 %v3789_v52, %v22507_v40  ;;  %11631 = vmatpush1.bf16.msk.msra.mxu0 %vm22509_vm13, %v11629_v55  ;;  %v11644_v3 = vpack.c.bf16 %v4019_v43, %v16171_v11  ;;  %vm22524_vm13 = vcmp.lt.s32.totalorder %v22503_v10, 63  ;;  %vm22527_vm15 = vmmov %vm22502_vm10  ;;  %v22531_v40 = vld [vmem:[#allocation119_spill] sm:$0xff] }
 0x413   : > { %11619 = vmatpush1.bf16.msk.msra.mxu1 %vm15364_vm0, %v16891_v26  ;;  %v11635_v0 = vpack.c.bf16 %v3788_v22, %v22514_v54  ;;  %v12975_v26 = vunpack.i.l.bf16 %v12974_v35  ;;  %vm22516_vm0 = vcmp.lt.s32.totalorder %v22489_v29, 63 }
 0x414   : > { %v3433_v39 = vpop.permute.xlu0 %3432  ;;  %10453 = vmatprep.subr.msk.mxu1 %vm22515_vm2, %v3464_v45  ;;  %11634 = vmatprep.subr.msk.bf16.mxu0 %vm11633_vm6, %v11632_v2  ;;  %vm22522_vm6 = vcmask 523264   ;;  %v22532_v2 = vmax.f32 %v22531_v40, 0.0 }
 0x415   : > { %vm22523_vm1 = vmmov %vm22522_vm6 }
 0x416   : > { %11637 = vmatpush1.bf16.msk.msra.mxu0 %vm11636_vm5, %v11635_v0  ;;  %vm22528_vm5 = vcmp.lt.s32.totalorder %v22511_v5, 63 }
 0x417   : > { %11640 = vmatprep.subr.msk.bf16.mxu0 %vm22495_vm4, %v11638_v6  ;;  %10454 = vmatpush1.msk.msra.mxu1 %vm22516_vm0, %v16910_v16  ;;  %vm22520_vm4 = vcmask 1031168   ;;  %v3791_v16 = vsel %vm22502_vm10, %v12975_v26, %v12976_v7  ;;  %vm22534_vm0 = vcmask 1039360  }
 0x418   : > { %v12969_v20 = vpop.permute.xlu0 %12968  ;;  %10455 = vmatmul.mubr.msk.f32.vlgmr.msra.gmra.mrb[28].mxu1 %vm22517_vm8, %v16945_v38  ;;  %11646 = vmatprep.subr.msk.bf16.mxu1 %vm15517_vm11, %v11644_v3  ;;  %v3466_v11 = vsel %vm22520_vm4, %v3431_v4, %v3433_v39  ;;  %vm22521_vm7 = vmmov %vm22520_vm4  ;;  %v22529_v4 = vld [vmem:[#allocation94_spill] sm:$0xff]  ;;  %v4052_v43 = vsel %vm22534_vm0, %v12966_v59, %v22533_v27  ;;  %vm22536_vm4 = vnez %v22535_v51 }
 0x419   : > { %v12971_v28 = vunpack.i.h.bf16 %v12969_v20  ;;  %v12970_v55 = vunpack.i.l.bf16 %v12969_v20  ;;  %11649 = vmatpush1.bf16.msk.msra.mxu1 %vm15529_vm14, %v11638_v6  ;;  %5193 = vmatprep.mubr.f32.mxu1 %v21567_v15  ;;  %v3467_v49 = vsel %vm22521_vm7, %v3433_v39, %v16961_v33  ;;  %vm22530_vm2 = vnez %v22529_v4  ;;  %v22541_v59 = vld [vmem:[#allocation18_spill] sm:$0xff] }
 0x41a   : > { %11643 = vmatpush1.bf16.msk.msra.mxu0 %vm22497_vm9, %v11620_v13  ;;  %vm22526_vm9 = vcmp.lt.s32.totalorder %v22525_v21, 63  ;;  %v3790_v13 = vsel %vm22527_vm15, %v3755_v50, %v12975_v26  ;;  %v22537_v50 = vld [vmem:[#allocation91_spill] sm:$0xff]  ;;  %v11662_v35 = vpack.c.bf16 %v4052_v43, %v16174_v1  ;;  %vm22551_vm15 = vmmov %vm22534_vm0 }
 0x41b   : > { %v3629_v22 = vsel %vm22522_vm6, %v12970_v55, %v12971_v28  ;;  %v3628_v52 = vsel %vm22523_vm1, %v16884_v18, %v12970_v55  ;;  %10466 = vmatprep.subr.msk.mxu0 %vm22524_vm13, %v3466_v11  ;;  %vm11657_vm12 = vmpackc.low %vm22526_vm9, %vm21549_vm3  ;;  %v11656_v18 = vpack.c.bf16 %v3791_v16, %v22532_v2  ;;  %vm22538_vm10 = vcmp.lt.s32.totalorder %v22537_v50, 63 }
 0x41c   : > { %v11653_v25 = vpack.c.bf16 %v3628_v52, %v3466_v11  ;;  %v11650_v60 = vpack.c.bf16 %v3629_v22, %v3467_v49  ;;  %vm11660_vm7 = vmpackc.low %vm22538_vm10, %vm21549_vm3  ;;  %vm22542_vm6 = vcmask 1031168  }
 0x41d   : > { %v3888_v39 = vsel %vm22542_vm6, %v16961_v33, %v22541_v59  ;;  %vm22543_vm1 = vmmov %vm22526_vm9 }
 0x41e   : > { %10467 = vmatpush1.msk.msra.mxu0 %vm22528_vm5, %v3465_v24  ;;  %11652 = vmatprep.subr.msk.bf16.mxu1 %vm22530_vm2, %v11650_v60  ;;  %v22539_v24 = vld [vmem:[#allocation118_spill] sm:$0xff]  ;;  %vm22544_vm13 = vmmov %vm22538_vm10 }
 0x41f   : > { %10468 = vmatmul.mubr.msk.f32.vlgmr.msra.gmra.mrb[30].mxu0 %vm22517_vm8, %v16945_v38  ;;  %11655 = vmatpush1.bf16.msk.msra.mxu1 %vm22536_vm4, %v11653_v25  ;;  %v22540_v54 = vmax.f32 %v22539_v24, 0.0  ;;  %vm22545_vm9 = vmmov %vm22517_vm8 }
 0x420   : > { %11658 = vmatprep.subr.msk.bf16.mxu1 %vm11657_vm12, %v11656_v18  ;;  %6509 = vmatprep.mubr.f32.mxu0 %v21567_v15  ;;  %vm22549_vm12 = vmmov %vm22534_vm0 }
 0x421   : > { %v11659_v0 = vpack.c.bf16 %v3790_v13, %v22540_v54  ;;  %vm22553_vm5 = vmmov %vm22534_vm0 }
 0x422   : > { %vm22555_vm2 = vmmov %vm22534_vm0 }
 0x423   : > { %11661 = vmatpush1.bf16.msk.msra.mxu1 %vm11660_vm7, %v11659_v0  ;;  %vm22558_vm8 = vmmov %vm22534_vm0 }
 0x424   : > { %11664 = vmatprep.subr.msk.bf16.mxu1 %vm15517_vm11, %v11662_v35  ;;  %vm22546_vm11 = vmmov %vm22534_vm0 }
 0x425   : > { %vm22560_vm4 = vmmov %vm22534_vm0 }
 0x426   : > { %vm22562_vm10 = vmmov %vm22534_vm0 }
 0x427   : > { %11667 = vmatpush1.bf16.msk.msra.mxu1 %vm15529_vm14, %v11644_v3  ;;  %vm22547_vm14 = vmmov %vm22534_vm0 }
 0x428   : > { %10479 = vmatprep.subr.msk.mxu1 %vm22543_vm1, %v3888_v39  ;;  %vm22564_vm7 = vmmov %vm22534_vm0 }
 0x429   : > { %v17057_v1 = vpop.permute.xlu0 %4058  ;;  %vm22566_vm6 = vmmov %vm22534_vm0 }
 0x42a   : > { %vm22568_vm1 = vmmov %vm22534_vm0 }
 0x42b   : > { %10480 = vmatpush1.msk.msra.mxu1 %vm22544_vm13, %v3467_v49  ;;  %vm22570_vm13 = vmmov %vm22534_vm0 }
 0x42c   : > { %10481 = vmatmul.mubr.msk.f32.vlgmr.msra.gmra.mrb[30].mxu1 %vm22545_vm9, %v16945_v38  ;;  %vm22572_vm9 = vmmov %vm22534_vm0 }
 0x42d   : > { %6580 = vmatprep.mubr.f32.mxu1 %v21567_v15 }
 0x45f   : > { %v4130_v6 = vpop.f32.mrb[16].mxu0 }
 0x460   : > { %v17060_v3 = vadd.f32 %v4130_v6, %v17057_v1  ;;  %v4132_v7 = vpop.f32.mrb[17].mxu0 }
 0x461   : > { %v17063_v33 = vadd.f32 %v4132_v7, %v17057_v1 }
 0x462   : > { %v5200_v26 = vmax.f32 %v17060_v3, 0.0 }
 0x463   : > { %v21067_v20 = vmax.f32 %v17063_v33, 0.0 }
 0x464   : > { %5264 = vrot.lane.b32.xlu1 %v5200_v26, %s13275_s14 }
 0x465   : > { %5266 = vrot.lane.b32.xlu0 %v21067_v20, %s13275_s14 }
 0x477   : > { %v4201_v38 = vpop.f32.mrb[16].mxu1 }
 0x478   : > { %v17074_v45 = vadd.f32 %v4201_v38, %v17057_v1  ;;  %v4203_v28 = vpop.f32.mrb[17].mxu1 }
 0x479   : > { %v17077_v55 = vadd.f32 %v4203_v28, %v17057_v1 }
 0x47a   : > { %v21066_v44 = vmax.f32 %v17074_v45, 0.0 }
 0x47b   : > { %v21063_v11 = vmax.f32 %v17077_v55, 0.0 }
 0x47c   : > { %5268 = vrot.lane.b32.xlu1 %v21066_v44, %s13275_s14 }
 0x47d   : > { %5270 = vrot.lane.b32.xlu0 %v21063_v11, %s13275_s14 }
 0x47f   : > { %v4272_v16 = vpop.f32.mrb[18].mxu0 }
 0x480   : > { %v17088_v49 = vadd.f32 %v4272_v16, %v17057_v1  ;;  %v4274_v22 = vpop.f32.mrb[19].mxu0 }
 0x481   : > { %v17091_v52 = vadd.f32 %v4274_v22, %v17057_v1 }
 0x482   : > { %v21062_v25 = vmax.f32 %v17088_v49, 0.0 }
 0x483   : > { %v21059_v60 = vmax.f32 %v17091_v52, 0.0 }
 0x484   : > { %5272 = vrot.lane.b32.xlu1 %v21062_v25, %s13275_s14 }
 0x485   : > { %5274 = vrot.lane.b32.xlu0 %v21059_v60, %s13275_s14 }
 0x48b   : > { %v4343_v13 = vpop.f32.mrb[18].mxu1 }
 0x48c   : > { %v17102_v4 = vadd.f32 %v4343_v13, %v17057_v1  ;;  %v4345_v40 = vpop.f32.mrb[19].mxu1 }
 0x48d   : > { %v17105_v2 = vadd.f32 %v4345_v40, %v17057_v1 }
 0x48e   : > { %v21058_v18 = vmax.f32 %v17102_v4, 0.0  ;;  %v22557_v17 = vmax.f32 %v17102_v4, 0.0 }
 0x48f   : > { %v21055_v27 = vmax.f32 %v17105_v2, 0.0 }
 0x490   : > { %5276 = vrot.lane.b32.xlu1 %v21058_v18, %s13275_s14 }
 0x491   : > { %5278 = vrot.lane.b32.xlu0 %v21055_v27, %s13275_s14 }
 0x493   : > { %v4414_v43 = vpop.f32.mrb[20].mxu0 }
 0x494   : > { %v17116_v51 = vadd.f32 %v4414_v43, %v17057_v1  ;;  %v4416_v24 = vpop.f32.mrb[21].mxu0 }
 0x495   : > { %v17119_v54 = vadd.f32 %v4416_v24, %v17057_v1 }
 0x496   : > { %v21054_v0 = vmax.f32 %v17116_v51, 0.0 }
 0x497   : > { %v21051_v35 = vmax.f32 %v17119_v54, 0.0 }
 0x498   : > { %5280 = vrot.lane.b32.xlu1 %v21054_v0, %s13275_s14 }
 0x499   : > { %5282 = vrot.lane.b32.xlu0 %v21051_v35, %s13275_s14 }
 0x4a0   : > { %v4485_v39 = vpop.f32.mrb[20].mxu1 }
 0x4a1   : > { %v17130_v6 = vadd.f32 %v4485_v39, %v17057_v1  ;;  %v4487_v7 = vpop.f32.mrb[21].mxu1 }
 0x4a2   : > { %v17133_v38 = vadd.f32 %v4487_v7, %v17057_v1 }
 0x4a3   : > { %v21050_v28 = vmax.f32 %v17130_v6, 0.0 }
 0x4a4   : > { %v21049_v16 = vmax.f32 %v17133_v38, 0.0 }
 0x4a5   : > { %5284 = vrot.lane.b32.xlu1 %v21050_v28, %s13275_s14 }
 0x4a6   : > { %5286 = vrot.lane.b32.xlu0 %v21049_v16, %s13275_s14 }
 0x4a7   : > { %v4556_v22 = vpop.f32.mrb[22].mxu0 }
 0x4a8   : > { %v17144_v13 = vadd.f32 %v4556_v22, %v17057_v1  ;;  %v4558_v40 = vpop.f32.mrb[23].mxu0 }
 0x4a9   : > { %v17147_v43 = vadd.f32 %v4558_v40, %v17057_v1 }
 0x4aa   : > { %v21053_v24 = vmax.f32 %v17144_v13, 0.0 }
 0x4ab   : > { %v21052_v39 = vmax.f32 %v17147_v43, 0.0 }
 0x4ac   : > { %5288 = vrot.lane.b32.xlu1 %v21053_v24, %s13275_s14 }
 0x4ad   : > { %5290 = vrot.lane.b32.xlu0 %v21052_v39, %s13275_s14 }
 0x4b3   : > { %v4627_v7 = vpop.f32.mrb[22].mxu1 }
 0x4b4   : > { %v17158_v22 = vadd.f32 %v4627_v7, %v17057_v1  ;;  %v4629_v16 = vpop.f32.mrb[23].mxu1 }
 0x4b5   : > { %v17161_v40 = vadd.f32 %v4629_v16, %v17057_v1 }
 0x4b6   : > { %v21057_v28 = vmax.f32 %v17158_v22, 0.0 }
 0x4b7   : > { %v21056_v35 = vmax.f32 %v17161_v40, 0.0 }
 0x4b8   : > { %5292 = vrot.lane.b32.xlu1 %v21057_v28, %s13275_s14 }
 0x4b9   : > { %5294 = vrot.lane.b32.xlu0 %v21056_v35, %s13275_s14 }
 0x4ba   : > { %v4698_v39 = vpop.f32.mrb[24].mxu0 }
 0x4bb   : > { %v17172_v7 = vadd.f32 %v4698_v39, %v17057_v1  ;;  %v4700_v24 = vpop.f32.mrb[25].mxu0 }
 0x4bc   : > { %v17175_v16 = vadd.f32 %v4700_v24, %v17057_v1 }
 0x4bd   : > { %v21061_v0 = vmax.f32 %v17172_v7, 0.0 }
 0x4be   : > { %v21060_v27 = vmax.f32 %v17175_v16, 0.0 }
 0x4bf   : > { %5296 = vrot.lane.b32.xlu0 %v21061_v0, %s13275_s14 }
 0x4c0   : > { %5298 = vrot.lane.b32.xlu1 %v21060_v27, %s13275_s14 }
 0x4c5   : > { %v4769_v35 = vpop.f32.mrb[24].mxu1 }
 0x4c6   : > { %v17186_v39 = vadd.f32 %v4769_v35, %v17057_v1  ;;  %v4771_v28 = vpop.f32.mrb[25].mxu1 }
 0x4c7   : > { %v17189_v24 = vadd.f32 %v4771_v28, %v17057_v1 }
 0x4c8   : > { %v21065_v18 = vmax.f32 %v17186_v39, 0.0 }
 0x4c9   : > { %v21064_v60 = vmax.f32 %v17189_v24, 0.0 }
 0x4ca   : > { %5300 = vrot.lane.b32.xlu0 %v21065_v18, %s13275_s14 }
 0x4cb   : > { %5302 = vrot.lane.b32.xlu1 %v21064_v60, %s13275_s14 }
 0x4cc   : > { %v4840_v27 = vpop.f32.mrb[26].mxu0 }
 0x4cd   : > { %v17200_v35 = vadd.f32 %v4840_v27, %v17057_v1  ;;  %v4842_v0 = vpop.f32.mrb[27].mxu0 }
 0x4ce   : > { %v17203_v28 = vadd.f32 %v4842_v0, %v17057_v1 }
 0x4cf   : > { %v21070_v25 = vmax.f32 %v17200_v35, 0.0 }
 0x4d0   : > { %v21073_v11 = vmax.f32 %v17203_v28, 0.0 }
 0x4d1   : > { %5304 = vrot.lane.b32.xlu0 %v21070_v25, %s13275_s14 }
 0x4d2   : > { %5306 = vrot.lane.b32.xlu1 %v21073_v11, %s13275_s14 }
 0x4d6   : > { %v5265_v60 = vpop.permute.xlu1 %5264 }
 0x4d7   : > { %v4911_v18 = vpop.f32.mrb[26].mxu1  ;;  %v5267_v27 = vpop.permute.xlu0 %5266 }
 0x4d8   : > { %v5328_v44 = vsel %vm22546_vm11, %v5265_v60, %v5267_v27  ;;  %v4913_v20 = vpop.f32.mrb[27].mxu1  ;;  %v17222_v37 = vadd.f32 %v4911_v18, %v17057_v1  ;;  %v22548_v60 = vmax.f32 %v17063_v33, 0.0  ;;  %vm22574_vm11 = vmmov %vm22534_vm0 }
 0x4d9   : > { %v17216_v0 = vmax.f32 %v5200_v26, %v5328_v44  ;;  %v17230_v26 = vadd.f32 %v4913_v20, %v17057_v1  ;;  %v22550_v44 = vmax.f32 %v17074_v45, 0.0 }
 0x4da   : > { %v21080_v33 = vmax.f32 %v17222_v37, 0.0 }
 0x4db   : > { %5456 = vrot.lane.b32.xlu1 %v17216_v0, %s13277_s22 }
 0x4e0   : > { %v4982_v50 = vpop.f32.mrb[28].mxu0 }
 0x4e1   : > { %v4984_v21 = vpop.f32.mrb[29].mxu0  ;;  %v17250_v18 = vadd.f32 %v4982_v50, %v17057_v1 }
 0x4e2   : > { %v17258_v62 = vadd.f32 %v4984_v21, %v17057_v1 }
 0x4e3   : > { %v21083_v50 = vmax.f32 %v17250_v18, 0.0 }
 0x4eb   : > { %v5053_v25 = vpop.f32.mrb[28].mxu1 }
 0x4ec   : > { %v5055_v5 = vpop.f32.mrb[29].mxu1 }
 0x4ee   : > { %v5269_v10 = vpop.permute.xlu1 %5268 }
 0x4ef   : > { %v5329_v11 = vsel %vm22547_vm14, %v5267_v27, %v5269_v10  ;;  %v5271_v29 = vpop.permute.xlu0 %5270  ;;  %vm22576_vm14 = vmmov %vm22534_vm0 }
 0x4f0   : > { %v17226_v30 = vmax.f32 %v22548_v60, %v5329_v11  ;;  %v5330_v3 = vsel %vm22549_vm12, %v5269_v10, %v5271_v29  ;;  %v21081_v11 = vmax.f32 %v17230_v26, 0.0  ;;  %v22552_v60 = vmax.f32 %v17077_v55, 0.0  ;;  %vm22578_vm12 = vmmov %vm22534_vm0 }
 0x4f1   : > { %v17234_v56 = vmax.f32 %v22550_v44, %v5330_v3  ;;  %v21085_v55 = vmax.f32 %v17258_v62, 0.0 }
 0x4f2   : > { %v5124_v34 = vpop.f32.mrb[30].mxu0  ;;  %5458 = vrot.lane.b32.xlu0 %v17226_v30, %s13277_s22 }
 0x4f3   : > { %v5126_v27 = vpop.f32.mrb[31].mxu0  ;;  %5460 = vrot.lane.b32.xlu1 %v17234_v56, %s13277_s22 }
 0x4f6   : > { %5308 = vrot.lane.b32.xlu0 %v21080_v33, %s13275_s14  ;;  %v5273_v10 = vpop.permute.xlu1 %5272  ;;  %v22554_v33 = vmax.f32 %v17088_v49, 0.0 }
 0x4f7   : > { %v5331_v20 = vsel %vm22551_vm15, %v5271_v29, %v5273_v10  ;;  %v5275_v45 = vpop.permute.xlu0 %5274  ;;  %5310 = vrot.lane.b32.xlu1 %v21081_v11, %s13275_s14  ;;  %vm22580_vm15 = vmmov %vm22534_vm0 }
 0x4f8   : > { %v17254_v3 = vmax.f32 %v22552_v60, %v5331_v20  ;;  %v5332_v44 = vsel %vm22553_vm5, %v5273_v10, %v5275_v45  ;;  %v17278_v60 = vadd.f32 %v5053_v25, %v17057_v1  ;;  %vm22582_vm5 = vmmov %vm22534_vm0 }
 0x4f9   : > { %v17262_v29 = vmax.f32 %v22554_v33, %v5332_v44  ;;  %v22556_v44 = vmax.f32 %v17091_v52, 0.0 }
 0x4fa   : > { %5462 = vrot.lane.b32.xlu0 %v17254_v3, %s13277_s22  ;;  %v21086_v25 = vmax.f32 %v17278_v60, 0.0 }
 0x4fb   : > { %5464 = vrot.lane.b32.xlu1 %v17262_v29, %s13277_s22 }
 0x4fe   : > { %5312 = vrot.lane.b32.xlu0 %v21083_v50, %s13275_s14  ;;  %v17286_v50 = vadd.f32 %v5055_v5, %v17057_v1 }
 0x4ff   : > { %v5195_v21 = vpop.f32.mrb[30].mxu1  ;;  %5314 = vrot.lane.b32.xlu1 %v21085_v55, %s13275_s14 }
 0x500   : > { %v5197_v49 = vpop.f32.mrb[31].mxu1  ;;  %v21091_v52 = vmax.f32 %v17286_v50, 0.0 }
 0x502   : > { %v5277_v33 = vpop.permute.xlu1 %5276 }
 0x503   : > { %v5333_v10 = vsel %vm22555_vm2, %v5275_v45, %v5277_v33  ;;  %v5279_v20 = vpop.permute.xlu0 %5278  ;;  %vm22584_vm2 = vmmov %vm22534_vm0 }
 0x504   : > { %v17282_v11 = vmax.f32 %v22556_v44, %v5333_v10  ;;  %v5334_v61 = vsel %vm22534_vm0, %v5277_v33, %v5279_v20  ;;  %v17314_v44 = vadd.f32 %v5126_v27, %v17057_v1  ;;  %v17330_v27 = vadd.f32 %v5197_v49, %v17057_v1 }
 0x505   : > { %v17290_v55 = vmax.f32 %v22557_v17, %v5334_v61  ;;  %v17306_v17 = vadd.f32 %v5124_v34, %v17057_v1  ;;  %v22559_v61 = vmax.f32 %v17105_v2, 0.0  ;;  %v17326_v2 = vadd.f32 %v5195_v21, %v17057_v1 }
 0x506   : > { %5466 = vrot.lane.b32.xlu0 %v17282_v11, %s13277_s22  ;;  %vm22586_vm0 = vcmask 523264  }
 0x507   : > { %5468 = vrot.lane.b32.xlu1 %v17290_v55, %s13277_s22  ;;  %v21088_v34 = vmax.f32 %v17306_v17, 0.0 }
 0x50a   : > { %5316 = vrot.lane.b32.xlu0 %v21086_v25, %s13275_s14  ;;  %v5281_v5 = vpop.permute.xlu1 %5280  ;;  %v22561_v25 = vmax.f32 %v17116_v51, 0.0  ;;  %v21089_v51 = vmax.f32 %v17326_v2, 0.0 }
 0x50b   : > { %v5335_v45 = vsel %vm22558_vm8, %v5279_v20, %v5281_v5  ;;  %v5283_v4 = vpop.permute.xlu0 %5282  ;;  %5318 = vrot.lane.b32.xlu1 %v21091_v52, %s13275_s14  ;;  %vm22587_vm8 = vmmov %vm22586_vm0 }
 0x50c   : > { %v17310_v33 = vmax.f32 %v22559_v61, %v5335_v45  ;;  %v5336_v10 = vsel %vm22560_vm4, %v5281_v5, %v5283_v4  ;;  %v21087_v5 = vmax.f32 %v17314_v44, 0.0  ;;  %v22563_v45 = vmax.f32 %v17119_v54, 0.0  ;;  %vm22588_vm4 = vmmov %vm22568_vm1 }
 0x50d   : > { %v17318_v20 = vmax.f32 %v22561_v25, %v5336_v10  ;;  %v21090_v25 = vmax.f32 %v17330_v27, 0.0  ;;  %v22567_v54 = vmax.f32 %v17133_v38, 0.0  ;;  %v22571_v38 = vmax.f32 %v17147_v43, 0.0 }
 0x50e   : > { %5470 = vrot.lane.b32.xlu0 %v17310_v33, %s13277_s22  ;;  %v22575_v43 = vmax.f32 %v17161_v40, 0.0  ;;  %v22579_v40 = vmax.f32 %v17175_v16, 0.0  ;;  %v22583_v16 = vmax.f32 %v17189_v24, 0.0 }
 0x50f   : > { %5472 = vrot.lane.b32.xlu1 %v17318_v20, %s13277_s22 }
 0x512   : > { %5320 = vrot.lane.b32.xlu0 %v21088_v34, %s13275_s14 }
 0x513   : > { %5322 = vrot.lane.b32.xlu1 %v21087_v5, %s13275_s14  ;;  %v22565_v5 = vmax.f32 %v17130_v6, 0.0  ;;  %v22569_v6 = vmax.f32 %v17144_v13, 0.0  ;;  %v22573_v13 = vmax.f32 %v17158_v22, 0.0  ;;  %v22577_v22 = vmax.f32 %v17172_v7, 0.0 }
 0x514   : > { %v22581_v7 = vmax.f32 %v17186_v39, 0.0  ;;  %v22585_v39 = vmax.f32 %v17200_v35, 0.0 }
 0x516   : > { %5324 = vrot.lane.b32.xlu0 %v21089_v51, %s13275_s14 }
 0x517   : > { %v5285_v21 = vpop.permute.xlu1 %5284  ;;  %5326 = vrot.lane.b32.xlu1 %v21090_v25, %s13275_s14  ;;  %s13281_s14 = smov 2  }
 0x518   : > { %v5337_v1 = vsel %vm22562_vm10, %v5283_v4, %v5285_v21  ;;  %v5287_v49 = vpop.permute.xlu0 %5286  ;;  %vm22590_vm10 = vmmov %vm22568_vm1 }
 0x519   : > { %v17349_v61 = vmax.f32 %v22563_v45, %v5337_v1  ;;  %v5338_v10 = vsel %vm22564_vm7, %v5285_v21, %v5287_v49  ;;  %vm22592_vm7 = vmmov %vm22586_vm0 }
 0x51a   : > { %v17354_v34 = vmax.f32 %v22565_v5, %v5338_v10 }
 0x51b   : > { %5474 = vrot.lane.b32.xlu0 %v17349_v61, %s13277_s22 }
 0x51c   : > { %5476 = vrot.lane.b32.xlu1 %v17354_v34, %s13277_s22 }
 0x51e   : > { %v5289_v4 = vpop.permute.xlu1 %5288 }
 0x51f   : > { %v5339_v51 = vsel %vm22566_vm6, %v5287_v49, %v5289_v4  ;;  %v5291_v25 = vpop.permute.xlu0 %5290  ;;  %vm22593_vm6 = vmmov %vm22586_vm0 }
 0x520   : > { %v17363_v1 = vmax.f32 %v22567_v54, %v5339_v51  ;;  %v5340_v21 = vsel %vm22568_vm1, %v5289_v4, %v5291_v25 }
 0x521   : > { %v17368_v5 = vmax.f32 %v22569_v6, %v5340_v21 }
 0x522   : > { %5478 = vrot.lane.b32.xlu0 %v17363_v1, %s13277_s22 }
 0x523   : > { %5480 = vrot.lane.b32.xlu1 %v17368_v5, %s13277_s22 }
 0x52a   : > { %v5293_v45 = vpop.permute.xlu1 %5292 }
 0x52b   : > { %v5341_v49 = vsel %vm22570_vm13, %v5291_v25, %v5293_v45  ;;  %v5295_v10 = vpop.permute.xlu0 %5294  ;;  %vm22595_vm13 = vmmov %vm22568_vm1 }
 0x52c   : > { %v17377_v51 = vmax.f32 %v22571_v38, %v5341_v49  ;;  %v5342_v4 = vsel %vm22572_vm9, %v5293_v45, %v5295_v10  ;;  %vm22597_vm9 = vmmov %vm22586_vm0 }
 0x52d   : > { %v17382_v54 = vmax.f32 %v22573_v13, %v5342_v4 }
 0x52e   : > { %5482 = vrot.lane.b32.xlu0 %v17377_v51, %s13277_s22 }
 0x52f   : > { %5484 = vrot.lane.b32.xlu1 %v17382_v54, %s13277_s22 }
 0x531   : > { %v5297_v21 = vpop.permute.xlu0 %5296 }
 0x532   : > { %v5343_v25 = vsel %vm22574_vm11, %v5295_v10, %v5297_v21  ;;  %v5299_v6 = vpop.permute.xlu1 %5298  ;;  %vm22598_vm11 = vmmov %vm22586_vm0 }
 0x533   : > { %v17391_v49 = vmax.f32 %v22575_v43, %v5343_v25  ;;  %v5344_v45 = vsel %vm22576_vm14, %v5297_v21, %v5299_v6  ;;  %vm22599_vm14 = vmmov %vm22568_vm1 }
 0x534   : > { %v17396_v38 = vmax.f32 %v22577_v22, %v5344_v45 }
 0x535   : > { %5486 = vrot.lane.b32.xlu0 %v17391_v49, %s13277_s22 }
 0x536   : > { %5488 = vrot.lane.b32.xlu1 %v17396_v38, %s13277_s22 }
 0x53c   : > { %v5301_v4 = vpop.permute.xlu0 %5300 }
 0x53d   : > { %v5345_v10 = vsel %vm22578_vm12, %v5299_v6, %v5301_v4  ;;  %v5303_v13 = vpop.permute.xlu1 %5302  ;;  %vm22601_vm12 = vmmov %vm22568_vm1 }
 0x53e   : > { %v17405_v25 = vmax.f32 %v22579_v40, %v5345_v10  ;;  %v5346_v21 = vsel %vm22580_vm15, %v5301_v4, %v5303_v13  ;;  %vm22603_vm15 = vmmov %vm22568_vm1 }
 0x53f   : > { %v17410_v43 = vmax.f32 %v22581_v7, %v5346_v21 }
 0x540   : > { %5490 = vrot.lane.b32.xlu0 %v17405_v25, %s13277_s22 }
 0x541   : > { %5492 = vrot.lane.b32.xlu1 %v17410_v43, %s13277_s22 }
 0x543   : > { %v5305_v45 = vpop.permute.xlu0 %5304 }
 0x544   : > { %v5347_v6 = vsel %vm22582_vm5, %v5303_v13, %v5305_v45  ;;  %v5307_v22 = vpop.permute.xlu1 %5306  ;;  %vm22605_vm5 = vmmov %vm22568_vm1 }
 0x545   : > { %v17419_v10 = vmax.f32 %v22583_v16, %v5347_v6  ;;  %v5348_v4 = vsel %vm22584_vm2, %v5305_v45, %v5307_v22  ;;  %vm22606_vm2 = vmmov %vm22586_vm0 }
 0x546   : > { %v17424_v40 = vmax.f32 %v22585_v39, %v5348_v4  ;;  %v22589_v39 = vmax.f32 %v17203_v28, 0.0 }
 0x547   : > { %5494 = vrot.lane.b32.xlu0 %v17419_v10, %s13277_s22 }
 0x548   : > { %5496 = vrot.lane.b32.xlu1 %v17424_v40, %s13277_s22 }
 0x54d   : > { %v5457_v21 = vpop.permute.xlu1 %5456 }
 0x564   : > { %v5459_v7 = vpop.permute.xlu0 %5458 }
 0x565   : > { %v5520_v13 = vsel %vm22586_vm0, %v5457_v21, %v5459_v7  ;;  %v5461_v52 = vpop.permute.xlu1 %5460 }
 0x566   : > { %v17432_v24 = vmax.f32 %v17216_v0, %v5520_v13  ;;  %v5521_v45 = vsel %vm22587_vm8, %v5459_v7, %v5461_v52  ;;  %vm22608_vm8 = vmmov %vm22568_vm1 }
 0x567   : > { %v17436_v35 = vmax.f32 %v17226_v30, %v5521_v45  ;;  %v22591_v30 = vmax.f32 %v17222_v37, 0.0 }
 0x568   : > { %v5309_v6 = vpop.permute.xlu0 %5308  ;;  %5648 = vrot.lane.b32.xlu0 %v17432_v24, %s13281_s14 }
 0x569   : > { %v5349_v16 = vsel %vm22588_vm4, %v5307_v22, %v5309_v6  ;;  %5650 = vrot.lane.b32.xlu1 %v17436_v35, %s13281_s14  ;;  %v5311_v4 = vpop.permute.xlu1 %5310  ;;  %vm22609_vm4 = vmmov %vm22568_vm1 }
 0x56a   : > { %v17445_v0 = vmax.f32 %v22589_v39, %v5349_v16  ;;  %v5350_v21 = vsel %vm22590_vm10, %v5309_v6, %v5311_v4  ;;  %vm22612_vm10 = vmmov %vm22586_vm0 }
 0x56b   : > { %v17450_v7 = vmax.f32 %v22591_v30, %v5350_v21  ;;  %v22594_v21 = vmax.f32 %v17230_v26, 0.0 }
 0x56c   : > { %v5463_v13 = vpop.permute.xlu0 %5462  ;;  %5498 = vrot.lane.b32.xlu0 %v17445_v0, %s13277_s22 }
 0x56d   : > { %v5522_v22 = vsel %vm22592_vm7, %v5461_v52, %v5463_v13  ;;  %5500 = vrot.lane.b32.xlu1 %v17450_v7, %s13277_s22  ;;  %v5465_v45 = vpop.permute.xlu1 %5464  ;;  %vm22613_vm7 = vmmov %vm22586_vm0 }
 0x56e   : > { %v17458_v28 = vmax.f32 %v17234_v56, %v5522_v22  ;;  %v5523_v16 = vsel %vm22593_vm6, %v5463_v13, %v5465_v45  ;;  %v22596_v13 = vmax.f32 %v17250_v18, 0.0  ;;  %vm22614_vm6 = vmmov %vm22568_vm1 }
 0x56f   : > { %v17462_v6 = vmax.f32 %v17254_v3, %v5523_v16 }
 0x570   : > { %v5313_v37 = vpop.permute.xlu0 %5312  ;;  %5652 = vrot.lane.b32.xlu0 %v17458_v28, %s13281_s14 }
 0x571   : > { %v5351_v39 = vsel %vm22568_vm1, %v5311_v4, %v5313_v37  ;;  %5654 = vrot.lane.b32.xlu1 %v17462_v6, %s13281_s14  ;;  %v5315_v52 = vpop.permute.xlu1 %5314  ;;  %vm22616_vm1 = vmmov %vm22586_vm0 }
 0x572   : > { %v17471_v30 = vmax.f32 %v22594_v21, %v5351_v39  ;;  %v5352_v56 = vsel %vm22595_vm13, %v5313_v37, %v5315_v52  ;;  %vm22617_vm13 = vmmov %vm22586_vm0 }
 0x573   : > { %v17476_v3 = vmax.f32 %v22596_v13, %v5352_v56 }
 0x574   : > { %5502 = vrot.lane.b32.xlu0 %v17471_v30, %s13277_s22 }
 0x575   : > { %5504 = vrot.lane.b32.xlu1 %v17476_v3, %s13277_s22 }
 0x578   : > { %v5467_v4 = vpop.permute.xlu0 %5466 }
 0x579   : > { %v5524_v22 = vsel %vm22597_vm9, %v5465_v45, %v5467_v4  ;;  %v5469_v16 = vpop.permute.xlu1 %5468  ;;  %v22600_v45 = vmax.f32 %v17258_v62, 0.0  ;;  %vm22618_vm9 = vmmov %vm22586_vm0 }
 0x57a   : > { %v17484_v26 = vmax.f32 %v17262_v29, %v5524_v22  ;;  %v5525_v39 = vsel %vm22598_vm11, %v5467_v4, %v5469_v16  ;;  %v22602_v4 = vmax.f32 %v17278_v60, 0.0  ;;  %vm22620_vm11 = vmmov %vm22586_vm0 }
 0x57b   : > { %v17488_v37 = vmax.f32 %v17282_v11, %v5525_v39 }
 0x57c   : > { %v5317_v18 = vpop.permute.xlu0 %5316  ;;  %5656 = vrot.lane.b32.xlu0 %v17484_v26, %s13281_s14 }
 0x57d   : > { %v5353_v21 = vsel %vm22599_vm14, %v5315_v52, %v5317_v18  ;;  %5658 = vrot.lane.b32.xlu1 %v17488_v37, %s13281_s14  ;;  %v5319_v56 = vpop.permute.xlu1 %5318  ;;  %vm22621_vm14 = vmmov %vm22586_vm0 }
 0x57e   : > { %v17497_v13 = vmax.f32 %v22600_v45, %v5353_v21  ;;  %v5354_v29 = vsel %vm22601_vm12, %v5317_v18, %v5319_v56  ;;  %v22604_v21 = vmax.f32 %v17286_v50, 0.0  ;;  %vm22623_vm12 = vmmov %vm22586_vm0 }
 0x57f   : > { %v17502_v11 = vmax.f32 %v22602_v4, %v5354_v29  ;;  %v22607_v29 = vmax.f32 %v17306_v17, 0.0 }
 0x580   : > { %v5471_v22 = vpop.permute.xlu0 %5470  ;;  %5506 = vrot.lane.b32.xlu0 %v17497_v13, %s13277_s22 }
 0x581   : > { %5508 = vrot.lane.b32.xlu1 %v17502_v11, %s13277_s22  ;;  %v5473_v52 = vpop.permute.xlu1 %5472  ;;  %v5526_v18 = vsel %vm22606_vm2, %v5469_v16, %v5471_v22  ;;  %vm22629_vm2 = vmmov %vm22586_vm0 }
 0x582   : > { %v5527_v48 = vsel %vm22586_vm0, %v5471_v22, %v5473_v52 }
 0x584   : > { %v5321_v39 = vpop.permute.xlu0 %5320 }
 0x585   : > { %v5355_v57 = vsel %vm22603_vm15, %v5319_v56, %v5321_v39  ;;  %v5323_v62 = vpop.permute.xlu1 %5322  ;;  %v17528_v56 = vmax.f32 %v17310_v33, %v5527_v48  ;;  %vm22625_vm15 = vmmov %vm22586_vm0 }
 0x586   : > { %v17511_v45 = vmax.f32 %v22604_v21, %v5355_v57  ;;  %v5356_v60 = vsel %vm22605_vm5, %v5321_v39, %v5323_v62  ;;  %v17525_v57 = vmax.f32 %v17290_v55, %v5526_v18  ;;  %v22610_v21 = vmax.f32 %v17326_v2, 0.0  ;;  %vm22627_vm5 = vmmov %vm22586_vm0 }
 0x587   : > { %v17517_v4 = vmax.f32 %v22607_v29, %v5356_v60  ;;  %v22611_v55 = vmax.f32 %v17314_v44, 0.0  ;;  %v22615_v29 = vmax.f32 %v17330_v27, 0.0  ;;  %vm21128_vm0 = vcmask 15360  }
 0x588   : > { %v5325_v32 = vpop.permute.xlu0 %5324  ;;  %5510 = vrot.lane.b32.xlu0 %v17511_v45, %s13277_s22 }
 0x589   : > { %5512 = vrot.lane.b32.xlu1 %v17517_v4, %s13277_s22  ;;  %v5327_v50 = vpop.permute.xlu1 %5326  ;;  %v5357_v16 = vsel %vm22609_vm4, %v5323_v62, %v5325_v32  ;;  %vm22633_vm4 = vmmov %vm22616_vm1 }
 0x58a   : > { %v5358_v17 = vsel %vm22608_vm8, %v5325_v32, %v5327_v50  ;;  %v17542_v48 = vmax.f32 %v22611_v55, %v5357_v16  ;;  %v5391_v2 = vsel %vm22614_vm6, %v5327_v50, 0.0  ;;  %vm22631_vm8 = vmmov %vm22616_vm1 }
 0x58b   : > { %v17538_v60 = vmax.f32 %v22610_v21, %v5358_v17  ;;  %v17563_v17 = vmax.f32 %v22615_v29, %v5391_v2  ;;  %vm22638_vm6 = vmmov %vm22616_vm1 }
 0x58c   : > { %5660 = vrot.lane.b32.xlu0 %v17525_v57, %s13281_s14 }
 0x58d   : > { %v5475_v39 = vpop.permute.xlu0 %5474  ;;  %5662 = vrot.lane.b32.xlu1 %v17528_v56, %s13281_s14 }
 0x58e   : > { %v5477_v22 = vpop.permute.xlu1 %5476  ;;  %v5528_v33 = vsel %vm22612_vm10, %v5473_v52, %v5475_v39  ;;  %vm22634_vm10 = vmmov %vm22616_vm1 }
 0x58f   : > { %v5529_v32 = vsel %vm22613_vm7, %v5475_v39, %v5477_v22  ;;  %v17551_v62 = vmax.f32 %v17318_v20, %v5528_v33  ;;  %vm22637_vm7 = vmmov %vm22616_vm1 }
 0x590   : > { %5516 = vrot.lane.b32.xlu0 %v17538_v60, %s13277_s22  ;;  %v17555_v18 = vmax.f32 %v17349_v61, %v5529_v32 }
 0x591   : > { %5514 = vrot.lane.b32.xlu1 %v17542_v48, %s13277_s22 }
 0x594   : > { %v5479_v44 = vpop.permute.xlu0 %5478  ;;  %5664 = vrot.lane.b32.xlu0 %v17551_v62, %s13281_s14 }
 0x595   : > { %5666 = vrot.lane.b32.xlu1 %v17555_v18, %s13281_s14  ;;  %v5481_v52 = vpop.permute.xlu1 %5480  ;;  %v5530_v16 = vsel %vm22617_vm13, %v5477_v22, %v5479_v44  ;;  %vm22641_vm13 = vmmov %vm22616_vm1 }
 0x596   : > { %v5531_v20 = vsel %vm22616_vm1, %v5479_v44, %v5481_v52  ;;  %v17575_v61 = vmax.f32 %v17354_v34, %v5530_v16 }
 0x597   : > { %v17568_v50 = vmax.f32 %v17363_v1, %v5531_v20 }
 0x598   : > { %5518 = vrot.lane.b32.xlu0 %v17563_v17, %s13277_s22  ;;  %s13282_s22 = smov 124  }
 0x599   : > { %5670 = vrot.lane.b32.xlu1 %v17568_v50, %s13281_s14 }
 0x59c   : > { %5668 = vrot.lane.b32.xlu0 %v17575_v61, %s13281_s14 }
 0x5a0   : > { %v5483_v27 = vpop.permute.xlu0 %5482 }
 0x5a1   : > { %v5532_v39 = vsel %vm22618_vm9, %v5481_v52, %v5483_v27  ;;  %v5485_v21 = vpop.permute.xlu1 %5484  ;;  %vm22644_vm9 = vmmov %vm22616_vm1 }
 0x5a2   : > { %v17581_v22 = vmax.f32 %v17368_v5, %v5532_v39  ;;  %v5533_v1 = vsel %vm22620_vm11, %v5483_v27, %v5485_v21  ;;  %vm22646_vm11 = vmmov %vm22616_vm1 }
 0x5a3   : > { %v17585_v55 = vmax.f32 %v17377_v51, %v5533_v1 }
 0x5a4   : > { %22619 = vst [vmem:[#allocation28_spill] sm:$0xff] %v17581_v22  ;;  %5672 = vrot.lane.b32.xlu0 %v17581_v22, %s13281_s14 }
 0x5a5   : > { %5674 = vrot.lane.b32.xlu1 %v17585_v55, %s13281_s14 }
 0x5a7   : > { %v5487_v34 = vpop.permute.xlu0 %5486 }
 0x5a8   : > { %v5534_v33 = vsel %vm22621_vm14, %v5485_v21, %v5487_v34  ;;  %v5489_v32 = vpop.permute.xlu1 %5488  ;;  %vm22649_vm14 = vmmov %vm22616_vm1 }
 0x5a9   : > { %v17593_v2 = vmax.f32 %v17382_v54, %v5534_v33  ;;  %v5535_v5 = vsel %vm22623_vm12, %v5487_v34, %v5489_v32  ;;  %vm22650_vm12 = vmmov %vm22616_vm1 }
 0x5aa   : > { %v17597_v44 = vmax.f32 %v17391_v49, %v5535_v5 }
 0x5ab   : > { %22622 = vst [vmem:[#allocation30_spill] sm:$0xff] %v17593_v2  ;;  %5676 = vrot.lane.b32.xlu1 %v17593_v2, %s13281_s14 }
 0x5ac   : > { %22624 = vst [vmem:[#allocation31_spill] sm:$0xff] %v17597_v44  ;;  %5678 = vrot.lane.b32.xlu0 %v17597_v44, %s13281_s14 }
 0x5b2   : > { %v5491_v51 = vpop.permute.xlu0 %5490 }
 0x5b3   : > { %v5536_v52 = vsel %vm22625_vm15, %v5489_v32, %v5491_v51  ;;  %v5493_v29 = vpop.permute.xlu1 %5492  ;;  %vm22655_vm15 = vmmov %vm22616_vm1 }
 0x5b4   : > { %v17605_v20 = vmax.f32 %v17396_v38, %v5536_v52  ;;  %v5537_v54 = vsel %vm22627_vm5, %v5491_v51, %v5493_v29  ;;  %vm22656_vm5 = vmmov %vm22616_vm1 }
 0x5b5   : > { %v17609_v16 = vmax.f32 %v17405_v25, %v5537_v54 }
 0x5b6   : > { %22626 = vst [vmem:[#allocation34_spill] sm:$0xff] %v17605_v20  ;;  %5680 = vrot.lane.b32.xlu1 %v17605_v20, %s13281_s14 }
 0x5b7   : > { %22628 = vst [vmem:[#allocation35_spill] sm:$0xff] %v17609_v16  ;;  %5682 = vrot.lane.b32.xlu0 %v17609_v16, %s13281_s14 }
 0x5b9   : > { %v5495_v49 = vpop.permute.xlu0 %5494 }
 0x5ba   : > { %v5538_v27 = vsel %vm22629_vm2, %v5493_v29, %v5495_v49  ;;  %v5497_v38 = vpop.permute.xlu1 %5496 }
 0x5bb   : > { %v17617_v39 = vmax.f32 %v17410_v43, %v5538_v27 }
 0x5bd   : > { %22630 = vst [vmem:[#allocation36_spill] sm:$0xff] %v17617_v39  ;;  %5684 = vrot.lane.b32.xlu1 %v17617_v39, %s13281_s14 }
 0x5da   : > { %v5649_v21 = vpop.permute.xlu0 %5648 }
 0x5db   : > { %v17622_v25 = vsel %vm21128_vm0, 0.0, %v5649_v21  ;;  %v5651_v1 = vpop.permute.xlu1 %5650 }
 0x5dc   : > { %v17625_v34 = vsel %vm21128_vm0, %v5649_v21, %v5651_v1  ;;  %v12977_v33 = vpack.i.bf16 %v21567_v15, %v17622_v25  ;;  %v5539_v21 = vsel %vm22631_vm8, %v5495_v49, %v5497_v38 }
 0x5dd   : > { %v12982_v43 = vpack.i.bf16 %v17625_v34, %v17622_v25 }
 0x5de   : > { %v5499_v32 = vpop.permute.xlu0 %5498  ;;  %12978 = vrot.lane.b32.xlu1 %v12977_v33, %s13282_s22  ;;  %v17650_v33 = vmax.f32 %v17419_v10, %v5539_v21 }
 0x5df   : > { %12983 = vrot.lane.b32.xlu0 %v12982_v43, %s13274_s12  ;;  %v5501_v5 = vpop.permute.xlu1 %5500 }
 0x5e0   : > { %22632 = vst [vmem:[#allocation38_spill] sm:$0xff] %v17650_v33  ;;  %v5541_v39 = vsel %vm22633_vm4, %v5499_v32, %v5501_v5  ;;  %vm21129_vm4 = vcmask 1014784  }
 0x5e1   : > { %v17667_v21 = vmax.f32 %v17445_v0, %v5541_v39 }
 0x5e2   : > { %v5653_v51 = vpop.permute.xlu0 %5652 }
 0x5e3   : > { %6007 = vrot.lane.b32.xlu0 %v17625_v34, %s13282_s22  ;;  %v5655_v52 = vpop.permute.xlu1 %5654  ;;  %v17636_v29 = vsel %vm21128_vm0, %v5651_v1, %v5653_v51  ;;  %22635 = vst [vmem:[#allocation41_spill] sm:$0xff] %v17667_v21 }
 0x5e4   : > { %v17639_v54 = vsel %vm21128_vm0, %v5653_v51, %v5655_v52  ;;  %6009 = vrot.lane.b32.xlu1 %v17636_v29, %s13282_s22 }
 0x5e5   : > { %v12987_v27 = vpack.i.bf16 %v17639_v54, %v17636_v29 }
 0x5e6   : > { %v5503_v1 = vpop.permute.xlu0 %5502 }
 0x5e7   : > { %12988 = vrot.lane.b32.xlu0 %v12987_v27, %s13274_s12  ;;  %v5505_v43 = vpop.permute.xlu1 %5504  ;;  %v5540_v27 = vsel %vm22634_vm10, %v5497_v38, %v5499_v32  ;;  %vm22661_vm10 = vcmask 1031168  }
 0x5e8   : > { %6011 = vrot.lane.b32.xlu1 %v17639_v54, %s13282_s22  ;;  %v5543_v39 = vsel %vm22637_vm7, %v5503_v1, %v5505_v43  ;;  %vm22662_vm7 = vmmov %vm22661_vm10 }
 0x5eb   : > { %5686 = vrot.lane.b32.xlu0 %v17650_v33, %s13281_s14 }
 0x5ee   : > { %v5657_v51 = vpop.permute.xlu0 %5656 }
 0x5ef   : > { %v5659_v20 = vpop.permute.xlu1 %5658  ;;  %v17656_v16 = vsel %vm21128_vm0, %v5655_v52, %v5657_v51  ;;  %v17673_v52 = vmax.f32 %v17424_v40, %v5540_v27 }
 0x5f0   : > { %v17659_v49 = vsel %vm21128_vm0, %v5657_v51, %v5659_v20  ;;  %6013 = vrot.lane.b32.xlu1 %v17656_v16, %s13282_s22 }
 0x5f1   : > { %v12992_v10 = vpack.i.bf16 %v17659_v49, %v17656_v16  ;;  %22636 = vst [vmem:[#allocation42_spill] sm:$0xff] %v17673_v52 }
 0x5f2   : > { %v5507_v51 = vpop.permute.xlu0 %5506 }
 0x5f3   : > { %12993 = vrot.lane.b32.xlu0 %v12992_v10, %s13274_s12  ;;  %v5509_v33 = vpop.permute.xlu1 %5508 }
 0x5f4   : > { %5690 = vrot.lane.b32.xlu1 %v17667_v21, %s13281_s14  ;;  %v17692_v21 = vmax.f32 %v17471_v30, %v5543_v39  ;;  %v5544_v39 = vsel %vm22641_vm13, %v5505_v43, %v5507_v51 }
 0x5f6   : > { %22639 = vst [vmem:[#allocation43_spill] sm:$0xff] %v17692_v21 }
 0x5f7   : > { %5688 = vrot.lane.b32.xlu0 %v17673_v52, %s13281_s14  ;;  %v5542_v52 = vsel %vm22638_vm6, %v5501_v5, %v5503_v1 }
 0x5f8   : > { %6015 = vrot.lane.b32.xlu1 %v17659_v49, %s13282_s22 }
 0x5fa   : > { %v5511_v38 = vpop.permute.xlu0 %5510 }
 0x5fb   : > { %v5513_v32 = vpop.permute.xlu1 %5512 }
 0x5fe   : > { %v5661_v0 = vpop.permute.xlu0 %5660 }
 0x5ff   : > { %v5663_v10 = vpop.permute.xlu1 %5662  ;;  %v17681_v2 = vsel %vm21128_vm0, %v5659_v20, %v5661_v0 }
 0x600   : > { %v17684_v40 = vsel %vm21128_vm0, %v5661_v0, %v5663_v10  ;;  %6017 = vrot.lane.b32.xlu0 %v17681_v2, %s13282_s22  ;;  %v17700_v0 = vmax.f32 %v17450_v7, %v5542_v52  ;;  %v5545_v7 = vsel %vm22616_vm1, %v5507_v51, %v5509_v33 }
 0x601   : > { %v12997_v27 = vpack.i.bf16 %v17684_v40, %v17681_v2 }
 0x602   : > { %v17694_v44 = vpop.permute.xlu0 %5516  ;;  %22640 = vst [vmem:[#allocation46_spill] sm:$0xff] %v17700_v0 }
 0x603   : > { %12998 = vrot.lane.b32.xlu1 %v12997_v27, %s13274_s12  ;;  %v5515_v20 = vpop.permute.xlu1 %5514 }
 0x604   : > { %5694 = vrot.lane.b32.xlu0 %v17692_v21, %s13281_s14 }
 0x606   : > { %v5665_v36 = vpop.permute.xlu0 %5664 }
 0x607   : > { %5692 = vrot.lane.b32.xlu1 %v17700_v0, %s13281_s14  ;;  %v5667_v22 = vpop.permute.xlu1 %5666  ;;  %v17705_v5 = vsel %vm21128_vm0, %v5663_v10, %v5665_v36  ;;  %v17720_v10 = vmax.f32 %v17497_v13, %v5545_v7  ;;  %v5546_v13 = vsel %vm22644_vm9, %v5509_v33, %v5511_v38  ;;  %v5547_v33 = vsel %vm22646_vm11, %v5511_v38, %v5513_v32 }
 0x608   : > { %v17708_v30 = vsel %vm21128_vm0, %v5665_v36, %v5667_v22  ;;  %6019 = vrot.lane.b32.xlu0 %v17684_v40, %s13282_s22  ;;  %v17723_v36 = vmax.f32 %v17476_v3, %v5544_v39  ;;  %vm5782_vm11 = vcmp.ge.s32.totalorder %v13816_v41, 2 }
 0x609   : > { %v13002_v1 = vpack.i.bf16 %v17708_v30, %v17705_v5  ;;  %22642 = vst [vmem:[#allocation97_spill] sm:$0xff] %v17720_v10 }
 0x60a   : > { %v5519_v52 = vpop.permute.xlu0 %5518  ;;  %22643 = vst [vmem:[#allocation120_spill] sm:$0xff] %v17723_v36 }
 0x60b   : > { %6021 = vrot.lane.b32.xlu1 %v17705_v5, %s13282_s22  ;;  %v5671_v0 = vpop.permute.xlu1 %5670 }
 0x60c   : > { %13003 = vrot.lane.b32.xlu0 %v13002_v1, %s13274_s12 }
 0x60e   : > { %v5669_v27 = vpop.permute.xlu0 %5668 }
 0x60f   : > { %5698 = vrot.lane.b32.xlu1 %v17720_v10, %s13281_s14  ;;  %v17730_v43 = vsel %vm21128_vm0, %v5669_v27, %v5671_v0  ;;  %v17733_v51 = vsel %vm21128_vm0, %v5667_v22, %v5669_v27  ;;  %v17752_v27 = vmax.f32 %v17502_v11, %v5546_v13  ;;  %v5548_v13 = vsel %vm22649_vm14, %v5513_v32, %v5515_v20 }
 0x610   : > { %5696 = vrot.lane.b32.xlu0 %v17723_v36, %s13281_s14  ;;  %v13007_v3 = vpack.i.bf16 %v17730_v43, %v17733_v51 }
 0x611   : > { %22645 = vst [vmem:[#allocation121_spill] sm:$0xff] %v17752_v27 }
 0x613   : > { %6023 = vrot.lane.b32.xlu1 %v17708_v30, %s13282_s22 }
 0x614   : > { %6025 = vrot.lane.b32.xlu0 %v17733_v51, %s13282_s22 }
 0x616   : > { %v5673_v1 = vpop.permute.xlu0 %5672 }
 0x617   : > { %v17743_v7 = vsel %vm21128_vm0, %v5671_v0, %v5673_v1  ;;  %13008 = vrot.lane.b32.xlu1 %v13007_v3, %s13274_s12  ;;  %v5675_v39 = vpop.permute.xlu1 %5674  ;;  %v17761_v0 = vmax.f32 %v17511_v45, %v5547_v33  ;;  %v17783_v33 = vmax.f32 %v17517_v4, %v5548_v13  ;;  %v5550_v4 = vsel %vm22655_vm15, %v17694_v44, %v5519_v52 }
 0x618   : > { %v17747_v22 = vsel %vm21128_vm0, %v5673_v1, %v5675_v39  ;;  %6027 = vrot.lane.b32.xlu0 %v17730_v43, %s13282_s22  ;;  %v5583_v13 = vsel %vm22656_vm5, %v5519_v52, 0.0  ;;  %vm5781_vm15 = vcmp.ge.s32.totalorder %v22172_v8, 2  ;;  %vm17883_vm5 = vmpackc.low %vm21549_vm3, %vm5782_vm11 }
 0x619   : > { %v13012_v36 = vpack.i.bf16 %v17747_v22, %v17743_v7  ;;  %22647 = vst [vmem:[#allocation47_spill] sm:$0xff] %v17761_v0  ;;  %22651 = vst [vmem:[#allocation51_spill] sm:$0xff] %v17783_v33 }
 0x61b   : > { %5700 = vrot.lane.b32.xlu1 %v17752_v27, %s13281_s14 }
 0x61c   : > { %13013 = vrot.lane.b32.xlu0 %v13012_v36, %s13274_s12  ;;  %v5549_v36 = vsel %vm22650_vm12, %v5515_v20, %v17694_v44 }
 0x61d   : > { %v5677_v3 = vpop.permute.xlu1 %5676 }
 0x61e   : > { %v5679_v1 = vpop.permute.xlu0 %5678  ;;  %v17771_v38 = vsel %vm21128_vm0, %v5675_v39, %v5677_v3  ;;  %v17789_v39 = vmax.f32 %v17542_v48, %v5549_v36 }
 0x61f   : > { %6029 = vrot.lane.b32.xlu1 %v17743_v7, %s13282_s22  ;;  %v17768_v11 = vsel %vm21128_vm0, %v5677_v3, %v5679_v1  ;;  %22648 = vst [vmem:[#allocation48_spill] sm:$0xff] %v17771_v38 }
 0x620   : > { %5702 = vrot.lane.b32.xlu0 %v17761_v0, %s13281_s14  ;;  %v13017_v45 = vpack.i.bf16 %v17768_v11, %v17771_v38  ;;  %22652 = vst [vmem:[#allocation99_spill] sm:$0xff] %v17789_v39 }
 0x623   : > { %6031 = vrot.lane.b32.xlu1 %v17747_v22, %s13282_s22 }
 0x624   : > { %6033 = vrot.lane.b32.xlu0 %v17771_v38, %s13282_s22 }
 0x627   : > { %13018 = vrot.lane.b32.xlu1 %v13017_v45, %s13274_s12  ;;  %v17810_v45 = vmax.f32 %v17538_v60, %v5550_v4 }
 0x628   : > { %5704 = vrot.lane.b32.xlu0 %v17783_v33, %s13281_s14  ;;  %v5681_v32 = vpop.permute.xlu1 %5680 }
 0x629   : > { %v5683_v3 = vpop.permute.xlu0 %5682  ;;  %v17797_v20 = vsel %vm21128_vm0, %v5679_v1, %v5681_v32  ;;  %22657 = vst [vmem:[#allocation122_spill] sm:$0xff] %v17810_v45  ;;  %v17813_v1 = vmax.f32 %v17563_v17, %v5583_v13  ;;  %v22659_v17 = vld [vmem:[#allocation25_spill] sm:$0xff] }
 0x62a   : > { %v17792_v27 = vsel %vm21128_vm0, %v5681_v32, %v5683_v3  ;;  %22654 = vst [vmem:[#allocation123_spill] sm:$0xff] %v17797_v20  ;;  %vm5780_vm2 = vcmp.ge.s32.totalorder %v22659_v17, 2  ;;  %vm21121_vm8 = vcmp.lt.s32.totalorder %v22659_v17, 62 }
 0x62b   : > { %22653 = vst [vmem:[#allocation52_spill] sm:$0xff] %v17792_v27  ;;  %5706 = vrot.lane.b32.xlu1 %v17789_v39, %s13281_s14  ;;  %v13022_v48 = vpack.i.bf16 %v17792_v27, %v17797_v20  ;;  %22658 = vst [vmem:[#allocation98_spill] sm:$0xff] %v17813_v1 }
 0x62c   : > { %6035 = vrot.lane.b32.xlu0 %v17768_v11, %s13282_s22  ;;  %vm17836_vm6 = vmpackc.low %vm21549_vm3, %vm5780_vm2 }
 0x62d   : > { %vm17847_vm1 = vmpackc.low %vm5780_vm2, %vm21121_vm8 }
 0x62e   : > { %vm17874_vm12 = vmpackc.low %vm21121_vm8, %vm21549_vm3  ;;  %vm21130_vm8 = vcmp.lt.s32.totalorder %v13816_v41, 62 }
 0x62f   : > { %6037 = vrot.lane.b32.xlu1 %v17797_v20, %s13282_s22  ;;  %v5685_v44 = vpop.permute.xlu1 %5684  ;;  %vm22676_vm2 = vmmov %vm22662_vm7 }
 0x630   : > { %13023 = vrot.lane.b32.xlu0 %v13022_v48, %s13274_s12  ;;  %v17822_v52 = vsel %vm21128_vm0, %v5683_v3, %v5685_v44 }
 0x633   : > { %5708 = vrot.lane.b32.xlu1 %v17810_v45, %s13281_s14 }
 0x634   : > { %5710 = vrot.lane.b32.xlu0 %v17813_v1, %s13281_s14 }
 0x637   : > { %6039 = vrot.lane.b32.xlu1 %v17792_v27, %s13282_s22 }
 0x638   : > { %6041 = vrot.lane.b32.xlu0 %v17822_v52, %s13282_s22 }
 0x650   : > { %v12979_v60 = vpop.permute.xlu1 %12978 }
 0x651   : > { %v12984_v36 = vpop.permute.xlu0 %12983  ;;  %v17827_v48 = vunpack.i.h.bf16 %v12979_v60  ;;  %v12980_v13 = vunpack.i.l.bf16 %v12979_v60 }
 0x652   : > { %v12986_v32 = vunpack.i.h.bf16 %v12984_v36  ;;  %v12985_v4 = vunpack.i.l.bf16 %v12984_v36 }
 0x653   : > { %22660 = vst [vmem:[#allocation53_spill] sm:$0xff] %v17827_v48 }
 0x654   : > { %v6365_v45 = vsel %vm22661_vm10, %v22541_v59, %v12985_v4  ;;  %v6366_v3 = vsel %vm22662_vm7, %v12985_v4, %v12986_v32  ;;  %v22665_v4 = vmov 0  ;;  %v22668_v59 = vld [vmem:[#allocation26_spill] sm:$0xff]  ;;  %vm22677_vm10 = vmmov %vm22676_vm2 }
 0x655   : > { %v6008_v33 = vpop.permute.xlu0 %6007  ;;  %v11668_v36 = vpack.c.bf16 %v6366_v3, %v17622_v25  ;;  %v11671_v60 = vpack.c.bf16 %v6365_v45, %v21567_v15  ;;  %v22666_v4 = vsel %vm17847_vm1, 4294967295, %v22665_v4  ;;  %vm5779_vm13 = vcmp.ge.s32.totalorder %v22668_v59, 2 }
 0x656   : > { %v6071_v39 = vsel %vm21129_vm4, %v12980_v13, %v6008_v33  ;;  %v6010_v0 = vpop.permute.xlu1 %6009  ;;  %22667 = vst [vmem:[#allocation54_spill] sm:$0xff] %v22666_v4  ;;  %vm21127_vm9 = vcmp.lt.s32.totalorder %v22668_v59, 62  ;;  %v6070_v3 = vsel %vm21129_vm4, %v17827_v48, %v12980_v13  ;;  %v22669_v13 = vmov 0  ;;  %v19693_v4 = vld [vmem:[%s20669_s7] sm:$0xff] }
 0x657   : > { %v11673_v45 = vpack.c.bf16 %v17625_v34, %v6071_v39  ;;  %11670 = vmatprep.subr.msk.bf16.mxu0 %vm17836_vm6, %v11668_v36  ;;  %v6072_v10 = vsel %vm21129_vm4, %v6008_v33, %v6010_v0  ;;  %vm17866_vm14 = vmpackc.low %vm5779_vm13, %vm21127_vm9  ;;  %v11676_v48 = vpack.c.bf16 %v17622_v25, %v6070_v3  ;;  %v22678_v3 = vmov 0 }
 0x658   : > { %11672 = vmatpush1.bf16.msra.mxu0 %v11671_v60  ;;  %v22670_v13 = vsel %vm17866_vm14, 4294967295, %v22669_v13  ;;  %v22672_v60 = vmov 0  ;;  %vm17894_vm7 = vmpackc.low %vm21127_vm9, %vm21549_vm3 }
 0x659   : > { %v12989_v21 = vpop.permute.xlu0 %12988  ;;  %11675 = vmatprep.subr.msk.bf16.mxu0 %vm17847_vm1, %v11673_v45  ;;  %22671 = vst [vmem:[#allocation55_spill] sm:$0xff] %v22670_v13  ;;  %v22673_v60 = vsel %vm17874_vm12, 4294967295, %v22672_v60  ;;  %v11679_v45 = vpack.c.bf16 %v6072_v10, %v17436_v35  ;;  %v22679_v3 = vsel %vm17894_vm7, 4294967295, %v22678_v3  ;;  %vm17926_vm9 = vmpackc.low %vm5782_vm11, %vm21130_vm8  ;;  %vm22832_vm1 = vcmask 1014784  }
 0x65a   : > { %v12991_v36 = vunpack.i.h.bf16 %v12989_v21  ;;  %v12990_v27 = vunpack.i.l.bf16 %v12989_v21  ;;  %v6012_v33 = vpop.permute.xlu1 %6011 }
 0x65b   : > { %v6073_v20 = vsel %vm21129_vm4, %v6010_v0, %v6012_v33 }
 0x65c   : > { %v6367_v25 = vsel %vm22676_vm2, %v12986_v32, %v12990_v27  ;;  %v6368_v21 = vsel %vm22677_vm10, %v12990_v27, %v12991_v36  ;;  %11678 = vmatpush1.bf16.msk.msra.mxu0 %vm17866_vm14, %v11676_v48  ;;  %vm17907_vm2 = vmpackc.low %vm21549_vm3, %vm5781_vm15  ;;  %v11682_v48 = vpack.c.bf16 %v6071_v39, %v17432_v24  ;;  %vm21131_vm10 = vcmp.lt.s32.totalorder %v22172_v8, 62 }
 0x65d   : > { %v11688_v35 = vpack.c.bf16 %v6367_v25, %v17625_v34  ;;  %v5687_v38 = vpop.permute.xlu0 %5686  ;;  %11681 = vmatprep.subr.msk.bf16.mxu0 %vm17874_vm12, %v11679_v45  ;;  %v11685_v27 = vpack.c.bf16 %v6368_v21, %v17636_v29  ;;  %v22682_v24 = vmov 0  ;;  %v11697_v0 = vpack.c.bf16 %v17639_v54, %v6073_v20  ;;  %vm17949_vm11 = vmpackc.low %vm5781_vm15, %vm21131_vm10 }
 0x65e   : > { %v17913_v13 = vsel %vm21128_vm0, %v5685_v44, %v5687_v38  ;;  %v22683_v24 = vsel %vm17926_vm9, 4294967295, %v22682_v24  ;;  %vm17938_vm0 = vmpackc.low %vm21549_vm3, %vm5779_vm13  ;;  %v22684_v39 = vmov 0  ;;  %v22686_v44 = vmov 0 }
 0x65f   : > { %11693 = vmatprep.subr.msk.bf16.mxu1 %vm17883_vm5, %v11685_v27  ;;  %6043 = vrot.lane.b32.xlu0 %v17913_v13, %s13282_s22  ;;  %v13027_v34 = vpack.i.bf16 %v17913_v13, %v17822_v52  ;;  %v22685_v39 = vsel %vm17938_vm0, 4294967295, %v22684_v39  ;;  %v22687_v44 = vsel %vm17949_vm11, 4294967295, %v22686_v44  ;;  %v11700_v45 = vpack.c.bf16 %v17636_v29, %v6072_v10  ;;  %vm17960_vm13 = vmpackc.low %vm21130_vm8, %vm21549_vm3 }
 0x660   : > { %11684 = vmatpush1.bf16.msk.msra.mxu0 %vm17894_vm7, %v11682_v48  ;;  %11696 = vmatpush1.bf16.msk.msra.mxu1 %vm17907_vm2, %v11688_v35  ;;  %vm22690_vm15 = vcmp.lt.s32.totalorder %v22659_v17, 62  ;;  %vm5784_vm8 = vcmp.ge.s32.totalorder %v13939_v9, 2  ;;  %vm22695_vm7 = vcmp.lt.s32.totalorder %v22668_v59, 62 }
 0x661   : > { %13028 = vrot.lane.b32.xlu1 %v13027_v34, %s13274_s12  ;;  %11687 = vmatprep.subr.msk.bf16.mxu0 %vm17836_vm6, %v11685_v27  ;;  %v22688_v27 = vmov 0  ;;  %v11706_v34 = vpack.c.bf16 %v6073_v20, %v17458_v28 }
 0x662   : > { %11699 = vmatprep.subr.msk.bf16.mxu1 %vm17926_vm9, %v11697_v0  ;;  %v6014_v25 = vpop.permute.xlu1 %6013  ;;  %v22689_v27 = vsel %vm17960_vm13, 4294967295, %v22688_v27  ;;  %vm21151_vm9 = vcmp.lt.s32.totalorder %v14077_v14, 62 }
 0x663   : > { %v6074_v21 = vsel %vm21129_vm4, %v6012_v33, %v6014_v25  ;;  %vm17974_vm4 = vmpackc.low %vm21131_vm10, %vm21549_vm3  ;;  %v22691_v33 = vmov 0  ;;  %vm22693_vm10 = vcmask 1031168  }
 0x664   : > { %v11703_v48 = vpack.c.bf16 %v6074_v21, %v17462_v6  ;;  %11690 = vmatpush1.bf16.msk.msra.mxu0 %vm17938_vm0, %v11688_v35  ;;  %11702 = vmatpush1.bf16.msk.msra.mxu1 %vm17949_vm11, %v11700_v45  ;;  %v22692_v33 = vsel %vm17974_vm4, 4294967295, %v22691_v33  ;;  %v17987_v45 = vld [vmem:[%s20667_s5] sm:$0xff]  ;;  %vm22694_vm0 = vmmov %vm22693_vm10  ;;  %vm22715_vm11 = vcmp.lt.s32.totalorder %v22172_v8, 62 }
 0x665   : > { %v12994_v29 = vpop.permute.xlu0 %12993  ;;  %10491 = vmatprep.subr.msk.mxu0 %vm22690_vm15, %v6073_v20  ;;  %vm18002_vm15 = vmpackc.low %vm21549_vm3, %vm5784_vm8 }
 0x666   : > { %v12996_v6 = vunpack.i.h.bf16 %v12994_v29  ;;  %v12995_v0 = vunpack.i.l.bf16 %v12994_v29  ;;  %11705 = vmatprep.subr.msk.bf16.mxu1 %vm17960_vm13, %v11703_v48  ;;  %v17981_v35 = vpop.permute.xlu1 %5690  ;;  %vm22701_vm13 = vcmp.ge.s32.totalorder %v13949_v53, 2 }
 0x668   : > { %v6369_v17 = vsel %vm22693_vm10, %v12991_v36, %v12995_v0  ;;  %v6370_v28 = vsel %vm22694_vm0, %v12995_v0, %v12996_v6  ;;  %10492 = vmatpush1.msk.msra.mxu0 %vm22695_vm7, %v6072_v10  ;;  %11708 = vmatpush1.bf16.msk.msra.mxu1 %vm17974_vm4, %v11706_v34  ;;  %v22696_v36 = vmov 0  ;;  %vm22698_vm0 = vcmask 588800   ;;  %vm18018_vm4 = vmpackc.low %vm21549_vm3, %vm22701_vm13 }
 0x669   : > { %v11712_v20 = vpack.c.bf16 %v6369_v17, %v17639_v54  ;;  %v5689_v48 = vpop.permute.xlu0 %5688  ;;  %v11709_v29 = vpack.c.bf16 %v6370_v28, %v17656_v16  ;;  %v22697_v36 = vsel %vm18002_vm15, 4294967295, %v22696_v36  ;;  %10493 = vmatmul.mubr.msk.f32.vlgmr.msra.gmra.mrb[32].mxu0 %vm22698_vm0, %v17987_v45  ;;  %vm22699_vm7 = vcmask 15360  }
 0x66a   : > { %v18010_v10 = vsel %vm22699_vm7, %v5689_v48, %v17981_v35  ;;  %v6016_v34 = vpop.permute.xlu1 %6015  ;;  %vm22700_vm10 = vmmov %vm22699_vm7  ;;  %v22702_v17 = vmov 0  ;;  %6651 = vmatprep.mubr.f32.mxu0 %v21567_v15  ;;  %vm22705_vm0 = vcmask 1014784   ;;  %vm22706_vm7 = vcmp.lt.s32.totalorder %v13939_v9, 62 }
 0x66b   : > { %v18013_v54 = vsel %vm22700_vm10, %v5687_v38, %v5689_v48  ;;  %v22703_v17 = vsel %vm18018_vm4, 4294967295, %v22702_v17  ;;  %11711 = vmatprep.subr.msk.bf16.mxu1 %vm17883_vm5, %v11709_v29  ;;  %v6075_v38 = vsel %vm22705_vm0, %v6014_v25, %v6016_v34  ;;  %vm18034_vm13 = vmpackc.low %vm5784_vm8, %vm22706_vm7  ;;  %v22707_v28 = vmov 0  ;;  %11717 = vmatprep.subr.msk.bf16.mxu0 %vm18002_vm15, %v11709_v29 }
 0x66c   : > { %22704 = vst [vmem:[#allocation101_spill] sm:$0xff] %v22703_v17  ;;  %6045 = vrot.lane.b32.xlu1 %v18013_v54, %s13282_s22  ;;  %v13032_v0 = vpack.i.bf16 %v18010_v10, %v18013_v54  ;;  %v22708_v28 = vsel %vm18034_vm13, 4294967295, %v22707_v28  ;;  %vm21138_vm10 = vcmp.lt.s32.totalorder %v13949_v53, 62  ;;  %11714 = vmatpush1.bf16.msk.msra.mxu1 %vm17907_vm2, %v11712_v20  ;;  %v11721_v48 = vpack.c.bf16 %v17659_v49, %v6075_v38 }
 0x66d   : > { %22709 = vst [vmem:[#allocation57_spill] sm:$0xff] %v22708_v28  ;;  %11720 = vmatpush1.bf16.msk.msra.mxu0 %vm18018_vm4, %v11712_v20  ;;  %vm22710_vm8 = vcmp.lt.s32.totalorder %v13816_v41, 62  ;;  %vm22711_vm0 = vcmp.ge.s32.totalorder %v13949_v53, 2  ;;  %v22712_v25 = vmov 0  ;;  %v11724_v29 = vpack.c.bf16 %v17656_v16, %v6074_v21 }
 0x66e   : > { %13033 = vrot.lane.b32.xlu0 %v13032_v0, %s13274_s12  ;;  %10504 = vmatprep.subr.msk.mxu1 %vm22710_vm8, %v6075_v38  ;;  %vm18055_vm7 = vmpackc.low %vm22711_vm0, %vm21138_vm10  ;;  %vm22716_vm8 = vcmask 588800   ;;  %vm22717_vm0 = vcmask 1014784   ;;  %vm22718_vm10 = vcmp.lt.s32.totalorder %v13939_v9, 62  ;;  %v22719_v16 = vmov 0 }
 0x66f   : > { %11723 = vmatprep.subr.msk.bf16.mxu0 %vm18034_vm13, %v11721_v48  ;;  %v22713_v25 = vsel %vm18055_vm7, 4294967295, %v22712_v25  ;;  %vm18073_vm13 = vmpackc.low %vm22718_vm10, %vm21549_vm3  ;;  %v22723_v48 = vmov 0  ;;  %vm5786_vm10 = vcmp.ge.s32.totalorder %v14077_v14, 2 }
 0x670   : > { %22714 = vst [vmem:[#allocation100_spill] sm:$0xff] %v22713_v25  ;;  %6047 = vrot.lane.b32.xlu1 %v18010_v10, %s13282_s22  ;;  %10505 = vmatpush1.msk.msra.mxu1 %vm22715_vm11, %v6074_v21  ;;  %v22720_v16 = vsel %vm18073_vm13, 4294967295, %v22719_v16  ;;  %vm22722_vm11 = vcmp.lt.s32.totalorder %v13949_v53, 62 }
 0x671   : > { %11726 = vmatpush1.bf16.msk.msra.mxu0 %vm18055_vm7, %v11724_v29  ;;  %10506 = vmatmul.mubr.msk.f32.vlgmr.msra.gmra.mrb[32].mxu1 %vm22716_vm8, %v17987_v45  ;;  %22721 = vst [vmem:[#allocation124_spill] sm:$0xff] %v22720_v16  ;;  %vm18081_vm7 = vmpackc.low %vm22722_vm11, %vm21549_vm3  ;;  %v11730_v29 = vpack.c.bf16 %v6075_v38, %v17484_v26  ;;  %vm21148_vm8 = vcmp.ge.s32.totalorder %v22211_v46, 2 }
 0x672   : > { %v6018_v20 = vpop.permute.xlu0 %6017  ;;  %6722 = vmatprep.mubr.f32.mxu1 %v21567_v15  ;;  %v22724_v48 = vsel %vm18081_vm7, 4294967295, %v22723_v48 }
 0x673   : > { %v6076_v0 = vsel %vm22717_vm0, %v6016_v34, %v6018_v20  ;;  %22725 = vst [vmem:[#allocation125_spill] sm:$0xff] %v22724_v48  ;;  %vm22726_vm0 = vcmask 1031168   ;;  %v23232_v32 = vld [vmem:[#allocation101_spill] sm:$0xff] }
 0x674   : > { %v11727_v21 = vpack.c.bf16 %v6076_v0, %v17488_v37  ;;  %vm22727_vm11 = vmmov %vm22726_vm0 }
 0x675   : > { %v12999_v25 = vpop.permute.xlu1 %12998 }
 0x676   : > { %v13001_v34 = vunpack.i.h.bf16 %v12999_v25  ;;  %v13000_v28 = vunpack.i.l.bf16 %v12999_v25  ;;  %v5695_v8 = vpop.permute.xlu0 %5694  ;;  %11729 = vmatprep.subr.msk.bf16.mxu0 %vm18073_vm13, %v11727_v21  ;;  %vm18100_vm13 = vmpackc.low %vm21549_vm3, %vm5786_vm10  ;;  %v22728_v21 = vmov 0 }
 0x677   : > { %11732 = vmatpush1.bf16.msk.msra.mxu0 %vm18081_vm7, %v11730_v29  ;;  %v22729_v21 = vsel %vm18100_vm13, 4294967295, %v22728_v21  ;;  %vm22730_vm7 = vcmask 15360  }
 0x678   : > { %v6371_v37 = vsel %vm22726_vm0, %v12996_v6, %v13000_v28  ;;  %v6372_v59 = vsel %vm22727_vm11, %v13000_v28, %v13001_v34  ;;  %vm22731_vm0 = vmmov %vm22730_vm7 }
 0x679   : > { %v11736_v26 = vpack.c.bf16 %v6371_v37, %v17659_v49  ;;  %v5693_v38 = vpop.permute.xlu1 %5692  ;;  %v11733_v25 = vpack.c.bf16 %v6372_v59, %v17681_v2  ;;  %vm18114_vm11 = vmpackc.low %vm21549_vm3, %vm21148_vm8  ;;  %v22732_v59 = vmov 0  ;;  %vm21165_vm8 = vcmp.lt.s32.totalorder %v22211_v46, 62 }
 0x67a   : > { %v18105_v29 = vsel %vm22730_vm7, %v5693_v38, %v5695_v8  ;;  %v6020_v6 = vpop.permute.xlu0 %6019  ;;  %v18109_v28 = vsel %vm22731_vm0, %v17981_v35, %v5693_v38  ;;  %v22733_v59 = vsel %vm18114_vm11, 4294967295, %v22732_v59  ;;  %vm22734_vm7 = vcmask 1014784   ;;  %vm18129_vm0 = vmpackc.low %vm5786_vm10, %vm21151_vm9 }
 0x67b   : > { %6049 = vrot.lane.b32.xlu0 %v18109_v28, %s13282_s22  ;;  %11735 = vmatprep.subr.msk.bf16.mxu0 %vm18002_vm15, %v11733_v25  ;;  %v13037_v49 = vpack.i.bf16 %v18105_v29, %v18109_v28  ;;  %v6077_v37 = vsel %vm22734_vm7, %v6018_v20, %v6020_v6  ;;  %v22735_v35 = vmov 0  ;;  %vm22738_vm10 = vmmov %vm22734_vm7  ;;  %vm22739_vm7 = vcmp.lt.s32.totalorder %v13939_v9, 62 }
 0x67c   : > { %v22736_v35 = vsel %vm18129_vm0, 4294967295, %v22735_v35  ;;  %11741 = vmatprep.subr.msk.bf16.mxu1 %vm18100_vm13, %v11733_v25  ;;  %11738 = vmatpush1.bf16.msk.msra.mxu0 %vm18018_vm4, %v11736_v26  ;;  %v11745_v38 = vpack.c.bf16 %v17684_v40, %v6077_v37  ;;  %vm22740_vm9 = vcmp.ge.s32.totalorder %v22211_v46, 2  ;;  %v22741_v25 = vmov 0 }
 0x67d   : > { %22737 = vst [vmem:[#allocation59_spill] sm:$0xff] %v22736_v35  ;;  %11744 = vmatpush1.bf16.msk.msra.mxu1 %vm18114_vm11, %v11736_v26  ;;  %13038 = vrot.lane.b32.xlu1 %v13037_v49, %s13274_s12  ;;  %v6022_v20 = vpop.permute.xlu1 %6021  ;;  %vm18153_vm4 = vmpackc.low %vm22740_vm9, %vm21165_vm8  ;;  %v11748_v26 = vpack.c.bf16 %v17681_v2, %v6076_v0  ;;  %vm22744_vm9 = vcmp.lt.s32.totalorder %v14077_v14, 62  ;;  %vm22747_vm15 = vcmp.lt.s32.totalorder %v13949_v53, 62 }
 0x67e   : > { %v18143_v48 = vsel %vm22738_vm10, %v6020_v6, %v6022_v20  ;;  %10517 = vmatprep.subr.msk.mxu0 %vm22739_vm7, %v6077_v37  ;;  %v13004_v16 = vpop.permute.xlu0 %13003  ;;  %11747 = vmatprep.subr.msk.bf16.mxu1 %vm18129_vm0, %v11745_v38  ;;  %v22742_v25 = vsel %vm18153_vm4, 4294967295, %v22741_v25  ;;  %vm18167_vm7 = vmpackc.low %vm22744_vm9, %vm21549_vm3  ;;  %v22745_v38 = vmov 0  ;;  %vm22751_vm0 = vcmask 1031168  }
 0x67f   : > { %22743 = vst [vmem:[#allocation60_spill] sm:$0xff] %v22742_v25  ;;  %v11751_v6 = vpack.c.bf16 %v18143_v48, %v17528_v56  ;;  %v13006_v49 = vunpack.i.h.bf16 %v13004_v16  ;;  %v13005_v9 = vunpack.i.l.bf16 %v13004_v16  ;;  %6051 = vrot.lane.b32.xlu0 %v18105_v29, %s13282_s22  ;;  %v22746_v38 = vsel %vm18167_vm7, 4294967295, %v22745_v38  ;;  %vm18176_vm10 = vmpackc.low %vm21165_vm8, %vm21549_vm3 }
 0x680   : > { %10518 = vmatpush1.msk.msra.mxu0 %vm22747_vm15, %v6076_v0  ;;  %v22748_v56 = vmov 0  ;;  %vm22752_vm12 = vmmov %vm22751_vm0  ;;  %vm22753_vm9 = vcmask 588800   ;;  %vm22754_vm15 = vcmp.ge.s32.totalorder %v22222_v23, 2  ;;  %v22755_v0 = vmov 0 }
 0x681   : > { %v22749_v56 = vsel %vm18176_vm10, 4294967295, %v22748_v56  ;;  %v6373_v2 = vsel %vm22751_vm0, %v13001_v34, %v13005_v9  ;;  %v6374_v16 = vsel %vm22752_vm12, %v13005_v9, %v13006_v49  ;;  %11750 = vmatpush1.bf16.msk.msra.mxu1 %vm18153_vm4, %v11748_v26  ;;  %v5699_v35 = vpop.permute.xlu1 %5698  ;;  %10519 = vmatmul.mubr.msk.f32.vlgmr.msra.gmra.mrb[34].mxu0 %vm22753_vm9, %v17987_v45  ;;  %vm18189_vm14 = vmpackc.low %vm21549_vm3, %vm22754_vm15  ;;  %vm22757_vm12 = vcmp.ge.s32.totalorder %v22231_v47, 2 }
 0x682   : > { %22750 = vst [vmem:[#allocation63_spill] sm:$0xff] %v22749_v56  ;;  %v22756_v0 = vsel %vm18189_vm14, 4294967295, %v22755_v0  ;;  %v11760_v53 = vpack.c.bf16 %v6373_v2, %v17684_v40  ;;  %11753 = vmatprep.subr.msk.bf16.mxu1 %vm18167_vm7, %v11751_v6  ;;  %v5697_v9 = vpop.permute.xlu0 %5696  ;;  %v11757_v34 = vpack.c.bf16 %v6374_v16, %v17705_v5  ;;  %vm18200_vm0 = vmpackc.low %vm21549_vm3, %vm22757_vm12  ;;  %v22758_v26 = vmov 0  ;;  %6793 = vmatprep.mubr.f32.mxu0 %v21567_v15 }
 0x683   : > { %v22759_v26 = vsel %vm18200_vm0, 4294967295, %v22758_v26  ;;  %v11754_v25 = vpack.c.bf16 %v6077_v37, %v17525_v57  ;;  %vm22761_vm9 = vcmask 15360   ;;  %vm21172_vm8 = vcmp.lt.s32.totalorder %v22222_v23, 62 }
 0x684   : > { %22760 = vst [vmem:[#allocation103_spill] sm:$0xff] %v22759_v26  ;;  %v18207_v17 = vsel %vm22761_vm9, %v5697_v9, %v5699_v35  ;;  %vm22762_vm15 = vmmov %vm22761_vm9  ;;  %11765 = vmatprep.subr.msk.bf16.mxu0 %vm18189_vm14, %v11757_v34  ;;  %vm22763_vm9 = vcmask 1014784   ;;  %v22765_v2 = vmov 0  ;;  %vm22769_vm7 = vcmp.lt.s32.totalorder %v22231_v47, 62 }
 0x685   : > { %v18210_v40 = vsel %vm22762_vm15, %v5695_v8, %v5697_v9  ;;  %11756 = vmatpush1.bf16.msk.msra.mxu1 %vm18176_vm10, %v11754_v25  ;;  %v6024_v57 = vpop.permute.xlu1 %6023  ;;  %11768 = vmatpush1.bf16.msk.msra.mxu0 %vm18200_vm0, %v11760_v53  ;;  %vm22764_vm15 = vcmp.ge.s32.totalorder %v22222_v23, 2  ;;  %vm22768_vm10 = vmmov %vm22763_vm9  ;;  %vm22770_vm4 = vcmp.ge.s32.totalorder %v22231_v47, 2  ;;  %v22771_v9 = vmov 0 }
 0x686   : > { %6053 = vrot.lane.b32.xlu1 %v18210_v40, %s13282_s22  ;;  %v13042_v6 = vpack.i.bf16 %v18207_v17, %v18210_v40  ;;  %11759 = vmatprep.subr.msk.bf16.mxu1 %vm18100_vm13, %v11757_v34  ;;  %v6026_v8 = vpop.permute.xlu0 %6025  ;;  %v6079_v37 = vsel %vm22763_vm9, %v6022_v20, %v6024_v57  ;;  %vm18232_vm12 = vmpackc.low %vm22764_vm15, %vm21172_vm8  ;;  %v11772_v20 = vpack.c.bf16 %v17705_v5, %v18143_v48 }
 0x687   : > { %v22766_v2 = vsel %vm18232_vm12, 4294967295, %v22765_v2  ;;  %v18237_v25 = vsel %vm22768_vm10, %v6024_v57, %v6026_v8  ;;  %v11769_v16 = vpack.c.bf16 %v17708_v30, %v6079_v37  ;;  %vm18244_vm13 = vmpackc.low %vm22770_vm4, %vm22769_vm7  ;;  %vm22777_vm4 = vcmp.lt.s32.totalorder %v14077_v14, 62 }
 0x688   : > { %13043 = vrot.lane.b32.xlu0 %v13042_v6, %s13274_s12  ;;  %22767 = vst [vmem:[#allocation64_spill] sm:$0xff] %v22766_v2  ;;  %v22772_v9 = vsel %vm18244_vm13, 4294967295, %v22771_v9  ;;  %v11775_v34 = vpack.c.bf16 %v18237_v25, %v17555_v18  ;;  %vm18257_vm10 = vmpackc.low %vm21172_vm8, %vm21549_vm3  ;;  %v22774_v6 = vmov 0  ;;  %vm22786_vm8 = vcmp.ge.s32.totalorder %v22254_v63, 2 }
 0x689   : > { %22773 = vst [vmem:[#allocation126_spill] sm:$0xff] %v22772_v9  ;;  %v22775_v6 = vsel %vm18257_vm10, 4294967295, %v22774_v6  ;;  %11762 = vmatpush1.bf16.msk.msra.mxu1 %vm18114_vm11, %v11760_v53  ;;  %v13009_v57 = vpop.permute.xlu1 %13008  ;;  %11771 = vmatprep.subr.msk.bf16.mxu0 %vm18232_vm12, %v11769_v16  ;;  %vm22778_vm9 = vmmov %vm22769_vm7  ;;  %v22779_v53 = vmov 0  ;;  %vm22782_vm12 = vcmask 1031168   ;;  %vm22831_vm11 = vcmask 588800  }
 0x68a   : > { %6055 = vrot.lane.b32.xlu1 %v18207_v17, %s13282_s22  ;;  %22776 = vst [vmem:[#allocation102_spill] sm:$0xff] %v22775_v6  ;;  %v13011_v5 = vunpack.i.h.bf16 %v13009_v57  ;;  %v13010_v56 = vunpack.i.l.bf16 %v13009_v57  ;;  %10530 = vmatprep.subr.msk.mxu1 %vm22777_vm4, %v6079_v37  ;;  %v6028_v18 = vpop.permute.xlu0 %6027  ;;  %vm18275_vm15 = vmpackc.low %vm22778_vm9, %vm21549_vm3  ;;  %vm22785_vm9 = vcmp.lt.s32.totalorder %v22211_v46, 62 }
 0x68b   : > { %11774 = vmatpush1.bf16.msk.msra.mxu0 %vm18244_vm13, %v11772_v20  ;;  %v22780_v53 = vsel %vm18275_vm15, 4294967295, %v22779_v53  ;;  %vm22783_vm4 = vmmov %vm22782_vm12  ;;  %v11778_v20 = vpack.c.bf16 %v6079_v37, %v17551_v62  ;;  %vm22799_vm13 = vcmask 1014784  }
 0x68c   : > { %11777 = vmatprep.subr.msk.bf16.mxu0 %vm18257_vm10, %v11775_v34  ;;  %22781 = vst [vmem:[#allocation27_spill] sm:$0xff] %v22780_v53  ;;  %v6375_v16 = vsel %vm22782_vm12, %v13006_v49, %v13010_v56  ;;  %v6376_v57 = vsel %vm22783_vm4, %v13010_v56, %v13011_v5  ;;  %vm22784_vm10 = vcmask 1014784   ;;  %vm18293_vm12 = vmpackc.low %vm21549_vm3, %vm22786_vm8  ;;  %vm22789_vm4 = vcmask 588800  }
 0x68d   : > { %v11784_v6 = vpack.c.bf16 %v6375_v16, %v17708_v30  ;;  %v6081_v34 = vsel %vm22784_vm10, %v6026_v8, %v6028_v18  ;;  %10531 = vmatpush1.msk.msra.mxu1 %vm22785_vm9, %v18143_v48  ;;  %v5701_v9 = vpop.permute.xlu1 %5700  ;;  %v11781_v2 = vpack.c.bf16 %v6376_v57, %v17733_v51  ;;  %vm22790_vm10 = vcmask 15360  }
 0x68e   : > { %10532 = vmatmul.mubr.msk.f32.vlgmr.msra.gmra.mrb[34].mxu1 %vm22789_vm4, %v17987_v45  ;;  %v18299_v62 = vpop.permute.xlu0 %13013  ;;  %v18304_v30 = vsel %vm22790_vm10, %v5699_v35, %v5701_v9  ;;  %vm22791_vm9 = vcmp.ge.s32.totalorder %v22265_v58, 2  ;;  %v22792_v48 = vmov 0  ;;  %vm22794_vm8 = vcmp.lt.s32.totalorder %v22254_v63, 62 }
 0x68f   : > { %11780 = vmatpush1.bf16.msk.msra.mxu0 %vm18275_vm15, %v11778_v20  ;;  %vm18309_vm7 = vmpackc.low %vm21549_vm3, %vm22791_vm9  ;;  %v21186_v56 = vunpack.i.h.bf16 %v18299_v62  ;;  %v13015_v8 = vunpack.i.l.bf16 %v18299_v62  ;;  %6057 = vrot.lane.b32.xlu0 %v18304_v30, %s13282_s22  ;;  %vm22795_vm4 = vcmp.ge.s32.totalorder %v22254_v63, 2  ;;  %v22796_v35 = vmov 0 }
 0x690   : > { %v22793_v48 = vsel %vm18309_vm7, 4294967295, %v22792_v48  ;;  %11783 = vmatprep.subr.msk.bf16.mxu0 %vm18189_vm14, %v11781_v2  ;;  %vm18323_vm10 = vmpackc.low %vm22795_vm4, %vm22794_vm8  ;;  %vm21185_vm9 = vcmp.lt.s32.totalorder %v22265_v58, 62  ;;  %v11793_v37 = vpack.c.bf16 %v17730_v43, %v6081_v34  ;;  %11789 = vmatprep.subr.msk.bf16.mxu1 %vm18293_vm12, %v11781_v2  ;;  %vm22800_vm8 = vcmp.ge.s32.totalorder %v22265_v58, 2 }
 0x691   : > { %v22797_v35 = vsel %vm18323_vm10, 4294967295, %v22796_v35  ;;  %6864 = vmatprep.mubr.f32.mxu1 %v21567_v15  ;;  %11792 = vmatpush1.bf16.msk.msra.mxu1 %vm18309_vm7, %v11784_v6  ;;  %v6030_v16 = vpop.permute.xlu1 %6029  ;;  %vm18346_vm4 = vmpackc.low %vm22800_vm8, %vm21185_vm9  ;;  %v22801_v2 = vmov 0  ;;  %vm22807_vm8 = vcmp.lt.s32.totalorder %v22254_v63, 62  ;;  %vm22820_vm14 = vcmask 1014784  }
 0x692   : > { %22798 = vst [vmem:[#allocation65_spill] sm:$0xff] %v22797_v35  ;;  %v18336_v57 = vsel %vm22799_vm13, %v6028_v18, %v6030_v16  ;;  %11795 = vmatprep.subr.msk.bf16.mxu1 %vm18323_vm10, %v11793_v37  ;;  %v5703_v20 = vpop.permute.xlu0 %5702  ;;  %v22802_v2 = vsel %vm18346_vm4, 4294967295, %v22801_v2  ;;  %v11796_v18 = vpack.c.bf16 %v17733_v51, %v18237_v25  ;;  %vm22804_vm13 = vcmask 1031168   ;;  %vm18366_vm15 = vmpackc.low %vm22807_vm8, %vm21549_vm3 }
 0x693   : > { %11786 = vmatpush1.bf16.msk.msra.mxu0 %vm18200_vm0, %v11784_v6  ;;  %22803 = vst [vmem:[#allocation16_spill] sm:$0xff] %v22802_v2  ;;  %v6378_v37 = vsel %vm22804_vm13, %v13015_v8, %v21186_v56  ;;  %v11799_v6 = vpack.c.bf16 %v18336_v57, %v17568_v50  ;;  %vm22805_vm10 = vcmp.lt.s32.totalorder %v22222_v23, 62  ;;  %vm22806_vm0 = vcmask 15360   ;;  %vm22811_vm9 = vmmov %vm22804_vm13 }
 0x694   : > { %10543 = vmatprep.subr.msk.mxu0 %vm22805_vm10, %v6081_v34  ;;  %v18361_v53 = vsel %vm22806_vm0, %v5701_v9, %v5703_v20  ;;  %v22808_v35 = vmov 0  ;;  %v6377_v51 = vsel %vm22811_vm9, %v13011_v5, %v13015_v8  ;;  %vm22812_vm10 = vcmp.ge.s32.totalorder %v22277_v19, 2 }
 0x695   : > { %v22809_v35 = vsel %vm18366_vm15, 4294967295, %v22808_v35  ;;  %6059 = vrot.lane.b32.xlu0 %v18361_v53, %s13282_s22  ;;  %v13047_v50 = vpack.i.bf16 %v18361_v53, %v18304_v30  ;;  %vm18378_vm0 = vmpackc.low %vm21549_vm3, %vm22812_vm10  ;;  %v22813_v9 = vmov 0  ;;  %11798 = vmatpush1.bf16.msk.msra.mxu1 %vm18346_vm4, %v11796_v18  ;;  %v6032_v56 = vpop.permute.xlu1 %6031  ;;  %vm22816_vm9 = vcmp.lt.s32.totalorder %v22265_v58, 62 }
 0x696   : > { %22810 = vst [vmem:[#allocation67_spill] sm:$0xff] %v22809_v35  ;;  %v22814_v9 = vsel %vm18378_vm0, 4294967295, %v22813_v9  ;;  %vm18388_vm8 = vmpackc.low %vm22816_vm9, %vm21549_vm3  ;;  %v22817_v5 = vmov 0  ;;  %v6083_v8 = vsel %vm22820_vm14, %v6030_v16, %v6032_v56  ;;  %11801 = vmatprep.subr.msk.bf16.mxu1 %vm18366_vm15, %v11799_v6  ;;  %v6034_v23 = vpop.permute.xlu0 %6033  ;;  %v11805_v46 = vpack.c.bf16 %v6378_v37, %v17743_v7  ;;  %v23209_v35 = vld [vmem:[#allocation55_spill] sm:$0xff] }
 0x697   : > { %22815 = vst [vmem:[#allocation105_spill] sm:$0xff] %v22814_v9  ;;  %v22818_v5 = vsel %vm18388_vm8, 4294967295, %v22817_v5  ;;  %13048 = vrot.lane.b32.xlu1 %v13047_v50, %s13274_s12  ;;  %vm22821_vm10 = vcmp.ge.s32.totalorder %v22287_v12, 2  ;;  %v22822_v18 = vmov 0  ;;  %v11802_v2 = vpack.c.bf16 %v6081_v34, %v17575_v61 }
 0x698   : > { %22819 = vst [vmem:[#allocation68_spill] sm:$0xff] %v22818_v5  ;;  %vm18400_vm13 = vmpackc.low %vm21549_vm3, %vm22821_vm10  ;;  %v11808_v26 = vpack.c.bf16 %v6377_v51, %v17730_v43  ;;  %v11817_v16 = vpack.c.bf16 %v17747_v22, %v6083_v8  ;;  %vm22825_vm14 = vcmp.lt.s32.totalorder %v22231_v47, 62  ;;  %vm22826_vm9 = vcmp.lt.s32.totalorder %v22277_v19, 62  ;;  %v22882_v47 = vld [vmem:[#allocation31_spill] sm:$0xff] }
 0x699   : > { %v22823_v18 = vsel %vm18400_vm13, 4294967295, %v22822_v18  ;;  %10544 = vmatpush1.msk.msra.mxu0 %vm22825_vm14, %v18237_v25  ;;  %vm22827_vm15 = vcmp.ge.s32.totalorder %v22277_v19, 2  ;;  %v22828_v37 = vmov 0  ;;  %vm21199_vm10 = vcmp.lt.s32.totalorder %v22287_v12, 62  ;;  %11804 = vmatpush1.bf16.msk.msra.mxu1 %vm18388_vm8, %v11802_v2  ;;  %v13019_v43 = vpop.permute.xlu1 %13018  ;;  %vm22838_vm14 = vmmov %vm22826_vm9 }
 0x69a   : > { %22824 = vst [vmem:[#allocation104_spill] sm:$0xff] %v22823_v18  ;;  %vm18414_vm4 = vmpackc.low %vm22827_vm15, %vm22826_vm9  ;;  %11813 = vmatprep.subr.msk.bf16.mxu0 %vm18378_vm0, %v11805_v46  ;;  %10545 = vmatmul.mubr.msk.f32.vlgmr.msra.gmra.mrb[36].mxu0 %vm22831_vm11, %v17987_v45  ;;  %v18424_v61 = vsel %vm22832_vm1, %v6032_v56, %v6034_v23  ;;  %v13021_v25 = vunpack.i.h.bf16 %v13019_v43  ;;  %v13020_v34 = vunpack.i.l.bf16 %v13019_v43  ;;  %v5705_v6 = vpop.permute.xlu0 %5704  ;;  %vm22833_vm1 = vcmp.ge.s32.totalorder %v22287_v12, 2  ;;  %v22849_v43 = vld [vmem:[#allocation28_spill] sm:$0xff]  ;;  %v22881_v18 = vld [vmem:[#allocation123_spill] sm:$0xff] }
 0x69b   : > { %v22829_v37 = vsel %vm18414_vm4, 4294967295, %v22828_v37  ;;  %11816 = vmatpush1.bf16.msk.msra.mxu0 %vm18400_vm13, %v11808_v26  ;;  %11807 = vmatprep.subr.msk.bf16.mxu1 %vm18293_vm12, %v11805_v46  ;;  %vm18438_vm11 = vmpackc.low %vm22833_vm1, %vm21199_vm10  ;;  %v22834_v56 = vmov 0  ;;  %v11820_v2 = vpack.c.bf16 %v17743_v7, %v18336_v57  ;;  %vm22837_vm15 = vcmask 15360  }
 0x69c   : > { %22830 = vst [vmem:[#allocation128_spill] sm:$0xff] %v22829_v37  ;;  %11819 = vmatprep.subr.msk.bf16.mxu0 %vm18414_vm4, %v11817_v16  ;;  %v22835_v56 = vsel %vm18438_vm11, 4294967295, %v22834_v56  ;;  %v18445_v51 = vsel %vm22837_vm15, %v5703_v20, %v5705_v6  ;;  %vm18450_vm9 = vmpackc.low %vm22838_vm14, %vm21549_vm3  ;;  %v22839_v46 = vmov 0  ;;  %6935 = vmatprep.mubr.f32.mxu0 %v21567_v15  ;;  %v11823_v50 = vpack.c.bf16 %v18424_v61, %v17585_v55 }
 0x69d   : > { %22836 = vst [vmem:[#allocation127_spill] sm:$0xff] %v22835_v56  ;;  %v22840_v46 = vsel %vm18450_vm9, 4294967295, %v22839_v46  ;;  %6061 = vrot.lane.b32.xlu1 %v18445_v51, %s13282_s22  ;;  %11810 = vmatpush1.bf16.msk.msra.mxu1 %vm18309_vm7, %v11808_v26  ;;  %v5707_v7 = vpop.permute.xlu1 %5706  ;;  %vm22842_vm15 = vcmask 1031168   ;;  %vm22843_vm14 = vcmp.lt.s32.totalorder %v22254_v63, 62  ;;  %vm22844_vm10 = vcmask 15360  }
 0x69e   : > { %22841 = vst [vmem:[#allocation69_spill] sm:$0xff] %v22840_v46  ;;  %v6380_v20 = vsel %vm22842_vm15, %v13020_v34, %v13021_v25  ;;  %10556 = vmatprep.subr.msk.mxu1 %vm22843_vm14, %v6083_v8  ;;  %v6036_v55 = vpop.permute.xlu0 %6035  ;;  %v18470_v16 = vsel %vm22844_vm10, %v5705_v6, %v5707_v7  ;;  %vm22845_vm4 = vcmp.lt.s32.totalorder %v22287_v12, 62  ;;  %v22846_v26 = vmov 0 }
 0x69f   : > { %11822 = vmatpush1.bf16.msk.msra.mxu0 %vm18438_vm11, %v11820_v2  ;;  %vm18475_vm8 = vmpackc.low %vm22845_vm4, %vm21549_vm3  ;;  %vm21207_vm1 = vcmp.ge.s32.totalorder %v22325_v42, 2  ;;  %vm21208_vm15 = vcmp.lt.s32.totalorder %v22311_v31, 62  ;;  %v11826_v2 = vpack.c.bf16 %v6083_v8, %v22849_v43  ;;  %v22850_v46 = vunpack.i.h.bf16 %v18299_v62  ;;  %v22858_v62 = vld [vmem:[#allocation48_spill] sm:$0xff] }
 0x6a0   : > { %11825 = vmatprep.subr.msk.bf16.mxu0 %vm18450_vm9, %v11823_v50  ;;  %v22847_v26 = vsel %vm18475_vm8, 4294967295, %v22846_v26  ;;  %vm22851_vm14 = vcmask 1031168   ;;  %vm22852_vm9 = vcmask 1014784   ;;  %v13052_v56 = vpack.i.bf16 %v18470_v16, %v18445_v51 }
 0x6a1   : > { %22848 = vst [vmem:[#allocation9_spill] sm:$0xff] %v22847_v26  ;;  %v6379_v50 = vsel %vm22851_vm14, %v22850_v46, %v13020_v34  ;;  %v6085_v6 = vsel %vm22852_vm9, %v6034_v23, %v6036_v55  ;;  %6063 = vrot.lane.b32.xlu1 %v18470_v16, %s13282_s22  ;;  %vm22853_vm4 = vcmp.ge.s32.totalorder %v22311_v31, 2  ;;  %v22854_v37 = vmov 0  ;;  %v6038_v23 = vpop.permute.xlu1 %6037  ;;  %vm18507_vm9 = vmpackc.low %vm21549_vm3, %vm21207_vm1  ;;  %v23318_v49 = vld [vmem:[#allocation104_spill] sm:$0xff] }
 0x6a2   : > { %vm18493_vm10 = vmpackc.low %vm21549_vm3, %vm22853_vm4  ;;  %v11841_v8 = vpack.c.bf16 %v17768_v11, %v6085_v6  ;;  %vm22857_vm14 = vcmp.lt.s32.totalorder %v22265_v58, 62  ;;  %v11829_v34 = vpack.c.bf16 %v6380_v20, %v22858_v62  ;;  %v22859_v46 = vmov 0  ;;  %13053 = vrot.lane.b32.xlu0 %v13052_v56, %s13274_s12  ;;  %v22874_v58 = vld [vmem:[#allocation62_spill] sm:$0xff] }
 0x6a3   : > { %v22855_v37 = vsel %vm18493_vm10, 4294967295, %v22854_v37  ;;  %10557 = vmatpush1.msk.msra.mxu1 %vm22857_vm14, %v18336_v57  ;;  %11828 = vmatpush1.bf16.msk.msra.mxu0 %vm18475_vm8, %v11826_v2  ;;  %v22860_v46 = vsel %vm18507_vm9, 4294967295, %v22859_v46  ;;  %v11832_v43 = vpack.c.bf16 %v6379_v50, %v17747_v22  ;;  %vm22862_vm4 = vcmask 588800   ;;  %v18515_v57 = vpop.permute.xlu0 %13023  ;;  %v22868_v50 = vld [vmem:[#allocation61_spill] sm:$0xff] }
 0x6a4   : > { %22856 = vst [vmem:[#allocation20_spill] sm:$0xff] %v22855_v37  ;;  %22861 = vst [vmem:[#allocation107_spill] sm:$0xff] %v22860_v46  ;;  %10558 = vmatmul.mubr.msk.f32.vlgmr.msra.gmra.mrb[36].mxu1 %vm22862_vm4, %v17987_v45  ;;  %vm22863_vm14 = vcmp.ge.s32.totalorder %v22311_v31, 2  ;;  %v22864_v20 = vmov 0  ;;  %vm21217_vm1 = vcmp.lt.s32.totalorder %v22325_v42, 62  ;;  %11831 = vmatprep.subr.msk.bf16.mxu0 %vm18378_vm0, %v11829_v34  ;;  %v21212_v22 = vunpack.i.h.bf16 %v18515_v57 }
 0x6a5   : > { %vm18521_vm8 = vmpackc.low %vm22863_vm14, %vm21208_vm15  ;;  %11837 = vmatprep.subr.msk.bf16.mxu1 %vm18493_vm10, %v11829_v34  ;;  %v13025_v56 = vunpack.i.l.bf16 %v18515_v57  ;;  %vm22867_vm4 = vcmask 1014784   ;;  %7006 = vmatprep.mubr.f32.mxu1 %v21567_v15  ;;  %vm22869_vm15 = vcmask 1031168   ;;  %v5709_v34 = vpop.permute.xlu1 %5708  ;;  %v22878_v63 = vmov 0 }
 0x6a6   : > { %v22865_v20 = vsel %vm18521_vm8, 4294967295, %v22864_v20  ;;  %v6086_v2 = vsel %vm22867_vm4, %v6036_v55, %v6038_v23  ;;  %11840 = vmatpush1.bf16.msk.msra.mxu1 %vm18507_vm9, %v11832_v43  ;;  %vm22870_vm4 = vcmp.ge.s32.totalorder %v22325_v42, 2  ;;  %v22871_v55 = vmov 0 }
 0x6a7   : > { %22866 = vst [vmem:[#allocation130_spill] sm:$0xff] %v22865_v20  ;;  %v6382_v26 = vsel %vm22869_vm15, %v13025_v56, %v21212_v22  ;;  %11843 = vmatprep.subr.msk.bf16.mxu1 %vm18521_vm8, %v11841_v8  ;;  %11834 = vmatpush1.bf16.msk.msra.mxu0 %vm18400_vm13, %v11832_v43  ;;  %vm18548_vm11 = vmpackc.low %vm22870_vm4, %vm21217_vm1  ;;  %v11844_v22 = vpack.c.bf16 %v22858_v62, %v18424_v61  ;;  %vm22875_vm8 = vcmp.lt.s32.totalorder %v22277_v19, 62  ;;  %v5711_v8 = vpop.permute.xlu0 %5710  ;;  %vm22876_vm13 = vcmask 15360   ;;  %v22897_v19 = vld [vmem:[#allocation30_spill] sm:$0xff] }
 0x6a8   : > { %v22872_v55 = vsel %vm18548_vm11, 4294967295, %v22871_v55  ;;  %v6381_v20 = vsel %vm22869_vm15, %v13021_v25, %v13025_v56  ;;  %10569 = vmatprep.subr.msk.mxu0 %vm22875_vm8, %v6085_v6  ;;  %v18559_v43 = vsel %vm22876_vm13, %v5707_v7, %v5709_v34  ;;  %vm22877_vm4 = vcmp.lt.s32.totalorder %v22311_v31, 62  ;;  %vm22883_vm14 = vmmov %vm22876_vm13 }
 0x6a9   : > { %22873 = vst [vmem:[#allocation71_spill] sm:$0xff] %v22872_v55  ;;  %vm18564_vm1 = vmpackc.low %vm22877_vm4, %vm21549_vm3  ;;  %v11853_v9 = vpack.c.bf16 %v6382_v26, %v22881_v18  ;;  %v11847_v62 = vpack.c.bf16 %v6086_v2, %v22882_v47  ;;  %v18571_v25 = vsel %vm22883_vm14, %v5709_v34, %v5711_v8  ;;  %6065 = vrot.lane.b32.xlu0 %v18559_v43, %s13282_s22  ;;  %vm22884_vm13 = vcmp.ge.s32.totalorder %v22868_v50, 2 }
 0x6aa   : > { %v22879_v63 = vsel %vm18564_vm1, 4294967295, %v22878_v63  ;;  %vm18578_vm8 = vmpackc.low %vm21549_vm3, %vm22884_vm13  ;;  %v22885_v7 = vmov 0  ;;  %11846 = vmatpush1.bf16.msk.msra.mxu1 %vm18548_vm11, %v11844_v22  ;;  %v13057_v47 = vpack.i.bf16 %v18571_v25, %v18559_v43  ;;  %vm22888_vm14 = vcmp.ge.s32.totalorder %v22874_v58, 2  ;;  %v6040_v22 = vpop.permute.xlu1 %6039 }
 0x6ab   : > { %22880 = vst [vmem:[#allocation129_spill] sm:$0xff] %v22879_v63  ;;  %v22886_v7 = vsel %vm18578_vm8, 4294967295, %v22885_v7  ;;  %vm18590_vm4 = vmpackc.low %vm21549_vm3, %vm22888_vm14  ;;  %v22889_v26 = vmov 0  ;;  %v11856_v56 = vpack.c.bf16 %v6381_v20, %v17768_v11  ;;  %11849 = vmatprep.subr.msk.bf16.mxu1 %vm18564_vm1, %v11847_v62  ;;  %vm22892_vm13 = vcmp.lt.s32.totalorder %v22287_v12, 62  ;;  %v22905_v62 = vld [vmem:[#allocation52_spill] sm:$0xff] }
 0x6ac   : > { %22887 = vst [vmem:[#allocation106_spill] sm:$0xff] %v22886_v7  ;;  %v22890_v26 = vsel %vm18590_vm4, 4294967295, %v22889_v26  ;;  %10570 = vmatpush1.msk.msra.mxu0 %vm22892_vm13, %v18424_v61  ;;  %vm22893_vm15 = vcmp.lt.s32.totalorder %v22325_v42, 62  ;;  %v22894_v34 = vmov 0  ;;  %v11850_v55 = vpack.c.bf16 %v6085_v6, %v22897_v19  ;;  %v6042_v61 = vpop.permute.xlu0 %6041  ;;  %13058 = vrot.lane.b32.xlu1 %v13057_v47, %s13274_s12  ;;  %v22912_v47 = vld [vmem:[#allocation35_spill] sm:$0xff] }
 0x6ad   : > { %22891 = vst [vmem:[#allocation10_spill] sm:$0xff] %v22890_v26  ;;  %vm18603_vm11 = vmpackc.low %vm22893_vm15, %vm21549_vm3  ;;  %vm22898_vm0 = vcmask 1014784   ;;  %vm22899_vm1 = vcmask 588800   ;;  %11861 = vmatprep.subr.msk.bf16.mxu0 %vm18578_vm8, %v11853_v9  ;;  %vm22900_vm13 = vcmp.lt.s32.totalorder %v22868_v50, 62  ;;  %vm22901_vm15 = vcmp.ge.s32.totalorder %v22868_v50, 2  ;;  %6067 = vrot.lane.b32.xlu0 %v18571_v25, %s13282_s22 }
 0x6ae   : > { %v22895_v34 = vsel %vm18603_vm11, 4294967295, %v22894_v34  ;;  %v6087_v11 = vsel %vm22898_vm0, %v6038_v23, %v6040_v22  ;;  %10571 = vmatmul.mubr.msk.f32.vlgmr.msra.gmra.mrb[38].mxu0 %vm22899_vm1, %v17987_v45  ;;  %vm18618_vm7 = vmpackc.low %vm22901_vm15, %vm22900_vm13  ;;  %v22902_v20 = vmov 0  ;;  %11852 = vmatpush1.bf16.msk.msra.mxu1 %vm18603_vm11, %v11850_v55  ;;  %vm22908_vm1 = vcmp.ge.s32.totalorder %v22874_v58, 2 }
 0x6af   : > { %22896 = vst [vmem:[#allocation21_spill] sm:$0xff] %v22895_v34  ;;  %v22903_v20 = vsel %vm18618_vm7, 4294967295, %v22902_v20  ;;  %v11865_v63 = vpack.c.bf16 %v22905_v62, %v6087_v11  ;;  %vm22906_vm14 = vmmov %vm22898_vm0  ;;  %11864 = vmatpush1.bf16.msk.msra.mxu0 %vm18590_vm4, %v11856_v56  ;;  %vm22907_vm0 = vcmp.lt.s32.totalorder %v22874_v58, 62  ;;  %v22909_v6 = vmov 0  ;;  %11855 = vmatprep.subr.msk.bf16.mxu1 %vm18493_vm10, %v11853_v9  ;;  %v6436_v9 = vld [vmem:[%s20668_s6] sm:$0xff] }
 0x6b0   : > { %22904 = vst [vmem:[#allocation73_spill] sm:$0xff] %v22903_v20  ;;  %v6088_v19 = vsel %vm22906_vm14, %v6040_v22, %v6042_v61  ;;  %vm18635_vm13 = vmpackc.low %vm22908_vm1, %vm22907_vm0  ;;  %v11868_v23 = vpack.c.bf16 %v22881_v18, %v6086_v2  ;;  %vm22913_vm14 = vcmask 15360   ;;  %vm22914_vm15 = vcmp.lt.s32.totalorder %v22868_v50, 62  ;;  %7077 = vmatprep.mubr.f32.mxu0 %v21567_v15  ;;  %v22922_v18 = vld [vmem:[#allocation34_spill] sm:$0xff] }
 0x6b1   : > { %v22910_v6 = vsel %vm18635_vm13, 4294967295, %v22909_v6  ;;  %v11871_v22 = vpack.c.bf16 %v6088_v19, %v22912_v47  ;;  %11867 = vmatprep.subr.msk.bf16.mxu0 %vm18618_vm7, %v11865_v63  ;;  %v18646_v55 = vsel %vm22913_vm14, %v5711_v8, 0.0  ;;  %vm18651_vm0 = vmpackc.low %vm22914_vm15, %vm21549_vm3  ;;  %v22915_v34 = vmov 0  ;;  %v22926_v47 = vld [vmem:[#allocation15_spill] sm:$0xff] }
 0x6b2   : > { %22911 = vst [vmem:[#allocation74_spill] sm:$0xff] %v22910_v6  ;;  %v22916_v34 = vsel %vm18651_vm0, 4294967295, %v22915_v34  ;;  %6199 = vrot.lane.b32.xlu1 %v18646_v55, %s13282_s22  ;;  %11858 = vmatpush1.bf16.msk.msra.mxu1 %vm18507_vm9, %v11856_v56  ;;  %vm22918_vm1 = vcmp.lt.s32.totalorder %v22874_v58, 62  ;;  %v22919_v63 = vmov 0  ;;  %v11874_v8 = vpack.c.bf16 %v6087_v11, %v22922_v18 }
 0x6b3   : > { %22917 = vst [vmem:[#allocation109_spill] sm:$0xff] %v22916_v34  ;;  %11870 = vmatpush1.bf16.msk.msra.mxu0 %vm18635_vm13, %v11868_v23  ;;  %6429 = vrot.lane.b32.xlu0 %v18646_v55, %s13274_s12  ;;  %vm18667_vm14 = vmpackc.low %vm22918_vm1, %vm21549_vm3  ;;  %vm22923_vm15 = vcmp.lt.s32.totalorder %v22311_v31, 62  ;;  %vm22924_vm1 = vcmp.lt.s32.totalorder %v22325_v42, 62  ;;  %vm22925_vm13 = vcmask 588800   ;;  %vm5798_vm7 = vcmp.ge.s32.totalorder %v22926_v47, 2  ;;  %v22927_v34 = vld [vmem:[#allocation66_spill] sm:$0xff] }
 0x6b4   : > { %v22920_v63 = vsel %vm18667_vm14, 4294967295, %v22919_v63  ;;  %10582 = vmatprep.subr.msk.mxu1 %vm22923_vm15, %v6087_v11  ;;  %11873 = vmatprep.subr.msk.bf16.mxu0 %vm18651_vm0, %v11871_v22  ;;  %vm5797_vm15 = vcmp.ge.s32.totalorder %v22927_v34, 2  ;;  %v22928_v22 = vunpack.i.h.bf16 %v18515_v57  ;;  %vm22934_vm11 = vcmask 1014784  }
 0x6b5   : > { %22921 = vst [vmem:[#allocation108_spill] sm:$0xff] %v22920_v63  ;;  %vm18704_vm0 = vmpackc.low %vm21549_vm3, %vm5797_vm15  ;;  %v22935_v57 = vmov 0  ;;  %vm21251_vm9 = vcmp.lt.s32.totalorder %v22927_v34, 62 }
 0x6b6   : > { %6439 = vperm.xlu1 %13062, %v6436_v9   ;;  %10583 = vmatpush1.msk.msra.mxu1 %vm22924_vm1, %v6086_v2  ;;  %v22936_v57 = vsel %vm18704_vm0, 4294967295, %v22935_v57 }
 0x6b7   : > { %11876 = vmatpush1.bf16.msk.msra.mxu0 %vm18667_vm14, %v11874_v8  ;;  %10584 = vmatmul.mubr.msk.f32.vlgmr.msra.gmra.mrb[38].mxu1 %vm22925_vm13, %v17987_v45  ;;  %vm22929_vm14 = vcmask 1031168   ;;  %vm18694_vm13 = vmpackc.low %vm21549_vm3, %vm5798_vm7  ;;  %v22931_v8 = vmov 0  ;;  %22937 = vst [vmem:[#allocation131_spill] sm:$0xff] %v22936_v57 }
 0x6b8   : > { %7148 = vmatprep.mubr.f32.mxu1 %v21567_v15  ;;  %vm22930_vm1 = vmmov %vm22929_vm14  ;;  %v22932_v8 = vsel %vm18694_vm13, 4294967295, %v22931_v8 }
 0x6b9   : > { %22933 = vst [vmem:[#allocation132_spill] sm:$0xff] %v22932_v8 }
 0x6d1   : > { %v6044_v56 = vpop.permute.xlu0 %6043 }
 0x6d2   : > { %v6089_v63 = vsel %vm22934_vm11, %v6042_v61, %v6044_v56  ;;  %vm18732_vm11 = vmpackc.low %vm5797_vm15, %vm21251_vm9  ;;  %vm22953_vm15 = vcmask 588800  }
 0x6d3   : > { %v13029_v23 = vpop.permute.xlu1 %13028  ;;  %v11889_v61 = vpack.c.bf16 %v17913_v13, %v6089_v63 }
 0x6d4   : > { %v13031_v11 = vunpack.i.h.bf16 %v13029_v23  ;;  %v13030_v18 = vunpack.i.l.bf16 %v13029_v23 }
 0x6d6   : > { %v6383_v9 = vsel %vm22929_vm14, %v22928_v22, %v13030_v18  ;;  %v6384_v2 = vsel %vm22930_vm1, %v13030_v18, %v13031_v11  ;;  %vm22938_vm14 = vcmp.lt.s32.totalorder %v22926_v47, 62  ;;  %v22939_v18 = vmov 0 }
 0x6d7   : > { %v11880_v6 = vpack.c.bf16 %v6383_v9, %v22905_v62  ;;  %v11877_v23 = vpack.c.bf16 %v6384_v2, %v17822_v52  ;;  %vm18710_vm1 = vmpackc.low %vm5798_vm7, %vm22938_vm14  ;;  %vm22942_vm7 = vcmp.lt.s32.totalorder %v22868_v50, 62  ;;  %v22943_v62 = vmov 0  ;;  %v22959_v50 = vld [vmem:[#allocation70_spill] sm:$0xff] }
 0x6d8   : > { %v22940_v18 = vsel %vm18710_vm1, 4294967295, %v22939_v18  ;;  %v22944_v62 = vsel %vm18732_vm11, 4294967295, %v22943_v62  ;;  %v11892_v22 = vpack.c.bf16 %v17822_v52, %v6088_v19  ;;  %vm22946_vm14 = vcmask 1014784  }
 0x6d9   : > { %22941 = vst [vmem:[#allocation11_spill] sm:$0xff] %v22940_v18  ;;  %11879 = vmatprep.subr.msk.bf16.mxu0 %vm18578_vm8, %v11877_v23  ;;  %11885 = vmatprep.subr.msk.bf16.mxu1 %vm18694_vm13, %v11877_v23  ;;  %22945 = vst [vmem:[#allocation23_spill] sm:$0xff] %v22944_v62  ;;  %v22952_v23 = vld [vmem:[#allocation38_spill] sm:$0xff]  ;;  %v22954_v52 = vmov 0 }
 0x6da   : > { %11882 = vmatpush1.bf16.msk.msra.mxu0 %vm18590_vm4, %v11880_v6  ;;  %11888 = vmatpush1.bf16.msk.msra.mxu1 %vm18704_vm0, %v11880_v6  ;;  %vm22947_vm4 = vcmp.lt.s32.totalorder %v22874_v58, 62  ;;  %v22949_v6 = vmov 0 }
 0x6db   : > { %10595 = vmatprep.subr.msk.mxu0 %vm22942_vm7, %v6089_v63  ;;  %11891 = vmatprep.subr.msk.bf16.mxu1 %vm18710_vm1, %v11889_v61  ;;  %vm22948_vm7 = vcmp.lt.s32.totalorder %v22926_v47, 62 }
 0x6dc   : > { %vm18745_vm1 = vmpackc.low %vm22948_vm7, %vm21549_vm3  ;;  %vm22965_vm7 = vcmask 1014784  }
 0x6dd   : > { %v22950_v6 = vsel %vm18745_vm1, 4294967295, %v22949_v6 }
 0x6de   : > { %v6046_v9 = vpop.permute.xlu1 %6045  ;;  %10596 = vmatpush1.msk.msra.mxu0 %vm22947_vm4, %v6088_v19  ;;  %11894 = vmatpush1.bf16.msk.msra.mxu1 %vm18732_vm11, %v11892_v22  ;;  %22951 = vst [vmem:[#allocation24_spill] sm:$0xff] %v22950_v6  ;;  %vm18755_vm4 = vmpackc.low %vm21251_vm9, %vm21549_vm3  ;;  %v22957_v19 = vld [vmem:[#allocation19_spill] sm:$0xff]  ;;  %vm22960_vm9 = vcmask 1031168  }
 0x6df   : > { %v6090_v2 = vsel %vm22946_vm14, %v6044_v56, %v6046_v9  ;;  %10597 = vmatmul.mubr.msk.f32.vlgmr.msra.gmra.mrb[40].mxu0 %vm22953_vm15, %v17987_v45  ;;  %v22955_v52 = vsel %vm18755_vm4, 4294967295, %v22954_v52  ;;  %vm5800_vm14 = vcmp.ge.s32.totalorder %v22957_v19, 2  ;;  %v22958_v56 = vld [vmem:[#allocation36_spill] sm:$0xff]  ;;  %vm21258_vm15 = vcmp.lt.s32.totalorder %v22957_v19, 62  ;;  %vm22961_vm11 = vmmov %vm22960_vm9 }
 0x6e0   : > { %v11895_v61 = vpack.c.bf16 %v6090_v2, %v22952_v23  ;;  %v13034_v18 = vpop.permute.xlu0 %13033  ;;  %22956 = vst [vmem:[#allocation111_spill] sm:$0xff] %v22955_v52  ;;  %v11898_v22 = vpack.c.bf16 %v6089_v63, %v22958_v56  ;;  %7219 = vmatprep.mubr.f32.mxu0 %v21567_v15  ;;  %vm18773_vm8 = vmpackc.low %vm21549_vm3, %vm5800_vm14  ;;  %v22962_v63 = vmov 0 }
 0x6e1   : > { %v13036_v62 = vunpack.i.h.bf16 %v13034_v18  ;;  %v13035_v58 = vunpack.i.l.bf16 %v13034_v18  ;;  %v22963_v63 = vsel %vm18773_vm8, 4294967295, %v22962_v63 }
 0x6e2   : > { %v6048_v23 = vpop.permute.xlu1 %6047  ;;  %11897 = vmatprep.subr.msk.bf16.mxu1 %vm18745_vm1, %v11895_v61  ;;  %22964 = vst [vmem:[#allocation76_spill] sm:$0xff] %v22963_v63  ;;  %vm22977_vm1 = vcmp.lt.s32.totalorder %v22927_v34, 62 }
 0x6e3   : > { %v6385_v42 = vsel %vm22960_vm9, %v13031_v11, %v13035_v58  ;;  %v6386_v20 = vsel %vm22961_vm11, %v13035_v58, %v13036_v62  ;;  %11900 = vmatpush1.bf16.msk.msra.mxu1 %vm18755_vm4, %v11898_v22  ;;  %v6091_v18 = vsel %vm22965_vm7, %v6046_v9, %v6048_v23  ;;  %vm22966_vm9 = vcmp.ge.s32.totalorder %v22959_v50, 2  ;;  %vm18791_vm4 = vmpackc.low %vm5800_vm14, %vm21258_vm15 }
 0x6e4   : > { %v11904_v61 = vpack.c.bf16 %v6385_v42, %v17913_v13  ;;  %v11901_v56 = vpack.c.bf16 %v6386_v20, %v18013_v54  ;;  %vm18783_vm11 = vmpackc.low %vm21549_vm3, %vm22966_vm9  ;;  %v22967_v58 = vmov 0  ;;  %v22970_v11 = vmov 0 }
 0x6e5   : > { %v22968_v58 = vsel %vm18783_vm11, 4294967295, %v22967_v58  ;;  %v22971_v11 = vsel %vm18791_vm4, 4294967295, %v22970_v11  ;;  %vm21261_vm7 = vcmp.lt.s32.totalorder %v22959_v50, 62  ;;  %v11913_v42 = vpack.c.bf16 %v18010_v10, %v6091_v18 }
 0x6e6   : > { %22969 = vst [vmem:[#allocation134_spill] sm:$0xff] %v22968_v58  ;;  %22972 = vst [vmem:[#allocation133_spill] sm:$0xff] %v22971_v11  ;;  %11903 = vmatprep.subr.msk.bf16.mxu1 %vm18694_vm13, %v11901_v56  ;;  %11909 = vmatprep.subr.msk.bf16.mxu0 %vm18773_vm8, %v11901_v56  ;;  %vm22973_vm14 = vcmp.lt.s32.totalorder %v22926_v47, 62  ;;  %v22974_v13 = vmov 0  ;;  %v11916_v20 = vpack.c.bf16 %v18013_v54, %v6090_v2  ;;  %v22984_v54 = vld [vmem:[#allocation41_spill] sm:$0xff]  ;;  %v22991_v47 = vld [vmem:[#allocation72_spill] sm:$0xff] }
 0x6e7   : > { %11906 = vmatpush1.bf16.msk.msra.mxu1 %vm18704_vm0, %v11904_v61  ;;  %11912 = vmatpush1.bf16.msk.msra.mxu0 %vm18783_vm11, %v11904_v61  ;;  %vm18813_vm15 = vmpackc.low %vm22966_vm9, %vm21261_vm7  ;;  %vm22980_vm9 = vcmp.lt.s32.totalorder %v22957_v19, 62  ;;  %v22981_v61 = vmov 0  ;;  %vm22992_vm0 = vcmask 1031168  }
 0x6e8   : > { %10608 = vmatprep.subr.msk.mxu1 %vm22973_vm14, %v6091_v18  ;;  %11915 = vmatprep.subr.msk.bf16.mxu0 %vm18791_vm4, %v11913_v42  ;;  %v22975_v13 = vsel %vm18813_vm15, 4294967295, %v22974_v13  ;;  %vm22978_vm14 = vcmask 588800   ;;  %vm22979_vm4 = vcmask 1014784   ;;  %vm18829_vm7 = vmpackc.low %vm22980_vm9, %vm21549_vm3  ;;  %v22986_v42 = vmov 0 }
 0x6e9   : > { %22976 = vst [vmem:[#allocation110_spill] sm:$0xff] %v22975_v13  ;;  %v22982_v61 = vsel %vm18829_vm7, 4294967295, %v22981_v61 }
 0x6ea   : > { %22983 = vst [vmem:[#allocation12_spill] sm:$0xff] %v22982_v61  ;;  %v23016_v61 = vld [vmem:[#allocation77_spill] sm:$0xff] }
 0x6eb   : > { %10609 = vmatpush1.msk.msra.mxu1 %vm22977_vm1, %v6090_v2  ;;  %11918 = vmatpush1.bf16.msk.msra.mxu0 %vm18813_vm15, %v11916_v20  ;;  %vm22985_vm1 = vcmp.lt.s32.totalorder %v22959_v50, 62  ;;  %v22989_v20 = vld [vmem:[#allocation22_spill] sm:$0xff] }
 0x6ec   : > { %10610 = vmatmul.mubr.msk.f32.vlgmr.msra.gmra.mrb[40].mxu1 %vm22978_vm14, %v17987_v45  ;;  %vm18837_vm15 = vmpackc.low %vm22985_vm1, %vm21549_vm3  ;;  %vm5802_vm14 = vcmp.ge.s32.totalorder %v22989_v20, 2  ;;  %vm21274_vm9 = vcmp.lt.s32.totalorder %v22989_v20, 62 }
 0x6ed   : > { %7290 = vmatprep.mubr.f32.mxu1 %v21567_v15  ;;  %v6050_v9 = vpop.permute.xlu0 %6049  ;;  %v22987_v42 = vsel %vm18837_vm15, 4294967295, %v22986_v42  ;;  %vm22993_vm1 = vmmov %vm22992_vm0 }
 0x6ee   : > { %v6092_v22 = vsel %vm22979_vm4, %v6048_v23, %v6050_v9  ;;  %22988 = vst [vmem:[#allocation78_spill] sm:$0xff] %v22987_v42  ;;  %v22990_v23 = vld [vmem:[#allocation42_spill] sm:$0xff]  ;;  %vm18854_vm13 = vmpackc.low %vm21549_vm3, %vm5802_vm14 }
 0x6ef   : > { %v11919_v2 = vpack.c.bf16 %v6092_v22, %v22984_v54  ;;  %v13039_v56 = vpop.permute.xlu1 %13038  ;;  %v11922_v13 = vpack.c.bf16 %v6091_v18, %v22990_v23  ;;  %v22994_v18 = vmov 0 }
 0x6f0   : > { %v13041_v34 = vunpack.i.h.bf16 %v13039_v56  ;;  %v13040_v11 = vunpack.i.l.bf16 %v13039_v56  ;;  %v22995_v18 = vsel %vm18854_vm13, 4294967295, %v22994_v18 }
 0x6f1   : > { %v6052_v52 = vpop.permute.xlu0 %6051  ;;  %11921 = vmatprep.subr.msk.bf16.mxu0 %vm18829_vm7, %v11919_v2  ;;  %22996 = vst [vmem:[#allocation79_spill] sm:$0xff] %v22995_v18 }
 0x6f2   : > { %v6387_v54 = vsel %vm22992_vm0, %v13036_v62, %v13040_v11  ;;  %v6388_v6 = vsel %vm22993_vm1, %v13040_v11, %v13041_v34  ;;  %11924 = vmatpush1.bf16.msk.msra.mxu0 %vm18837_vm15, %v11922_v13  ;;  %v6093_v56 = vsel %vm22979_vm4, %v6050_v9, %v6052_v52  ;;  %vm22997_vm0 = vcmp.ge.s32.totalorder %v22991_v47, 2  ;;  %vm18872_vm15 = vmpackc.low %vm5802_vm14, %vm21274_vm9 }
 0x6f3   : > { %v11928_v2 = vpack.c.bf16 %v6387_v54, %v18010_v10  ;;  %v11925_v23 = vpack.c.bf16 %v6388_v6, %v18109_v28  ;;  %vm18864_vm1 = vmpackc.low %vm21549_vm3, %vm22997_vm0  ;;  %v22998_v62 = vmov 0  ;;  %v23001_v11 = vmov 0 }
 0x6f4   : > { %v22999_v62 = vsel %vm18864_vm1, 4294967295, %v22998_v62  ;;  %v23002_v11 = vsel %vm18872_vm15, 4294967295, %v23001_v11  ;;  %vm21283_vm4 = vcmp.lt.s32.totalorder %v22991_v47, 62  ;;  %v11937_v10 = vpack.c.bf16 %v18105_v29, %v6093_v56 }
 0x6f5   : > { %23000 = vst [vmem:[#allocation80_spill] sm:$0xff] %v22999_v62  ;;  %23003 = vst [vmem:[#allocation113_spill] sm:$0xff] %v23002_v11  ;;  %11927 = vmatprep.subr.msk.bf16.mxu0 %vm18773_vm8, %v11925_v23  ;;  %11933 = vmatprep.subr.msk.bf16.mxu1 %vm18854_vm13, %v11925_v23  ;;  %vm23004_vm14 = vcmask 1014784   ;;  %vm23005_vm0 = vcmp.lt.s32.totalorder %v22957_v19, 62  ;;  %vm23006_vm9 = vcmp.ge.s32.totalorder %v22991_v47, 2  ;;  %v23007_v9 = vmov 0 }
 0x6f6   : > { %11930 = vmatpush1.bf16.msk.msra.mxu0 %vm18783_vm11, %v11928_v2  ;;  %11936 = vmatpush1.bf16.msk.msra.mxu1 %vm18864_vm1, %v11928_v2  ;;  %vm18895_vm7 = vmpackc.low %vm23006_vm9, %vm21283_vm4  ;;  %v11940_v54 = vpack.c.bf16 %v18109_v28, %v6092_v22  ;;  %v23010_v23 = vld [vmem:[#allocation43_spill] sm:$0xff]  ;;  %vm23017_vm4 = vcmp.lt.s32.totalorder %v22959_v50, 62  ;;  %vm23018_vm11 = vcmp.lt.s32.totalorder %v22991_v47, 62  ;;  %v23019_v28 = vmov 0 }
 0x6f7   : > { %10621 = vmatprep.subr.msk.mxu0 %vm23005_vm0, %v6093_v56  ;;  %11939 = vmatprep.subr.msk.bf16.mxu1 %vm18872_vm15, %v11937_v10  ;;  %v23008_v9 = vsel %vm18895_vm7, 4294967295, %v23007_v9  ;;  %v23015_v10 = vld [vmem:[#allocation75_spill] sm:$0xff]  ;;  %vm23022_vm8 = vcmask 1031168   ;;  %vm23024_vm9 = vcmask 1014784  }
 0x6f8   : > { %v6054_v6 = vpop.permute.xlu1 %6053  ;;  %23009 = vst [vmem:[#allocation112_spill] sm:$0xff] %v23008_v9  ;;  %vm21294_vm15 = vcmp.lt.s32.totalorder %v23015_v10, 62  ;;  %vm23023_vm10 = vmmov %vm23022_vm8 }
 0x6f9   : > { %v6094_v13 = vsel %vm23004_vm14, %v6052_v52, %v6054_v6  ;;  %vm23011_vm14 = vcmp.lt.s32.totalorder %v22989_v20, 62  ;;  %v23012_v52 = vmov 0 }
 0x6fa   : > { %v11943_v2 = vpack.c.bf16 %v6094_v13, %v23010_v23  ;;  %v13044_v42 = vpop.permute.xlu0 %13043  ;;  %vm18904_vm0 = vmpackc.low %vm23011_vm14, %vm21549_vm3  ;;  %10622 = vmatpush1.msk.msra.mxu0 %vm23017_vm4, %v6092_v22  ;;  %11942 = vmatpush1.bf16.msk.msra.mxu1 %vm18895_vm7, %v11940_v54  ;;  %vm23025_vm4 = vcmask 588800   ;;  %vm23026_vm7 = vcmp.ge.s32.totalorder %v23015_v10, 2  ;;  %v23027_v22 = vmov 0  ;;  %v23030_v54 = vld [vmem:[#allocation46_spill] sm:$0xff] }
 0x6fb   : > { %v23013_v52 = vsel %vm18904_vm0, 4294967295, %v23012_v52  ;;  %v13046_v19 = vunpack.i.h.bf16 %v13044_v42  ;;  %v13045_v11 = vunpack.i.l.bf16 %v13044_v42  ;;  %vm18917_vm14 = vmpackc.low %vm23018_vm11, %vm21549_vm3  ;;  %10623 = vmatmul.mubr.msk.f32.vlgmr.msra.gmra.mrb[42].mxu0 %vm23025_vm4, %v17987_v45  ;;  %v11946_v50 = vpack.c.bf16 %v6093_v56, %v23030_v54 }
 0x6fc   : > { %23014 = vst [vmem:[#allocation84_spill] sm:$0xff] %v23013_v52  ;;  %v6056_v58 = vpop.permute.xlu1 %6055  ;;  %v23020_v28 = vsel %vm18917_vm14, 4294967295, %v23019_v28  ;;  %11945 = vmatprep.subr.msk.bf16.mxu1 %vm18904_vm0, %v11943_v2  ;;  %vm18932_vm11 = vmpackc.low %vm21549_vm3, %vm23026_vm7  ;;  %7361 = vmatprep.mubr.f32.mxu0 %v21567_v15  ;;  %v23035_v2 = vmov 0  ;;  %vm21298_vm4 = vcmp.lt.s32.totalorder %v23016_v61, 62  ;;  %v23038_v56 = vmov 0 }
 0x6fd   : > { %23021 = vst [vmem:[#allocation85_spill] sm:$0xff] %v23020_v28  ;;  %v6389_v42 = vsel %vm23022_vm8, %v13041_v34, %v13045_v11  ;;  %v6390_v23 = vsel %vm23023_vm10, %v13045_v11, %v13046_v19  ;;  %v6095_v63 = vsel %vm23024_vm9, %v6054_v6, %v6056_v58  ;;  %v23028_v22 = vsel %vm18932_vm11, 4294967295, %v23027_v22  ;;  %vm18951_vm9 = vmpackc.low %vm23026_vm7, %vm21294_vm15 }
 0x6fe   : > { %23029 = vst [vmem:[#allocation86_spill] sm:$0xff] %v23028_v22  ;;  %v11952_v34 = vpack.c.bf16 %v6389_v42, %v18105_v29  ;;  %v11949_v11 = vpack.c.bf16 %v6390_v23, %v18210_v40  ;;  %vm23031_vm10 = vcmp.ge.s32.totalorder %v23016_v61, 2  ;;  %v23032_v6 = vmov 0  ;;  %11948 = vmatpush1.bf16.msk.msra.mxu1 %vm18917_vm14, %v11946_v50 }
 0x6ff   : > { %vm18942_vm8 = vmpackc.low %vm21549_vm3, %vm23031_vm10  ;;  %v23036_v2 = vsel %vm18951_vm9, 4294967295, %v23035_v2  ;;  %v11961_v29 = vpack.c.bf16 %v18207_v17, %v6095_v63  ;;  %v11964_v50 = vpack.c.bf16 %v18210_v40, %v6094_v13  ;;  %vm23041_vm15 = vcmask 1014784  }
 0x700   : > { %v23033_v6 = vsel %vm18942_vm8, 4294967295, %v23032_v6  ;;  %23037 = vst [vmem:[#allocation89_spill] sm:$0xff] %v23036_v2  ;;  %11957 = vmatprep.subr.msk.bf16.mxu0 %vm18932_vm11, %v11949_v11  ;;  %11951 = vmatprep.subr.msk.bf16.mxu1 %vm18854_vm13, %v11949_v11  ;;  %vm18971_vm7 = vmpackc.low %vm23031_vm10, %vm21298_vm4  ;;  %vm23042_vm14 = vcmp.lt.s32.totalorder %v23015_v10, 62  ;;  %v23043_v54 = vmov 0  ;;  %v23046_v11 = vld [vmem:[#allocation97_spill] sm:$0xff]  ;;  %vm23047_vm10 = vcmp.lt.s32.totalorder %v22989_v20, 62 }
 0x701   : > { %23034 = vst [vmem:[#allocation115_spill] sm:$0xff] %v23033_v6  ;;  %11960 = vmatpush1.bf16.msk.msra.mxu0 %vm18942_vm8, %v11952_v34  ;;  %v23039_v56 = vsel %vm18971_vm7, 4294967295, %v23038_v56  ;;  %v6058_v42 = vpop.permute.xlu0 %6057  ;;  %v23048_v40 = vmov 0  ;;  %vm23056_vm0 = vcmask 1031168  }
 0x702   : > { %11963 = vmatprep.subr.msk.bf16.mxu0 %vm18951_vm9, %v11961_v29  ;;  %23040 = vst [vmem:[#allocation114_spill] sm:$0xff] %v23039_v56  ;;  %v6096_v23 = vsel %vm23041_vm15, %v6056_v58, %v6058_v42  ;;  %11954 = vmatpush1.bf16.msk.msra.mxu1 %vm18864_vm1, %v11952_v34  ;;  %vm18982_vm9 = vmpackc.low %vm23042_vm14, %vm21549_vm3  ;;  %v23051_v58 = vld [vmem:[#allocation120_spill] sm:$0xff]  ;;  %vm23052_vm14 = vcmp.lt.s32.totalorder %v22991_v47, 62  ;;  %v23054_v56 = vld [vmem:[#allocation13_spill] sm:$0xff] }
 0x703   : > { %v23044_v54 = vsel %vm18982_vm9, 4294967295, %v23043_v54  ;;  %v11967_v29 = vpack.c.bf16 %v6096_v23, %v23046_v11  ;;  %10634 = vmatprep.subr.msk.mxu1 %vm23047_vm10, %v6095_v63  ;;  %vm18994_vm15 = vmpackc.low %vm21298_vm4, %vm21549_vm3  ;;  %v11970_v34 = vpack.c.bf16 %v6095_v63, %v23051_v58  ;;  %vm23053_vm10 = vcmask 588800   ;;  %v23055_v58 = vld [vmem:[#allocation81_spill] sm:$0xff] }
 0x704   : > { %23045 = vst [vmem:[#allocation87_spill] sm:$0xff] %v23044_v54  ;;  %v23049_v40 = vsel %vm18994_vm15, 4294967295, %v23048_v40  ;;  %vm5806_vm4 = vcmp.ge.s32.totalorder %v23054_v56, 2 }
 0x705   : > { %11966 = vmatpush1.bf16.msk.msra.mxu0 %vm18971_vm7, %v11964_v50  ;;  %23050 = vst [vmem:[#allocation88_spill] sm:$0xff] %v23049_v40  ;;  %vm5805_vm7 = vcmp.ge.s32.totalorder %v23055_v58, 2  ;;  %v23058_v40 = vmov 0 }
 0x706   : > { %11969 = vmatprep.subr.msk.bf16.mxu0 %vm18982_vm9, %v11967_v29  ;;  %10635 = vmatpush1.msk.msra.mxu1 %vm23052_vm14, %v6094_v13  ;;  %vm21309_vm9 = vcmp.lt.s32.totalorder %v23054_v56, 62  ;;  %vm23057_vm14 = vmmov %vm23056_vm0 }
 0x707   : > { %10636 = vmatmul.mubr.msk.f32.vlgmr.msra.gmra.mrb[42].mxu1 %vm23053_vm10, %v17987_v45  ;;  %v6060_v50 = vpop.permute.xlu0 %6059  ;;  %vm19014_vm10 = vmpackc.low %vm21549_vm3, %vm5806_vm4 }
 0x708   : > { %7432 = vmatprep.mubr.f32.mxu1 %v21567_v15  ;;  %v23059_v40 = vsel %vm19014_vm10, 4294967295, %v23058_v40  ;;  %vm19024_vm1 = vmpackc.low %vm21549_vm3, %vm5805_vm7 }
 0x709   : > { %11972 = vmatpush1.bf16.msk.msra.mxu0 %vm18994_vm15, %v11970_v34  ;;  %v13049_v11 = vpop.permute.xlu1 %13048  ;;  %23060 = vst [vmem:[#allocation90_spill] sm:$0xff] %v23059_v40  ;;  %vm23061_vm15 = vcmask 1014784   ;;  %v23109_v40 = vld [vmem:[#allocation91_spill] sm:$0xff] }
 0x70a   : > { %v13051_v2 = vunpack.i.h.bf16 %v13049_v11  ;;  %v13050_v63 = vunpack.i.l.bf16 %v13049_v11  ;;  %v6097_v34 = vsel %vm23061_vm15, %v6058_v42, %v6060_v50  ;;  %v23062_v11 = vmov 0 }
 0x70b   : > { %v23063_v11 = vsel %vm19024_vm1, 4294967295, %v23062_v11 }
 0x70c   : > { %v6391_v13 = vsel %vm23056_vm0, %v13046_v19, %v13050_v63  ;;  %v6392_v29 = vsel %vm23057_vm14, %v13050_v63, %v13051_v2  ;;  %23064 = vst [vmem:[#allocation117_spill] sm:$0xff] %v23063_v11  ;;  %vm19030_vm0 = vmpackc.low %vm5806_vm4, %vm21309_vm9  ;;  %v23065_v19 = vmov 0  ;;  %vm21319_vm14 = vcmp.lt.s32.totalorder %v23055_v58, 62 }
 0x70d   : > { %v11976_v54 = vpack.c.bf16 %v6391_v13, %v18207_v17  ;;  %v11973_v47 = vpack.c.bf16 %v6392_v29, %v18304_v30  ;;  %v23066_v19 = vsel %vm19030_vm0, 4294967295, %v23065_v19  ;;  %v11985_v17 = vpack.c.bf16 %v18361_v53, %v6097_v34  ;;  %vm19053_vm9 = vmpackc.low %vm5805_vm7, %vm21319_vm14  ;;  %v23076_v13 = vld [vmem:[#allocation47_spill] sm:$0xff] }
 0x70e   : > { %23067 = vst [vmem:[#allocation92_spill] sm:$0xff] %v23066_v19  ;;  %vm23068_vm4 = vcmp.lt.s32.totalorder %v23015_v10, 62  ;;  %vm23078_vm7 = vcmask 588800   ;;  %v23084_v19 = vld [vmem:[#allocation83_spill] sm:$0xff] }
 0x70f   : > { %v6062_v42 = vpop.permute.xlu1 %6061  ;;  %11975 = vmatprep.subr.msk.bf16.mxu0 %vm18932_vm11, %v11973_v47  ;;  %11981 = vmatprep.subr.msk.bf16.mxu1 %vm19014_vm10, %v11973_v47  ;;  %v23069_v47 = vmov 0 }
 0x710   : > { %v6098_v63 = vsel %vm23061_vm15, %v6060_v50, %v6062_v42  ;;  %11978 = vmatpush1.bf16.msk.msra.mxu0 %vm18942_vm8, %v11976_v54  ;;  %11984 = vmatpush1.bf16.msk.msra.mxu1 %vm19024_vm1, %v11976_v54  ;;  %v23070_v47 = vsel %vm19053_vm9, 4294967295, %v23069_v47  ;;  %v11988_v50 = vpack.c.bf16 %v18304_v30, %v6096_v23  ;;  %vm23072_vm15 = vcmp.lt.s32.totalorder %v23054_v56, 62 }
 0x711   : > { %10647 = vmatprep.subr.msk.mxu0 %vm23068_vm4, %v6097_v34  ;;  %11987 = vmatprep.subr.msk.bf16.mxu1 %vm19030_vm0, %v11985_v17  ;;  %23071 = vst [vmem:[#allocation116_spill] sm:$0xff] %v23070_v47  ;;  %vm19061_vm8 = vmpackc.low %vm23072_vm15, %vm21549_vm3  ;;  %v23073_v54 = vmov 0  ;;  %v11991_v29 = vpack.c.bf16 %v6098_v63, %v23076_v13  ;;  %vm23077_vm4 = vcmp.lt.s32.totalorder %v23016_v61, 62  ;;  %v23079_v30 = vmov 0  ;;  %v23082_v13 = vld [vmem:[#allocation82_spill] sm:$0xff] }
 0x712   : > { %v23074_v54 = vsel %vm19061_vm8, 4294967295, %v23073_v54  ;;  %vm19077_vm15 = vmpackc.low %vm21319_vm14, %vm21549_vm3  ;;  %vm23086_vm0 = vcmask 1031168  }
 0x713   : > { %23075 = vst [vmem:[#allocation17_spill] sm:$0xff] %v23074_v54  ;;  %v6064_v17 = vpop.permute.xlu1 %6063  ;;  %v23080_v30 = vsel %vm19077_vm15, 4294967295, %v23079_v30  ;;  %vm23087_vm14 = vmmov %vm23086_vm0 }
 0x714   : > { %10648 = vmatpush1.msk.msra.mxu0 %vm23077_vm4, %v6096_v23  ;;  %11990 = vmatpush1.bf16.msk.msra.mxu1 %vm19053_vm9, %v11988_v50  ;;  %v13054_v10 = vpop.permute.xlu0 %13053  ;;  %23081 = vst [vmem:[#allocation93_spill] sm:$0xff] %v23080_v30  ;;  %vm5808_vm4 = vcmp.ge.s32.totalorder %v23082_v13, 2  ;;  %v23083_v23 = vld [vmem:[#allocation121_spill] sm:$0xff]  ;;  %vm21323_vm9 = vcmp.ge.s32.totalorder %v23084_v19, 2 }
 0x715   : > { %10649 = vmatmul.mubr.msk.f32.vlgmr.msra.gmra.mrb[44].mxu0 %vm23078_vm7, %v17987_v45  ;;  %11993 = vmatprep.subr.msk.bf16.mxu1 %vm19061_vm8, %v11991_v29  ;;  %v11994_v61 = vpack.c.bf16 %v6097_v34, %v23083_v23  ;;  %v13056_v50 = vunpack.i.h.bf16 %v13054_v10  ;;  %v13055_v47 = vunpack.i.l.bf16 %v13054_v10  ;;  %vm21324_vm7 = vcmp.lt.s32.totalorder %v23082_v13, 62  ;;  %vm19094_vm11 = vmpackc.low %vm21549_vm3, %vm5808_vm4 }
 0x716   : > { %7503 = vmatprep.mubr.f32.mxu0 %v21567_v15  ;;  %vm23085_vm8 = vcmask 1014784   ;;  %v23088_v10 = vmov 0 }
 0x717   : > { %v6099_v45 = vsel %vm23085_vm8, %v6062_v42, %v6064_v17  ;;  %v6393_v29 = vsel %vm23086_vm0, %v13051_v2, %v13055_v47  ;;  %v6394_v54 = vsel %vm23087_vm14, %v13055_v47, %v13056_v50  ;;  %v23089_v10 = vsel %vm19094_vm11, 4294967295, %v23088_v10  ;;  %vm19103_vm8 = vmpackc.low %vm21549_vm3, %vm21323_vm9 }
 0x718   : > { %11996 = vmatpush1.bf16.msk.msra.mxu1 %vm19077_vm15, %v11994_v61  ;;  %23090 = vst [vmem:[#allocation94_spill] sm:$0xff] %v23089_v10  ;;  %v12000_v34 = vpack.c.bf16 %v6393_v29, %v18361_v53  ;;  %v11997_v23 = vpack.c.bf16 %v6394_v54, %v18445_v51  ;;  %v23091_v2 = vmov 0  ;;  %vm19111_vm0 = vmpackc.low %vm5808_vm4, %vm21324_vm7  ;;  %v23094_v61 = vmov 0 }
 0x719   : > { %v23092_v2 = vsel %vm19103_vm8, 4294967295, %v23091_v2  ;;  %v23095_v61 = vsel %vm19111_vm0, 4294967295, %v23094_v61  ;;  %vm21335_vm14 = vcmp.lt.s32.totalorder %v23084_v19, 62  ;;  %v12009_v53 = vpack.c.bf16 %v18470_v16, %v6099_v45 }
 0x71a   : > { %23093 = vst [vmem:[#allocation119_spill] sm:$0xff] %v23092_v2  ;;  %23096 = vst [vmem:[#allocation96_spill] sm:$0xff] %v23095_v61  ;;  %11999 = vmatprep.subr.msk.bf16.mxu1 %vm19014_vm10, %v11997_v23  ;;  %12005 = vmatprep.subr.msk.bf16.mxu0 %vm19094_vm11, %v11997_v23  ;;  %vm23097_vm9 = vcmask 1014784   ;;  %vm23098_vm4 = vcmp.lt.s32.totalorder %v23054_v56, 62  ;;  %vm23099_vm7 = vcmp.ge.s32.totalorder %v23084_v19, 2  ;;  %v23100_v54 = vmov 0 }
 0x71b   : > { %v6066_v42 = vpop.permute.xlu0 %6065  ;;  %12008 = vmatpush1.bf16.msk.msra.mxu0 %vm19103_vm8, %v12000_v34  ;;  %vm19134_vm15 = vmpackc.low %vm23099_vm7, %vm21335_vm14  ;;  %v23107_v23 = vld [vmem:[#allocation14_spill] sm:$0xff]  ;;  %vm23110_vm14 = vcmp.lt.s32.totalorder %v23055_v58, 62  ;;  %vm23115_vm10 = vcmask 1031168   ;;  %vm23117_vm7 = vcmask 1014784  }
 0x71c   : > { %v6100_v47 = vsel %vm23097_vm9, %v6064_v17, %v6066_v42  ;;  %12002 = vmatpush1.bf16.msk.msra.mxu1 %vm19024_vm1, %v12000_v34  ;;  %12011 = vmatprep.subr.msk.bf16.mxu0 %vm19111_vm0, %v12009_v53  ;;  %v23101_v54 = vsel %vm19134_vm15, 4294967295, %v23100_v54  ;;  %v12012_v17 = vpack.c.bf16 %v18445_v51, %v6098_v63  ;;  %vm23103_vm9 = vcmp.lt.s32.totalorder %v23082_v13, 62  ;;  %v23108_v53 = vld [vmem:[#allocation99_spill] sm:$0xff]  ;;  %vm23116_vm13 = vmmov %vm23115_vm10 }
 0x71d   : > { %10660 = vmatprep.subr.msk.mxu1 %vm23098_vm4, %v6099_v45  ;;  %23102 = vst [vmem:[#allocation95_spill] sm:$0xff] %v23101_v54  ;;  %vm19142_vm1 = vmpackc.low %vm23103_vm9, %vm21549_vm3  ;;  %v23104_v34 = vmov 0  ;;  %v12015_v61 = vpack.c.bf16 %v6100_v47, %v23108_v53  ;;  %vm23111_vm9 = vcmp.lt.s32.totalorder %v23084_v19, 62  ;;  %v23112_v51 = vmov 0 }
 0x71e   : > { %v13059_v29 = vpop.permute.xlu1 %13058  ;;  %v23105_v34 = vsel %vm19142_vm1, 4294967295, %v23104_v34  ;;  %vm19156_vm0 = vmpackc.low %vm23111_vm9, %vm21549_vm3  ;;  %vm21350_vm4 = vcmp.lt.s32.totalorder %v23107_v23, 62 }
 0x71f   : > { %23106 = vst [vmem:[#allocation118_spill] sm:$0xff] %v23105_v34  ;;  %v13061_v56 = vunpack.i.h.bf16 %v13059_v29  ;;  %v13060_v30 = vunpack.i.l.bf16 %v13059_v29  ;;  %v6068_v11 = vpop.permute.xlu0 %6067  ;;  %12014 = vmatpush1.bf16.msk.msra.mxu0 %vm19134_vm15, %v12012_v17  ;;  %v23113_v51 = vsel %vm19156_vm0, 4294967295, %v23112_v51  ;;  %v23122_v17 = vld [vmem:[#allocation51_spill] sm:$0xff] }
 0x720   : > { %10661 = vmatpush1.msk.msra.mxu1 %vm23110_vm14, %v6098_v63  ;;  %23114 = vst [vmem:[#allocation28_spill] sm:$0xff] %v23113_v51  ;;  %v6101_v20 = vsel %vm23117_vm7, %v6066_v42, %v6068_v11  ;;  %12017 = vmatprep.subr.msk.bf16.mxu0 %vm19142_vm1, %v12015_v61  ;;  %vm23118_vm14 = vcmp.ge.s32.totalorder %v23107_v23, 2  ;;  %v23119_v63 = vmov 0  ;;  %v12018_v54 = vpack.c.bf16 %v6099_v45, %v23122_v17  ;;  %v23139_v17 = vld [vmem:[#allocation98_spill] sm:$0xff] }
 0x721   : > { %v6395_v29 = vsel %vm23115_vm10, %v13056_v50, %v13060_v30  ;;  %v6396_v53 = vsel %vm23116_vm13, %v13060_v30, %v13061_v56  ;;  %vm19169_vm15 = vmpackc.low %vm21549_vm3, %vm23118_vm14  ;;  %v13173_v30 = vld [vmem:[%s20667_s5] sm:$0xff]  ;;  %vm23123_vm13 = vcmask 588800   ;;  %vm23124_vm10 = vcmp.ge.s32.totalorder %v23109_v40, 2 }
 0x722   : > { %v23120_v63 = vsel %vm19169_vm15, 4294967295, %v23119_v63  ;;  %v12024_v58 = vpack.c.bf16 %v6395_v29, %v18470_v16  ;;  %10662 = vmatmul.mubr.msk.f32.vlgmr.msra.gmra.mrb[44].mxu1 %vm23123_vm13, %v13173_v30  ;;  %v12021_v50 = vpack.c.bf16 %v6396_v53, %v18559_v43  ;;  %vm19183_vm7 = vmpackc.low %vm21549_vm3, %vm23124_vm10  ;;  %v23125_v42 = vmov 0 }
 0x723   : > { %23121 = vst [vmem:[#allocation48_spill] sm:$0xff] %v23120_v63  ;;  %v23126_v42 = vsel %vm19183_vm7, 4294967295, %v23125_v42  ;;  %vm23128_vm9 = vmmov %vm23118_vm14  ;;  %v23129_v16 = vmov 0  ;;  %vm21455_vm1 = vcmp.lt.s32.totalorder %v23109_v40, 62  ;;  %7574 = vmatprep.mubr.f32.mxu1 %v21567_v15  ;;  %v12033_v45 = vpack.c.bf16 %v18571_v25, %v6101_v20  ;;  %12020 = vmatpush1.bf16.msk.msra.mxu0 %vm19156_vm0, %v12018_v54 }
 0x724   : > { %v6200_v6 = vpop.permute.xlu1 %6199  ;;  %23127 = vst [vmem:[#allocation123_spill] sm:$0xff] %v23126_v42  ;;  %vm19191_vm14 = vmpackc.low %vm23128_vm9, %vm21350_vm4  ;;  %12029 = vmatprep.subr.msk.bf16.mxu1 %vm19169_vm15, %v12021_v50  ;;  %vm23132_vm13 = vcmask 1014784   ;;  %12023 = vmatprep.subr.msk.bf16.mxu0 %vm19094_vm11, %v12021_v50  ;;  %v23133_v54 = vmov 0  ;;  %v23136_v53 = vmov 0 }
 0x725   : > { %v23130_v16 = vsel %vm19191_vm14, 4294967295, %v23129_v16  ;;  %v6201_v61 = vsel %vm23132_vm13, %v6068_v11, %v6200_v6  ;;  %12032 = vmatpush1.bf16.msk.msra.mxu1 %vm19183_vm7, %v12024_v58  ;;  %v6430_v29 = vpop.permute.xlu0 %6429  ;;  %vm19213_vm9 = vmpackc.low %vm23124_vm10, %vm21455_vm1  ;;  %v12036_v11 = vpack.c.bf16 %v18559_v43, %v6100_v47  ;;  %vm23142_vm10 = vcmp.lt.s32.totalorder %v23082_v13, 62 }
 0x726   : > { %23131 = vst [vmem:[#allocation31_spill] sm:$0xff] %v23130_v16  ;;  %12035 = vmatprep.subr.msk.bf16.mxu1 %vm19191_vm14, %v12033_v45  ;;  %v23134_v54 = vsel %vm19213_vm9, 4294967295, %v23133_v54  ;;  %vm19221_vm13 = vmpackc.low %vm21350_vm4, %vm21549_vm3  ;;  %v12039_v50 = vpack.c.bf16 %v6201_v61, %v23139_v17  ;;  %v23140_v45 = vld [vmem:[#allocation18_spill] sm:$0xff]  ;;  %vm23141_vm14 = vcmask 1031168   ;;  %v23143_v43 = vmov 0 }
 0x727   : > { %23135 = vst [vmem:[#allocation30_spill] sm:$0xff] %v23134_v54  ;;  %v23137_v53 = vsel %vm19221_vm13, 4294967295, %v23136_v53  ;;  %12026 = vmatpush1.bf16.msk.msra.mxu0 %vm19103_vm8, %v12024_v58  ;;  %v6432_v16 = vsel %vm23141_vm14, %v6430_v29, %v23140_v45  ;;  %vm19239_vm4 = vmpackc.low %vm21455_vm1, %vm21549_vm3  ;;  %v23146_v58 = vld [vmem:[#allocation122_spill] sm:$0xff]  ;;  %vm23151_vm3 = vcmask 1014784  }
 0x728   : > { %23138 = vst [vmem:[#allocation52_spill] sm:$0xff] %v23137_v53  ;;  %10673 = vmatprep.subr.msk.mxu0 %vm23142_vm10, %v6101_v20  ;;  %v23144_v43 = vsel %vm19239_vm4, 4294967295, %v23143_v43  ;;  %v12042_v17 = vpack.c.bf16 %v6101_v20, %v23146_v58  ;;  %vm23147_vm0 = vmmov %vm23141_vm14  ;;  %v12045_v13 = vpack.c.bf16 %v6432_v16, %v18646_v55  ;;  %vm23148_vm14 = vcmp.lt.s32.totalorder %v23084_v19, 62  ;;  %v23150_v20 = vld [vmem:[#allocation53_spill] sm:$0xff] }
 0x729   : > { %12038 = vmatpush1.bf16.msk.msra.mxu1 %vm19213_vm9, %v12036_v11  ;;  %23145 = vst [vmem:[#allocation35_spill] sm:$0xff] %v23144_v43  ;;  %v6431_v51 = vsel %vm23147_vm0, %v13061_v56, %v6430_v29  ;;  %vm23149_vm10 = vcmask 588800   ;;  %v6267_v55 = vsel %vm23151_vm3, %v6200_v6, %v23150_v20  ;;  %vm23152_vm0 = vcmp.lt.s32.totalorder %v23107_v23, 62 }
 0x72a   : > { %12041 = vmatprep.subr.msk.bf16.mxu1 %vm19221_vm13, %v12039_v50  ;;  %v12048_v11 = vpack.c.bf16 %v6431_v51, %v18571_v25 }
 0x72b   : > { %10674 = vmatpush1.msk.msra.mxu0 %vm23148_vm14, %v6100_v47  ;;  %vm23153_vm14 = vmmov %vm23149_vm10 }
 0x72c   : > { %10675 = vmatmul.mubr.msk.f32.vlgmr.msra.gmra.mrb[46].mxu0 %vm23149_vm10, %v13173_v30  ;;  %vm23161_vm10 = vcmask 15360  }
 0x72d   : > { %12044 = vmatpush1.bf16.msk.msra.mxu1 %vm19239_vm4, %v12042_v17  ;;  %8310 = vmatprep.mubr.f32.mxu0 %v21567_v15  ;;  %vm23162_vm3 = vmmov %vm23161_vm10  ;;  %vm23215_vm4 = vnez %v22687_v44 }
 0x72e   : > { %12047 = vmatprep.subr.msk.bf16.mxu1 %vm19169_vm15, %v12045_v13 }
 0x731   : > { %12050 = vmatpush1.bf16.msk.msra.mxu1 %vm19183_vm7, %v12048_v11 }
 0x732   : > { %10686 = vmatprep.subr.msk.mxu1 %vm23152_vm0, %v6267_v55  ;;  %vm23163_vm0 = vmmov %vm23162_vm3 }
 0x735   : > { %10687 = vmatpush1.msk.msra.mxu1 %vm21455_vm1, %v6201_v61  ;;  %v19265_v56 = vpop.permute.xlu1 %6439 }
 0x736   : > { %10688 = vmatmul.mubr.msk.f32.vlgmr.msra.gmra.mrb[46].mxu1 %vm23153_vm14, %v13173_v30  ;;  %vm23165_vm14 = vmmov %vm23163_vm0 }
 0x737   : > { %8381 = vmatprep.mubr.f32.mxu1 %v21567_v15 }
 0x73c   : > { %v6511_v13 = vpop.f32.mrb[32].mxu0 }
 0x73d   : > { %v19268_v25 = vadd.f32 %v6511_v13, %v19265_v56  ;;  %v6513_v47 = vpop.f32.mrb[33].mxu0 }
 0x73e   : > { %v19271_v51 = vadd.f32 %v6513_v47, %v19265_v56 }
 0x73f   : > { %v21356_v6 = vmax.f32 %v19268_v25, 0.0 }
 0x740   : > { %v21357_v16 = vmax.f32 %v19271_v51, 0.0 }
 0x741   : > { %7645 = vrot.lane.b32.xlu0 %v21356_v6, %s13281_s14 }
 0x742   : > { %7647 = vrot.lane.b32.xlu1 %v21357_v16, %s13281_s14 }
 0x744   : > { %v6582_v30 = vpop.f32.mrb[32].mxu1 }
 0x745   : > { %v19282_v61 = vadd.f32 %v6582_v30, %v19265_v56  ;;  %v6584_v29 = vpop.f32.mrb[33].mxu1 }
 0x746   : > { %v19285_v50 = vadd.f32 %v6584_v29, %v19265_v56 }
 0x747   : > { %v21354_v58 = vmax.f32 %v19282_v61, 0.0 }
 0x748   : > { %v21355_v17 = vmax.f32 %v19285_v50, 0.0 }
 0x749   : > { %7649 = vrot.lane.b32.xlu0 %v21354_v58, %s13281_s14 }
 0x74a   : > { %7651 = vrot.lane.b32.xlu1 %v21355_v17, %s13281_s14 }
 0x754   : > { %v6653_v11 = vpop.f32.mrb[34].mxu0 }
 0x755   : > { %v19296_v55 = vadd.f32 %v6653_v11, %v19265_v56  ;;  %v6655_v13 = vpop.f32.mrb[35].mxu0 }
 0x756   : > { %v19299_v47 = vadd.f32 %v6655_v13, %v19265_v56 }
 0x757   : > { %v21358_v30 = vmax.f32 %v19296_v55, 0.0 }
 0x758   : > { %v21359_v29 = vmax.f32 %v19299_v47, 0.0 }
 0x759   : > { %7653 = vrot.lane.b32.xlu0 %v21358_v30, %s13281_s14 }
 0x75a   : > { %7655 = vrot.lane.b32.xlu1 %v21359_v29, %s13281_s14 }
 0x761   : > { %v6724_v58 = vpop.f32.mrb[34].mxu1 }
 0x762   : > { %v19310_v11 = vadd.f32 %v6724_v58, %v19265_v56  ;;  %v6726_v17 = vpop.f32.mrb[35].mxu1 }
 0x763   : > { %v19313_v13 = vadd.f32 %v6726_v17, %v19265_v56 }
 0x764   : > { %v21362_v6 = vmax.f32 %v19310_v11, 0.0 }
 0x765   : > { %v21363_v16 = vmax.f32 %v19313_v13, 0.0 }
 0x766   : > { %7657 = vrot.lane.b32.xlu0 %v21362_v6, %s13281_s14 }
 0x767   : > { %7659 = vrot.lane.b32.xlu1 %v21363_v16, %s13281_s14 }
 0x76d   : > { %v6795_v30 = vpop.f32.mrb[36].mxu0 }
 0x76e   : > { %v19324_v58 = vadd.f32 %v6795_v30, %v19265_v56  ;;  %v6797_v29 = vpop.f32.mrb[37].mxu0 }
 0x76f   : > { %v19327_v17 = vadd.f32 %v6797_v29, %v19265_v56 }
 0x770   : > { %v21366_v40 = vmax.f32 %v19324_v58, 0.0 }
 0x771   : > { %v21367_v23 = vmax.f32 %v19327_v17, 0.0 }
 0x772   : > { %7661 = vrot.lane.b32.xlu0 %v21366_v40, %s13281_s14 }
 0x773   : > { %7663 = vrot.lane.b32.xlu1 %v21367_v23, %s13281_s14 }
 0x777   : > { %v6866_v6 = vpop.f32.mrb[36].mxu1 }
 0x778   : > { %v19338_v30 = vadd.f32 %v6866_v6, %v19265_v56  ;;  %v6868_v16 = vpop.f32.mrb[37].mxu1 }
 0x779   : > { %v19341_v29 = vadd.f32 %v6868_v16, %v19265_v56 }
 0x77a   : > { %23154 = vst [vmem:[#allocation34_spill] sm:$0xff] %v19338_v30  ;;  %v21370_v43 = vmax.f32 %v19338_v30, 0.0 }
 0x77b   : > { %v21371_v53 = vmax.f32 %v19341_v29, 0.0 }
 0x77c   : > { %7665 = vrot.lane.b32.xlu0 %v21370_v43, %s13281_s14 }
 0x77d   : > { %7667 = vrot.lane.b32.xlu1 %v21371_v53, %s13281_s14 }
 0x781   : > { %v6937_v40 = vpop.f32.mrb[38].mxu0 }
 0x782   : > { %v19352_v6 = vadd.f32 %v6937_v40, %v19265_v56  ;;  %v6939_v23 = vpop.f32.mrb[39].mxu0 }
 0x783   : > { %v19355_v16 = vadd.f32 %v6939_v23, %v19265_v56 }
 0x784   : > { %23155 = vst [vmem:[#allocation38_spill] sm:$0xff] %v19352_v6  ;;  %v21376_v54 = vmax.f32 %v19352_v6, 0.0 }
 0x785   : > { %23156 = vst [vmem:[#allocation36_spill] sm:$0xff] %v19355_v16  ;;  %v21377_v19 = vmax.f32 %v19355_v16, 0.0 }
 0x786   : > { %7669 = vrot.lane.b32.xlu0 %v21376_v54, %s13281_s14 }
 0x787   : > { %7671 = vrot.lane.b32.xlu1 %v21377_v19, %s13281_s14 }
 0x78a   : > { %v7008_v43 = vpop.f32.mrb[38].mxu1 }
 0x78b   : > { %v19366_v40 = vadd.f32 %v7008_v43, %v19265_v56  ;;  %v7010_v53 = vpop.f32.mrb[39].mxu1 }
 0x78c   : > { %v19369_v23 = vadd.f32 %v7010_v53, %v19265_v56 }
 0x78d   : > { %23157 = vst [vmem:[#allocation41_spill] sm:$0xff] %v19366_v40  ;;  %v21385_v42 = vmax.f32 %v19366_v40, 0.0 }
 0x78e   : > { %23158 = vst [vmem:[#allocation42_spill] sm:$0xff] %v19369_v23  ;;  %v21386_v63 = vmax.f32 %v19369_v23, 0.0 }
 0x78f   : > { %7673 = vrot.lane.b32.xlu0 %v21385_v42, %s13281_s14 }
 0x790   : > { %7675 = vrot.lane.b32.xlu1 %v21386_v63, %s13281_s14 }
 0x7b2   : > { %v7079_v54 = vpop.f32.mrb[40].mxu0 }
 0x7b3   : > { %v19380_v43 = vadd.f32 %v7079_v54, %v19265_v56  ;;  %v7081_v19 = vpop.f32.mrb[41].mxu0  ;;  %v7646_v2 = vpop.permute.xlu0 %7645 }
 0x7b4   : > { %v19383_v53 = vadd.f32 %v7081_v19, %v19265_v56  ;;  %v7648_v22 = vpop.permute.xlu1 %7647  ;;  %v19394_v54 = vsel %vm23161_vm10, 0.0, %v7646_v2  ;;  %vm23167_vm10 = vmmov %vm23163_vm0 }
 0x7b5   : > { %23159 = vst [vmem:[#allocation43_spill] sm:$0xff] %v19380_v43  ;;  %v21389_v34 = vmax.f32 %v19380_v43, 0.0 }
 0x7b6   : > { %23160 = vst [vmem:[#allocation46_spill] sm:$0xff] %v19383_v53  ;;  %v21391_v10 = vmax.f32 %v19383_v53, 0.0 }
 0x7b7   : > { %7677 = vrot.lane.b32.xlu0 %v21389_v34, %s13281_s14 }
 0x7b8   : > { %7679 = vrot.lane.b32.xlu1 %v21391_v10, %s13281_s14  ;;  %v19408_v10 = vsel %vm23165_vm14, %v7646_v2, %v7648_v22  ;;  %vm23170_vm14 = vmmov %vm23163_vm0 }
 0x7bb   : > { %v7650_v42 = vpop.permute.xlu0 %7649 }
 0x7bc   : > { %7807 = vrot.lane.b32.xlu1 %v19394_v54, %s13282_s22  ;;  %v7652_v19 = vpop.permute.xlu1 %7651  ;;  %v19402_v28 = vsel %vm23163_vm0, %v7648_v22, %v7650_v42 }
 0x7bd   : > { %v19399_v63 = vsel %vm23162_vm3, %v7650_v42, %v7652_v19  ;;  %vm23168_vm3 = vmmov %vm23163_vm0 }
 0x7be   : > { %v13068_v62 = vpack.i.bf16 %v19399_v63, %v19402_v28 }
 0x7bf   : > { %v7150_v52 = vpop.f32.mrb[40].mxu1 }
 0x7c0   : > { %v19405_v34 = vadd.f32 %v7150_v52, %v19265_v56  ;;  %v7152_v9 = vpop.f32.mrb[41].mxu1  ;;  %7811 = vrot.lane.b32.xlu1 %v19402_v28, %s13282_s22  ;;  %v13063_v52 = vpack.i.bf16 %v19408_v10, %v19394_v54 }
 0x7c1   : > { %v19416_v57 = vadd.f32 %v7152_v9, %v19265_v56 }
 0x7c2   : > { %23164 = vst [vmem:[#allocation97_spill] sm:$0xff] %v19405_v34  ;;  %v21398_v18 = vmax.f32 %v19405_v34, 0.0 }
 0x7c3   : > { %23166 = vst [vmem:[#allocation120_spill] sm:$0xff] %v19416_v57  ;;  %v21400_v22 = vmax.f32 %v19416_v57, 0.0 }
 0x7c4   : > { %7681 = vrot.lane.b32.xlu0 %v21398_v18, %s13281_s14  ;;  %13069 = vrot.lane.b32.xlu1 %v13068_v62, %s13274_s12 }
 0x7c8   : > { %13064 = vrot.lane.b32.xlu0 %v13063_v52, %s13274_s12  ;;  %7683 = vrot.lane.b32.xlu1 %v21400_v22, %s13281_s14 }
 0x7cb   : > { %v7654_v9 = vpop.permute.xlu0 %7653 }
 0x7cc   : > { %7809 = vrot.lane.b32.xlu0 %v19408_v10, %s13282_s22  ;;  %v7656_v2 = vpop.permute.xlu1 %7655  ;;  %v19432_v42 = vsel %vm23167_vm10, %v7652_v19, %v7654_v9  ;;  %vm23174_vm10 = vmmov %vm23163_vm0 }
 0x7cd   : > { %v19435_v18 = vsel %vm23168_vm3, %v7654_v9, %v7656_v2  ;;  %vm23175_vm3 = vmmov %vm23163_vm0 }
 0x7ce   : > { %v7221_v62 = vpop.f32.mrb[42].mxu0  ;;  %v13073_v34 = vpack.i.bf16 %v19435_v18, %v19432_v42 }
 0x7cf   : > { %v7223_v52 = vpop.f32.mrb[43].mxu0  ;;  %v19443_v22 = vadd.f32 %v7221_v62, %v19265_v56 }
 0x7d0   : > { %7813 = vrot.lane.b32.xlu0 %v19399_v63, %s13282_s22  ;;  %13074 = vrot.lane.b32.xlu1 %v13073_v34, %s13274_s12 }
 0x7d1   : > { %23169 = vst [vmem:[#allocation47_spill] sm:$0xff] %v19443_v22  ;;  %v21406_v19 = vmax.f32 %v19443_v22, 0.0 }
 0x7d4   : > { %7815 = vrot.lane.b32.xlu0 %v19432_v42, %s13282_s22 }
 0x7d8   : > { %7685 = vrot.lane.b32.xlu0 %v21406_v19, %s13281_s14  ;;  %v7658_v9 = vpop.permute.xlu0 %7657 }
 0x7d9   : > { %v7660_v57 = vpop.permute.xlu1 %7659  ;;  %v19452_v8 = vsel %vm23163_vm0, %v7656_v2, %v7658_v9  ;;  %v19467_v2 = vadd.f32 %v7223_v52, %v19265_v56 }
 0x7da   : > { %v19455_v43 = vsel %vm23170_vm14, %v7658_v9, %v7660_v57  ;;  %7819 = vrot.lane.b32.xlu1 %v19452_v8, %s13282_s22  ;;  %v7292_v34 = vpop.f32.mrb[42].mxu1  ;;  %vm23177_vm14 = vmmov %vm23163_vm0 }
 0x7db   : > { %v19460_v62 = vadd.f32 %v7292_v34, %v19265_v56  ;;  %v7294_v53 = vpop.f32.mrb[43].mxu1  ;;  %v13078_v19 = vpack.i.bf16 %v19455_v43, %v19452_v8  ;;  %23172 = vst [vmem:[#allocation99_spill] sm:$0xff] %v19467_v2  ;;  %v21411_v34 = vmax.f32 %v19467_v2, 0.0 }
 0x7dc   : > { %7817 = vrot.lane.b32.xlu0 %v19435_v18, %s13282_s22  ;;  %v19476_v22 = vadd.f32 %v7294_v53, %v19265_v56 }
 0x7dd   : > { %23171 = vst [vmem:[#allocation121_spill] sm:$0xff] %v19460_v62  ;;  %v21410_v9 = vmax.f32 %v19460_v62, 0.0 }
 0x7de   : > { %13079 = vrot.lane.b32.xlu1 %v13078_v19, %s13274_s12  ;;  %23173 = vst [vmem:[#allocation51_spill] sm:$0xff] %v19476_v22  ;;  %v21415_v62 = vmax.f32 %v19476_v22, 0.0 }
 0x7e0   : > { %7689 = vrot.lane.b32.xlu0 %v21410_v9, %s13281_s14 }
 0x7e2   : > { %7687 = vrot.lane.b32.xlu1 %v21411_v34, %s13281_s14 }
 0x7e4   : > { %v7662_v31 = vpop.permute.xlu0 %7661  ;;  %7821 = vrot.lane.b32.xlu0 %v19455_v43, %s13282_s22 }
 0x7e5   : > { %v7664_v52 = vpop.permute.xlu1 %7663  ;;  %v19484_v19 = vsel %vm23174_vm10, %v7660_v57, %v7662_v31  ;;  %vm23181_vm10 = vmmov %vm23163_vm0 }
 0x7e6   : > { %v19488_v9 = vsel %vm23175_vm3, %v7662_v31, %v7664_v52  ;;  %7691 = vrot.lane.b32.xlu1 %v21415_v62, %s13281_s14  ;;  %vm23183_vm3 = vmmov %vm23163_vm0 }
 0x7e7   : > { %v13083_v53 = vpack.i.bf16 %v19488_v9, %v19484_v19 }
 0x7e8   : > { %v7363_v34 = vpop.f32.mrb[44].mxu0  ;;  %7823 = vrot.lane.b32.xlu0 %v19484_v19, %s13282_s22 }
 0x7e9   : > { %v19498_v2 = vadd.f32 %v7363_v34, %v19265_v56  ;;  %v7365_v57 = vpop.f32.mrb[45].mxu0 }
 0x7ea   : > { %13084 = vrot.lane.b32.xlu1 %v13083_v53, %s13274_s12  ;;  %v19516_v53 = vadd.f32 %v7365_v57, %v19265_v56 }
 0x7eb   : > { %23176 = vst [vmem:[#allocation98_spill] sm:$0xff] %v19498_v2  ;;  %v21419_v26 = vmax.f32 %v19498_v2, 0.0 }
 0x7ec   : > { %23178 = vst [vmem:[#allocation122_spill] sm:$0xff] %v19516_v53 }
 0x7ed   : > { %7693 = vrot.lane.b32.xlu0 %v21419_v26, %s13281_s14 }
 0x7ee   : > { %v7666_v31 = vpop.permute.xlu0 %7665 }
 0x7ef   : > { %v7668_v62 = vpop.permute.xlu1 %7667  ;;  %v19506_v22 = vsel %vm23163_vm0, %v7664_v52, %v7666_v31  ;;  %v21425_v52 = vmax.f32 %v19516_v53, 0.0 }
 0x7f0   : > { %v19509_v7 = vsel %vm23177_vm14, %v7666_v31, %v7668_v62  ;;  %7827 = vrot.lane.b32.xlu1 %v19506_v22, %s13282_s22  ;;  %vm23187_vm14 = vmmov %vm23163_vm0 }
 0x7f1   : > { %v13088_v34 = vpack.i.bf16 %v19509_v7, %v19506_v22  ;;  %7825 = vrot.lane.b32.xlu0 %v19488_v9, %s13282_s22 }
 0x7f4   : > { %13089 = vrot.lane.b32.xlu1 %v13088_v34, %s13274_s12 }
 0x7f5   : > { %v7434_v26 = vpop.f32.mrb[44].mxu1  ;;  %7829 = vrot.lane.b32.xlu0 %v19509_v7, %s13282_s22 }
 0x7f6   : > { %v7436_v31 = vpop.f32.mrb[45].mxu1  ;;  %v19525_v40 = vadd.f32 %v7434_v26, %v19265_v56 }
 0x7f7   : > { %v19528_v23 = vadd.f32 %v7436_v31, %v19265_v56 }
 0x7f8   : > { %v7670_v2 = vpop.permute.xlu0 %7669  ;;  %23179 = vst [vmem:[#allocation135_spill] sm:$0xff] %v19525_v40  ;;  %7695 = vrot.lane.b32.xlu1 %v21425_v52, %s13281_s14  ;;  %v21431_v26 = vmax.f32 %v19525_v40, 0.0 }
 0x7f9   : > { %23180 = vst [vmem:[#allocation136_spill] sm:$0xff] %v19528_v23  ;;  %v7672_v57 = vpop.permute.xlu1 %7671  ;;  %v19534_v34 = vsel %vm23181_vm10, %v7668_v62, %v7670_v2  ;;  %v21430_v12 = vmax.f32 %v19528_v23, 0.0  ;;  %vm23191_vm10 = vmmov %vm23163_vm0 }
 0x7fa   : > { %23182 = vst [vmem:[#allocation137_spill] sm:$0xff] %v19534_v34  ;;  %7831 = vrot.lane.b32.xlu0 %v19534_v34, %s13282_s22  ;;  %v19540_v6 = vsel %vm23183_vm3, %v7670_v2, %v7672_v57  ;;  %vm23193_vm3 = vmmov %vm23163_vm0 }
 0x7fb   : > { %23184 = vst [vmem:[#allocation138_spill] sm:$0xff] %v19540_v6  ;;  %v13093_v62 = vpack.i.bf16 %v19540_v6, %v19534_v34 }
 0x7fc   : > { %7699 = vrot.lane.b32.xlu1 %v21430_v12, %s13281_s14 }
 0x7fe   : > { %7697 = vrot.lane.b32.xlu0 %v21431_v26, %s13281_s14 }
 0x7ff   : > { %v7505_v52 = vpop.f32.mrb[46].mxu0 }
 0x800   : > { %13094 = vrot.lane.b32.xlu1 %v13093_v62, %s13274_s12  ;;  %v19556_v53 = vadd.f32 %v7505_v52, %v19265_v56  ;;  %v7507_v23 = vpop.f32.mrb[47].mxu0 }
 0x801   : > { %v7674_v31 = vpop.permute.xlu0 %7673 }
 0x802   : > { %v19553_v2 = vsel %vm23163_vm0, %v7672_v57, %v7674_v31  ;;  %23186 = vst [vmem:[#allocation140_spill] sm:$0xff] %v19556_v53  ;;  %v7676_v46 = vpop.permute.xlu1 %7675  ;;  %v21433_v26 = vmax.f32 %v19556_v53, 0.0  ;;  %v19569_v57 = vadd.f32 %v7507_v23, %v19265_v56 }
 0x803   : > { %23185 = vst [vmem:[#allocation139_spill] sm:$0xff] %v19553_v2  ;;  %v19559_v12 = vsel %vm23187_vm14, %v7674_v31, %v7676_v46  ;;  %vm23197_vm14 = vcmask 1031168  }
 0x804   : > { %23188 = vst [vmem:[#allocation141_spill] sm:$0xff] %v19559_v12  ;;  %v13098_v40 = vpack.i.bf16 %v19559_v12, %v19553_v2  ;;  %7701 = vrot.lane.b32.xlu0 %v21433_v26, %s13281_s14  ;;  %23189 = vst [vmem:[#allocation142_spill] sm:$0xff] %v19569_v57  ;;  %v21438_v31 = vmax.f32 %v19569_v57, 0.0 }
 0x806   : > { %13099 = vrot.lane.b32.xlu1 %v13098_v40, %s13274_s12 }
 0x808   : > { %7833 = vrot.lane.b32.xlu0 %v19540_v6, %s13282_s22 }
 0x809   : > { %v7576_v52 = vpop.f32.mrb[46].mxu1 }
 0x80a   : > { %7835 = vrot.lane.b32.xlu1 %v19553_v2, %s13282_s22  ;;  %v7578_v62 = vpop.f32.mrb[47].mxu1  ;;  %v19582_v40 = vadd.f32 %v7576_v52, %v19265_v56 }
 0x80b   : > { %v19593_v57 = vadd.f32 %v7578_v62, %v19265_v56 }
 0x80c   : > { %7837 = vrot.lane.b32.xlu0 %v19559_v12, %s13282_s22  ;;  %23190 = vst [vmem:[#allocation143_spill] sm:$0xff] %v19582_v40  ;;  %v21444_v52 = vmax.f32 %v19582_v40, 0.0 }
 0x80d   : > { %23195 = vst [vmem:[#allocation146_spill] sm:$0xff] %v19593_v57 }
 0x80e   : > { %7703 = vrot.lane.b32.xlu1 %v21438_v31, %s13281_s14 }
 0x829   : > { %v7678_v23 = vpop.permute.xlu0 %7677 }
 0x82a   : > { %v7680_v26 = vpop.permute.xlu1 %7679  ;;  %v19585_v53 = vsel %vm23191_vm10, %v7676_v46, %v7678_v23  ;;  %v21449_v46 = vmax.f32 %v19593_v57, 0.0  ;;  %vm23198_vm10 = vmmov %vm23163_vm0 }
 0x82b   : > { %23192 = vst [vmem:[#allocation144_spill] sm:$0xff] %v19585_v53  ;;  %v19588_v37 = vsel %vm23193_vm3, %v7678_v23, %v7680_v26  ;;  %7839 = vrot.lane.b32.xlu0 %v19585_v53, %s13282_s22  ;;  %vm23199_vm3 = vmmov %vm23197_vm14 }
 0x82c   : > { %23194 = vst [vmem:[#allocation145_spill] sm:$0xff] %v19588_v37  ;;  %v13103_v31 = vpack.i.bf16 %v19588_v37, %v19585_v53 }
 0x82e   : > { %v7808_v12 = vpop.permute.xlu1 %7807  ;;  %13104 = vrot.lane.b32.xlu1 %v13103_v31, %s13274_s12 }
 0x82f   : > { %7705 = vrot.lane.b32.xlu0 %v21444_v52, %s13281_s14 }
 0x832   : > { %v7812_v23 = vpop.permute.xlu1 %7811  ;;  %7707 = vrot.lane.b32.xlu1 %v21449_v46, %s13281_s14 }
 0x833   : > { %7841 = vrot.lane.b32.xlu0 %v19588_v37, %s13282_s22 }
 0x836   : > { %v7682_v56 = vpop.permute.xlu0 %7681  ;;  %v13070_v62 = vpop.permute.xlu1 %13069 }
 0x837   : > { %v19609_v53 = vsel %vm23163_vm0, %v7680_v26, %v7682_v56  ;;  %v13072_v31 = vunpack.i.h.bf16 %v13070_v62  ;;  %v13071_v16 = vunpack.i.l.bf16 %v13070_v62  ;;  %vm23200_vm0 = vmmov %vm23199_vm3 }
 0x838   : > { %23196 = vst [vmem:[#allocation147_spill] sm:$0xff] %v19609_v53  ;;  %7843 = vrot.lane.b32.xlu0 %v19609_v53, %s13282_s22  ;;  %vm23201_vm1 = vmmov %vm23200_vm0 }
 0x839   : > { %v8169_v52 = vsel %vm23197_vm14, %v13071_v16, %v13072_v31  ;;  %vm23202_vm14 = vcmask 1014784  }
 0x83a   : > { %v13065_v40 = vpop.permute.xlu0 %13064  ;;  %v12068_v2 = vpack.c.bf16 %v8169_v52, %v19402_v28  ;;  %v7684_v6 = vpop.permute.xlu1 %7683 }
 0x83b   : > { %v13067_v57 = vunpack.i.h.bf16 %v13065_v40  ;;  %v13066_v46 = vunpack.i.l.bf16 %v13065_v40  ;;  %v19616_v37 = vsel %vm23198_vm10, %v7682_v56, %v7684_v6  ;;  %vm23203_vm10 = vmmov %vm23202_vm14 }
 0x83c   : > { %v13108_v34 = vpack.i.bf16 %v19616_v37, %v19609_v53  ;;  %12076 = vmatprep.subr.msk.bf16.mxu1 %vm17883_vm5, %v12068_v2 }
 0x83d   : > { %v8168_v5 = vsel %vm23199_vm3, %v13067_v57, %v13071_v16  ;;  %v8166_v26 = vsel %vm23200_vm0, %v23140_v45, %v13066_v46  ;;  %v8167_v62 = vsel %vm23201_vm1, %v13066_v46, %v13067_v57  ;;  %v7871_v57 = vsel %vm23203_vm10, %v23150_v20, %v7808_v12  ;;  %vm23204_vm1 = vmmov %vm23203_vm10 }
 0x83e   : > { %v12071_v52 = vpack.c.bf16 %v8168_v5, %v19408_v10  ;;  %v7810_v40 = vpop.permute.xlu0 %7809  ;;  %v12051_v30 = vpack.c.bf16 %v8167_v62, %v19394_v54  ;;  %v12054_v56 = vpack.c.bf16 %v8166_v26, %v21567_v15  ;;  %13109 = vrot.lane.b32.xlu1 %v13108_v34, %s13274_s12  ;;  %v23205_v26 = vld [vmem:[#allocation54_spill] sm:$0xff]  ;;  %v12059_v34 = vpack.c.bf16 %v19394_v54, %v7871_v57  ;;  %vm23207_vm0 = vmmov %vm23204_vm1 }
 0x83f   : > { %v7872_v16 = vsel %vm23202_vm14, %v7808_v12, %v7810_v40  ;;  %v7873_v45 = vsel %vm23204_vm1, %v7810_v40, %v7812_v23  ;;  %vm23206_vm3 = vnez %v23205_v26  ;;  %vm23210_vm14 = vnez %v23209_v35 }
 0x840   : > { %v12056_v46 = vpack.c.bf16 %v19408_v10, %v7872_v16  ;;  %12053 = vmatprep.subr.msk.bf16.mxu0 %vm17836_vm6, %v12051_v30  ;;  %12079 = vmatpush1.bf16.msk.msra.mxu1 %vm17907_vm2, %v12071_v52  ;;  %v23208_v10 = vmax.f32 %v19271_v51, 0.0  ;;  %vm23211_vm10 = vnez %v22673_v60  ;;  %vm23212_vm1 = vnez %v22683_v24 }
 0x841   : > { %12055 = vmatpush1.bf16.msra.mxu0 %v12054_v56  ;;  %v12083_v56 = vpack.c.bf16 %v19402_v28, %v7873_v45  ;;  %v23213_v54 = vmax.f32 %v19268_v25, 0.0  ;;  %v23216_v35 = vmax.f32 %v19285_v50, 0.0  ;;  %v23217_v26 = vmax.f32 %v19282_v61, 0.0 }
 0x842   : > { %v7814_v5 = vpop.permute.xlu0 %7813  ;;  %12058 = vmatprep.subr.msk.bf16.mxu0 %vm23206_vm3, %v12056_v46  ;;  %v13075_v12 = vpop.permute.xlu1 %13074  ;;  %7845 = vrot.lane.b32.xlu1 %v19616_v37, %s13282_s22  ;;  %v12062_v30 = vpack.c.bf16 %v7873_v45, %v23208_v10  ;;  %vm23214_vm3 = vcmask 1031168  }
 0x843   : > { %v7874_v62 = vsel %vm23207_vm0, %v7812_v23, %v7814_v5  ;;  %v13077_v20 = vunpack.i.h.bf16 %v13075_v12  ;;  %v13076_v53 = vunpack.i.l.bf16 %v13075_v12  ;;  %v12065_v51 = vpack.c.bf16 %v7872_v16, %v23213_v54  ;;  %v23246_v54 = vld [vmem:[#allocation100_spill] sm:$0xff] }
 0x844   : > { %v12080_v40 = vpack.c.bf16 %v19399_v63, %v7874_v62  ;;  %v12089_v60 = vpack.c.bf16 %v7874_v62, %v23217_v26 }
 0x845   : > { %12061 = vmatpush1.bf16.msk.msra.mxu0 %vm23210_vm14, %v12059_v34  ;;  %v8171_v23 = vsel %vm23214_vm3, %v13076_v53, %v13077_v20  ;;  %vm23218_vm14 = vnez %v22679_v3 }
 0x846   : > { %v7816_v46 = vpop.permute.xlu0 %7815  ;;  %12064 = vmatprep.subr.msk.bf16.mxu0 %vm23211_vm10, %v12062_v30  ;;  %12082 = vmatprep.subr.msk.bf16.mxu1 %vm23212_vm1, %v12080_v40  ;;  %vm23219_vm10 = vmmov %vm23214_vm3  ;;  %v12092_v25 = vpack.c.bf16 %v8171_v23, %v19432_v42  ;;  %vm23220_vm1 = vnez %v22689_v27  ;;  %vm23222_vm3 = vnez %v22692_v33  ;;  %v23224_v27 = vld [vmem:[#allocation25_spill] sm:$0xff]  ;;  %v23243_v40 = vmax.f32 %v19299_v47, 0.0 }
 0x847   : > { %v7875_v57 = vsel %vm23207_vm0, %v7814_v5, %v7816_v46  ;;  %12085 = vmatpush1.bf16.msk.msra.mxu1 %vm23215_vm4, %v12083_v56  ;;  %v8170_v24 = vsel %vm23219_vm10, %v13072_v31, %v13076_v53  ;;  %vm23221_vm4 = vcmask 15360   ;;  %vm23225_vm0 = vcmp.lt.s32.totalorder %v23224_v27, 62  ;;  %v23239_v5 = vld [vmem:[#allocation57_spill] sm:$0xff] }
 0x848   : > { %v12086_v28 = vpack.c.bf16 %v7875_v57, %v23216_v35  ;;  %v12095_v3 = vpack.c.bf16 %v8170_v24, %v19399_v63  ;;  %v12107_v10 = vpack.c.bf16 %v19432_v42, %v7875_v57  ;;  %v23251_v23 = vmax.f32 %v19296_v55, 0.0  ;;  %v23253_v24 = vld [vmem:[#allocation59_spill] sm:$0xff] }
 0x849   : > { %12067 = vmatpush1.bf16.msk.msra.mxu0 %vm23218_vm14, %v12065_v51  ;;  %vm23226_vm14 = vcmask 1014784   ;;  %v23249_v51 = vld [vmem:[#allocation124_spill] sm:$0xff]  ;;  %v23261_v27 = vmax.f32 %v19310_v11, 0.0 }
 0x84a   : > { %v7686_v16 = vpop.permute.xlu0 %7685  ;;  %12070 = vmatprep.subr.msk.bf16.mxu0 %vm17836_vm6, %v12068_v2  ;;  %12088 = vmatprep.subr.msk.bf16.mxu1 %vm23220_vm1, %v12086_v28  ;;  %vm23223_vm6 = vnez %v22685_v39  ;;  %v23228_v39 = vld [vmem:[#allocation26_spill] sm:$0xff]  ;;  %vm23230_vm1 = vnez %v22697_v36  ;;  %v23266_v36 = vld [vmem:[#allocation63_spill] sm:$0xff] }
 0x84b   : > { %v19674_v44 = vsel %vm23221_vm4, %v7684_v6, %v7686_v16  ;;  %12091 = vmatpush1.bf16.msk.msra.mxu1 %vm23222_vm3, %v12089_v60  ;;  %vm23229_vm10 = vcmp.lt.s32.totalorder %v23228_v39, 62  ;;  %vm23233_vm4 = vnez %v23232_v32 }
 0x84c   : > { %7847 = vrot.lane.b32.xlu0 %v19674_v44, %s13282_s22  ;;  %12094 = vmatprep.subr.msk.bf16.mxu1 %vm17883_vm5, %v12092_v25  ;;  %v7820_v61 = vpop.permute.xlu1 %7819  ;;  %vm23227_vm5 = vcmp.lt.s32.totalorder %v13816_v41, 62  ;;  %v23234_v41 = vld [vmem:[#allocation29_spill] sm:$0xff] }
 0x84d   : > { %12073 = vmatpush1.bf16.msk.msra.mxu0 %vm23223_vm6, %v12071_v52  ;;  %vm23235_vm3 = vcmp.lt.s32.totalorder %v23234_v41, 62  ;;  %vm23236_vm6 = vmmov %vm23226_vm14 }
 0x84e   : > { %v7818_v1 = vpop.permute.xlu0 %7817  ;;  %10698 = vmatprep.subr.msk.mxu0 %vm23225_vm0, %v7874_v62  ;;  %vm23237_vm0 = vcmask 1031168  }
 0x84f   : > { %v7876_v50 = vsel %vm23226_vm14, %v7816_v46, %v7818_v1  ;;  %12097 = vmatpush1.bf16.msk.msra.mxu1 %vm17907_vm2, %v12095_v3  ;;  %vm23231_vm2 = vcmask 588800   ;;  %v7877_v31 = vsel %vm23236_vm6, %v7818_v1, %v7820_v61  ;;  %vm23238_vm14 = vmmov %vm23237_vm0 }
 0x850   : > { %10711 = vmatprep.subr.msk.mxu1 %vm23227_vm5, %v7876_v50  ;;  %v13080_v33 = vpop.permute.xlu1 %13079  ;;  %v12104_v63 = vpack.c.bf16 %v19435_v18, %v7876_v50  ;;  %vm23240_vm5 = vnez %v23239_v5  ;;  %v12110_v56 = vpack.c.bf16 %v7877_v31, %v23243_v40  ;;  %v12131_v35 = vpack.c.bf16 %v19452_v8, %v7877_v31  ;;  %v23281_v40 = vld [vmem:[#allocation37_spill] sm:$0xff] }
 0x851   : > { %10699 = vmatpush1.msk.msra.mxu0 %vm23229_vm10, %v7873_v45  ;;  %v13082_v6 = vunpack.i.h.bf16 %v13080_v33  ;;  %v13081_v53 = vunpack.i.l.bf16 %v13080_v33  ;;  %vm23241_vm10 = vmmov %vm23231_vm2 }
 0x852   : > { %v7690_v2 = vpop.permute.xlu0 %7689  ;;  %12100 = vmatprep.subr.msk.bf16.mxu0 %vm23230_vm1, %v12092_v25  ;;  %10700 = vmatmul.mubr.msk.f32.vlgmr.msra.gmra.mrb[48].mxu0 %vm23231_vm2, %v19693_v4  ;;  %vm23242_vm2 = vcmask 15360  }
 0x853   : > { %12103 = vmatpush1.bf16.msk.msra.mxu0 %vm23233_vm4, %v12095_v3  ;;  %10712 = vmatpush1.msk.msra.mxu1 %vm23235_vm3, %v7875_v57  ;;  %v8172_v45 = vsel %vm23237_vm0, %v13077_v20, %v13081_v53  ;;  %v8173_v52 = vsel %vm23238_vm14, %v13081_v53, %v13082_v6  ;;  %vm23244_vm3 = vmmov %vm23236_vm6  ;;  %vm23245_vm6 = vnez %v22729_v21  ;;  %vm23247_vm0 = vnez %v23246_v54  ;;  %v23257_v3 = vld [vmem:[#allocation125_spill] sm:$0xff] }
 0x854   : > { %12106 = vmatprep.subr.msk.bf16.mxu0 %vm23240_vm5, %v12104_v63  ;;  %10713 = vmatmul.mubr.msk.f32.vlgmr.msra.gmra.mrb[48].mxu1 %vm23241_vm10, %v19693_v4  ;;  %v12116_v34 = vpack.c.bf16 %v8173_v52, %v19452_v8  ;;  %v12119_v62 = vpack.c.bf16 %v8172_v45, %v19435_v18  ;;  %v7688_v12 = vpop.permute.xlu1 %7687  ;;  %vm23248_vm14 = vnez %v22733_v59  ;;  %vm23250_vm5 = vnez %v23249_v51  ;;  %vm23252_vm10 = vmmov %vm23242_vm2  ;;  %v23271_v52 = vld [vmem:[#allocation33_spill] sm:$0xff] }
 0x855   : > { %8452 = vmatprep.mubr.f32.mxu0 %v21567_v15  ;;  %8523 = vmatprep.mubr.f32.mxu1 %v21567_v15  ;;  %v19721_v20 = vsel %vm23242_vm2, %v7686_v16, %v7688_v12  ;;  %v12113_v57 = vpack.c.bf16 %v7876_v50, %v23251_v23  ;;  %v19744_v28 = vsel %vm23252_vm10, %v7688_v12, %v7690_v2  ;;  %v23256_v8 = vmax.f32 %v19313_v13, 0.0 }
 0x856   : > { %v7822_v30 = vpop.permute.xlu0 %7821  ;;  %v13113_v46 = vpack.i.bf16 %v19721_v20, %v19674_v44  ;;  %7849 = vrot.lane.b32.xlu0 %v19721_v20, %s13282_s22  ;;  %12124 = vmatprep.subr.msk.bf16.mxu1 %vm23245_vm6, %v12116_v34  ;;  %v23286_v54 = vmax.f32 %v19327_v17, 0.0 }
 0x857   : > { %v7878_v18 = vsel %vm23244_vm3, %v7820_v61, %v7822_v30  ;;  %12109 = vmatpush1.bf16.msk.msra.mxu0 %vm23247_vm0, %v12107_v10  ;;  %12127 = vmatpush1.bf16.msk.msra.mxu1 %vm23248_vm14, %v12119_v62  ;;  %vm23254_vm3 = vnez %v23253_v24  ;;  %vm23255_vm0 = vcmask 1014784   ;;  %v23259_v61 = vld [vmem:[#allocation60_spill] sm:$0xff] }
 0x858   : > { %v12128_v42 = vpack.c.bf16 %v19455_v43, %v7878_v18  ;;  %v7692_v47 = vpop.permute.xlu1 %7691  ;;  %13114 = vrot.lane.b32.xlu1 %v13113_v46, %s13274_s12  ;;  %12112 = vmatprep.subr.msk.bf16.mxu0 %vm23250_vm5, %v12110_v56  ;;  %vm23258_vm5 = vnez %v23257_v3  ;;  %vm23260_vm10 = vnez %v23259_v61  ;;  %v12137_v50 = vpack.c.bf16 %v7878_v18, %v23261_v27  ;;  %v23283_v56 = vld [vmem:[#allocation64_spill] sm:$0xff]  ;;  %v23297_v61 = vld [vmem:[#allocation27_spill] sm:$0xff] }
 0x859   : > { %v19747_v26 = vsel %vm23242_vm2, %v7690_v2, %v7692_v47  ;;  %vm23262_vm2 = vnez %v22746_v38 }
 0x85a   : > { %v7824_v60 = vpop.permute.xlu0 %7823  ;;  %12130 = vmatprep.subr.msk.bf16.mxu1 %vm23254_vm3, %v12128_v42  ;;  %v13118_v25 = vpack.i.bf16 %v19747_v26, %v19744_v28  ;;  %7851 = vrot.lane.b32.xlu0 %v19744_v28, %s13282_s22  ;;  %vm23263_vm3 = vcmask 1031168  }
 0x85b   : > { %v7879_v55 = vsel %vm23255_vm0, %v7822_v30, %v7824_v60  ;;  %12115 = vmatpush1.bf16.msk.msra.mxu0 %vm23258_vm5, %v12113_v57  ;;  %12133 = vmatpush1.bf16.msk.msra.mxu1 %vm23260_vm10, %v12131_v35  ;;  %vm23264_vm0 = vmmov %vm23263_vm3  ;;  %vm23265_vm5 = vcmask 15360   ;;  %v23288_v57 = vld [vmem:[#allocation126_spill] sm:$0xff] }
 0x85c   : > { %v12134_v16 = vpack.c.bf16 %v7879_v55, %v23256_v8  ;;  %v13085_v1 = vpop.permute.xlu1 %13084  ;;  %13119 = vrot.lane.b32.xlu1 %v13118_v25, %s13274_s12  ;;  %12118 = vmatprep.subr.msk.bf16.mxu0 %vm23230_vm1, %v12116_v34  ;;  %vm23267_vm1 = vnez %v23266_v36  ;;  %v23290_v35 = vld [vmem:[#allocation102_spill] sm:$0xff] }
 0x85d   : > { %v13087_v33 = vunpack.i.h.bf16 %v13085_v1  ;;  %v13086_v39 = vunpack.i.l.bf16 %v13085_v1 }
 0x85e   : > { %12136 = vmatprep.subr.msk.bf16.mxu1 %vm23262_vm2, %v12134_v16  ;;  %vm23272_vm2 = vcmp.lt.s32.totalorder %v23271_v52, 62  ;;  %v23295_v16 = vld [vmem:[#allocation65_spill] sm:$0xff] }
 0x85f   : > { %v7694_v13 = vpop.permute.xlu0 %7693  ;;  %v8174_v63 = vsel %vm23263_vm3, %v13082_v6, %v13086_v39  ;;  %v8175_v53 = vsel %vm23264_vm0, %v13086_v39, %v13087_v33  ;;  %12121 = vmatpush1.bf16.msk.msra.mxu0 %vm23233_vm4, %v12119_v62  ;;  %12139 = vmatpush1.bf16.msk.msra.mxu1 %vm23267_vm1, %v12137_v50  ;;  %v23268_v6 = vld [vmem:[#allocation32_spill] sm:$0xff]  ;;  %vm23270_vm4 = vcmask 1014784   ;;  %vm23273_vm3 = vcmask 588800  }
 0x860   : > { %v19772_v2 = vsel %vm23265_vm5, %v7692_v47, %v7694_v13  ;;  %v12140_v11 = vpack.c.bf16 %v8175_v53, %v19484_v19  ;;  %v12143_v41 = vpack.c.bf16 %v8174_v63, %v19455_v43  ;;  %7853 = vrot.lane.b32.xlu1 %v19747_v26, %s13282_s22  ;;  %vm23269_vm10 = vcmp.lt.s32.totalorder %v23268_v6, 62  ;;  %vm23276_vm5 = vmmov %vm23270_vm4  ;;  %v23300_v50 = vld [vmem:[#allocation16_spill] sm:$0xff] }
 0x861   : > { %10724 = vmatprep.subr.msk.mxu0 %vm23269_vm10, %v7878_v18  ;;  %7855 = vrot.lane.b32.xlu0 %v19772_v2, %s13282_s22  ;;  %vm23274_vm0 = vnez %v22756_v0  ;;  %v23302_v0 = vld [vmem:[#allocation67_spill] sm:$0xff] }
 0x862   : > { %v7828_v38 = vpop.permute.xlu1 %7827  ;;  %12142 = vmatprep.subr.msk.bf16.mxu1 %vm23245_vm6, %v12140_v11  ;;  %vm23275_vm6 = vcmp.lt.s32.totalorder %v14077_v14, 62  ;;  %v12155_v14 = vpack.c.bf16 %v19484_v19, %v7879_v55 }
 0x863   : > { %v7826_v32 = vpop.permute.xlu0 %7825  ;;  %10725 = vmatpush1.msk.msra.mxu0 %vm23272_vm2, %v7877_v31  ;;  %12145 = vmatpush1.bf16.msk.msra.mxu1 %vm23248_vm14, %v12143_v41  ;;  %v23277_v31 = vld [vmem:[#allocation103_spill] sm:$0xff]  ;;  %vm23279_vm14 = vcmask 1031168   ;;  %vm23282_vm2 = vcmp.lt.s32.totalorder %v23281_v40, 62 }
 0x864   : > { %v7880_v45 = vsel %vm23270_vm4, %v7824_v60, %v7826_v32  ;;  %10726 = vmatmul.mubr.msk.f32.vlgmr.msra.gmra.mrb[50].mxu0 %vm23273_vm3, %v19693_v4  ;;  %12148 = vmatprep.subr.msk.bf16.mxu0 %vm23274_vm0, %v12140_v11  ;;  %v7881_v21 = vsel %vm23276_vm5, %v7826_v32, %v7828_v38  ;;  %vm23278_vm1 = vnez %v23277_v31  ;;  %vm23280_vm10 = vmmov %vm23279_vm14  ;;  %vm23284_vm3 = vnez %v23283_v56 }
 0x865   : > { %v12152_v43 = vpack.c.bf16 %v19488_v9, %v7880_v45  ;;  %10737 = vmatprep.subr.msk.mxu1 %vm23275_vm6, %v7880_v45  ;;  %12151 = vmatpush1.bf16.msk.msra.mxu0 %vm23278_vm1, %v12143_v41  ;;  %vm23285_vm6 = vcmask 588800   ;;  %v12158_v47 = vpack.c.bf16 %v7881_v21, %v23286_v54  ;;  %vm23287_vm5 = vcmask 15360   ;;  %v23308_v41 = vld [vmem:[#allocation39_spill] sm:$0xff]  ;;  %v23327_v54 = vld [vmem:[#allocation45_spill] sm:$0xff] }
 0x866   : > { %v13090_v5 = vpop.permute.xlu1 %13089  ;;  %8594 = vmatprep.mubr.f32.mxu0 %v21567_v15  ;;  %v23292_v60 = vmax.f32 %v19324_v58, 0.0  ;;  %v12179_v3 = vpack.c.bf16 %v19506_v22, %v7881_v21 }
 0x867   : > { %v13092_v34 = vunpack.i.h.bf16 %v13090_v5  ;;  %v13091_v62 = vunpack.i.l.bf16 %v13090_v5  ;;  %v7830_v59 = vpop.permute.xlu0 %7829  ;;  %10738 = vmatpush1.msk.msra.mxu1 %vm23282_vm2, %v7879_v55  ;;  %12154 = vmatprep.subr.msk.bf16.mxu0 %vm23284_vm3, %v12152_v43  ;;  %vm23293_vm2 = vnez %v22793_v48  ;;  %v23294_v55 = vmax.f32 %v19341_v29, 0.0  ;;  %v23313_v43 = vld [vmem:[#allocation40_spill] sm:$0xff]  ;;  %v23323_v48 = vld [vmem:[#allocation138_spill] sm:$0xff] }
 0x868   : > { %v7882_v30 = vsel %vm23270_vm4, %v7828_v38, %v7830_v59  ;;  %10739 = vmatmul.mubr.msk.f32.vlgmr.msra.gmra.mrb[50].mxu1 %vm23285_vm6, %v19693_v4  ;;  %v12161_v24 = vpack.c.bf16 %v7880_v45, %v23292_v60  ;;  %vm23296_vm3 = vnez %v23295_v16  ;;  %vm23298_vm6 = vnez %v23297_v61  ;;  %v23310_v38 = vld [vmem:[#allocation137_spill] sm:$0xff]  ;;  %v23311_v45 = vld [vmem:[#allocation68_spill] sm:$0xff]  ;;  %v23341_v61 = vld [vmem:[#allocation107_spill] sm:$0xff] }
 0x869   : > { %v8176_v12 = vsel %vm23279_vm14, %v13087_v33, %v13091_v62  ;;  %v8177_v10 = vsel %vm23280_vm10, %v13091_v62, %v13092_v34  ;;  %v12176_v51 = vpack.c.bf16 %v19509_v7, %v7882_v30  ;;  %8665 = vmatprep.mubr.f32.mxu1 %v21567_v15  ;;  %vm23289_vm14 = vnez %v23288_v57  ;;  %v23330_v57 = vld [vmem:[#allocation128_spill] sm:$0xff]  ;;  %v23340_v16 = vld [vmem:[#allocation141_spill] sm:$0xff] }
 0x86a   : > { %v12164_v46 = vpack.c.bf16 %v8177_v10, %v19506_v22  ;;  %v12167_v18 = vpack.c.bf16 %v8176_v12, %v19488_v9  ;;  %v7696_v42 = vpop.permute.xlu1 %7695  ;;  %12157 = vmatpush1.bf16.msk.msra.mxu0 %vm23289_vm14, %v12155_v14  ;;  %vm23291_vm10 = vnez %v23290_v35  ;;  %vm23299_vm14 = vmmov %vm23287_vm5  ;;  %v23324_v14 = vld [vmem:[#allocation44_spill] sm:$0xff] }
 0x86b   : > { %v19820_v23 = vsel %vm23287_vm5, %v7694_v13, %v7696_v42  ;;  %12160 = vmatprep.subr.msk.bf16.mxu0 %vm23291_vm10, %v12158_v47  ;;  %vm23301_vm10 = vnez %v23300_v50  ;;  %v23304_v13 = vld [vmem:[#allocation34_spill] sm:$0xff] }
 0x86c   : > { %v13123_v19 = vpack.i.bf16 %v19820_v23, %v19772_v2  ;;  %7857 = vrot.lane.b32.xlu0 %v19820_v23, %s13282_s22  ;;  %v7832_v9 = vpop.permute.xlu0 %7831  ;;  %12172 = vmatprep.subr.msk.bf16.mxu1 %vm18293_vm12, %v12164_v46  ;;  %v23305_v63 = vmax.f32 %v23304_v13, 0.0  ;;  %v23351_v13 = vld [vmem:[#allocation71_spill] sm:$0xff] }
 0x86d   : > { %v19834_v17 = vsel %vm23270_vm4, %v7830_v59, %v7832_v9  ;;  %12175 = vmatpush1.bf16.msk.msra.mxu1 %vm23293_vm2, %v12167_v18  ;;  %vm23306_vm4 = vcmask 1031168  }
 0x86e   : > { %v7700_v25 = vpop.permute.xlu1 %7699  ;;  %13124 = vrot.lane.b32.xlu1 %v13123_v19, %s13274_s12  ;;  %v12182_v8 = vpack.c.bf16 %v19834_v17, %v23294_v55  ;;  %12178 = vmatprep.subr.msk.bf16.mxu1 %vm23296_vm3, %v12176_v51  ;;  %v12185_v53 = vpack.c.bf16 %v7882_v30, %v23305_v63  ;;  %vm23307_vm3 = vmmov %vm23306_vm4  ;;  %v23336_v55 = vld [vmem:[#allocation20_spill] sm:$0xff]  ;;  %v23353_v63 = vld [vmem:[#allocation49_spill] sm:$0xff] }
 0x86f   : > { %12163 = vmatpush1.bf16.msk.msra.mxu0 %vm23298_vm6, %v12161_v24  ;;  %vm23309_vm6 = vcmp.lt.s32.totalorder %v23308_v41, 62  ;;  %v23359_v41 = vld [vmem:[#allocation42_spill] sm:$0xff] }
 0x870   : > { %v7698_v58 = vpop.permute.xlu0 %7697  ;;  %12166 = vmatprep.subr.msk.bf16.mxu0 %vm23274_vm0, %v12164_v46  ;;  %vm23303_vm0 = vnez %v23302_v0  ;;  %v12203_v46 = vpack.c.bf16 %v23310_v38, %v19834_v17  ;;  %v23349_v0 = vld [vmem:[#allocation9_spill] sm:$0xff] }
 0x871   : > { %v19852_v1 = vsel %vm23287_vm5, %v7696_v42, %v7698_v58  ;;  %v19855_v27 = vsel %vm23299_vm14, %v7698_v58, %v7700_v25  ;;  %12181 = vmatpush1.bf16.msk.msra.mxu1 %vm23301_vm10, %v12179_v3  ;;  %vm23312_vm5 = vnez %v23311_v45  ;;  %vm23315_vm10 = vcmask 588800   ;;  %v23343_v58 = vld [vmem:[#allocation38_spill] sm:$0xff] }
 0x872   : > { %v13128_v29 = vpack.i.bf16 %v19855_v27, %v19852_v1  ;;  %v13095_v22 = vpop.permute.xlu1 %13094  ;;  %7859 = vrot.lane.b32.xlu0 %v19852_v1, %s13282_s22  ;;  %12184 = vmatprep.subr.msk.bf16.mxu1 %vm23303_vm0, %v12182_v8 }
 0x873   : > { %v13097_v33 = vunpack.i.h.bf16 %v13095_v22  ;;  %v13096_v39 = vunpack.i.l.bf16 %v13095_v22  ;;  %12169 = vmatpush1.bf16.msk.msra.mxu0 %vm23278_vm1, %v12167_v18  ;;  %vm23314_vm1 = vcmp.lt.s32.totalorder %v23313_v43, 62  ;;  %v23326_v18 = vld [vmem:[#allocation139_spill] sm:$0xff]  ;;  %v23345_v22 = vld [vmem:[#allocation69_spill] sm:$0xff] }
 0x874   : > { %13129 = vrot.lane.b32.xlu1 %v13128_v29, %s13274_s12  ;;  %10750 = vmatprep.subr.msk.mxu0 %vm23309_vm6, %v7882_v30  ;;  %vm23321_vm6 = vcmask 1014784   ;;  %v23344_v29 = vmax.f32 %v23343_v58, 0.0  ;;  %v23390_v58 = vld [vmem:[#allocation109_spill] sm:$0xff] }
 0x875   : > { %v8178_v36 = vsel %vm23306_vm4, %v13092_v34, %v13096_v39  ;;  %v8179_v11 = vsel %vm23307_vm3, %v13096_v39, %v13097_v33  ;;  %12187 = vmatpush1.bf16.msk.msra.mxu1 %vm23312_vm5, %v12185_v53  ;;  %vm23320_vm4 = vmmov %vm23307_vm3  ;;  %v23347_v39 = vld [vmem:[#allocation130_spill] sm:$0xff] }
 0x876   : > { %v12188_v6 = vpack.c.bf16 %v8179_v11, %v23310_v38  ;;  %v12191_v32 = vpack.c.bf16 %v8178_v36, %v19509_v7  ;;  %v7702_v5 = vpop.permute.xlu0 %7701  ;;  %v23316_v7 = vld [vmem:[#allocation105_spill] sm:$0xff]  ;;  %vm23322_vm5 = vmmov %vm23321_vm6  ;;  %v23355_v53 = vld [vmem:[#allocation50_spill] sm:$0xff]  ;;  %v23360_v38 = vmax.f32 %v23359_v41, 0.0 }
 0x877   : > { %10751 = vmatpush1.msk.msra.mxu0 %vm23314_vm1, %v7881_v21  ;;  %v19887_v31 = vsel %vm23299_vm14, %v7700_v25, %v7702_v5  ;;  %vm23317_vm0 = vnez %v23316_v7  ;;  %vm23328_vm1 = vcmp.lt.s32.totalorder %v23327_v54, 62  ;;  %vm23329_vm14 = vmmov %vm23315_vm10  ;;  %v23373_v54 = vld [vmem:[#allocation106_spill] sm:$0xff] }
 0x878   : > { %v19878_v52 = vpop.permute.xlu1 %13099  ;;  %12190 = vmatprep.subr.msk.bf16.mxu1 %vm18293_vm12, %v12188_v6  ;;  %10752 = vmatmul.mubr.msk.f32.vlgmr.msra.gmra.mrb[52].mxu0 %vm23315_vm10, %v19693_v4  ;;  %vm23319_vm12 = vnez %v23318_v49  ;;  %vm23331_vm10 = vnez %v23330_v57  ;;  %v23363_v49 = vld [vmem:[#allocation129_spill] sm:$0xff] }
 0x879   : > { %v13102_v34 = vunpack.i.h.bf16 %v19878_v52  ;;  %v13101_v62 = vunpack.i.l.bf16 %v19878_v52  ;;  %12196 = vmatprep.subr.msk.bf16.mxu0 %vm23317_vm0, %v12188_v6  ;;  %7861 = vrot.lane.b32.xlu1 %v19855_v27, %s13282_s22  ;;  %v8237_v57 = vld [vmem:[%s20670_s8] sm:$0xff] }
 0x87a   : > { %12193 = vmatpush1.bf16.msk.msra.mxu1 %vm23293_vm2, %v12191_v32  ;;  %12199 = vmatpush1.bf16.msk.msra.mxu0 %vm23319_vm12, %v12191_v32  ;;  %v7834_v12 = vpop.permute.xlu0 %7833  ;;  %vm23325_vm2 = vcmp.lt.s32.totalorder %v23324_v14, 62  ;;  %v23361_v32 = vld [vmem:[#allocation41_spill] sm:$0xff] }
 0x87b   : > { %7863 = vrot.lane.b32.xlu0 %v19887_v31, %s13282_s22  ;;  %v8181_v21 = vsel %vm23320_vm4, %v13101_v62, %v13102_v34  ;;  %8736 = vmatprep.mubr.f32.mxu0 %v21567_v15  ;;  %v8180_v10 = vsel %vm23307_vm3, %v13097_v33, %v13101_v62  ;;  %v7884_v30 = vsel %vm23321_vm6, %v7832_v9, %v7834_v12  ;;  %v23332_v9 = vld [vmem:[#allocation36_spill] sm:$0xff]  ;;  %vm23334_vm4 = vcmask 15360   ;;  %vm23335_vm3 = vmmov %vm23322_vm5 }
 0x87c   : > { %v7836_v59 = vpop.permute.xlu1 %7835  ;;  %v12200_v56 = vpack.c.bf16 %v23323_v48, %v7884_v30  ;;  %10763 = vmatprep.subr.msk.mxu1 %vm23325_vm2, %v7884_v30  ;;  %v12212_v42 = vpack.c.bf16 %v8181_v21, %v23326_v18  ;;  %v12215_v47 = vpack.c.bf16 %v8180_v10, %v23323_v48  ;;  %v23333_v35 = vmax.f32 %v23332_v9, 0.0  ;;  %v23378_v9 = vld [vmem:[#allocation56_spill] sm:$0xff] }
 0x87d   : > { %v7885_v40 = vsel %vm23322_vm5, %v7834_v12, %v7836_v59  ;;  %vm23337_vm6 = vnez %v23336_v55  ;;  %vm23342_vm2 = vnez %v23341_v61  ;;  %v12209_v50 = vpack.c.bf16 %v7884_v30, %v23344_v29  ;;  %v23370_v30 = vld [vmem:[#allocation144_spill] sm:$0xff]  ;;  %v23387_v61 = vld [vmem:[#allocation74_spill] sm:$0xff]  ;;  %v23392_v29 = vld [vmem:[#allocation43_spill] sm:$0xff] }
 0x87e   : > { %10764 = vmatpush1.msk.msra.mxu1 %vm23328_vm1, %v19834_v17  ;;  %v7838_v19 = vpop.permute.xlu0 %7837  ;;  %12202 = vmatprep.subr.msk.bf16.mxu0 %vm23331_vm10, %v12200_v56  ;;  %v12206_v60 = vpack.c.bf16 %v7885_v40, %v23333_v35  ;;  %v23338_v17 = vld [vmem:[#allocation127_spill] sm:$0xff]  ;;  %vm23346_vm1 = vnez %v23345_v22  ;;  %v12227_v33 = vpack.c.bf16 %v23326_v18, %v7885_v40  ;;  %vm23350_vm10 = vnez %v23349_v0 }
 0x87f   : > { %10765 = vmatmul.mubr.msk.f32.vlgmr.msra.gmra.mrb[52].mxu1 %vm23329_vm14, %v19693_v4  ;;  %v7886_v25 = vsel %vm23335_vm3, %v7836_v59, %v7838_v19  ;;  %12220 = vmatprep.subr.msk.bf16.mxu1 %vm23337_vm6, %v12212_v42  ;;  %vm23339_vm5 = vnez %v23338_v17  ;;  %vm23348_vm14 = vnez %v23347_v39  ;;  %vm23354_vm3 = vcmp.lt.s32.totalorder %v23353_v63, 62  ;;  %v23366_v59 = vld [vmem:[#allocation21_spill] sm:$0xff]  ;;  %v23383_v17 = vld [vmem:[#allocation46_spill] sm:$0xff] }
 0x880   : > { %v7704_v51 = vpop.permute.xlu1 %7703  ;;  %12205 = vmatpush1.bf16.msk.msra.mxu0 %vm23339_vm5, %v12203_v46  ;;  %v12224_v3 = vpack.c.bf16 %v23340_v16, %v7886_v25  ;;  %12223 = vmatpush1.bf16.msk.msra.mxu1 %vm23342_vm2, %v12215_v47  ;;  %vm23356_vm5 = vcmp.lt.s32.totalorder %v23355_v53, 62  ;;  %v23362_v45 = vmax.f32 %v23361_v32, 0.0 }
 0x881   : > { %v19923_v24 = vsel %vm23334_vm4, %v7702_v5, %v7704_v51  ;;  %12208 = vmatprep.subr.msk.bf16.mxu0 %vm23346_vm1, %v12206_v60  ;;  %8807 = vmatprep.mubr.f32.mxu1 %v21567_v15  ;;  %vm23352_vm4 = vnez %v23351_v13  ;;  %vm23357_vm1 = vcmask 588800   ;;  %v23380_v60 = vld [vmem:[#allocation73_spill] sm:$0xff] }
 0x882   : > { %v13133_v8 = vpack.i.bf16 %v19923_v24, %v19887_v31  ;;  %7865 = vrot.lane.b32.xlu0 %v19923_v24, %s13282_s22  ;;  %12226 = vmatprep.subr.msk.bf16.mxu1 %vm23348_vm14, %v12224_v3  ;;  %vm23358_vm14 = vcmask 1014784   ;;  %v12233_v52 = vpack.c.bf16 %v7886_v25, %v23362_v45  ;;  %v23385_v3 = vld [vmem:[#allocation58_spill] sm:$0xff]  ;;  %v23399_v45 = vld [vmem:[#allocation132_spill] sm:$0xff] }
 0x884   : > { %13134 = vrot.lane.b32.xlu1 %v13133_v8, %s13274_s12  ;;  %12211 = vmatpush1.bf16.msk.msra.mxu0 %vm23350_vm10, %v12209_v50  ;;  %vm23367_vm10 = vnez %v23366_v59  ;;  %v23384_v8 = vmax.f32 %v23383_v17, 0.0  ;;  %v23393_v50 = vmax.f32 %v23392_v29, 0.0  ;;  %v23427_v29 = vld [vmem:[#allocation134_spill] sm:$0xff] }
 0x885   : > { %12229 = vmatpush1.bf16.msk.msra.mxu1 %vm23352_vm4, %v12227_v33  ;;  %12214 = vmatprep.subr.msk.bf16.mxu0 %vm23317_vm0, %v12212_v42  ;;  %vm23364_vm0 = vnez %v23363_v49  ;;  %vm23368_vm4 = vcmask 1031168   ;;  %v23394_v33 = vld [vmem:[#allocation108_spill] sm:$0xff]  ;;  %v23409_v49 = vld [vmem:[#allocation23_spill] sm:$0xff] }
 0x888   : > { %12217 = vmatpush1.bf16.msk.msra.mxu0 %vm23319_vm12, %v12215_v47  ;;  %vm23365_vm12 = vcmask 15360   ;;  %v23375_v47 = vld [vmem:[#allocation145_spill] sm:$0xff] }
 0x889   : > { %10776 = vmatprep.subr.msk.mxu0 %vm23354_vm3, %v7886_v25  ;;  %vm23369_vm3 = vmmov %vm23368_vm4 }
 0x88c   : > { %10777 = vmatpush1.msk.msra.mxu0 %vm23356_vm5, %v7885_v40  ;;  %vm23371_vm5 = vmmov %vm23365_vm12 }
 0x88d   : > { %10778 = vmatmul.mubr.msk.f32.vlgmr.msra.gmra.mrb[54].mxu0 %vm23357_vm1, %v19693_v4  ;;  %vm23372_vm1 = vmmov %vm23371_vm5 }
 0x88e   : > { %8878 = vmatprep.mubr.f32.mxu0 %v21567_v15 }
 0x89d   : > { %v7840_v36 = vpop.permute.xlu0 %7839 }
 0x89e   : > { %v7887_v11 = vsel %vm23358_vm14, %v7838_v19, %v7840_v36  ;;  %v23376_v19 = vld [vmem:[#allocation10_spill] sm:$0xff] }
 0x89f   : > { %v12230_v6 = vpack.c.bf16 %v7887_v11, %v23360_v38  ;;  %v12251_v25 = vpack.c.bf16 %v23370_v30, %v7887_v11 }
 0x8a0   : > { %v13105_v43 = vpop.permute.xlu1 %13104 }
 0x8a1   : > { %v13107_v5 = vunpack.i.h.bf16 %v13105_v43  ;;  %v13106_v62 = vunpack.i.l.bf16 %v13105_v43  ;;  %v7706_v7 = vpop.permute.xlu0 %7705  ;;  %12232 = vmatprep.subr.msk.bf16.mxu1 %vm23364_vm0, %v12230_v6  ;;  %vm23374_vm0 = vnez %v23373_v54  ;;  %v23403_v43 = vld [vmem:[#allocation61_spill] sm:$0xff] }
 0x8a2   : > { %v19969_v21 = vsel %vm23365_vm12, %v7704_v51, %v7706_v7  ;;  %12235 = vmatpush1.bf16.msk.msra.mxu1 %vm23367_vm10, %v12233_v52  ;;  %vm23377_vm12 = vnez %v23376_v19  ;;  %vm23381_vm10 = vnez %v23380_v60  ;;  %v23401_v52 = vld [vmem:[#allocation131_spill] sm:$0xff] }
 0x8a3   : > { %v8182_v12 = vsel %vm23368_vm4, %v13102_v34, %v13106_v62  ;;  %v8183_v10 = vsel %vm23369_vm3, %v13106_v62, %v13107_v5  ;;  %7867 = vrot.lane.b32.xlu0 %v19969_v21, %s13282_s22  ;;  %vm23382_vm4 = vmmov %vm23358_vm14  ;;  %vm23388_vm3 = vnez %v23387_v61  ;;  %v23424_v61 = vld [vmem:[#allocation76_spill] sm:$0xff] }
 0x8a4   : > { %v12236_v40 = vpack.c.bf16 %v8183_v10, %v23370_v30  ;;  %v12239_v48 = vpack.c.bf16 %v8182_v12, %v23340_v16  ;;  %v7708_v56 = vpop.permute.xlu1 %7707  ;;  %v23413_v10 = vld [vmem:[#allocation120_spill] sm:$0xff] }
 0x8a5   : > { %v19980_v14 = vsel %vm23371_vm5, %v7706_v7, %v7708_v56  ;;  %v19983_v46 = vsel %vm23372_vm1, %v7708_v56, 0.0  ;;  %v7842_v18 = vpop.permute.xlu0 %7841  ;;  %vm23389_vm5 = vcmask 588800   ;;  %vm23391_vm1 = vnez %v23390_v58  ;;  %v23407_v7 = vld [vmem:[#allocation62_spill] sm:$0xff] }
 0x8a6   : > { %v13138_v34 = vpack.i.bf16 %v19980_v14, %v19969_v21  ;;  %v7888_v42 = vsel %vm23358_vm14, %v7840_v36, %v7842_v18  ;;  %12238 = vmatprep.subr.msk.bf16.mxu1 %vm23337_vm6, %v12236_v40  ;;  %12244 = vmatprep.subr.msk.bf16.mxu0 %vm23374_vm0, %v12236_v40  ;;  %vm23379_vm6 = vcmp.lt.s32.totalorder %v23378_v9, 62  ;;  %vm23395_vm14 = vnez %v23394_v33  ;;  %v23398_v36 = vld [vmem:[#allocation147_spill] sm:$0xff]  ;;  %v23432_v33 = vld [vmem:[#allocation133_spill] sm:$0xff] }
 0x8a7   : > { %v12248_v51 = vpack.c.bf16 %v23375_v47, %v7888_v42  ;;  %8000 = vrot.lane.b32.xlu0 %v19983_v46, %s13282_s22  ;;  %12241 = vmatpush1.bf16.msk.msra.mxu1 %vm23342_vm2, %v12239_v48  ;;  %vm23386_vm2 = vcmp.lt.s32.totalorder %v23385_v3, 62  ;;  %v12257_v22 = vpack.c.bf16 %v7888_v42, %v23393_v50  ;;  %v23414_v30 = vmax.f32 %v23413_v10, 0.0  ;;  %v23456_v10 = vld [vmem:[#allocation51_spill] sm:$0xff] }
 0x8a8   : > { %12247 = vmatpush1.bf16.msk.msra.mxu0 %vm23377_vm12, %v12239_v48  ;;  %13139 = vrot.lane.b32.xlu1 %v13138_v34, %s13274_s12  ;;  %v23415_v48 = vld [vmem:[#allocation97_spill] sm:$0xff]  ;;  %v23417_v34 = vld [vmem:[#allocation24_spill] sm:$0xff] }
 0x8a9   : > { %10789 = vmatprep.subr.msk.mxu1 %vm23379_vm6, %v7888_v42  ;;  %12250 = vmatprep.subr.msk.bf16.mxu0 %vm23381_vm10, %v12248_v51  ;;  %vm23396_vm6 = vcmask 1031168   ;;  %v23416_v56 = vmax.f32 %v23415_v48, 0.0  ;;  %v23419_v42 = vld [vmem:[#allocation111_spill] sm:$0xff]  ;;  %v23458_v48 = vld [vmem:[#allocation112_spill] sm:$0xff] }
 0x8aa   : > { %v7844_v35 = vpop.permute.xlu0 %7843  ;;  %vm23397_vm10 = vmmov %vm23396_vm6 }
 0x8ab   : > { %v7889_v55 = vsel %vm23382_vm4, %v7842_v18, %v7844_v35  ;;  %8240 = vperm.xlu0 %12736, %v8237_v57   ;;  %10790 = vmatpush1.msk.msra.mxu1 %vm23386_vm2, %v7887_v11  ;;  %vm23400_vm2 = vnez %v23399_v45  ;;  %v23445_v45 = vld [vmem:[#allocation47_spill] sm:$0xff] }
 0x8ac   : > { %v12254_v16 = vpack.c.bf16 %v7889_v55, %v23384_v8  ;;  %12253 = vmatpush1.bf16.msk.msra.mxu0 %vm23388_vm3, %v12251_v25  ;;  %7869 = vrot.lane.b32.xlu1 %v19980_v14, %s13282_s22  ;;  %vm23402_vm3 = vnez %v23401_v52  ;;  %v12275_v62 = vpack.c.bf16 %v23398_v36, %v7889_v55  ;;  %v23446_v52 = vmax.f32 %v23445_v45, 0.0  ;;  %s13206_s22 = sshll.u32 %s13283_s21, 4  ;;  %s13207_s22 = int_to_ptr.vmem [resolvable:$false] %s13206_s22 }
 0x8ad   : > { %10791 = vmatmul.mubr.msk.f32.vlgmr.msra.gmra.mrb[54].mxu1 %vm23389_vm5, %v19693_v4  ;;  %vm23404_vm5 = vcmp.lt.s32.totalorder %v23403_v43, 62  ;;  %s13208_s24 = scalar_lea.vmem %s13207_s22, 32 }
 0x8ae   : > { %12256 = vmatprep.subr.msk.bf16.mxu0 %vm23391_vm1, %v12254_v16  ;;  %8949 = vmatprep.mubr.f32.mxu1 %v21567_v15 }
 0x8b0   : > { %12259 = vmatpush1.bf16.msk.msra.mxu0 %vm23395_vm14, %v12257_v22  ;;  %v13110_v39 = vpop.permute.xlu1 %13109  ;;  %8230 = vrot.lane.b32.xlu1 %v19983_v46, %s13274_s12  ;;  %vm23408_vm14 = vcmp.lt.s32.totalorder %v23407_v7, 62  ;;  %v23430_v22 = vld [vmem:[#allocation15_spill] sm:$0xff] }
 0x8b1   : > { %v13112_v0 = vunpack.i.h.bf16 %v13110_v39  ;;  %v13111_v13 = vunpack.i.l.bf16 %v13110_v39 }
 0x8b3   : > { %v8184_v63 = vsel %vm23396_vm6, %v13107_v5, %v13111_v13  ;;  %v8185_v53 = vsel %vm23397_vm10, %v13111_v13, %v13112_v0  ;;  %v23405_v5 = vld [vmem:[#allocation11_spill] sm:$0xff]  ;;  %vm23411_vm6 = vcmask 588800   ;;  %vm23418_vm10 = vnez %v23417_v34 }
 0x8b4   : > { %v12260_v11 = vpack.c.bf16 %v8185_v53, %v23398_v36  ;;  %v12263_v41 = vpack.c.bf16 %v8184_v63, %v23375_v47  ;;  %v7846_v38 = vpop.permute.xlu1 %7845  ;;  %vm23406_vm1 = vnez %v23405_v5  ;;  %v23435_v13 = vld [vmem:[#allocation99_spill] sm:$0xff] }
 0x8b5   : > { %v7890_v6 = vsel %vm23382_vm4, %v7844_v35, %v7846_v38  ;;  %v23436_v63 = vmax.f32 %v23435_v13, 0.0  ;;  %v23483_v13 = vld [vmem:[#allocation122_spill] sm:$0xff] }
 0x8b6   : > { %v12272_v32 = vpack.c.bf16 %v19616_v37, %v7890_v6  ;;  %12262 = vmatprep.subr.msk.bf16.mxu0 %vm23374_vm0, %v12260_v11  ;;  %12268 = vmatprep.subr.msk.bf16.mxu1 %vm23400_vm2, %v12260_v11  ;;  %vm23410_vm0 = vnez %v23409_v49  ;;  %v12281_v18 = vpack.c.bf16 %v7890_v6, %v23416_v56  ;;  %v23450_v49 = vld [vmem:[#allocation80_spill] sm:$0xff] }
 0x8b7   : > { %12265 = vmatpush1.bf16.msk.msra.mxu0 %vm23377_vm12, %v12263_v41  ;;  %12271 = vmatpush1.bf16.msk.msra.mxu1 %vm23402_vm3, %v12263_v41  ;;  %vm23412_vm12 = vmmov %vm23382_vm4  ;;  %vm23420_vm4 = vnez %v23419_v42  ;;  %v23460_v56 = vld [vmem:[#allocation84_spill] sm:$0xff] }
 0x8b8   : > { %10802 = vmatprep.subr.msk.mxu0 %vm23404_vm5, %v7890_v6  ;;  %12274 = vmatprep.subr.msk.bf16.mxu1 %vm23406_vm1, %v12272_v32  ;;  %vm23421_vm5 = vmmov %vm23412_vm12  ;;  %vm23422_vm1 = vcmask 1031168   ;;  %v23440_v6 = vld [vmem:[#allocation110_spill] sm:$0xff] }
 0x8bb   : > { %10803 = vmatpush1.msk.msra.mxu0 %vm23408_vm14, %v7889_v55  ;;  %12277 = vmatpush1.bf16.msk.msra.mxu1 %vm23410_vm0, %v12275_v62  ;;  %vm23423_vm14 = vmmov %vm23422_vm1  ;;  %vm23425_vm0 = vnez %v23424_v61  ;;  %v23447_v62 = vld [vmem:[#allocation79_spill] sm:$0xff] }
 0x8bc   : > { %10804 = vmatmul.mubr.msk.f32.vlgmr.msra.gmra.mrb[56].mxu0 %vm23411_vm6, %v19693_v4  ;;  %vm23426_vm6 = vmmov %vm23421_vm5 }
 0x8bd   : > { %9020 = vmatprep.mubr.f32.mxu0 %v21567_v15 }
 0x8be   : > { %v7848_v59 = vpop.permute.xlu0 %7847 }
 0x8bf   : > { %v7891_v12 = vsel %vm23412_vm12, %v7846_v38, %v7848_v59  ;;  %vm23428_vm12 = vnez %v23427_v29  ;;  %v23438_v38 = vld [vmem:[#allocation66_spill] sm:$0xff] }
 0x8c0   : > { %v12278_v40 = vpack.c.bf16 %v7891_v12, %v23414_v30  ;;  %v12299_v39 = vpack.c.bf16 %v19674_v44, %v7891_v12  ;;  %v23457_v30 = vmax.f32 %v23456_v10, 0.0 }
 0x8c2   : > { %12280 = vmatprep.subr.msk.bf16.mxu1 %vm23418_vm10, %v12278_v40  ;;  %vm23429_vm10 = vmmov %vm23422_vm1 }
 0x8c3   : > { %12283 = vmatpush1.bf16.msk.msra.mxu1 %vm23420_vm4, %v12281_v18  ;;  %vm23431_vm4 = vcmp.lt.s32.totalorder %v23430_v22, 62  ;;  %v23462_v18 = vld [vmem:[#allocation121_spill] sm:$0xff] }
 0x8c4   : > { %v23463_v34 = vmax.f32 %v23462_v18, 0.0  ;;  %v23480_v22 = vld [vmem:[#allocation89_spill] sm:$0xff] }
 0x8c8   : > { %v7850_v54 = vpop.permute.xlu0 %7849 }
 0x8c9   : > { %v7892_v57 = vsel %vm23421_vm5, %v7848_v59, %v7850_v54  ;;  %vm23433_vm5 = vnez %v23432_v33  ;;  %v23454_v59 = vld [vmem:[#allocation78_spill] sm:$0xff] }
 0x8ca   : > { %v13115_v47 = vpop.permute.xlu1 %13114  ;;  %v12296_v3 = vpack.c.bf16 %v19721_v20, %v7892_v57  ;;  %v12305_v43 = vpack.c.bf16 %v7892_v57, %v23446_v52 }
 0x8cb   : > { %v13117_v51 = vunpack.i.h.bf16 %v13115_v47  ;;  %v13116_v19 = vunpack.i.l.bf16 %v13115_v47  ;;  %v23464_v47 = vld [vmem:[#allocation19_spill] sm:$0xff] }
 0x8cc   : > { %v7852_v55 = vpop.permute.xlu0 %7851 }
 0x8cd   : > { %v8186_v9 = vsel %vm23422_vm1, %v13112_v0, %v13116_v19  ;;  %v8187_v35 = vsel %vm23423_vm14, %v13116_v19, %v13117_v51  ;;  %v7893_v58 = vsel %vm23426_vm6, %v7850_v54, %v7852_v55  ;;  %vm23441_vm14 = vnez %v23440_v6 }
 0x8ce   : > { %v12284_v60 = vpack.c.bf16 %v8187_v35, %v19674_v44  ;;  %v12287_v25 = vpack.c.bf16 %v8186_v9, %v19616_v37  ;;  %v13120_v17 = vpop.permute.xlu1 %13119  ;;  %v12302_v53 = vpack.c.bf16 %v7893_v58, %v23436_v63  ;;  %v23443_v44 = vld [vmem:[#allocation12_spill] sm:$0xff]  ;;  %v23484_v63 = vmax.f32 %v23483_v13, 0.0 }
 0x8cf   : > { %v13122_v8 = vunpack.i.h.bf16 %v13120_v17  ;;  %v13121_v16 = vunpack.i.l.bf16 %v13120_v17 }
 0x8d0   : > { %12286 = vmatprep.subr.msk.bf16.mxu1 %vm23400_vm2, %v12284_v60  ;;  %12292 = vmatprep.subr.msk.bf16.mxu0 %vm23425_vm0, %v12284_v60  ;;  %vm23434_vm2 = vmmov %vm23422_vm1  ;;  %vm23439_vm1 = vcmp.lt.s32.totalorder %v23438_v38, 62  ;;  %v23487_v38 = vld [vmem:[#allocation114_spill] sm:$0xff] }
 0x8d1   : > { %12289 = vmatpush1.bf16.msk.msra.mxu1 %vm23402_vm3, %v12287_v25  ;;  %12295 = vmatpush1.bf16.msk.msra.mxu0 %vm23428_vm12, %v12287_v25  ;;  %v8189_v37 = vsel %vm23429_vm10, %v13121_v16, %v13122_v8  ;;  %v8188_v0 = vsel %vm23434_vm2, %v13117_v51, %v13121_v16  ;;  %vm23437_vm3 = vmmov %vm23426_vm6  ;;  %vm23442_vm6 = vcmask 588800   ;;  %vm23444_vm10 = vnez %v23443_v44  ;;  %v23470_v25 = vld [vmem:[#allocation70_spill] sm:$0xff] }
 0x8d2   : > { %v7854_v50 = vpop.permute.xlu1 %7853  ;;  %10815 = vmatprep.subr.msk.mxu1 %vm23431_vm4, %v7892_v57  ;;  %12298 = vmatprep.subr.msk.bf16.mxu0 %vm23433_vm5, %v12296_v3  ;;  %v12308_v11 = vpack.c.bf16 %v8189_v37, %v19744_v28  ;;  %v12311_v32 = vpack.c.bf16 %v8188_v0, %v19721_v20  ;;  %vm23448_vm4 = vnez %v23447_v62  ;;  %vm23449_vm5 = vmmov %vm23437_vm3  ;;  %vm23451_vm2 = vnez %v23450_v49  ;;  %v23452_v20 = vld [vmem:[#allocation113_spill] sm:$0xff]  ;;  %v23499_v49 = vld [vmem:[#allocation88_spill] sm:$0xff] }
 0x8d3   : > { %v7894_v36 = vsel %vm23437_vm3, %v7852_v55, %v7854_v50  ;;  %v7856_v41 = vpop.permute.xlu0 %7855  ;;  %vm23453_vm3 = vnez %v23452_v20  ;;  %v23466_v57 = vld [vmem:[#allocation85_spill] sm:$0xff] }
 0x8d4   : > { %v12320_v5 = vpack.c.bf16 %v19747_v26, %v7894_v36  ;;  %v7895_v7 = vsel %vm23449_vm5, %v7854_v50, %v7856_v41  ;;  %v12329_v42 = vpack.c.bf16 %v7894_v36, %v23463_v34  ;;  %v23478_v50 = vld [vmem:[#allocation22_spill] sm:$0xff]  ;;  %v23511_v34 = vld [vmem:[#allocation75_spill] sm:$0xff] }
 0x8d5   : > { %10816 = vmatpush1.msk.msra.mxu1 %vm23439_vm1, %v7891_v12  ;;  %12301 = vmatpush1.bf16.msk.msra.mxu0 %vm23441_vm14, %v12299_v39  ;;  %vm23455_vm1 = vnez %v23454_v59  ;;  %v12323_v12 = vpack.c.bf16 %v19744_v28, %v7893_v58  ;;  %v12326_v40 = vpack.c.bf16 %v7895_v7, %v23457_v30  ;;  %vm23459_vm14 = vnez %v23458_v48  ;;  %v23501_v59 = vld [vmem:[#allocation92_spill] sm:$0xff]  ;;  %v23507_v48 = vld [vmem:[#allocation17_spill] sm:$0xff] }
 0x8d6   : > { %10817 = vmatmul.mubr.msk.f32.vlgmr.msra.gmra.mrb[56].mxu1 %vm23442_vm6, %v19693_v4  ;;  %12304 = vmatprep.subr.msk.bf16.mxu0 %vm23444_vm10, %v12302_v53  ;;  %vm23461_vm6 = vnez %v23460_v56  ;;  %vm23465_vm10 = vcmp.lt.s32.totalorder %v23464_v47, 62  ;;  %v12347_v33 = vpack.c.bf16 %v19772_v2, %v7895_v7  ;;  %v23509_v56 = vld [vmem:[#allocation135_spill] sm:$0xff] }
 0x8d7   : > { %12316 = vmatprep.subr.msk.bf16.mxu1 %vm23448_vm4, %v12308_v11  ;;  %9091 = vmatprep.mubr.f32.mxu1 %v21567_v15 }
 0x8d8   : > { %12319 = vmatpush1.bf16.msk.msra.mxu1 %vm23451_vm2, %v12311_v32 }
 0x8d9   : > { %12322 = vmatprep.subr.msk.bf16.mxu1 %vm23453_vm3, %v12320_v5  ;;  %12307 = vmatpush1.bf16.msk.msra.mxu0 %vm23455_vm1, %v12305_v43  ;;  %vm23468_vm3 = vcmask 1031168  }
 0x8da   : > { %12310 = vmatprep.subr.msk.bf16.mxu0 %vm23425_vm0, %v12308_v11  ;;  %vm23467_vm0 = vnez %v23466_v57  ;;  %vm23469_vm1 = vmmov %vm23468_vm3 }
 0x8dc   : > { %12325 = vmatpush1.bf16.msk.msra.mxu1 %vm23459_vm14, %v12323_v12  ;;  %vm23472_vm14 = vcmask 588800   ;;  %v23503_v12 = vld [vmem:[#allocation136_spill] sm:$0xff] }
 0x8dd   : > { %12328 = vmatprep.subr.msk.bf16.mxu1 %vm23461_vm6, %v12326_v40  ;;  %12313 = vmatpush1.bf16.msk.msra.mxu0 %vm23428_vm12, %v12311_v32  ;;  %vm23471_vm12 = vcmp.lt.s32.totalorder %v23470_v25, 62  ;;  %v23491_v32 = vld [vmem:[#allocation98_spill] sm:$0xff]  ;;  %v23504_v10 = vmax.f32 %v23503_v12, 0.0  ;;  %v23505_v40 = vld [vmem:[#allocation116_spill] sm:$0xff] }
 0x8de   : > { %v7858_v54 = vpop.permute.xlu0 %7857  ;;  %10828 = vmatprep.subr.msk.mxu0 %vm23465_vm10, %v7894_v36  ;;  %vm23475_vm10 = vmmov %vm23449_vm5  ;;  %v23492_v44 = vmax.f32 %v23491_v32, 0.0  ;;  %v23552_v12 = vld [vmem:[#allocation18_spill] sm:$0xff] }
 0x8df   : > { %v7896_v9 = vsel %vm23449_vm5, %v7856_v41, %v7858_v54  ;;  %vm23479_vm5 = vcmp.lt.s32.totalorder %v23478_v50, 62  ;;  %v23485_v41 = vld [vmem:[#allocation72_spill] sm:$0xff] }
 0x8e0   : > { %v13125_v28 = vpop.permute.xlu1 %13124  ;;  %12331 = vmatpush1.bf16.msk.msra.mxu1 %vm23467_vm0, %v12329_v42  ;;  %v12344_v3 = vpack.c.bf16 %v19820_v23, %v7896_v9  ;;  %v12353_v45 = vpack.c.bf16 %v7896_v9, %v23492_v44 }
 0x8e1   : > { %v13127_v51 = vunpack.i.h.bf16 %v13125_v28  ;;  %v13126_v19 = vunpack.i.l.bf16 %v13125_v28  ;;  %10829 = vmatpush1.msk.msra.mxu0 %vm23471_vm12, %v7893_v58  ;;  %vm23488_vm12 = vnez %v23487_v38  ;;  %v23513_v28 = vld [vmem:[#allocation93_spill] sm:$0xff] }
 0x8e2   : > { %10830 = vmatmul.mubr.msk.f32.vlgmr.msra.gmra.mrb[58].mxu0 %vm23472_vm14, %v19693_v4 }
 0x8e3   : > { %v8190_v35 = vsel %vm23468_vm3, %v13122_v8, %v13126_v19  ;;  %v8191_v60 = vsel %vm23469_vm1, %v13126_v19, %v13127_v51  ;;  %9162 = vmatprep.mubr.f32.mxu0 %v21567_v15  ;;  %v23473_v8 = vld [vmem:[#allocation86_spill] sm:$0xff]  ;;  %vm23481_vm3 = vnez %v23480_v22  ;;  %v23515_v19 = vld [vmem:[#allocation77_spill] sm:$0xff] }
 0x8e4   : > { %v12332_v55 = vpack.c.bf16 %v8191_v60, %v19772_v2  ;;  %v12335_v17 = vpack.c.bf16 %v8190_v35, %v19747_v26  ;;  %v7860_v16 = vpop.permute.xlu0 %7859  ;;  %vm23474_vm6 = vnez %v23473_v8  ;;  %v23476_v26 = vld [vmem:[#allocation115_spill] sm:$0xff]  ;;  %v23525_v8 = vld [vmem:[#allocation96_spill] sm:$0xff] }
 0x8e5   : > { %v7897_v58 = vsel %vm23475_vm10, %v7858_v54, %v7860_v16  ;;  %vm23477_vm0 = vnez %v23476_v26  ;;  %v23489_v2 = vld [vmem:[#allocation87_spill] sm:$0xff]  ;;  %v23533_v26 = vld [vmem:[#allocation142_spill] sm:$0xff] }
 0x8e6   : > { %12334 = vmatprep.subr.msk.bf16.mxu1 %vm23448_vm4, %v12332_v55  ;;  %12340 = vmatprep.subr.msk.bf16.mxu0 %vm23474_vm6, %v12332_v55  ;;  %v13130_v61 = vpop.permute.xlu1 %13129  ;;  %vm23482_vm4 = vmmov %vm23469_vm1  ;;  %v12350_v53 = vpack.c.bf16 %v7897_v58, %v23484_v63  ;;  %vm23490_vm10 = vnez %v23489_v2  ;;  %v12371_v20 = vpack.c.bf16 %v19852_v1, %v7897_v58  ;;  %v23534_v50 = vmax.f32 %v23533_v26, 0.0  ;;  %v23539_v63 = vld [vmem:[#allocation28_spill] sm:$0xff] }
 0x8e7   : > { %v13132_v29 = vunpack.i.h.bf16 %v13130_v61  ;;  %v13131_v37 = vunpack.i.l.bf16 %v13130_v61  ;;  %12337 = vmatpush1.bf16.msk.msra.mxu1 %vm23451_vm2, %v12335_v17  ;;  %12343 = vmatpush1.bf16.msk.msra.mxu0 %vm23477_vm0, %v12335_v17  ;;  %vm23486_vm2 = vcmp.lt.s32.totalorder %v23485_v41, 62  ;;  %v23527_v61 = vld [vmem:[#allocation81_spill] sm:$0xff]  ;;  %v23565_v17 = vld [vmem:[#allocation14_spill] sm:$0xff] }
 0x8e8   : > { %10841 = vmatprep.subr.msk.mxu1 %vm23479_vm5, %v7896_v9  ;;  %12346 = vmatprep.subr.msk.bf16.mxu0 %vm23481_vm3, %v12344_v3  ;;  %vm23493_vm5 = vcmask 1014784   ;;  %v23523_v3 = vld [vmem:[#allocation13_spill] sm:$0xff] }
 0x8e9   : > { %v8192_v39 = vsel %vm23482_vm4, %v13127_v51, %v13131_v37  ;;  %v8193_v0 = vsel %vm23469_vm1, %v13131_v37, %v13132_v29  ;;  %vm23496_vm4 = vmmov %vm23493_vm5 }
 0x8ea   : > { %v12356_v36 = vpack.c.bf16 %v8193_v0, %v19852_v1  ;;  %v12359_v11 = vpack.c.bf16 %v8192_v39, %v19820_v23  ;;  %v23494_v23 = vld [vmem:[#allocation90_spill] sm:$0xff]  ;;  %v23510_v1 = vmax.f32 %v23509_v56, 0.0 }
 0x8eb   : > { %10842 = vmatpush1.msk.msra.mxu1 %vm23486_vm2, %v7895_v7  ;;  %12349 = vmatpush1.bf16.msk.msra.mxu0 %vm23488_vm12, %v12347_v33  ;;  %v7862_v6 = vpop.permute.xlu1 %7861  ;;  %vm23495_vm3 = vnez %v23494_v23  ;;  %v23497_v7 = vld [vmem:[#allocation117_spill] sm:$0xff]  ;;  %vm23500_vm2 = vnez %v23499_v49  ;;  %vm23502_vm12 = vnez %v23501_v59  ;;  %v23535_v33 = vld [vmem:[#allocation140_spill] sm:$0xff]  ;;  %v23537_v0 = vld [vmem:[#allocation118_spill] sm:$0xff] }
 0x8ec   : > { %10843 = vmatmul.mubr.msk.f32.vlgmr.msra.gmra.mrb[58].mxu1 %vm23472_vm14, %v19693_v4  ;;  %12352 = vmatprep.subr.msk.bf16.mxu0 %vm23490_vm10, %v12350_v53  ;;  %v7898_v52 = vsel %vm23493_vm5, %v7860_v16, %v7862_v6  ;;  %vm23498_vm1 = vnez %v23497_v7  ;;  %vm23506_vm14 = vnez %v23505_v40  ;;  %vm23508_vm10 = vnez %v23507_v48  ;;  %v23546_v23 = vld [vmem:[#allocation82_spill] sm:$0xff] }
 0x8ed   : > { %v7864_v43 = vpop.permute.xlu0 %7863  ;;  %12364 = vmatprep.subr.msk.bf16.mxu1 %vm23495_vm3, %v12356_v36  ;;  %9233 = vmatprep.mubr.f32.mxu1 %v21567_v15  ;;  %v12368_v5 = vpack.c.bf16 %v19855_v27, %v7898_v52  ;;  %v12377_v18 = vpack.c.bf16 %v7898_v52, %v23510_v1  ;;  %vm23512_vm5 = vcmp.lt.s32.totalorder %v23511_v34, 62  ;;  %v23536_v39 = vmax.f32 %v23535_v33, 0.0  ;;  %v23550_v7 = vld [vmem:[#allocation146_spill] sm:$0xff]  ;;  %v23558_v1 = vld [vmem:[#allocation143_spill] sm:$0xff] }
 0x8ee   : > { %v7899_v62 = vsel %vm23496_vm4, %v7862_v6, %v7864_v43  ;;  %12367 = vmatpush1.bf16.msk.msra.mxu1 %vm23498_vm1, %v12359_v11  ;;  %vm23516_vm4 = vcmp.lt.s32.totalorder %v23515_v19, 62  ;;  %v23551_v49 = vmax.f32 %v23550_v7, 0.0 }
 0x8ef   : > { %12355 = vmatpush1.bf16.msk.msra.mxu0 %vm23500_vm2, %v12353_v45  ;;  %12370 = vmatprep.subr.msk.bf16.mxu1 %vm23502_vm12, %v12368_v5  ;;  %v12374_v30 = vpack.c.bf16 %v7899_v62, %v23504_v10  ;;  %vm23518_vm2 = vcmask 1014784   ;;  %vm23519_vm12 = vcmask 1031168   ;;  %v23548_v5 = vld [vmem:[#allocation31_spill] sm:$0xff] }
 0x8f0   : > { %12358 = vmatprep.subr.msk.bf16.mxu0 %vm23474_vm6, %v12356_v36  ;;  %vm23514_vm6 = vnez %v23513_v28 }
 0x8f2   : > { %12373 = vmatpush1.bf16.msk.msra.mxu1 %vm23506_vm14, %v12371_v20  ;;  %vm23520_vm14 = vmmov %vm23519_vm12 }
 0x8f3   : > { %12361 = vmatpush1.bf16.msk.msra.mxu0 %vm23477_vm0, %v12359_v11  ;;  %12376 = vmatprep.subr.msk.bf16.mxu1 %vm23508_vm10, %v12374_v30  ;;  %vm23517_vm0 = vcmask 588800   ;;  %vm23524_vm10 = vcmp.lt.s32.totalorder %v23523_v3, 62  ;;  %v23554_v30 = vld [vmem:[#allocation83_spill] sm:$0xff] }
 0x8f4   : > { %10854 = vmatprep.subr.msk.mxu0 %vm23512_vm5, %v7898_v52  ;;  %v7866_v42 = vpop.permute.xlu0 %7865  ;;  %vm23526_vm5 = vnez %v23525_v8  ;;  %v23567_v3 = vld [vmem:[#allocation91_spill] sm:$0xff] }
 0x8f5   : > { %v7900_v57 = vsel %vm23518_vm2, %v7864_v43, %v7866_v42 }
 0x8f6   : > { %v13135_v54 = vpop.permute.xlu1 %13134  ;;  %12379 = vmatpush1.bf16.msk.msra.mxu1 %vm23514_vm6, %v12377_v18  ;;  %v12392_v55 = vpack.c.bf16 %v19923_v24, %v7900_v57  ;;  %vm23528_vm6 = vcmp.lt.s32.totalorder %v23527_v61, 62  ;;  %v23559_v18 = vmax.f32 %v23558_v1, 0.0 }
 0x8f7   : > { %v13137_v47 = vunpack.i.h.bf16 %v13135_v54  ;;  %v13136_v51 = vunpack.i.l.bf16 %v13135_v54  ;;  %10855 = vmatpush1.msk.msra.mxu0 %vm23516_vm4, %v7897_v58  ;;  %v23529_v58 = vld [vmem:[#allocation95_spill] sm:$0xff]  ;;  %vm23531_vm4 = vmmov %vm23517_vm0 }
 0x8f8   : > { %10856 = vmatmul.mubr.msk.f32.vlgmr.msra.gmra.mrb[60].mxu0 %vm23517_vm0, %v19693_v4  ;;  %vm23538_vm0 = vnez %v23537_v0 }
 0x8f9   : > { %v8194_v9 = vsel %vm23519_vm12, %v13132_v29, %v13136_v51  ;;  %v8195_v35 = vsel %vm23520_vm14, %v13136_v51, %v13137_v47  ;;  %9304 = vmatprep.mubr.f32.mxu0 %v21567_v15  ;;  %vm23541_vm14 = vmmov %vm23519_vm12 }
 0x8fa   : > { %v12380_v60 = vpack.c.bf16 %v8195_v35, %v19887_v31  ;;  %v12383_v25 = vpack.c.bf16 %v8194_v9, %v19855_v27  ;;  %v12395_v27 = vpack.c.bf16 %v19887_v31, %v7899_v62  ;;  %v12401_v31 = vpack.c.bf16 %v7900_v57, %v23536_v39  ;;  %v23563_v35 = vld [vmem:[#allocation53_spill] sm:$0xff] }
 0x8fc   : > { %12382 = vmatprep.subr.msk.bf16.mxu1 %vm23495_vm3, %v12380_v60  ;;  %12388 = vmatprep.subr.msk.bf16.mxu0 %vm19094_vm11, %v12380_v60  ;;  %vm23530_vm3 = vnez %v23529_v58 }
 0x8fd   : > { %12385 = vmatpush1.bf16.msk.msra.mxu1 %vm23498_vm1, %v12383_v25  ;;  %12391 = vmatpush1.bf16.msk.msra.mxu0 %vm19103_vm8, %v12383_v25  ;;  %vm23532_vm1 = vmmov %vm23518_vm2  ;;  %vm23540_vm2 = vnez %v23539_v63 }
 0x8fe   : > { %10867 = vmatprep.subr.msk.mxu1 %vm23524_vm10, %v7900_v57  ;;  %12394 = vmatprep.subr.msk.bf16.mxu0 %vm23526_vm5, %v12392_v55  ;;  %vm23542_vm10 = vmmov %vm23532_vm1 }
 0x8ff   : > { %vm23544_vm5 = vmmov %vm23532_vm1 }
 0x901   : > { %10868 = vmatpush1.msk.msra.mxu1 %vm23528_vm6, %v7899_v62  ;;  %12397 = vmatpush1.bf16.msk.msra.mxu0 %vm23530_vm3, %v12395_v27  ;;  %vm23547_vm6 = vcmp.lt.s32.totalorder %v23546_v23, 62  ;;  %vm23549_vm3 = vnez %v23548_v5 }
 0x902   : > { %10869 = vmatmul.mubr.msk.f32.vlgmr.msra.gmra.mrb[60].mxu1 %vm23531_vm4, %v19693_v4 }
 0x903   : > { %9375 = vmatprep.mubr.f32.mxu1 %v21567_v15 }
 0x915   : > { %v7868_v29 = vpop.permute.xlu0 %7867 }
 0x916   : > { %v7901_v37 = vsel %vm23532_vm1, %v7866_v42, %v7868_v29 }
 0x917   : > { %v12398_v22 = vpack.c.bf16 %v7901_v37, %v23534_v50  ;;  %v12419_v62 = vpack.c.bf16 %v19969_v21, %v7901_v37 }
 0x919   : > { %12400 = vmatprep.subr.msk.bf16.mxu0 %vm23538_vm0, %v12398_v22  ;;  %v8001_v32 = vpop.permute.xlu0 %8000 }
 0x91a   : > { %v13140_v13 = vpop.permute.xlu1 %13139  ;;  %12403 = vmatpush1.bf16.msk.msra.mxu0 %vm23540_vm2, %v12401_v31 }
 0x91b   : > { %v13142_v53 = vunpack.i.h.bf16 %v13140_v13  ;;  %v13141_v36 = vunpack.i.l.bf16 %v13140_v13 }
 0x91d   : > { %v8196_v15 = vsel %vm23519_vm12, %v13137_v47, %v13141_v36  ;;  %v8197_v11 = vsel %vm23541_vm14, %v13141_v36, %v13142_v53  ;;  %v23561_v47 = vld [vmem:[#allocation35_spill] sm:$0xff] }
 0x91e   : > { %v12404_v41 = vpack.c.bf16 %v8197_v11, %v19969_v21  ;;  %v12407_v38 = vpack.c.bf16 %v8196_v15, %v19923_v24  ;;  %v7870_v6 = vpop.permute.xlu1 %7869  ;;  %vm23562_vm0 = vnez %v23561_v47 }
 0x91f   : > { %v7902_v2 = vsel %vm23542_vm10, %v7868_v29, %v7870_v6  ;;  %v8002_v52 = vsel %vm23544_vm5, %v7870_v6, %v8001_v32 }
 0x920   : > { %v12416_v44 = vpack.c.bf16 %v19980_v14, %v7902_v2  ;;  %12406 = vmatprep.subr.msk.bf16.mxu0 %vm19094_vm11, %v12404_v41  ;;  %12412 = vmatprep.subr.msk.bf16.mxu1 %vm19169_vm15, %v12404_v41  ;;  %v12422_v20 = vpack.c.bf16 %v8002_v52, %v23551_v49  ;;  %vm23553_vm11 = vmmov %vm23519_vm12  ;;  %v12425_v34 = vpack.c.bf16 %v7902_v2, %v23559_v18 }
 0x921   : > { %12409 = vmatpush1.bf16.msk.msra.mxu0 %vm19103_vm8, %v12407_v38  ;;  %12415 = vmatpush1.bf16.msk.msra.mxu1 %vm19183_vm7, %v12407_v38  ;;  %vm23555_vm8 = vcmp.lt.s32.totalorder %v23554_v30, 62  ;;  %vm23560_vm1 = vmmov %vm23553_vm11 }
 0x922   : > { %v8231_v24 = vpop.permute.xlu1 %8230  ;;  %10880 = vmatprep.subr.msk.mxu0 %vm23547_vm6, %v7902_v2  ;;  %12418 = vmatprep.subr.msk.bf16.mxu1 %vm23549_vm3, %v12416_v44  ;;  %vm23570_vm2 = vmmov %vm23560_vm1 }
 0x923   : > { %v8233_v10 = vsel %vm23553_vm11, %v8231_v24, %v23552_v12  ;;  %v8232_v54 = vsel %vm23560_vm1, %v13142_v53, %v8231_v24  ;;  %vm23571_vm12 = vmmov %vm23560_vm1 }
 0x924   : > { %v12428_v28 = vpack.c.bf16 %v8233_v10, %v19983_v46  ;;  %v12431_v19 = vpack.c.bf16 %v8232_v54, %v19980_v14  ;;  %vm23572_vm14 = vmmov %vm23560_vm1 }
 0x925   : > { %v8312_v59 = vpop.f32.mrb[48].mxu0  ;;  %10881 = vmatpush1.msk.msra.mxu0 %vm23555_vm8, %v7901_v37  ;;  %12421 = vmatpush1.bf16.msk.msra.mxu1 %vm19213_vm9, %v12419_v62  ;;  %vm23564_vm9 = vmmov %vm23544_vm5 }
 0x926   : > { %v8314_v48 = vpop.f32.mrb[49].mxu0  ;;  %10882 = vmatmul.mubr.msk.f32.vlgmr.msra.gmra.mrb[62].mxu0 %vm23531_vm4, %v19693_v4  ;;  %12424 = vmatprep.subr.msk.bf16.mxu1 %vm19221_vm13, %v12422_v20  ;;  %v8068_v60 = vsel %vm23564_vm9, %v8001_v32, %v23563_v35  ;;  %vm23569_vm13 = vmmov %vm23531_vm4 }
 0x927   : > { %v8383_v21 = vpop.f32.mrb[48].mxu1  ;;  %vm23573_vm10 = vmmov %vm23560_vm1 }
 0x928   : > { %v8385_v42 = vpop.f32.mrb[49].mxu1  ;;  %vm23574_vm5 = vmmov %vm23560_vm1 }
 0x929   : > { %12427 = vmatpush1.bf16.msk.msra.mxu1 %vm23562_vm0, %v12425_v34  ;;  %vm23575_vm6 = vmmov %vm23560_vm1 }
 0x92a   : > { %v20276_v51 = vpop.permute.xlu0 %8240  ;;  %12430 = vmatprep.subr.msk.bf16.mxu1 %vm19169_vm15, %v12428_v28  ;;  %vm23566_vm15 = vcmp.lt.s32.totalorder %v23565_v17, 62  ;;  %vm23576_vm3 = vmmov %vm23560_vm1 }
 0x92b   : > { %v20282_v57 = vadd.f32 %v8314_v48, %v20276_v51  ;;  %v20285_v9 = vadd.f32 %v8312_v59, %v20276_v51  ;;  %v20291_v25 = vadd.f32 %v8385_v42, %v20276_v51  ;;  %v20297_v14 = vadd.f32 %v8383_v21, %v20276_v51  ;;  %vm23577_vm11 = vmmov %vm23560_vm1 }
 0x92c   : > { %vm23578_vm8 = vmmov %vm23560_vm1 }
 0x92d   : > { %v9383_v46 = vmax.f32 %v20282_v57, 0.0  ;;  %12433 = vmatpush1.bf16.msk.msra.mxu1 %vm19183_vm7, %v12431_v19  ;;  %v9382_v55 = vmax.f32 %v20285_v9, 0.0  ;;  %v9385_v16 = vmax.f32 %v20291_v25, 0.0  ;;  %vm23568_vm7 = vcmp.lt.s32.totalorder %v23567_v3, 62  ;;  %v9737_v57 = vld [vmem:[#allocation2 + $0x108] sm:$0xff]  ;;  %v9640_v9 = vld [vmem:[#allocation2 + $0x10] sm:$0xff]  ;;  %vm23579_vm4 = vmmov %vm23560_vm1 }
 0x92e   : > { %10893 = vmatprep.subr.msk.mxu1 %vm23566_vm15, %v8068_v60  ;;  %v9384_v8 = vmax.f32 %v20297_v14, 0.0  ;;  %vm23581_vm0 = vmmov %vm23560_vm1 }
 0x92f   : > { %9448 = vrot.lane.b32.xlu0 %v9383_v46, %s13274_s12  ;;  %9446 = vrot.lane.b32.xlu1 %v9382_v55, %s13274_s12  ;;  %vm23584_vm9 = vmmov %vm23581_vm0 }
 0x930   : > { %vm23585_vm15 = vmmov %vm23581_vm0 }
 0x931   : > { %10894 = vmatpush1.msk.msra.mxu1 %vm23568_vm7, %v8002_v52  ;;  %vm23588_vm7 = vmmov %vm23581_vm0 }
 0x932   : > { %10895 = vmatmul.mubr.msk.f32.vlgmr.msra.gmra.mrb[62].mxu1 %vm23569_vm13, %v19693_v4  ;;  %vm23589_vm13 = vmmov %vm23581_vm0 }
 0x933   : > { %9452 = vrot.lane.b32.xlu0 %v9385_v16, %s13274_s12  ;;  %9450 = vrot.lane.b32.xlu1 %v9384_v8, %s13274_s12 }
 0x937   : > { %v8454_v27 = vpop.f32.mrb[50].mxu0 }
 0x938   : > { %v20320_v61 = vadd.f32 %v8454_v27, %v20276_v51  ;;  %v8456_v58 = vpop.f32.mrb[51].mxu0 }
 0x939   : > { %v20323_v29 = vadd.f32 %v8456_v58, %v20276_v51 }
 0x93a   : > { %v9386_v37 = vmax.f32 %v20320_v61, 0.0 }
 0x93b   : > { %v9387_v4 = vmax.f32 %v20323_v29, 0.0  ;;  %v8525_v26 = vpop.f32.mrb[50].mxu1 }
 0x93c   : > { %v20328_v50 = vadd.f32 %v8525_v26, %v20276_v51  ;;  %v8527_v22 = vpop.f32.mrb[51].mxu1  ;;  %9454 = vrot.lane.b32.xlu1 %v9386_v37, %s13274_s12 }
 0x93d   : > { %v20334_v33 = vadd.f32 %v8527_v22, %v20276_v51  ;;  %9456 = vrot.lane.b32.xlu0 %v9387_v4, %s13274_s12 }
 0x93e   : > { %v9388_v39 = vmax.f32 %v20328_v50, 0.0 }
 0x93f   : > { %v9389_v31 = vmax.f32 %v20334_v33, 0.0 }
 0x940   : > { %9458 = vrot.lane.b32.xlu1 %v9388_v39, %s13274_s12 }
 0x941   : > { %9460 = vrot.lane.b32.xlu0 %v9389_v31, %s13274_s12 }
 0x94b   : > { %v8596_v0 = vpop.f32.mrb[52].mxu0 }
 0x94c   : > { %v20348_v13 = vadd.f32 %v8596_v0, %v20276_v51  ;;  %v8598_v63 = vpop.f32.mrb[53].mxu0 }
 0x94d   : > { %v20351_v53 = vadd.f32 %v8598_v63, %v20276_v51 }
 0x94e   : > { %v9390_v36 = vmax.f32 %v20348_v13, 0.0 }
 0x94f   : > { %v21487_v15 = vmax.f32 %v20351_v53, 0.0 }
 0x950   : > { %9462 = vrot.lane.b32.xlu1 %v9390_v36, %s13274_s12 }
 0x951   : > { %9464 = vrot.lane.b32.xlu0 %v21487_v15, %s13274_s12 }
 0x952   : > { %v8667_v11 = vpop.f32.mrb[52].mxu1 }
 0x953   : > { %v20362_v41 = vadd.f32 %v8667_v11, %v20276_v51  ;;  %v8669_v38 = vpop.f32.mrb[53].mxu1 }
 0x954   : > { %v20365_v6 = vadd.f32 %v8669_v38, %v20276_v51 }
 0x955   : > { %v21486_v2 = vmax.f32 %v20362_v41, 0.0 }
 0x956   : > { %v21485_v32 = vmax.f32 %v20365_v6, 0.0 }
 0x957   : > { %9466 = vrot.lane.b32.xlu1 %v21486_v2, %s13274_s12 }
 0x958   : > { %9468 = vrot.lane.b32.xlu0 %v21485_v32, %s13274_s12 }
 0x960   : > { %v8738_v44 = vpop.f32.mrb[54].mxu0 }
 0x961   : > { %v20376_v45 = vadd.f32 %v8738_v44, %v20276_v51  ;;  %v8740_v52 = vpop.f32.mrb[55].mxu0 }
 0x962   : > { %v20379_v43 = vadd.f32 %v8740_v52, %v20276_v51 }
 0x963   : > { %v21484_v24 = vmax.f32 %v20376_v45, 0.0 }
 0x964   : > { %v21483_v23 = vmax.f32 %v20379_v43, 0.0 }
 0x965   : > { %9470 = vrot.lane.b32.xlu1 %v21484_v24, %s13274_s12 }
 0x966   : > { %9472 = vrot.lane.b32.xlu0 %v21483_v23, %s13274_s12 }
 0x980   : > { %v8809_v5 = vpop.f32.mrb[54].mxu1 }
 0x981   : > { %v20390_v62 = vadd.f32 %v8809_v5, %v20276_v51  ;;  %v8811_v7 = vpop.f32.mrb[55].mxu1 }
 0x982   : > { %v20393_v49 = vadd.f32 %v8811_v7, %v20276_v51 }
 0x983   : > { %v21482_v20 = vmax.f32 %v20390_v62, 0.0 }
 0x984   : > { %v21481_v59 = vmax.f32 %v20393_v49, 0.0 }
 0x985   : > { %9474 = vrot.lane.b32.xlu1 %v21482_v20, %s13274_s12  ;;  %v9836_v20 = vld [vmem:[#allocation2 + $0x210] sm:$0xff] }
 0x986   : > { %9476 = vrot.lane.b32.xlu0 %v21481_v59, %s13274_s12  ;;  %v9736_v59 = vld [vmem:[#allocation2 + $0x100] sm:$0xff] }
 0x98f   : > { %v8880_v12 = vpop.f32.mrb[56].mxu0 }
 0x990   : > { %v20404_v10 = vadd.f32 %v8880_v12, %v20276_v51  ;;  %v8882_v30 = vpop.f32.mrb[57].mxu0 }
 0x991   : > { %v20407_v40 = vadd.f32 %v8882_v30, %v20276_v51 }
 0x992   : > { %v21480_v48 = vmax.f32 %v20404_v10, 0.0 }
 0x993   : > { %v21479_v56 = vmax.f32 %v20407_v40, 0.0 }
 0x994   : > { %9478 = vrot.lane.b32.xlu1 %v21480_v48, %s13274_s12 }
 0x995   : > { %9480 = vrot.lane.b32.xlu0 %v21479_v56, %s13274_s12 }
 0x9a9   : > { %v8951_v21 = vpop.f32.mrb[56].mxu1 }
 0x9aa   : > { %v20418_v1 = vadd.f32 %v8951_v21, %v20276_v51  ;;  %v8953_v18 = vpop.f32.mrb[57].mxu1 }
 0x9ab   : > { %v20422_v42 = vadd.f32 %v8953_v18, %v20276_v51 }
 0x9ac   : > { %v21478_v34 = vmax.f32 %v20418_v1, 0.0 }
 0x9ad   : > { %v21477_v54 = vmax.f32 %v20422_v42, 0.0 }
 0x9ae   : > { %9482 = vrot.lane.b32.xlu1 %v21478_v34, %s13274_s12 }
 0x9af   : > { %9484 = vrot.lane.b32.xlu0 %v21477_v54, %s13274_s12 }
 0x9b5   : > { %v9022_v28 = vpop.f32.mrb[58].mxu0 }
 0x9b6   : > { %v9024_v47 = vpop.f32.mrb[59].mxu0  ;;  %v20432_v19 = vadd.f32 %v9022_v28, %v20276_v51 }
 0x9b7   : > { %v20435_v35 = vadd.f32 %v9024_v47, %v20276_v51 }
 0x9b8   : > { %v21475_v60 = vmax.f32 %v20432_v19, 0.0 }
 0x9b9   : > { %v21473_v17 = vmax.f32 %v20435_v35, 0.0 }
 0x9ba   : > { %9486 = vrot.lane.b32.xlu1 %v21475_v60, %s13274_s12 }
 0x9bb   : > { %9488 = vrot.lane.b32.xlu0 %v21473_v17, %s13274_s12 }
 0x9bf   : > { %v9093_v3 = vpop.f32.mrb[58].mxu1 }
 0x9c0   : > { %v20446_v27 = vadd.f32 %v9093_v3, %v20276_v51  ;;  %v9095_v58 = vpop.f32.mrb[59].mxu1 }
 0x9c1   : > { %v20449_v26 = vadd.f32 %v9095_v58, %v20276_v51 }
 0x9c2   : > { %v21472_v22 = vmax.f32 %v20446_v27, 0.0 }
 0x9c3   : > { %v21471_v0 = vmax.f32 %v20449_v26, 0.0 }
 0x9c4   : > { %9490 = vrot.lane.b32.xlu1 %v21472_v22, %s13274_s12 }
 0x9c5   : > { %9492 = vrot.lane.b32.xlu0 %v21471_v0, %s13274_s12 }
 0x9cb   : > { %v9164_v63 = vpop.f32.mrb[60].mxu0 }
 0x9cc   : > { %v20460_v11 = vadd.f32 %v9164_v63, %v20276_v51  ;;  %v9166_v38 = vpop.f32.mrb[61].mxu0 }
 0x9cd   : > { %v20464_v52 = vadd.f32 %v9166_v38, %v20276_v51 }
 0x9ce   : > { %v21470_v44 = vmax.f32 %v20460_v11, 0.0 }
 0x9cf   : > { %v21467_v5 = vmax.f32 %v20464_v52, 0.0 }
 0x9d0   : > { %9494 = vrot.lane.b32.xlu1 %v21470_v44, %s13274_s12 }
 0x9d1   : > { %9496 = vrot.lane.b32.xlu0 %v21467_v5, %s13274_s12 }
 0x9d5   : > { %v9235_v7 = vpop.f32.mrb[60].mxu1 }
 0x9d6   : > { %v20474_v12 = vadd.f32 %v9235_v7, %v20276_v51  ;;  %v9237_v30 = vpop.f32.mrb[61].mxu1 }
 0x9d7   : > { %v20477_v21 = vadd.f32 %v9237_v30, %v20276_v51 }
 0x9d8   : > { %v21466_v18 = vmax.f32 %v20474_v12, 0.0 }
 0x9d9   : > { %v21465_v28 = vmax.f32 %v20477_v21, 0.0 }
 0x9da   : > { %9498 = vrot.lane.b32.xlu1 %v21466_v18, %s13274_s12 }
 0x9db   : > { %9500 = vrot.lane.b32.xlu0 %v21465_v28, %s13274_s12 }
 0x9f9   : > { %v9306_v47 = vpop.f32.mrb[62].mxu0 }
 0x9fa   : > { %v20488_v3 = vadd.f32 %v9306_v47, %v20276_v51  ;;  %v9308_v58 = vpop.f32.mrb[63].mxu0 }
 0x9fb   : > { %v20491_v63 = vadd.f32 %v9308_v58, %v20276_v51 }
 0x9fc   : > { %v21469_v38 = vmax.f32 %v20488_v3, 0.0 }
 0x9fd   : > { %v21468_v7 = vmax.f32 %v20491_v63, 0.0 }
 0x9fe   : > { %9502 = vrot.lane.b32.xlu1 %v21469_v38, %s13274_s12  ;;  %v9449_v38 = vpop.permute.xlu0 %9448 }
 0x9ff   : > { %9504 = vrot.lane.b32.xlu0 %v21468_v7, %s13274_s12  ;;  %v9447_v7 = vpop.permute.xlu1 %9446 }
 0xa00   : > { %v9510_v22 = vsel %vm23572_vm14, %v9447_v7, %v9449_v38  ;;  %v9638_v7 = vld [vmem:[#allocation2] sm:$0xff]  ;;  %vm23596_vm14 = vmmov %vm23581_vm0 }
 0xa01   : > { %v9574_v54 = vmax.f32 %v9382_v55, %v9510_v22 }
 0xa02   : > { %v9453_v44 = vpop.permute.xlu0 %9452 }
 0xa05   : > { %v9377_v30 = vpop.f32.mrb[62].mxu1 }
 0xa06   : > { %v20502_v47 = vadd.f32 %v9377_v30, %v20276_v51  ;;  %v9379_v28 = vpop.f32.mrb[63].mxu1  ;;  %v9451_v30 = vpop.permute.xlu1 %9450 }
 0xa07   : > { %v20505_v58 = vadd.f32 %v9379_v28, %v20276_v51  ;;  %v9511_v51 = vsel %vm23570_vm2, %v9449_v38, %v9451_v30  ;;  %v9512_v28 = vsel %vm23571_vm12, %v9451_v30, %v9453_v44  ;;  %vm23592_vm2 = vmmov %vm23581_vm0 }
 0xa08   : > { %v21474_v18 = vmax.f32 %v20502_v47, 0.0  ;;  %v9576_v60 = vmax.f32 %v9384_v8, %v9512_v28  ;;  %vm23593_vm12 = vmmov %vm23581_vm0 }
 0xa09   : > { %v21476_v5 = vmax.f32 %v20505_v58, 0.0 }
 0xa0a   : > { %9506 = vrot.lane.b32.xlu1 %v21474_v18, %s13274_s12  ;;  %v9455_v0 = vpop.permute.xlu1 %9454  ;;  %v9575_v18 = vmax.f32 %v9383_v46, %v9511_v51  ;;  %v9834_v46 = vld [vmem:[#allocation2 + $0x200] sm:$0xff]  ;;  %v9835_v51 = vld [vmem:[#allocation2 + $0x208] sm:$0xff] }
 0xa0b   : > { %9508 = vrot.lane.b32.xlu0 %v21476_v5, %s13274_s12  ;;  %v9513_v17 = vsel %vm23573_vm10, %v9453_v44, %v9455_v0  ;;  %v9457_v5 = vpop.permute.xlu0 %9456  ;;  %v9639_v44 = vld [vmem:[#allocation2 + $0x8] sm:$0xff]  ;;  %vm23597_vm10 = vmmov %vm23581_vm0  ;;  %s392_s12 = sand.u32 1, %s13260_s18  }
 0xa0c   : > { %v9577_v34 = vmax.f32 %v9385_v16, %v9513_v17  ;;  %v9514_v56 = vsel %vm23574_vm5, %v9455_v0, %v9457_v5  ;;  %v9606_v30 = vmax.f32 %v9574_v54, %v9575_v18  ;;  %v9607_v48 = vmax.f32 %v9575_v18, %v9576_v60  ;;  %v9738_v17 = vld [vmem:[#allocation2 + $0x110] sm:$0xff]  ;;  %vm23600_vm5 = vmmov %vm23581_vm0  ;;  %s393_s29 = scalar_lea.vmem [#allocation5], %s392_s12  ;;  %s9947_s14 = scalar_lea.sflag [#allocation4], %s392_s12 }
 0xa0d   : > { %v9578_v8 = vmax.f32 %v9386_v37, %v9514_v56  ;;  %v9641_v37 = vld [vmem:[#allocation2 + $0x18] sm:$0xff]  ;;  %s9959_s15 = sshll.u32 %s393_s29, 4  ;;  %s20622_s15 = int_to_ptr.vmem [resolvable:$true] %s9959_s15 }
 0xa0e   : > { %v9459_v38 = vpop.permute.xlu1 %9458  ;;  %v9608_v14 = vmax.f32 %v9576_v60, %v9577_v34  ;;  %v9670_v25 = vmul.f32 %v9638_v7, %v9606_v30  ;;  %v9671_v16 = vmul.f32 %v9639_v44, %v9607_v48  ;;  %v9768_v54 = vmul.f32 %v9736_v59, %v9606_v30  ;;  %v9739_v44 = vld [vmem:[#allocation2 + $0x118] sm:$0xff]  ;;  %s13202_s13 = scalar_lea.vmem %s20622_s15, 16  ;;  %p13209_p2 = scmp.lt.s32.totalorder %s20622_s15, %s13207_s22 }
 0xa0f   : > { %v9515_v55 = vsel %vm23575_vm6, %v9457_v5, %v9459_v38  ;;  %v9461_v22 = vpop.permute.xlu0 %9460  ;;  %v9769_v0 = vmul.f32 %v9737_v57, %v9607_v48  ;;  %v9866_v18 = vmul.f32 %v9834_v46, %v9606_v30  ;;  %v9867_v28 = vmul.f32 %v9835_v51, %v9607_v48  ;;  %v9837_v59 = vld [vmem:[#allocation2 + $0x218] sm:$0xff]  ;;  %vm23601_vm6 = vmmov %vm23581_vm0  ;;  %p13203_p6 = scmp.ne.s32.totalorder %s20622_s15, %s13202_s13  ;;  %p13210_p3 = scmp.lt.s32.totalorder %s13208_s24, %s13202_s13 }
 0xa10   : > { %v9672_v23 = vmul.f32 %v9640_v9, %v9608_v14  ;;  %v9609_v24 = vmax.f32 %v9577_v34, %v9578_v8  ;;  %v9579_v60 = vmax.f32 %v9387_v4, %v9515_v55  ;;  %v9770_v61 = vmul.f32 %v9738_v17, %v9608_v14  ;;  %v9642_v9 = vld [vmem:[#allocation2 + $0x20] sm:$0xff] }
 0xa11   : > { %v9516_v56 = vsel %vm23576_vm3, %v9459_v38, %v9461_v22  ;;  %v9702_v5 = vadd.f32 %v9671_v16, %v9670_v25  ;;  %v9868_v7 = vmul.f32 %v9836_v20, %v9608_v14  ;;  %v9800_v2 = vadd.f32 %v9769_v0, %v9768_v54  ;;  %v9740_v25 = vld [vmem:[#allocation2 + $0x120] sm:$0xff]  ;;  %vm23604_vm3 = vmmov %vm23581_vm0  ;;  %p13204_p10 = pnand %p13203_p6, %p23624_p9  ;;  %p13211_p4 = por %p13210_p3, %p13209_p2 }
 0xa12   : > { %v9463_v32 = vpop.permute.xlu1 %9462  ;;  %v9898_v15 = vadd.f32 %v9867_v28, %v9866_v18  ;;  %v9673_v57 = vmul.f32 %v9641_v37, %v9609_v24  ;;  %v9610_v46 = vmax.f32 %v9578_v8, %v9579_v60  ;;  %v9580_v29 = vmax.f32 %v9388_v39, %v9516_v56  ;;  %v9838_v16 = vld [vmem:[#allocation2 + $0x220] sm:$0xff]  ;;  %v9643_v39 = vld [vmem:[#allocation2 + $0x28] sm:$0xff]  ;;  %v9742_v56 = vld [vmem:[#allocation2 + $0x130] sm:$0xff] }
 0xa13   : > { %v9517_v30 = vsel %vm23577_vm11, %v9461_v22, %v9463_v32  ;;  %v9703_v48 = vadd.f32 %v9702_v5, %v9672_v23  ;;  %v9465_v4 = vpop.permute.xlu0 %9464  ;;  %v9801_v34 = vadd.f32 %v9800_v2, %v9770_v61  ;;  %v9771_v51 = vmul.f32 %v9739_v44, %v9609_v24  ;;  %v9839_v28 = vld [vmem:[#allocation2 + $0x228] sm:$0xff]  ;;  %v9644_v61 = vld [vmem:[#allocation2 + $0x30] sm:$0xff]  ;;  %vm23605_vm11 = vmmov %vm23581_vm0  ;;  %p13205_p12 = pneg %p13204_p10 }
 0xa14   : > { %v9899_v55 = vadd.f32 %v9898_v15, %v9868_v7  ;;  %v9869_v38 = vmul.f32 %v9837_v59, %v9609_v24  ;;  %v9581_v20 = vmax.f32 %v9389_v31, %v9517_v30  ;;  %v9518_v17 = vsel %vm23578_vm8, %v9463_v32, %v9465_v4  ;;  %v9741_v15 = vld [vmem:[#allocation2 + $0x128] sm:$0xff]  ;;  %v9840_v30 = vld [vmem:[#allocation2 + $0x230] sm:$0xff]  ;;  %vm23608_vm8 = vmmov %vm23581_vm0 }
 0xa15   : > { %v9704_v23 = vadd.f32 %v9703_v48, %v9673_v57  ;;  %v9674_v22 = vmul.f32 %v9642_v9, %v9610_v46  ;;  %v9611_v8 = vmax.f32 %v9579_v60, %v9580_v29  ;;  %v9802_v54 = vadd.f32 %v9801_v34, %v9771_v51  ;;  %p13212_p7 = pnand %p13211_p4, %p13205_p12 }
 0xa16   : > { %v9467_v14 = vpop.permute.xlu1 %9466  ;;  %v9772_v50 = vmul.f32 %v9740_v25, %v9610_v46  ;;  %v9900_v0 = vadd.f32 %v9899_v55, %v9869_v38  ;;  %v9870_v18 = vmul.f32 %v9838_v16, %v9610_v46  ;;  %v9612_v24 = vmax.f32 %v9580_v29, %v9581_v20  ;;  %v9743_v55 = vld [vmem:[#allocation2 + $0x138] sm:$0xff] }
 0xa17   : > { %v9519_v2 = vsel %vm23579_vm4, %v9465_v4, %v9467_v14  ;;  %v9582_v33 = vmax.f32 %v9390_v36, %v9518_v17  ;;  %v9469_v31 = vpop.permute.xlu0 %9468  ;;  %v9705_v37 = vadd.f32 %v9704_v23, %v9674_v22  ;;  %v9675_v32 = vmul.f32 %v9643_v39, %v9611_v8  ;;  %v9645_v4 = vld [vmem:[#allocation2 + $0x38] sm:$0xff]  ;;  %v9646_v22 = vld [vmem:[#allocation2 + $0x40] sm:$0xff]  ;;  %vm23609_vm4 = vmmov %vm23581_vm0 }
 0xa18   : > { %v23580_v60 = vmax.f32 %v20351_v53, 0.0  ;;  %v9803_v44 = vadd.f32 %v9802_v54, %v9772_v50  ;;  %v9773_v59 = vmul.f32 %v9741_v15, %v9611_v8  ;;  %v9520_v48 = vsel %vm23560_vm1, %v9467_v14, %v9469_v31  ;;  %v9841_v23 = vld [vmem:[#allocation2 + $0x238] sm:$0xff]  ;;  %v9744_v50 = vld [vmem:[#allocation2 + $0x140] sm:$0xff]  ;;  %vm23612_vm1 = vmmov %vm23581_vm0 }
 0xa19   : > { %v9901_v57 = vadd.f32 %v9900_v0, %v9870_v18  ;;  %v9871_v46 = vmul.f32 %v9839_v28, %v9611_v8  ;;  %v9676_v29 = vmul.f32 %v9644_v61, %v9612_v24  ;;  %v9613_v13 = vmax.f32 %v9581_v20, %v9582_v33  ;;  %v9842_v15 = vld [vmem:[#allocation2 + $0x240] sm:$0xff] }
 0xa1a   : > { %v9583_v5 = vmax.f32 %v23580_v60, %v9519_v2  ;;  %v9471_v7 = vpop.permute.xlu1 %9470  ;;  %v9774_v36 = vmul.f32 %v9742_v56, %v9612_v24  ;;  %v9706_v51 = vadd.f32 %v9705_v37, %v9675_v32  ;;  %v9872_v9 = vmul.f32 %v9840_v30, %v9612_v24  ;;  %v9647_v37 = vld [vmem:[#allocation2 + $0x48] sm:$0xff] }
 0xa1b   : > { %v9521_v34 = vsel %vm23581_vm0, %v9469_v31, %v9471_v7  ;;  %v23582_v53 = vmax.f32 %v20362_v41, 0.0  ;;  %v9473_v16 = vpop.permute.xlu0 %9472  ;;  %v9804_v17 = vadd.f32 %v9803_v44, %v9773_v59  ;;  %v9902_v14 = vadd.f32 %v9901_v57, %v9871_v46  ;;  %v9745_v44 = vld [vmem:[#allocation2 + $0x148] sm:$0xff] }
 0xa1c   : > { %v9614_v38 = vmax.f32 %v9582_v33, %v9583_v5  ;;  %v9707_v54 = vadd.f32 %v9706_v51, %v9676_v29  ;;  %v9677_v8 = vmul.f32 %v9645_v4, %v9613_v13  ;;  %v23583_v20 = vmax.f32 %v20365_v6, 0.0  ;;  %v9843_v46 = vld [vmem:[#allocation2 + $0x248] sm:$0xff]  ;;  %v9648_v29 = vld [vmem:[#allocation2 + $0x50] sm:$0xff] }
 0xa1d   : > { %v9584_v25 = vmax.f32 %v23582_v53, %v9520_v48  ;;  %v9805_v0 = vadd.f32 %v9804_v17, %v9774_v36  ;;  %v9775_v18 = vmul.f32 %v9743_v55, %v9613_v13  ;;  %v9522_v24 = vsel %vm23584_vm9, %v9471_v7, %v9473_v16  ;;  %v9746_v4 = vld [vmem:[#allocation2 + $0x150] sm:$0xff]  ;;  %vm23615_vm9 = vmmov %vm23581_vm0 }
 0xa1e   : > { %v9585_v39 = vmax.f32 %v23583_v20, %v9521_v34  ;;  %v9475_v2 = vpop.permute.xlu1 %9474  ;;  %v9903_v33 = vadd.f32 %v9902_v14, %v9872_v9  ;;  %v9873_v41 = vmul.f32 %v9841_v23, %v9613_v13  ;;  %v9678_v31 = vmul.f32 %v9646_v22, %v9614_v38  ;;  %v9649_v22 = vld [vmem:[#allocation2 + $0x58] sm:$0xff] }
 0xa1f   : > { %v9615_v28 = vmax.f32 %v9583_v5, %v9584_v25  ;;  %v9776_v61 = vmul.f32 %v9744_v50, %v9614_v38  ;;  %v9523_v32 = vsel %vm23585_vm15, %v9473_v16, %v9475_v2  ;;  %v9708_v56 = vadd.f32 %v9707_v54, %v9677_v8  ;;  %v9477_v48 = vpop.permute.xlu0 %9476  ;;  %v9747_v50 = vld [vmem:[#allocation2 + $0x158] sm:$0xff]  ;;  %vm23617_vm15 = vmmov %vm23581_vm0 }
 0xa20   : > { %v9874_v60 = vmul.f32 %v9842_v15, %v9614_v38  ;;  %v9616_v59 = vmax.f32 %v9584_v25, %v9585_v39  ;;  %v23586_v6 = vmax.f32 %v20376_v45, 0.0  ;;  %v9806_v57 = vadd.f32 %v9805_v0, %v9775_v18  ;;  %v9844_v38 = vld [vmem:[#allocation2 + $0x250] sm:$0xff] }
 0xa21   : > { %v9904_v7 = vadd.f32 %v9903_v33, %v9873_v41  ;;  %v9709_v36 = vadd.f32 %v9708_v56, %v9678_v31  ;;  %v9679_v13 = vmul.f32 %v9647_v37, %v9615_v28  ;;  %v23587_v5 = vmax.f32 %v20379_v43, 0.0  ;;  %v9650_v33 = vld [vmem:[#allocation2 + $0x60] sm:$0xff] }
 0xa22   : > { %v9586_v30 = vmax.f32 %v23586_v6, %v9522_v24  ;;  %v9479_v51 = vpop.permute.xlu1 %9478  ;;  %v9807_v9 = vadd.f32 %v9806_v57, %v9776_v61  ;;  %v9777_v55 = vmul.f32 %v9745_v44, %v9615_v28  ;;  %v9524_v53 = vsel %vm23588_vm7, %v9475_v2, %v9477_v48  ;;  %v9845_v24 = vld [vmem:[#allocation2 + $0x258] sm:$0xff]  ;;  %v9651_v57 = vld [vmem:[#allocation2 + $0x68] sm:$0xff]  ;;  %vm23619_vm7 = vmmov %vm23581_vm0 }
 0xa23   : > { %v9587_v34 = vmax.f32 %v23587_v5, %v9523_v32  ;;  %v9905_v25 = vadd.f32 %v9904_v7, %v9874_v60  ;;  %v9875_v45 = vmul.f32 %v9843_v46, %v9615_v28  ;;  %v9680_v16 = vmul.f32 %v9648_v29, %v9616_v59  ;;  %v9481_v18 = vpop.permute.xlu0 %9480  ;;  %v9748_v28 = vld [vmem:[#allocation2 + $0x160] sm:$0xff] }
 0xa24   : > { %v9617_v17 = vmax.f32 %v9585_v39, %v9586_v30  ;;  %v9778_v23 = vmul.f32 %v9746_v4, %v9616_v59  ;;  %v9525_v14 = vsel %vm23589_vm13, %v9477_v48, %v9479_v51  ;;  %v9710_v54 = vadd.f32 %v9709_v36, %v9679_v13  ;;  %v9846_v60 = vld [vmem:[#allocation2 + $0x260] sm:$0xff]  ;;  %v9749_v36 = vld [vmem:[#allocation2 + $0x168] sm:$0xff]  ;;  %vm23620_vm13 = vmmov %vm23581_vm0 }
 0xa25   : > { %v9876_v8 = vmul.f32 %v9844_v38, %v9616_v59  ;;  %v9618_v20 = vmax.f32 %v9586_v30, %v9587_v34  ;;  %v23590_v43 = vmax.f32 %v20390_v62, 0.0  ;;  %v9808_v15 = vadd.f32 %v9807_v9, %v9777_v55  ;;  %v9847_v55 = vld [vmem:[#allocation2 + $0x268] sm:$0xff]  ;;  %v9652_v38 = vld [vmem:[#allocation2 + $0x70] sm:$0xff] }
 0xa26   : > { %v9906_v2 = vadd.f32 %v9905_v25, %v9875_v45  ;;  %v9711_v41 = vadd.f32 %v9710_v54, %v9680_v16  ;;  %v9681_v31 = vmul.f32 %v9649_v22, %v9617_v17  ;;  %v23591_v39 = vmax.f32 %v20393_v49, 0.0  ;;  %v9483_v37 = vpop.permute.xlu1 %9482  ;;  %v9750_v45 = vld [vmem:[#allocation2 + $0x170] sm:$0xff] }
 0xa27   : > { %v9588_v0 = vmax.f32 %v23590_v43, %v9524_v53  ;;  %v9809_v32 = vadd.f32 %v9808_v15, %v9778_v23  ;;  %v9779_v56 = vmul.f32 %v9747_v50, %v9617_v17  ;;  %v9526_v44 = vsel %vm23592_vm2, %v9479_v51, %v9481_v18  ;;  %v9485_v5 = vpop.permute.xlu0 %9484 }
 0xa28   : > { %v9589_v61 = vmax.f32 %v23591_v39, %v9525_v14  ;;  %v9907_v59 = vadd.f32 %v9906_v2, %v9876_v8  ;;  %v9877_v62 = vmul.f32 %v9845_v24, %v9617_v17  ;;  %v9682_v6 = vmul.f32 %v9650_v33, %v9618_v20  ;;  %v9848_v14 = vld [vmem:[#allocation2 + $0x270] sm:$0xff]  ;;  %v9751_v33 = vld [vmem:[#allocation2 + $0x178] sm:$0xff] }
 0xa29   : > { %v9619_v30 = vmax.f32 %v9587_v34, %v9588_v0  ;;  %v9780_v48 = vmul.f32 %v9748_v28, %v9618_v20  ;;  %v9527_v46 = vsel %vm23593_vm12, %v9481_v18, %v9483_v37  ;;  %v9712_v29 = vadd.f32 %v9711_v41, %v9681_v31  ;;  %v9849_v39 = vld [vmem:[#allocation2 + $0x278] sm:$0xff] }
 0xa2a   : > { %v9878_v7 = vmul.f32 %v9846_v60, %v9618_v20  ;;  %v9620_v13 = vmax.f32 %v9588_v0, %v9589_v61  ;;  %v23594_v49 = vmax.f32 %v20404_v10, 0.0  ;;  %v9810_v9 = vadd.f32 %v9809_v32, %v9779_v56  ;;  %v9653_v0 = vld [vmem:[#allocation2 + $0x78] sm:$0xff]  ;;  %v9654_v32 = vld [vmem:[#allocation2 + $0x80] sm:$0xff] }
 0xa2b   : > { %v9908_v51 = vadd.f32 %v9907_v59, %v9877_v62  ;;  %v9713_v53 = vadd.f32 %v9712_v29, %v9682_v6  ;;  %v9683_v25 = vmul.f32 %v9651_v57, %v9619_v30  ;;  %v23595_v34 = vmax.f32 %v20407_v40, 0.0 }
 0xa2c   : > { %v9590_v4 = vmax.f32 %v23594_v49, %v9526_v44  ;;  %v9487_v17 = vpop.permute.xlu1 %9486  ;;  %v9811_v23 = vadd.f32 %v9810_v9, %v9780_v48  ;;  %v9781_v22 = vmul.f32 %v9749_v36, %v9619_v30  ;;  %v9528_v54 = vsel %vm23596_vm14, %v9483_v37, %v9485_v5  ;;  %v9752_v44 = vld [vmem:[#allocation2 + $0x180] sm:$0xff]  ;;  %v9753_v9 = vld [vmem:[#allocation2 + $0x188] sm:$0xff] }
 0xa2d   : > { %v9591_v16 = vmax.f32 %v23595_v34, %v9527_v46  ;;  %v9909_v8 = vadd.f32 %v9908_v51, %v9878_v7  ;;  %v9879_v10 = vmul.f32 %v9847_v55, %v9619_v30  ;;  %v9684_v50 = vmul.f32 %v9652_v38, %v9620_v13  ;;  %v9489_v31 = vpop.permute.xlu0 %9488  ;;  %v9850_v48 = vld [vmem:[#allocation2 + $0x280] sm:$0xff] }
 0xa2e   : > { %v9621_v20 = vmax.f32 %v9589_v61, %v9590_v4  ;;  %v9782_v43 = vmul.f32 %v9750_v45, %v9620_v13  ;;  %v9529_v18 = vsel %vm23597_vm10, %v9485_v5, %v9487_v17  ;;  %v9714_v15 = vadd.f32 %v9713_v53, %v9683_v25  ;;  %v9851_v25 = vld [vmem:[#allocation2 + $0x288] sm:$0xff]  ;;  %v9656_v45 = vld [vmem:[#allocation2 + $0x90] sm:$0xff] }
 0xa2f   : > { %v9880_v24 = vmul.f32 %v9848_v14, %v9620_v13  ;;  %v9622_v2 = vmax.f32 %v9590_v4, %v9591_v16  ;;  %v23598_v40 = vmax.f32 %v20418_v1, 0.0  ;;  %v9812_v28 = vadd.f32 %v9811_v23, %v9781_v22  ;;  %v9655_v13 = vld [vmem:[#allocation2 + $0x88] sm:$0xff]  ;;  %v9754_v22 = vld [vmem:[#allocation2 + $0x190] sm:$0xff] }
 0xa30   : > { %v9910_v37 = vadd.f32 %v9909_v8, %v9879_v10  ;;  %v9715_v56 = vadd.f32 %v9714_v15, %v9684_v50  ;;  %v9685_v60 = vmul.f32 %v9653_v0, %v9621_v20  ;;  %v23599_v61 = vmax.f32 %v20422_v42, 0.0  ;;  %v9852_v50 = vld [vmem:[#allocation2 + $0x290] sm:$0xff] }
 0xa31   : > { %v9592_v41 = vmax.f32 %v23598_v40, %v9528_v54  ;;  %v9813_v6 = vadd.f32 %v9812_v28, %v9782_v43  ;;  %v9783_v30 = vmul.f32 %v9751_v33, %v9621_v20  ;;  %v9530_v57 = vsel %vm23600_vm5, %v9487_v17, %v9489_v31 }
 0xa32   : > { %v9593_v59 = vmax.f32 %v23599_v61, %v9529_v18  ;;  %v9911_v46 = vadd.f32 %v9910_v37, %v9880_v24  ;;  %v9881_v1 = vmul.f32 %v9849_v39, %v9621_v20  ;;  %v9686_v29 = vmul.f32 %v9654_v32, %v9622_v2  ;;  %v9657_v24 = vld [vmem:[#allocation2 + $0x98] sm:$0xff]  ;;  %v9658_v37 = vld [vmem:[#allocation2 + $0xa0] sm:$0xff] }
 0xa33   : > { %v9623_v7 = vmax.f32 %v9591_v16, %v9592_v41  ;;  %v9784_v36 = vmul.f32 %v9752_v44, %v9622_v2  ;;  %v9716_v4 = vadd.f32 %v9715_v56, %v9685_v60  ;;  %v9882_v5 = vmul.f32 %v9850_v48, %v9622_v2 }
 0xa34   : > { %v9624_v55 = vmax.f32 %v9592_v41, %v9593_v59  ;;  %v23602_v42 = vmax.f32 %v20432_v19, 0.0  ;;  %v9814_v53 = vadd.f32 %v9813_v6, %v9783_v30  ;;  %v9912_v34 = vadd.f32 %v9911_v46, %v9881_v1  ;;  %v9755_v41 = vld [vmem:[#allocation2 + $0x198] sm:$0xff]  ;;  %v9854_v46 = vld [vmem:[#allocation2 + $0x2a0] sm:$0xff] }
 0xa35   : > { %v9717_v17 = vadd.f32 %v9716_v4, %v9686_v29  ;;  %v9687_v23 = vmul.f32 %v9655_v13, %v9623_v7  ;;  %v23603_v16 = vmax.f32 %v20435_v35, 0.0  ;;  %v9785_v10 = vmul.f32 %v9753_v9, %v9623_v7  ;;  %v9757_v9 = vld [vmem:[#allocation2 + $0x1a8] sm:$0xff] }
 0xa36   : > { %v9491_v62 = vpop.permute.xlu1 %9490  ;;  %v9594_v38 = vmax.f32 %v23602_v42, %v9530_v57  ;;  %v9815_v8 = vadd.f32 %v9814_v53, %v9784_v36  ;;  %v9913_v43 = vadd.f32 %v9912_v34, %v9882_v5  ;;  %v9883_v19 = vmul.f32 %v9851_v25, %v9623_v7 }
 0xa37   : > { %v9531_v49 = vsel %vm23601_vm6, %v9489_v31, %v9491_v62  ;;  %v9493_v51 = vpop.permute.xlu0 %9492  ;;  %v9688_v0 = vmul.f32 %v9656_v45, %v9624_v55  ;;  %v9786_v15 = vmul.f32 %v9754_v22, %v9624_v55  ;;  %v9718_v2 = vadd.f32 %v9717_v17, %v9687_v23  ;;  %v9853_v31 = vld [vmem:[#allocation2 + $0x298] sm:$0xff]  ;;  %v9758_v22 = vld [vmem:[#allocation2 + $0x1b0] sm:$0xff] }
 0xa38   : > { %v9595_v14 = vmax.f32 %v23603_v16, %v9531_v49  ;;  %v9532_v20 = vsel %vm23604_vm3, %v9491_v62, %v9493_v51  ;;  %v9625_v18 = vmax.f32 %v9593_v59, %v9594_v38  ;;  %v9884_v40 = vmul.f32 %v9852_v50, %v9624_v55  ;;  %v9756_v62 = vld [vmem:[#allocation2 + $0x1a0] sm:$0xff]  ;;  %v9659_v49 = vld [vmem:[#allocation2 + $0xa8] sm:$0xff] }
 0xa39   : > { %v23606_v28 = vmax.f32 %v20446_v27, 0.0  ;;  %v9816_v32 = vadd.f32 %v9815_v8, %v9785_v10  ;;  %v9914_v60 = vadd.f32 %v9913_v43, %v9883_v19  ;;  %v9719_v44 = vadd.f32 %v9718_v2, %v9688_v0 }
 0xa3a   : > { %v9626_v35 = vmax.f32 %v9594_v38, %v9595_v14  ;;  %v9689_v61 = vmul.f32 %v9657_v24, %v9625_v18  ;;  %v23607_v59 = vmax.f32 %v20449_v26, 0.0  ;;  %v9787_v48 = vmul.f32 %v9755_v41, %v9625_v18  ;;  %v9855_v38 = vld [vmem:[#allocation2 + $0x2a8] sm:$0xff]  ;;  %v9661_v24 = vld [vmem:[#allocation2 + $0xb8] sm:$0xff] }
 0xa3b   : > { %v9596_v39 = vmax.f32 %v23606_v28, %v9532_v20  ;;  %v9817_v30 = vadd.f32 %v9816_v32, %v9786_v15  ;;  %v9885_v57 = vmul.f32 %v9853_v31, %v9625_v18  ;;  %v9915_v29 = vadd.f32 %v9914_v60, %v9884_v40  ;;  %v9857_v40 = vld [vmem:[#allocation2 + $0x2b8] sm:$0xff]  ;;  %v9760_v32 = vld [vmem:[#allocation2 + $0x1c0] sm:$0xff] }
 0xa3c   : > { %v9690_v7 = vmul.f32 %v9658_v37, %v9626_v35  ;;  %v9788_v13 = vmul.f32 %v9756_v62, %v9626_v35  ;;  %v9720_v4 = vadd.f32 %v9719_v44, %v9689_v61  ;;  %v9886_v5 = vmul.f32 %v9854_v46, %v9626_v35  ;;  %v9858_v61 = vld [vmem:[#allocation2 + $0x2c0] sm:$0xff] }
 0xa3d   : > { %v9627_v36 = vmax.f32 %v9595_v14, %v9596_v39  ;;  %v9818_v26 = vadd.f32 %v9817_v30, %v9787_v48  ;;  %v23610_v53 = vmax.f32 %v20460_v11, 0.0  ;;  %v9916_v34 = vadd.f32 %v9915_v29, %v9885_v57 }
 0xa3e   : > { %v9721_v17 = vadd.f32 %v9720_v4, %v9690_v7  ;;  %v23611_v8 = vmax.f32 %v20464_v52, 0.0  ;;  %v23613_v31 = vmax.f32 %v20474_v12, 0.0  ;;  %v23614_v48 = vmax.f32 %v20477_v21, 0.0 }
 0xa3f   : > { %v9691_v23 = vmul.f32 %v9659_v49, %v9627_v36  ;;  %v9819_v16 = vadd.f32 %v9818_v26, %v9788_v13  ;;  %v9789_v14 = vmul.f32 %v9757_v9, %v9627_v36  ;;  %v9917_v50 = vadd.f32 %v9916_v34, %v9886_v5  ;;  %v9859_v9 = vld [vmem:[#allocation2 + $0x2c8] sm:$0xff]  ;;  %v9664_v26 = vld [vmem:[#allocation2 + $0xd0] sm:$0xff] }
 0xa40   : > { %v9887_v20 = vmul.f32 %v9855_v38, %v9627_v36  ;;  %v9663_v36 = vld [vmem:[#allocation2 + $0xc8] sm:$0xff]  ;;  %v23616_v13 = vmax.f32 %v20488_v3, 0.0  ;;  %v9762_v38 = vld [vmem:[#allocation2 + $0x1d0] sm:$0xff]  ;;  %v9763_v3 = vld [vmem:[#allocation2 + $0x1d8] sm:$0xff]  ;;  %vm9931_vm2 = vcmask 7168   ;;  %vm9934_vm12 = vcmask 23552  }
 0xa41   : > { %v9722_v11 = vadd.f32 %v9721_v17, %v9691_v23  ;;  %v9820_v2 = vadd.f32 %v9819_v16, %v9789_v14  ;;  %v9860_v17 = vld [vmem:[#allocation2 + $0x2d0] sm:$0xff]  ;;  %v9665_v14 = vld [vmem:[#allocation2 + $0xd8] sm:$0xff]  ;;  %vm23623_vm14 = vcmask 15360   ;;  %vm9944_vm10 = vcmask 16384  }
 0xa42   : > { %v9495_v54 = vpop.permute.xlu1 %9494  ;;  %v9918_v28 = vadd.f32 %v9917_v50, %v9887_v20  ;;  %v9861_v20 = vld [vmem:[#allocation2 + $0x2d8] sm:$0xff] }
 0xa43   : > { %v9533_v33 = vsel %vm23605_vm11, %v9493_v51, %v9495_v54  ;;  %v9497_v56 = vpop.permute.xlu0 %9496  ;;  %v9660_v51 = vld [vmem:[#allocation2 + $0xb0] sm:$0xff] }
 0xa44   : > { %v9597_v6 = vmax.f32 %v23607_v59, %v9533_v33  ;;  %v9534_v27 = vsel %vm23608_vm8, %v9495_v54, %v9497_v56  ;;  %v9856_v54 = vld [vmem:[#allocation2 + $0x2b0] sm:$0xff]  ;;  %v9759_v33 = vld [vmem:[#allocation2 + $0x1b8] sm:$0xff] }
 0xa45   : > { %v9598_v25 = vmax.f32 %v23610_v53, %v9534_v27  ;;  %v9761_v27 = vld [vmem:[#allocation2 + $0x1c8] sm:$0xff] }
 0xa46   : > { %v9628_v55 = vmax.f32 %v9596_v39, %v9597_v6  ;;  %v9662_v39 = vld [vmem:[#allocation2 + $0xc0] sm:$0xff] }
 0xa47   : > { %v9629_v18 = vmax.f32 %v9597_v6, %v9598_v25 }
 0xa48   : > { %v9692_v43 = vmul.f32 %v9660_v51, %v9628_v55  ;;  %v9790_v0 = vmul.f32 %v9758_v22, %v9628_v55  ;;  %v9888_v15 = vmul.f32 %v9856_v54, %v9628_v55 }
 0xa49   : > { %v9693_v60 = vmul.f32 %v9661_v24, %v9629_v18  ;;  %v9791_v44 = vmul.f32 %v9759_v33, %v9629_v18  ;;  %v9889_v30 = vmul.f32 %v9857_v40, %v9629_v18  ;;  %v23618_v33 = vmax.f32 %v20491_v63, 0.0  ;;  %v9863_v63 = vld [vmem:[#allocation2 + $0x2e8] sm:$0xff] }
 0xa4a   : > { %v9723_v52 = vadd.f32 %v9722_v11, %v9692_v43  ;;  %v9919_v6 = vadd.f32 %v9918_v28, %v9888_v15  ;;  %v9666_v28 = vld [vmem:[#allocation2 + $0xe0] sm:$0xff] }
 0xa4c   : > { %v9499_v1 = vpop.permute.xlu1 %9498  ;;  %v9724_v4 = vadd.f32 %v9723_v52, %v9693_v60  ;;  %v9764_v52 = vld [vmem:[#allocation2 + $0x1e0] sm:$0xff] }
 0xa4d   : > { %v9535_v42 = vsel %vm23609_vm4, %v9497_v56, %v9499_v1  ;;  %v9501_v45 = vpop.permute.xlu0 %9500  ;;  %v9821_v56 = vadd.f32 %v9820_v2, %v9790_v0 }
 0xa4e   : > { %v9599_v10 = vmax.f32 %v23611_v8, %v9535_v42  ;;  %v9536_v19 = vsel %vm23612_vm1, %v9499_v1, %v9501_v45  ;;  %v9920_v42 = vadd.f32 %v9919_v6, %v9889_v30 }
 0xa4f   : > { %v9600_v35 = vmax.f32 %v23613_v31, %v9536_v19  ;;  %v9822_v5 = vadd.f32 %v9821_v56, %v9791_v44  ;;  %v23622_v56 = vmax.f32 %v20505_v58, 0.0  ;;  %v9668_v58 = vld [vmem:[#allocation2 + $0xf0] sm:$0xff] }
 0xa50   : > { %v9630_v41 = vmax.f32 %v9598_v25, %v9599_v10 }
 0xa51   : > { %v9631_v29 = vmax.f32 %v9599_v10, %v9600_v35 }
 0xa52   : > { %v9694_v46 = vmul.f32 %v9662_v39, %v9630_v41  ;;  %v9792_v1 = vmul.f32 %v9760_v32, %v9630_v41  ;;  %v9890_v7 = vmul.f32 %v9858_v61, %v9630_v41  ;;  %v9862_v39 = vld [vmem:[#allocation2 + $0x2e0] sm:$0xff]  ;;  %v23621_v32 = vmax.f32 %v20502_v47, 0.0  ;;  %v9667_v61 = vld [vmem:[#allocation2 + $0xe8] sm:$0xff]  ;;  %v9766_v47 = vld [vmem:[#allocation2 + $0x1f0] sm:$0xff] }
 0xa53   : > { %v9695_v53 = vmul.f32 %v9663_v36, %v9631_v29  ;;  %v9793_v25 = vmul.f32 %v9761_v27, %v9631_v29  ;;  %v9891_v34 = vmul.f32 %v9859_v9, %v9631_v29 }
 0xa54   : > { %v9725_v21 = vadd.f32 %v9724_v4, %v9694_v46  ;;  %v9823_v51 = vadd.f32 %v9822_v5, %v9792_v1  ;;  %v9767_v4 = vld [vmem:[#allocation2 + $0x1f8] sm:$0xff]  ;;  %v9864_v5 = vld [vmem:[#allocation2 + $0x2f0] sm:$0xff] }
 0xa56   : > { %v9726_v54 = vadd.f32 %v9725_v21, %v9695_v53  ;;  %v9824_v8 = vadd.f32 %v9823_v51, %v9793_v25 }
 0xa70   : > { %v9503_v37 = vpop.permute.xlu1 %9502 }
 0xa71   : > { %v9537_v62 = vsel %vm23581_vm0, %v9501_v45, %v9503_v37  ;;  %v9505_v59 = vpop.permute.xlu0 %9504  ;;  %v9921_v45 = vadd.f32 %v9920_v42, %v9890_v7 }
 0xa72   : > { %v9601_v57 = vmax.f32 %v23614_v48, %v9537_v62  ;;  %v9538_v12 = vsel %vm23615_vm9, %v9503_v37, %v9505_v59  ;;  %v9765_v62 = vld [vmem:[#allocation2 + $0x1e8] sm:$0xff] }
 0xa73   : > { %v9602_v49 = vmax.f32 %v23616_v13, %v9538_v12  ;;  %v9922_v50 = vadd.f32 %v9921_v45, %v9891_v34 }
 0xa74   : > { %v9632_v55 = vmax.f32 %v9600_v35, %v9601_v57 }
 0xa75   : > { %v9633_v23 = vmax.f32 %v9601_v57, %v9602_v49 }
 0xa76   : > { %v9696_v22 = vmul.f32 %v9664_v26, %v9632_v55  ;;  %v9794_v16 = vmul.f32 %v9762_v38, %v9632_v55  ;;  %v9892_v10 = vmul.f32 %v9860_v17, %v9632_v55  ;;  %v9669_v26 = vld [vmem:[#allocation2 + $0xf8] sm:$0xff] }
 0xa77   : > { %v9697_v43 = vmul.f32 %v9665_v14, %v9633_v23  ;;  %v9795_v11 = vmul.f32 %v9763_v3, %v9633_v23  ;;  %v9893_v35 = vmul.f32 %v9861_v20, %v9633_v23  ;;  %v9865_v23 = vld [vmem:[#allocation2 + $0x2f8] sm:$0xff] }
 0xa78   : > { %v9727_v0 = vadd.f32 %v9726_v54, %v9696_v22  ;;  %v9825_v18 = vadd.f32 %v9824_v8, %v9794_v16  ;;  %v9923_v31 = vadd.f32 %v9922_v50, %v9892_v10 }
 0xa7a   : > { %v9826_v6 = vadd.f32 %v9825_v18, %v9795_v11  ;;  %v9924_v1 = vadd.f32 %v9923_v31, %v9893_v35 }
 0xa7c   : > { %v9507_v19 = vpop.permute.xlu1 %9506 }
 0xa7d   : > { %v9539_v15 = vsel %vm23617_vm15, %v9505_v59, %v9507_v19  ;;  %v9509_v24 = vpop.permute.xlu0 %9508  ;;  %v9728_v59 = vadd.f32 %v9727_v0, %v9697_v43 }
 0xa7e   : > { %v9603_v2 = vmax.f32 %v23618_v33, %v9539_v15  ;;  %v9540_v40 = vsel %vm23619_vm7, %v9507_v19, %v9509_v24  ;;  %v9573_v41 = vsel %vm23620_vm13, %v9509_v24, 0.0  ;;  %v9942_v33 = vld [vmem:[%s20672_s10] sm:$0x1] }
 0xa7f   : > { %v9604_v37 = vmax.f32 %v23621_v32, %v9540_v40  ;;  %v9605_v60 = vmax.f32 %v23622_v56, %v9573_v41 }
 0xa80   : > { %v9634_v44 = vmax.f32 %v9602_v49, %v9603_v2 }
 0xa81   : > { %v9635_v30 = vmax.f32 %v9603_v2, %v9604_v37  ;;  %v9636_v46 = vmax.f32 %v9604_v37, %v9605_v60  ;;  %v9637_v27 = vmax.f32 %v9605_v60, 0.0 }
 0xa82   : > { %v9698_v48 = vmul.f32 %v9666_v28, %v9634_v44  ;;  %v9796_v57 = vmul.f32 %v9764_v52, %v9634_v44  ;;  %v9894_v12 = vmul.f32 %v9862_v39, %v9634_v44 }
 0xa83   : > { %v9699_v29 = vmul.f32 %v9667_v61, %v9635_v30  ;;  %v9797_v7 = vmul.f32 %v9765_v62, %v9635_v30  ;;  %v9895_v36 = vmul.f32 %v9863_v63, %v9635_v30  ;;  %v9798_v55 = vmul.f32 %v9766_v47, %v9636_v46 }
 0xa84   : > { %v9827_v13 = vadd.f32 %v9826_v6, %v9796_v57  ;;  %v9729_v49 = vadd.f32 %v9728_v59, %v9698_v48  ;;  %v9925_v9 = vadd.f32 %v9924_v1, %v9894_v12  ;;  %v9700_v38 = vmul.f32 %v9668_v58, %v9636_v46 }
 0xa85   : > { %v9799_v53 = vmul.f32 %v9767_v4, %v9637_v27  ;;  %v9896_v45 = vmul.f32 %v9864_v5, %v9636_v46  ;;  %v9701_v34 = vmul.f32 %v9669_v26, %v9637_v27  ;;  %v9897_v3 = vmul.f32 %v9865_v23, %v9637_v27 }
 0xa86   : > { %v9828_v42 = vadd.f32 %v9827_v13, %v9797_v7  ;;  %v9730_v21 = vadd.f32 %v9729_v49, %v9699_v29  ;;  %v9926_v51 = vadd.f32 %v9925_v9, %v9895_v36 }
 0xa88   : > { %v9829_v25 = vadd.f32 %v9828_v42, %v9798_v55  ;;  %v9731_v17 = vadd.f32 %v9730_v21, %v9700_v38  ;;  %v9927_v16 = vadd.f32 %v9926_v51, %v9896_v45 }
 0xa8a   : > { %v9830_v22 = vadd.f32 %v9829_v25, %v9799_v53  ;;  %v9732_v14 = vadd.f32 %v9731_v17, %v9701_v34  ;;  %v9928_v54 = vadd.f32 %v9927_v16, %v9897_v3 }
 0xa8c   : > { %9831 = vadd.xlane.f32.xlu0 %v9830_v22  ;;  %9733 = vadd.xlane.f32.xlu1 %v9732_v14 }
 0xa90   : > { %9929 = vadd.xlane.f32.xlu0 %v9928_v54 }
 0xb19   : > { %v9832_v8 = vpop.xlane.xlu0 %9831  ;;  %v9734_v10 = vpop.xlane.xlu1 %9733 }
 0xb1a   : > { %v9932_v50 = vsel %vm9931_vm2, %v9734_v10, %v9832_v8 }
 0xb1d   : > { %v9930_v20 = vpop.xlane.xlu0 %9929 }
 0xb1e   : > { %v9933_v43 = vsel %vm23623_vm14, %v9932_v50, %v9930_v20 }
 0xb1f   : > { %v9935_v19 = vsel %vm9934_vm12, %v9933_v43, 0.0 }
 0xb20   : > { %v9936_v0 = vrot.slane %v9935_v19, 4 }
 0xb22   : > { %v9937_v18 = vadd.f32 %v9936_v0, %v9935_v19 }
 0xb24   : > { %v9938_v11 = vrot.slane %v9937_v18, 2 }
 0xb26   : > { %v9939_v15 = vadd.f32 %v9938_v11, %v9937_v18 }
 0xb28   : > { %v9940_v24 = vrot.slane %v9939_v15, 1 }
 0xb2a   : > { %v9941_v2 = vadd.f32 %v9940_v24, %v9939_v15 }
 0xb2c   : > { %v9943_v40 = vadd.f32 %v9942_v33, %v9941_v2 }
 0xb2e   : > { %9945 = vst.msk [vmem:[%s393_s29] sm:$0x1] %vm9944_vm10, %v9943_v40 }
 0xb2f   : > { %13215 = shalt.err (!%p13212_p7)
}
 0xb30   : > { %s13216_s12 = scalar_lea.hbm %s20620_s25, 16  ;;  %s13220_s26 = scalar_lea.hbm %s20673_s11, 32 }
 0xb31   : > { %p13217_p8 = scmp.ne.s32.totalorder %s20620_s25, %s13216_s12  ;;  %p13221_p1 = scmp.lt.u32.totalorder %s20620_s25, %s20673_s11 }
 0xb32   : > { %p13222_p0 = scmp.lt.u32.totalorder %s13220_s26, %s13216_s12  ;;  %p13224_p6 = scmp.lt.u32.totalorder %s13216_s12, %s20620_s25 }
 0xb33   : > { %p13218_p11 = pnand %p13217_p8, %p23624_p9 }
 0xb34   : > { %p13223_p5 = por %p13222_p0, %p13221_p1 }
 0xb35   : > { %p13219_p13 = pneg %p13218_p11 }
 0xb36   : > { %p13225_p10 = por %p13224_p6, %p13223_p5 }
 0xb38   : > { %p13226_p12 = pnand %p13225_p10, %p13219_p13 }
 0xb3a   : > { %13229 = shalt.err (!%p13226_p12)
}
 0xb3b   : > { %12438 = dma.vmem_to_hbm [thread:$0]  (%p23624_p9), %s20622_s15, 16, %s20620_s25, %s9947_s14  }
 0xb3c PF: > { %p12450_p2 = scmp.ge.s32.totalorder %s13268_s20, 2  ;;  %s9971_s13 = sand.u32 1, %s13256_s17  }
 0xb3d   : > { %p23625_p3 = scmp.ne.s32.totalorder %s21490_s28, 0  ;;  %s9972_s22 = scalar_lea.sflag [#allocation4], %s9971_s13 }
 0xb3f   : > { %p12445_p4 = pnand %p12450_p2, %p23625_p3 }
 0xb41   : > { %13251 = dma.done.wait (!%p12445_p4), %s9972_s22, 16  }
 0xb42   : > { %13253 = vsyncadd (!%p12445_p4), %s9972_s22, 4294967280  ;;  %s23626_s24 = sld [smem:[#allocation8_spill]]  ;;  %p22_p7 = scmp.ge.s32.totalorder %s13369_s23, 4  }
 0xb43   : > { %s23627_s17 = smov %s13260_s18  ;;  %s23628_s18 = smov %s13264_s19 }
 0xb44   : > { %s23630_s20 = smov %s13369_s23  ;;  %24 = sbr.rel (!%p22_p7) target bundleno = 4 (0x4), region = 106 }
 0xb48   : > { %s23629_s19 = smov %s23626_s24 }
 0xb4b   :  { %9976 = vsyncpa [#allocation3], 1 }
 0xb4c   :  { %9978 = vsyncpa [#allocation3 + $0x1], 1 }
 0xb4d   :  { %9979 = vsyncpa [#allocation4], 1 }
 0xb4e   :  { %9981 = vsyncpa [#allocation4 + $0x1], 1 }

</bundles_post_ra>
